<compile_context>
chip_gen: v7x
topology: tpu7x:2x2x1
jax: 0.10.0
libtpu: 0.0.40
codegen_flags: <defaults>
</compile_context>

<pallas_src>
import functools

import jax
import jax.numpy as jnp
from jax.experimental import pallas as pl
from jax.experimental.pallas import tpu as pltpu


# ----------------------------------------------------------------------------
# Fused network kernel
# ----------------------------------------------------------------------------
def _net_kernel(x_ref, w0_ref, b0_ref,
                w1_ref, b1_ref, w2_ref, b2_ref, w3_ref, b3_ref, w4_ref, b4_ref,
                wl1_ref, bl1_ref, wl3_ref, bl3_ref,
                o_ref, *, tile_h):
    f32 = jnp.float32
    hin = tile_h + 8                                    # rows incl. conv halo
    h0 = pl.multiple_of(pl.program_id(1) * tile_h, 8)   # first input row

    # ---------------- lin0 + ReLU -------------------------------------------
    xs = x_ref[pl.ds(h0, hin), :]                       # (hin, 128)
    a0 = jnp.dot(xs, w0_ref[...], preferred_element_type=f32) + b0_ref[...]
    a0 = jnp.maximum(a0, 0.0)

    # W-shifted copies (kw taps).  Shifted-out lanes are zero, so columns past
    # the valid width are garbage-but-finite and never read downstream.
    a0_sh = [a0,
             jnp.concatenate([a0[:, 1:], jnp.zeros((hin, 1), f32)], axis=1),
             jnp.concatenate([a0[:, 2:], jnp.zeros((hin, 2), f32)], axis=1)]

    # ---------------- conv1 (Cin=1, bias only, no ReLU) ----------------------
    w1 = w1_ref[...]                                    # (32, 9)
    b1 = b1_ref[...]                                    # (32, 1)
    rows1 = []
    for h in range(hin - 2):
        taps = [a0_sh[kw][h + kh:h + kh + 1, :]
                for kw in range(3) for kh in range(3)]  # 9 x (1, 128)
        rmat = jnp.concatenate(taps, axis=0)            # (9, 128)
        rows1.append(jnp.dot(w1, rmat, preferred_element_type=f32) + b1)

    zpad = (None, jnp.zeros((32, 1), f32), jnp.zeros((32, 2), f32))

    def shift(row, kw):
        if kw == 0:
            return row
        return jnp.concatenate([row[:, kw:], zpad[kw]], axis=1)

    # ---------------- conv2..conv4 (dropout = identity, + ReLU) --------------
    def conv_relu(rows, w_ref_, b_ref_):
        wc = w_ref_[...]                                # (32, 288) tap-major
        bc = b_ref_[...]                                # (32, 1)
        sh = [[shift(r_, kw) for r_ in rows] for kw in range(3)]
        out = []
        for h in range(len(rows) - 2):
            taps = [sh[kw][h + kh] for kw in range(3) for kh in range(3)]
            rmat = jnp.concatenate(taps, axis=0)        # (288, 128)
            y = jnp.dot(wc, rmat, preferred_element_type=f32) + bc
            out.append(jnp.maximum(y, 0.0))             # (32, 128)
        return out

    rows2 = conv_relu(rows1, w2_ref, b2_ref)            # tile_h + 4 rows
    rows3 = conv_relu(rows2, w3_ref, b3_ref)            # tile_h + 2 rows
    rows4 = conv_relu(rows3, w4_ref, b4_ref)            # tile_h     rows

    # ---------------- head: lin1+ReLU -> lin3+ReLU -> log-softmax ------------
    wl1 = wl1_ref[...]
    bl1 = bl1_ref[...]
    wl3 = wl3_ref[...]
    bl3 = bl3_ref[...]
    zs = []
    for t in range(tile_h):
        xt = rows4[t][:, :120]                          # (32, 120) valid W
        g = jnp.maximum(jnp.dot(xt, wl1, preferred_element_type=f32) + bl1,
                        0.0)                            # (32, 128)
        z = jnp.maximum(jnp.dot(g, wl3, preferred_element_type=f32) + bl3,
                        0.0)                            # (32, 30)
        z = z - jnp.max(z, axis=-1, keepdims=True)
        z = z - jnp.log(jnp.sum(jnp.exp(z), axis=-1, keepdims=True))
        zs.append(z)
    o_ref[...] = jnp.stack(zs, axis=1)                  # (32, tile_h, 30)


def _round_up(n, m):
    return ((n + m - 1) // m) * m


# ----------------------------------------------------------------------------
# Full network forward
# ----------------------------------------------------------------------------
def network_forward(x, params):
    B, T, D = x.shape
    assert D == 128, "Network.lin0 expects 128 input features"
    ho = T - 8                      # conv-output rows after four valid 3x3s
    assert ho >= 1, "need at least 9 input frames"

    tile_h = min(16, _round_up(ho, 8))
    ho_pad = _round_up(ho, tile_h)
    t_pad = ho_pad + 8
    if t_pad != T:                  # zero-pad the sequence; padded rows are
        x = jnp.pad(x, ((0, 0), (0, t_pad - T), (0, 0)))   # sliced off below
    n_tiles = ho_pad // tile_h

    # Repack conv weights into tap-major (Cout, 9*Cin): tap = kw*3 + kh.
    def conv_taps(w):
        k1, k2, cin, cout = w.shape
        return jnp.transpose(w, (1, 0, 2, 3)).reshape(k1 * k2 * cin, cout).T

    w1m = conv_taps(params["w_conv1"])                  # (32, 9)
    w2m = conv_taps(params["w_conv2"])                  # (32, 288)
    w3m = conv_taps(params["w_conv3"])
    w4m = conv_taps(params["w_conv4"])

    kernel = functools.partial(_net_kernel, tile_h=tile_h)
    const = lambda b, r: (0, 0)

    out = pl.pallas_call(
        kernel,
        out_shape=jax.ShapeDtypeStruct((B, 32, ho_pad, 30), jnp.float32),
        grid=(B, n_tiles),
        in_specs=[
            pl.BlockSpec((None, t_pad, 128), lambda b, r: (b, 0, 0)),
            pl.BlockSpec((128, 128), const), pl.BlockSpec((1, 128), const),
            pl.BlockSpec((32, 9), const),    pl.BlockSpec((32, 1), const),
            pl.BlockSpec((32, 288), const),  pl.BlockSpec((32, 1), const),
            pl.BlockSpec((32, 288), const),  pl.BlockSpec((32, 1), const),
            pl.BlockSpec((32, 288), const),  pl.BlockSpec((32, 1), const),
            pl.BlockSpec((120, 128), const), pl.BlockSpec((1, 128), const),
            pl.BlockSpec((128, 30), const),  pl.BlockSpec((1, 30), const),
        ],
        out_specs=pl.BlockSpec((None, 32, tile_h, 30),
                               lambda b, r: (b, 0, r, 0)),
        compiler_params=pltpu.CompilerParams(
            dimension_semantics=("parallel", "parallel"),
            vmem_limit_bytes=48 * 1024 * 1024),
    )(x,
      params["w_lin0"], params["b_lin0"].reshape(1, 128),
      w1m, params["b_conv1"].reshape(32, 1),
      w2m, params["b_conv2"].reshape(32, 1),
      w3m, params["b_conv3"].reshape(32, 1),
      w4m, params["b_conv4"].reshape(32, 1),
      params["w_lin1"], params["b_lin1"].reshape(1, 128),
      params["w_lin3"], params["b_lin3"].reshape(1, 30))

    out = out[:, :, :ho, :]                             # drop padded rows
    return out.reshape(B, 32 * ho, 30)                  # free (leading) merge


# ----------------------------------------------------------------------------
# Pure-JAX reference (mirrors the PyTorch module exactly)
# ----------------------------------------------------------------------------
def reference_forward(x, p):
    hp = jax.lax.Precision.HIGHEST
    h = jnp.maximum(jnp.dot(x, p["w_lin0"], precision=hp) + p["b_lin0"], 0.0)
    a = h[:, None, :, :]                                # NCHW (B,1,T,128)

    def conv(t, w, b):
        y = jax.lax.conv_general_dilated(
            t, w, window_strides=(1, 1), padding="VALID",
            dimension_numbers=("NCHW", "HWIO", "NCHW"), precision=hp)
        return y + b.reshape(1, -1, 1, 1)

    a = conv(a, p["w_conv1"], p["b_conv1"])
    a = jnp.maximum(conv(a, p["w_conv2"], p["b_conv2"]), 0.0)
    a = jnp.maximum(conv(a, p["w_conv3"], p["b_conv3"]), 0.0)
    a = jnp.maximum(conv(a, p["w_conv4"], p["b_conv4"]), 0.0)
    b_, c_, ho_, wo_ = a.shape
    a = a.reshape(b_, c_ * ho_, wo_)
    z = jnp.maximum(jnp.dot(a, p["w_lin1"], precision=hp) + p["b_lin1"], 0.0)
    z = jnp.maximum(jnp.dot(z, p["w_lin3"], precision=hp) + p["b_lin3"], 0.0)
    return jax.nn.log_softmax(z, axis=-1)


# ----------------------------------------------------------------------------
# Deterministic parameter init (PyTorch-style uniform(-1/sqrt(fan_in), ...))
# ----------------------------------------------------------------------------
def init_params(key):
    ks = jax.random.split(key, 7)

    def lin(k, fin, fout):
        bound = 1.0 / (fin ** 0.5)
        kw, kb = jax.random.split(k)
        w = jax.random.uniform(kw, (fin, fout), jnp.float32, -bound, bound)
        b = jax.random.uniform(kb, (fout,), jnp.float32, -bound, bound)
        return w, b

    def conv(k, cin, cout, ksz=3):
        bound = 1.0 / ((cin * ksz * ksz) ** 0.5)
        kw, kb = jax.random.split(k)
        w = jax.random.uniform(kw, (ksz, ksz, cin, cout), jnp.float32,
                               -bound, bound)
        b = jax.random.uniform(kb, (cout,), jnp.float32, -bound, bound)
        return w, b

    p = {}
    p["w_lin0"], p["b_lin0"] = lin(ks[0], 128, 128)
    p["w_conv1"], p["b_conv1"] = conv(ks[1], 1, 32)
    p["w_conv2"], p["b_conv2"] = conv(ks[2], 32, 32)
    p["w_conv3"], p["b_conv3"] = conv(ks[3], 32, 32)
    p["w_conv4"], p["b_conv4"] = conv(ks[4], 32, 32)
    p["w_lin1"], p["b_lin1"] = lin(ks[5], 120, 128)
    p["w_lin3"], p["b_lin3"] = lin(ks[6], 128, 30)
    return p


if __name__ == "__main__":
    key = jax.random.PRNGKey(0)
    kx, kp = jax.random.split(key)
    B, T, D = 2, 16, 128                     # input must have last dim 128
    x = jax.random.normal(kx, (B, T, D), jnp.float32)
    params = init_params(kp)

    out = jax.jit(network_forward)(x, params)
    out = jax.block_until_ready(out)

    assert out.shape == (B, 32 * (T - 8), 30), out.shape
    assert bool(jnp.all(jnp.isfinite(out)))
    # rows of a log-softmax must (log-)sum to ~0
    assert bool(jnp.allclose(jax.nn.logsumexp(out, axis=-1), 0.0, atol=1e-4))

    ref = jax.jit(reference_forward)(x, params)
    ref = jax.block_until_ready(ref)
    assert bool(jnp.allclose(out, ref, atol=3e-2, rtol=3e-2)), \
        float(jnp.max(jnp.abs(out - ref)))

    print("KERNEL_OK")
</pallas_src>

<mosaic_0001>
module attributes {stable_mosaic.version = 11 : i64} {
  func.func @_net_kernel(%arg0: i32, %arg1: i32, %arg2: memref<1x16x128xf32, #tpu.memory_space<vmem>>, %arg3: memref<128x128xf32, #tpu.memory_space<vmem>>, %arg4: memref<1x128xf32, #tpu.memory_space<vmem>>, %arg5: memref<32x9xf32, #tpu.memory_space<vmem>>, %arg6: memref<32x1xf32, #tpu.memory_space<vmem>>, %arg7: memref<32x288xf32, #tpu.memory_space<vmem>>, %arg8: memref<32x1xf32, #tpu.memory_space<vmem>>, %arg9: memref<32x288xf32, #tpu.memory_space<vmem>>, %arg10: memref<32x1xf32, #tpu.memory_space<vmem>>, %arg11: memref<32x288xf32, #tpu.memory_space<vmem>>, %arg12: memref<32x1xf32, #tpu.memory_space<vmem>>, %arg13: memref<120x128xf32, #tpu.memory_space<vmem>>, %arg14: memref<1x128xf32, #tpu.memory_space<vmem>>, %arg15: memref<128x30xf32, #tpu.memory_space<vmem>>, %arg16: memref<1x30xf32, #tpu.memory_space<vmem>>, %arg17: memref<1x32x8x30xf32, #tpu.memory_space<vmem>>) attributes {dimension_semantics = [#tpu.dimension_semantics<parallel>, #tpu.dimension_semantics<parallel>], iteration_bounds = array<i64: 2, 1>, scalar_prefetch = 0 : i64, scratch_operands = 0 : i64, tpu.core_type = #tpu.core_type<tc>, window_params = [{transform_indices = @transform_0, window_bounds = array<i64: 1, 16, 128>}, {pipeline_mode = #tpu.pipeline_mode<synchronous>, transform_indices = @transform_1, window_bounds = array<i64: 128, 128>}, {pipeline_mode = #tpu.pipeline_mode<synchronous>, transform_indices = @transform_2, window_bounds = array<i64: 1, 128>}, {pipeline_mode = #tpu.pipeline_mode<synchronous>, transform_indices = @transform_3, window_bounds = array<i64: 32, 9>}, {pipeline_mode = #tpu.pipeline_mode<synchronous>, transform_indices = @transform_4, window_bounds = array<i64: 32, 1>}, {pipeline_mode = #tpu.pipeline_mode<synchronous>, transform_indices = @transform_5, window_bounds = array<i64: 32, 288>}, {pipeline_mode = #tpu.pipeline_mode<synchronous>, transform_indices = @transform_6, window_bounds = array<i64: 32, 1>}, {pipeline_mode = #tpu.pipeline_mode<synchronous>, transform_indices = @transform_7, window_bounds = array<i64: 32, 288>}, {pipeline_mode = #tpu.pipeline_mode<synchronous>, transform_indices = @transform_8, window_bounds = array<i64: 32, 1>}, {pipeline_mode = #tpu.pipeline_mode<synchronous>, transform_indices = @transform_9, window_bounds = array<i64: 32, 288>}, {pipeline_mode = #tpu.pipeline_mode<synchronous>, transform_indices = @transform_10, window_bounds = array<i64: 32, 1>}, {pipeline_mode = #tpu.pipeline_mode<synchronous>, transform_indices = @transform_11, window_bounds = array<i64: 120, 128>}, {pipeline_mode = #tpu.pipeline_mode<synchronous>, transform_indices = @transform_12, window_bounds = array<i64: 1, 128>}, {pipeline_mode = #tpu.pipeline_mode<synchronous>, transform_indices = @transform_13, window_bounds = array<i64: 128, 30>}, {pipeline_mode = #tpu.pipeline_mode<synchronous>, transform_indices = @transform_14, window_bounds = array<i64: 1, 30>}, {transform_indices = @transform_15, window_bounds = array<i64: 1, 32, 8, 30>}]} {
    %c8_i32 = arith.constant 8 : i32
    %0 = arith.muli %arg1, %c8_i32 : i32
    %1 = tpu.assume_multiple %0, 8 : i32
    %c0 = arith.constant 0 : index
    %2 = arith.index_cast %1 : i32 to index
    %c0_0 = arith.constant 0 : index
    %3 = vector.load %arg2[%c0, %2, %c0_0] : memref<1x16x128xf32, #tpu.memory_space<vmem>>, vector<1x16x128xf32>
    %4 = vector.shape_cast %3 : vector<1x16x128xf32> to vector<16x128xf32>
    %c0_1 = arith.constant 0 : index
    %c0_2 = arith.constant 0 : index
    %5 = vector.load %arg3[%c0_1, %c0_2] : memref<128x128xf32, #tpu.memory_space<vmem>>, vector<128x128xf32>
    %cst = arith.constant dense<0.000000e+00> : vector<16x128xf32>
    %6 = tpu.matmul %4, %5, %cst {dimension_numbers = #tpu.dot_dimension_numbers<[1], [0], [0], [1], [0, 0, 1, 1], [], []>} : vector<16x128xf32>, vector<128x128xf32>, vector<16x128xf32> -> vector<16x128xf32>
    %c0_3 = arith.constant 0 : index
    %c0_4 = arith.constant 0 : index
    %7 = vector.load %arg4[%c0_3, %c0_4] : memref<1x128xf32, #tpu.memory_space<vmem>>, vector<1x128xf32>
    %8 = vector.broadcast %7 : vector<1x128xf32> to vector<16x128xf32>
    %9 = arith.addf %6, %8 : vector<16x128xf32>
    %cst_5 = arith.constant 0.000000e+00 : f32
    %10 = vector.broadcast %cst_5 : f32 to vector<16x128xf32>
    %11 = arith.maximumf %9, %10 : vector<16x128xf32>
    %12 = vector.extract_strided_slice %11 {offsets = [0, 1], sizes = [16, 127], strides = [1, 1]} : vector<16x128xf32> to vector<16x127xf32>
    %cst_6 = arith.constant 0.000000e+00 : f32
    %13 = vector.broadcast %cst_6 : f32 to vector<16x1xf32>
    %14 = tpu.concatenate %12, %13 in 1 : vector<16x127xf32>, vector<16x1xf32> -> vector<16x128xf32>
    %15 = vector.extract_strided_slice %11 {offsets = [0, 2], sizes = [16, 126], strides = [1, 1]} : vector<16x128xf32> to vector<16x126xf32>
    %cst_7 = arith.constant 0.000000e+00 : f32
    %16 = vector.broadcast %cst_7 : f32 to vector<16x2xf32>
    %17 = tpu.concatenate %15, %16 in 1 : vector<16x126xf32>, vector<16x2xf32> -> vector<16x128xf32>
    %c0_8 = arith.constant 0 : index
    %c0_9 = arith.constant 0 : index
    %18 = vector.load %arg5[%c0_8, %c0_9] : memref<32x9xf32, #tpu.memory_space<vmem>>, vector<32x9xf32>
    %c0_10 = arith.constant 0 : index
    %c0_11 = arith.constant 0 : index
    %19 = vector.load %arg6[%c0_10, %c0_11] : memref<32x1xf32, #tpu.memory_space<vmem>>, vector<32x1xf32>
    %20 = vector.extract_strided_slice %11 {offsets = [0, 0], sizes = [1, 128], strides = [1, 1]} : vector<16x128xf32> to vector<1x128xf32>
    %21 = vector.extract_strided_slice %11 {offsets = [1, 0], sizes = [1, 128], strides = [1, 1]} : vector<16x128xf32> to vector<1x128xf32>
    %22 = vector.extract_strided_slice %11 {offsets = [2, 0], sizes = [1, 128], strides = [1, 1]} : vector<16x128xf32> to vector<1x128xf32>
    %23 = vector.extract_strided_slice %14 {offsets = [0, 0], sizes = [1, 128], strides = [1, 1]} : vector<16x128xf32> to vector<1x128xf32>
    %24 = vector.extract_strided_slice %14 {offsets = [1, 0], sizes = [1, 128], strides = [1, 1]} : vector<16x128xf32> to vector<1x128xf32>
    %25 = vector.extract_strided_slice %14 {offsets = [2, 0], sizes = [1, 128], strides = [1, 1]} : vector<16x128xf32> to vector<1x128xf32>
    %26 = vector.extract_strided_slice %17 {offsets = [0, 0], sizes = [1, 128], strides = [1, 1]} : vector<16x128xf32> to vector<1x128xf32>
    %27 = vector.extract_strided_slice %17 {offsets = [1, 0], sizes = [1, 128], strides = [1, 1]} : vector<16x128xf32> to vector<1x128xf32>
    %28 = vector.extract_strided_slice %17 {offsets = [2, 0], sizes = [1, 128], strides = [1, 1]} : vector<16x128xf32> to vector<1x128xf32>
    %29 = tpu.concatenate %20, %21, %22, %23, %24, %25, %26, %27, %28 in 0 : vector<1x128xf32>, vector<1x128xf32>, vector<1x128xf32>, vector<1x128xf32>, vector<1x128xf32>, vector<1x128xf32>, vector<1x128xf32>, vector<1x128xf32>, vector<1x128xf32> -> vector<9x128xf32>
    %cst_12 = arith.constant dense<0.000000e+00> : vector<32x128xf32>
    %30 = tpu.matmul %18, %29, %cst_12 {dimension_numbers = #tpu.dot_dimension_numbers<[1], [0], [0], [1], [0, 0, 1, 1], [], []>} : vector<32x9xf32>, vector<9x128xf32>, vector<32x128xf32> -> vector<32x128xf32>
    %31 = vector.broadcast %19 : vector<32x1xf32> to vector<32x128xf32>
    %32 = arith.addf %30, %31 : vector<32x128xf32>
    %33 = vector.extract_strided_slice %11 {offsets = [1, 0], sizes = [1, 128], strides = [1, 1]} : vector<16x128xf32> to vector<1x128xf32>
    %34 = vector.extract_strided_slice %11 {offsets = [2, 0], sizes = [1, 128], strides = [1, 1]} : vector<16x128xf32> to vector<1x128xf32>
    %35 = vector.extract_strided_slice %11 {offsets = [3, 0], sizes = [1, 128], strides = [1, 1]} : vector<16x128xf32> to vector<1x128xf32>
    %36 = vector.extract_strided_slice %14 {offsets = [1, 0], sizes = [1, 128], strides = [1, 1]} : vector<16x128xf32> to vector<1x128xf32>
    %37 = vector.extract_strided_slice %14 {offsets = [2, 0], sizes = [1, 128], strides = [1, 1]} : vector<16x128xf32> to vector<1x128xf32>
    %38 = vector.extract_strided_slice %14 {offsets = [3, 0], sizes = [1, 128], strides = [1, 1]} : vector<16x128xf32> to vector<1x128xf32>
    %39 = vector.extract_strided_slice %17 {offsets = [1, 0], sizes = [1, 128], strides = [1, 1]} : vector<16x128xf32> to vector<1x128xf32>
    %40 = vector.extract_strided_slice %17 {offsets = [2, 0], sizes = [1, 128], strides = [1, 1]} : vector<16x128xf32> to vector<1x128xf32>
    %41 = vector.extract_strided_slice %17 {offsets = [3, 0], sizes = [1, 128], strides = [1, 1]} : vector<16x128xf32> to vector<1x128xf32>
    %42 = tpu.concatenate %33, %34, %35, %36, %37, %38, %39, %40, %41 in 0 : vector<1x128xf32>, vector<1x128xf32>, vector<1x128xf32>, vector<1x128xf32>, vector<1x128xf32>, vector<1x128xf32>, vector<1x128xf32>, vector<1x128xf32>, vector<1x128xf32> -> vector<9x128xf32>
    %cst_13 = arith.constant dense<0.000000e+00> : vector<32x128xf32>
    %43 = tpu.matmul %18, %42, %cst_13 {dimension_numbers = #tpu.dot_dimension_numbers<[1], [0], [0], [1], [0, 0, 1, 1], [], []>} : vector<32x9xf32>, vector<9x128xf32>, vector<32x128xf32> -> vector<32x128xf32>
    %44 = vector.broadcast %19 : vector<32x1xf32> to vector<32x128xf32>
    %45 = arith.addf %43, %44 : vector<32x128xf32>
    %46 = vector.extract_strided_slice %11 {offsets = [2, 0], sizes = [1, 128], strides = [1, 1]} : vector<16x128xf32> to vector<1x128xf32>
    %47 = vector.extract_strided_slice %11 {offsets = [3, 0], sizes = [1, 128], strides = [1, 1]} : vector<16x128xf32> to vector<1x128xf32>
    %48 = vector.extract_strided_slice %11 {offsets = [4, 0], sizes = [1, 128], strides = [1, 1]} : vector<16x128xf32> to vector<1x128xf32>
    %49 = vector.extract_strided_slice %14 {offsets = [2, 0], sizes = [1, 128], strides = [1, 1]} : vector<16x128xf32> to vector<1x128xf32>
    %50 = vector.extract_strided_slice %14 {offsets = [3, 0], sizes = [1, 128], strides = [1, 1]} : vector<16x128xf32> to vector<1x128xf32>
    %51 = vector.extract_strided_slice %14 {offsets = [4, 0], sizes = [1, 128], strides = [1, 1]} : vector<16x128xf32> to vector<1x128xf32>
    %52 = vector.extract_strided_slice %17 {offsets = [2, 0], sizes = [1, 128], strides = [1, 1]} : vector<16x128xf32> to vector<1x128xf32>
    %53 = vector.extract_strided_slice %17 {offsets = [3, 0], sizes = [1, 128], strides = [1, 1]} : vector<16x128xf32> to vector<1x128xf32>
    %54 = vector.extract_strided_slice %17 {offsets = [4, 0], sizes = [1, 128], strides = [1, 1]} : vector<16x128xf32> to vector<1x128xf32>
    %55 = tpu.concatenate %46, %47, %48, %49, %50, %51, %52, %53, %54 in 0 : vector<1x128xf32>, vector<1x128xf32>, vector<1x128xf32>, vector<1x128xf32>, vector<1x128xf32>, vector<1x128xf32>, vector<1x128xf32>, vector<1x128xf32>, vector<1x128xf32> -> vector<9x128xf32>
    %cst_14 = arith.constant dense<0.000000e+00> : vector<32x128xf32>
    %56 = tpu.matmul %18, %55, %cst_14 {dimension_numbers = #tpu.dot_dimension_numbers<[1], [0], [0], [1], [0, 0, 1, 1], [], []>} : vector<32x9xf32>, vector<9x128xf32>, vector<32x128xf32> -> vector<32x128xf32>
    %57 = vector.broadcast %19 : vector<32x1xf32> to vector<32x128xf32>
    %58 = arith.addf %56, %57 : vector<32x128xf32>
    %59 = vector.extract_strided_slice %11 {offsets = [3, 0], sizes = [1, 128], strides = [1, 1]} : vector<16x128xf32> to vector<1x128xf32>
    %60 = vector.extract_strided_slice %11 {offsets = [4, 0], sizes = [1, 128], strides = [1, 1]} : vector<16x128xf32> to vector<1x128xf32>
    %61 = vector.extract_strided_slice %11 {offsets = [5, 0], sizes = [1, 128], strides = [1, 1]} : vector<16x128xf32> to vector<1x128xf32>
    %62 = vector.extract_strided_slice %14 {offsets = [3, 0], sizes = [1, 128], strides = [1, 1]} : vector<16x128xf32> to vector<1x128xf32>
    %63 = vector.extract_strided_slice %14 {offsets = [4, 0], sizes = [1, 128], strides = [1, 1]} : vector<16x128xf32> to vector<1x128xf32>
    %64 = vector.extract_strided_slice %14 {offsets = [5, 0], sizes = [1, 128], strides = [1, 1]} : vector<16x128xf32> to vector<1x128xf32>
    %65 = vector.extract_strided_slice %17 {offsets = [3, 0], sizes = [1, 128], strides = [1, 1]} : vector<16x128xf32> to vector<1x128xf32>
    %66 = vector.extract_strided_slice %17 {offsets = [4, 0], sizes = [1, 128], strides = [1, 1]} : vector<16x128xf32> to vector<1x128xf32>
    %67 = vector.extract_strided_slice %17 {offsets = [5, 0], sizes = [1, 128], strides = [1, 1]} : vector<16x128xf32> to vector<1x128xf32>
    %68 = tpu.concatenate %59, %60, %61, %62, %63, %64, %65, %66, %67 in 0 : vector<1x128xf32>, vector<1x128xf32>, vector<1x128xf32>, vector<1x128xf32>, vector<1x128xf32>, vector<1x128xf32>, vector<1x128xf32>, vector<1x128xf32>, vector<1x128xf32> -> vector<9x128xf32>
    %cst_15 = arith.constant dense<0.000000e+00> : vector<32x128xf32>
    %69 = tpu.matmul %18, %68, %cst_15 {dimension_numbers = #tpu.dot_dimension_numbers<[1], [0], [0], [1], [0, 0, 1, 1], [], []>} : vector<32x9xf32>, vector<9x128xf32>, vector<32x128xf32> -> vector<32x128xf32>
    %70 = vector.broadcast %19 : vector<32x1xf32> to vector<32x128xf32>
    %71 = arith.addf %69, %70 : vector<32x128xf32>
    %72 = vector.extract_strided_slice %11 {offsets = [4, 0], sizes = [1, 128], strides = [1, 1]} : vector<16x128xf32> to vector<1x128xf32>
    %73 = vector.extract_strided_slice %11 {offsets = [5, 0], sizes = [1, 128], strides = [1, 1]} : vector<16x128xf32> to vector<1x128xf32>
    %74 = vector.extract_strided_slice %11 {offsets = [6, 0], sizes = [1, 128], strides = [1, 1]} : vector<16x128xf32> to vector<1x128xf32>
    %75 = vector.extract_strided_slice %14 {offsets = [4, 0], sizes = [1, 128], strides = [1, 1]} : vector<16x128xf32> to vector<1x128xf32>
    %76 = vector.extract_strided_slice %14 {offsets = [5, 0], sizes = [1, 128], strides = [1, 1]} : vector<16x128xf32> to vector<1x128xf32>
    %77 = vector.extract_strided_slice %14 {offsets = [6, 0], sizes = [1, 128], strides = [1, 1]} : vector<16x128xf32> to vector<1x128xf32>
    %78 = vector.extract_strided_slice %17 {offsets = [4, 0], sizes = [1, 128], strides = [1, 1]} : vector<16x128xf32> to vector<1x128xf32>
    %79 = vector.extract_strided_slice %17 {offsets = [5, 0], sizes = [1, 128], strides = [1, 1]} : vector<16x128xf32> to vector<1x128xf32>
    %80 = vector.extract_strided_slice %17 {offsets = [6, 0], sizes = [1, 128], strides = [1, 1]} : vector<16x128xf32> to vector<1x128xf32>
    %81 = tpu.concatenate %72, %73, %74, %75, %76, %77, %78, %79, %80 in 0 : vector<1x128xf32>, vector<1x128xf32>, vector<1x128xf32>, vector<1x128xf32>, vector<1x128xf32>, vector<1x128xf32>, vector<1x128xf32>, vector<1x128xf32>, vector<1x128xf32> -> vector<9x128xf32>
    %cst_16 = arith.constant dense<0.000000e+00> : vector<32x128xf32>
    %82 = tpu.matmul %18, %81, %cst_16 {dimension_numbers = #tpu.dot_dimension_numbers<[1], [0], [0], [1], [0, 0, 1, 1], [], []>} : vector<32x9xf32>, vector<9x128xf32>, vector<32x128xf32> -> vector<32x128xf32>
    %83 = vector.broadcast %19 : vector<32x1xf32> to vector<32x128xf32>
    %84 = arith.addf %82, %83 : vector<32x128xf32>
    %85 = vector.extract_strided_slice %11 {offsets = [5, 0], sizes = [1, 128], strides = [1, 1]} : vector<16x128xf32> to vector<1x128xf32>
    %86 = vector.extract_strided_slice %11 {offsets = [6, 0], sizes = [1, 128], strides = [1, 1]} : vector<16x128xf32> to vector<1x128xf32>
    %87 = vector.extract_strided_slice %11 {offsets = [7, 0], sizes = [1, 128], strides = [1, 1]} : vector<16x128xf32> to vector<1x128xf32>
    %88 = vector.extract_strided_slice %14 {offsets = [5, 0], sizes = [1, 128], strides = [1, 1]} : vector<16x128xf32> to vector<1x128xf32>
    %89 = vector.extract_strided_slice %14 {offsets = [6, 0], sizes = [1, 128], strides = [1, 1]} : vector<16x128xf32> to vector<1x128xf32>
    %90 = vector.extract_strided_slice %14 {offsets = [7, 0], sizes = [1, 128], strides = [1, 1]} : vector<16x128xf32> to vector<1x128xf32>
    %91 = vector.extract_strided_slice %17 {offsets = [5, 0], sizes = [1, 128], strides = [1, 1]} : vector<16x128xf32> to vector<1x128xf32>
    %92 = vector.extract_strided_slice %17 {offsets = [6, 0], sizes = [1, 128], strides = [1, 1]} : vector<16x128xf32> to vector<1x128xf32>
    %93 = vector.extract_strided_slice %17 {offsets = [7, 0], sizes = [1, 128], strides = [1, 1]} : vector<16x128xf32> to vector<1x128xf32>
    %94 = tpu.concatenate %85, %86, %87, %88, %89, %90, %91, %92, %93 in 0 : vector<1x128xf32>, vector<1x128xf32>, vector<1x128xf32>, vector<1x128xf32>, vector<1x128xf32>, vector<1x128xf32>, vector<1x128xf32>, vector<1x128xf32>, vector<1x128xf32> -> vector<9x128xf32>
    %cst_17 = arith.constant dense<0.000000e+00> : vector<32x128xf32>
    %95 = tpu.matmul %18, %94, %cst_17 {dimension_numbers = #tpu.dot_dimension_numbers<[1], [0], [0], [1], [0, 0, 1, 1], [], []>} : vector<32x9xf32>, vector<9x128xf32>, vector<32x128xf32> -> vector<32x128xf32>
    %96 = vector.broadcast %19 : vector<32x1xf32> to vector<32x128xf32>
    %97 = arith.addf %95, %96 : vector<32x128xf32>
    %98 = vector.extract_strided_slice %11 {offsets = [6, 0], sizes = [1, 128], strides = [1, 1]} : vector<16x128xf32> to vector<1x128xf32>
    %99 = vector.extract_strided_slice %11 {offsets = [7, 0], sizes = [1, 128], strides = [1, 1]} : vector<16x128xf32> to vector<1x128xf32>
    %100 = vector.extract_strided_slice %11 {offsets = [8, 0], sizes = [1, 128], strides = [1, 1]} : vector<16x128xf32> to vector<1x128xf32>
    %101 = vector.extract_strided_slice %14 {offsets = [6, 0], sizes = [1, 128], strides = [1, 1]} : vector<16x128xf32> to vector<1x128xf32>
    %102 = vector.extract_strided_slice %14 {offsets = [7, 0], sizes = [1, 128], strides = [1, 1]} : vector<16x128xf32> to vector<1x128xf32>
    %103 = vector.extract_strided_slice %14 {offsets = [8, 0], sizes = [1, 128], strides = [1, 1]} : vector<16x128xf32> to vector<1x128xf32>
    %104 = vector.extract_strided_slice %17 {offsets = [6, 0], sizes = [1, 128], strides = [1, 1]} : vector<16x128xf32> to vector<1x128xf32>
    %105 = vector.extract_strided_slice %17 {offsets = [7, 0], sizes = [1, 128], strides = [1, 1]} : vector<16x128xf32> to vector<1x128xf32>
    %106 = vector.extract_strided_slice %17 {offsets = [8, 0], sizes = [1, 128], strides = [1, 1]} : vector<16x128xf32> to vector<1x128xf32>
    %107 = tpu.concatenate %98, %99, %100, %101, %102, %103, %104, %105, %106 in 0 : vector<1x128xf32>, vector<1x128xf32>, vector<1x128xf32>, vector<1x128xf32>, vector<1x128xf32>, vector<1x128xf32>, vector<1x128xf32>, vector<1x128xf32>, vector<1x128xf32> -> vector<9x128xf32>
    %cst_18 = arith.constant dense<0.000000e+00> : vector<32x128xf32>
    %108 = tpu.matmul %18, %107, %cst_18 {dimension_numbers = #tpu.dot_dimension_numbers<[1], [0], [0], [1], [0, 0, 1, 1], [], []>} : vector<32x9xf32>, vector<9x128xf32>, vector<32x128xf32> -> vector<32x128xf32>
    %109 = vector.broadcast %19 : vector<32x1xf32> to vector<32x128xf32>
    %110 = arith.addf %108, %109 : vector<32x128xf32>
    %111 = vector.extract_strided_slice %11 {offsets = [7, 0], sizes = [1, 128], strides = [1, 1]} : vector<16x128xf32> to vector<1x128xf32>
    %112 = vector.extract_strided_slice %11 {offsets = [8, 0], sizes = [1, 128], strides = [1, 1]} : vector<16x128xf32> to vector<1x128xf32>
    %113 = vector.extract_strided_slice %11 {offsets = [9, 0], sizes = [1, 128], strides = [1, 1]} : vector<16x128xf32> to vector<1x128xf32>
    %114 = vector.extract_strided_slice %14 {offsets = [7, 0], sizes = [1, 128], strides = [1, 1]} : vector<16x128xf32> to vector<1x128xf32>
    %115 = vector.extract_strided_slice %14 {offsets = [8, 0], sizes = [1, 128], strides = [1, 1]} : vector<16x128xf32> to vector<1x128xf32>
    %116 = vector.extract_strided_slice %14 {offsets = [9, 0], sizes = [1, 128], strides = [1, 1]} : vector<16x128xf32> to vector<1x128xf32>
    %117 = vector.extract_strided_slice %17 {offsets = [7, 0], sizes = [1, 128], strides = [1, 1]} : vector<16x128xf32> to vector<1x128xf32>
    %118 = vector.extract_strided_slice %17 {offsets = [8, 0], sizes = [1, 128], strides = [1, 1]} : vector<16x128xf32> to vector<1x128xf32>
    %119 = vector.extract_strided_slice %17 {offsets = [9, 0], sizes = [1, 128], strides = [1, 1]} : vector<16x128xf32> to vector<1x128xf32>
    %120 = tpu.concatenate %111, %112, %113, %114, %115, %116, %117, %118, %119 in 0 : vector<1x128xf32>, vector<1x128xf32>, vector<1x128xf32>, vector<1x128xf32>, vector<1x128xf32>, vector<1x128xf32>, vector<1x128xf32>, vector<1x128xf32>, vector<1x128xf32> -> vector<9x128xf32>
    %cst_19 = arith.constant dense<0.000000e+00> : vector<32x128xf32>
    %121 = tpu.matmul %18, %120, %cst_19 {dimension_numbers = #tpu.dot_dimension_numbers<[1], [0], [0], [1], [0, 0, 1, 1], [], []>} : vector<32x9xf32>, vector<9x128xf32>, vector<32x128xf32> -> vector<32x128xf32>
    %122 = vector.broadcast %19 : vector<32x1xf32> to vector<32x128xf32>
    %123 = arith.addf %121, %122 : vector<32x128xf32>
    %124 = vector.extract_strided_slice %11 {offsets = [8, 0], sizes = [1, 128], strides = [1, 1]} : vector<16x128xf32> to vector<1x128xf32>
    %125 = vector.extract_strided_slice %11 {offsets = [9, 0], sizes = [1, 128], strides = [1, 1]} : vector<16x128xf32> to vector<1x128xf32>
    %126 = vector.extract_strided_slice %11 {offsets = [10, 0], sizes = [1, 128], strides = [1, 1]} : vector<16x128xf32> to vector<1x128xf32>
    %127 = vector.extract_strided_slice %14 {offsets = [8, 0], sizes = [1, 128], strides = [1, 1]} : vector<16x128xf32> to vector<1x128xf32>
    %128 = vector.extract_strided_slice %14 {offsets = [9, 0], sizes = [1, 128], strides = [1, 1]} : vector<16x128xf32> to vector<1x128xf32>
    %129 = vector.extract_strided_slice %14 {offsets = [10, 0], sizes = [1, 128], strides = [1, 1]} : vector<16x128xf32> to vector<1x128xf32>
    %130 = vector.extract_strided_slice %17 {offsets = [8, 0], sizes = [1, 128], strides = [1, 1]} : vector<16x128xf32> to vector<1x128xf32>
    %131 = vector.extract_strided_slice %17 {offsets = [9, 0], sizes = [1, 128], strides = [1, 1]} : vector<16x128xf32> to vector<1x128xf32>
    %132 = vector.extract_strided_slice %17 {offsets = [10, 0], sizes = [1, 128], strides = [1, 1]} : vector<16x128xf32> to vector<1x128xf32>
    %133 = tpu.concatenate %124, %125, %126, %127, %128, %129, %130, %131, %132 in 0 : vector<1x128xf32>, vector<1x128xf32>, vector<1x128xf32>, vector<1x128xf32>, vector<1x128xf32>, vector<1x128xf32>, vector<1x128xf32>, vector<1x128xf32>, vector<1x128xf32> -> vector<9x128xf32>
    %cst_20 = arith.constant dense<0.000000e+00> : vector<32x128xf32>
    %134 = tpu.matmul %18, %133, %cst_20 {dimension_numbers = #tpu.dot_dimension_numbers<[1], [0], [0], [1], [0, 0, 1, 1], [], []>} : vector<32x9xf32>, vector<9x128xf32>, vector<32x128xf32> -> vector<32x128xf32>
    %135 = vector.broadcast %19 : vector<32x1xf32> to vector<32x128xf32>
    %136 = arith.addf %134, %135 : vector<32x128xf32>
    %137 = vector.extract_strided_slice %11 {offsets = [9, 0], sizes = [1, 128], strides = [1, 1]} : vector<16x128xf32> to vector<1x128xf32>
    %138 = vector.extract_strided_slice %11 {offsets = [10, 0], sizes = [1, 128], strides = [1, 1]} : vector<16x128xf32> to vector<1x128xf32>
    %139 = vector.extract_strided_slice %11 {offsets = [11, 0], sizes = [1, 128], strides = [1, 1]} : vector<16x128xf32> to vector<1x128xf32>
    %140 = vector.extract_strided_slice %14 {offsets = [9, 0], sizes = [1, 128], strides = [1, 1]} : vector<16x128xf32> to vector<1x128xf32>
    %141 = vector.extract_strided_slice %14 {offsets = [10, 0], sizes = [1, 128], strides = [1, 1]} : vector<16x128xf32> to vector<1x128xf32>
    %142 = vector.extract_strided_slice %14 {offsets = [11, 0], sizes = [1, 128], strides = [1, 1]} : vector<16x128xf32> to vector<1x128xf32>
    %143 = vector.extract_strided_slice %17 {offsets = [9, 0], sizes = [1, 128], strides = [1, 1]} : vector<16x128xf32> to vector<1x128xf32>
    %144 = vector.extract_strided_slice %17 {offsets = [10, 0], sizes = [1, 128], strides = [1, 1]} : vector<16x128xf32> to vector<1x128xf32>
    %145 = vector.extract_strided_slice %17 {offsets = [11, 0], sizes = [1, 128], strides = [1, 1]} : vector<16x128xf32> to vector<1x128xf32>
    %146 = tpu.concatenate %137, %138, %139, %140, %141, %142, %143, %144, %145 in 0 : vector<1x128xf32>, vector<1x128xf32>, vector<1x128xf32>, vector<1x128xf32>, vector<1x128xf32>, vector<1x128xf32>, vector<1x128xf32>, vector<1x128xf32>, vector<1x128xf32> -> vector<9x128xf32>
    %cst_21 = arith.constant dense<0.000000e+00> : vector<32x128xf32>
    %147 = tpu.matmul %18, %146, %cst_21 {dimension_numbers = #tpu.dot_dimension_numbers<[1], [0], [0], [1], [0, 0, 1, 1], [], []>} : vector<32x9xf32>, vector<9x128xf32>, vector<32x128xf32> -> vector<32x128xf32>
    %148 = vector.broadcast %19 : vector<32x1xf32> to vector<32x128xf32>
    %149 = arith.addf %147, %148 : vector<32x128xf32>
    %150 = vector.extract_strided_slice %11 {offsets = [10, 0], sizes = [1, 128], strides = [1, 1]} : vector<16x128xf32> to vector<1x128xf32>
    %151 = vector.extract_strided_slice %11 {offsets = [11, 0], sizes = [1, 128], strides = [1, 1]} : vector<16x128xf32> to vector<1x128xf32>
    %152 = vector.extract_strided_slice %11 {offsets = [12, 0], sizes = [1, 128], strides = [1, 1]} : vector<16x128xf32> to vector<1x128xf32>
    %153 = vector.extract_strided_slice %14 {offsets = [10, 0], sizes = [1, 128], strides = [1, 1]} : vector<16x128xf32> to vector<1x128xf32>
    %154 = vector.extract_strided_slice %14 {offsets = [11, 0], sizes = [1, 128], strides = [1, 1]} : vector<16x128xf32> to vector<1x128xf32>
    %155 = vector.extract_strided_slice %14 {offsets = [12, 0], sizes = [1, 128], strides = [1, 1]} : vector<16x128xf32> to vector<1x128xf32>
    %156 = vector.extract_strided_slice %17 {offsets = [10, 0], sizes = [1, 128], strides = [1, 1]} : vector<16x128xf32> to vector<1x128xf32>
    %157 = vector.extract_strided_slice %17 {offsets = [11, 0], sizes = [1, 128], strides = [1, 1]} : vector<16x128xf32> to vector<1x128xf32>
    %158 = vector.extract_strided_slice %17 {offsets = [12, 0], sizes = [1, 128], strides = [1, 1]} : vector<16x128xf32> to vector<1x128xf32>
    %159 = tpu.concatenate %150, %151, %152, %153, %154, %155, %156, %157, %158 in 0 : vector<1x128xf32>, vector<1x128xf32>, vector<1x128xf32>, vector<1x128xf32>, vector<1x128xf32>, vector<1x128xf32>, vector<1x128xf32>, vector<1x128xf32>, vector<1x128xf32> -> vector<9x128xf32>
    %cst_22 = arith.constant dense<0.000000e+00> : vector<32x128xf32>
    %160 = tpu.matmul %18, %159, %cst_22 {dimension_numbers = #tpu.dot_dimension_numbers<[1], [0], [0], [1], [0, 0, 1, 1], [], []>} : vector<32x9xf32>, vector<9x128xf32>, vector<32x128xf32> -> vector<32x128xf32>
    %161 = vector.broadcast %19 : vector<32x1xf32> to vector<32x128xf32>
    %162 = arith.addf %160, %161 : vector<32x128xf32>
    %163 = vector.extract_strided_slice %11 {offsets = [11, 0], sizes = [1, 128], strides = [1, 1]} : vector<16x128xf32> to vector<1x128xf32>
    %164 = vector.extract_strided_slice %11 {offsets = [12, 0], sizes = [1, 128], strides = [1, 1]} : vector<16x128xf32> to vector<1x128xf32>
    %165 = vector.extract_strided_slice %11 {offsets = [13, 0], sizes = [1, 128], strides = [1, 1]} : vector<16x128xf32> to vector<1x128xf32>
    %166 = vector.extract_strided_slice %14 {offsets = [11, 0], sizes = [1, 128], strides = [1, 1]} : vector<16x128xf32> to vector<1x128xf32>
    %167 = vector.extract_strided_slice %14 {offsets = [12, 0], sizes = [1, 128], strides = [1, 1]} : vector<16x128xf32> to vector<1x128xf32>
    %168 = vector.extract_strided_slice %14 {offsets = [13, 0], sizes = [1, 128], strides = [1, 1]} : vector<16x128xf32> to vector<1x128xf32>
    %169 = vector.extract_strided_slice %17 {offsets = [11, 0], sizes = [1, 128], strides = [1, 1]} : vector<16x128xf32> to vector<1x128xf32>
    %170 = vector.extract_strided_slice %17 {offsets = [12, 0], sizes = [1, 128], strides = [1, 1]} : vector<16x128xf32> to vector<1x128xf32>
    %171 = vector.extract_strided_slice %17 {offsets = [13, 0], sizes = [1, 128], strides = [1, 1]} : vector<16x128xf32> to vector<1x128xf32>
    %172 = tpu.concatenate %163, %164, %165, %166, %167, %168, %169, %170, %171 in 0 : vector<1x128xf32>, vector<1x128xf32>, vector<1x128xf32>, vector<1x128xf32>, vector<1x128xf32>, vector<1x128xf32>, vector<1x128xf32>, vector<1x128xf32>, vector<1x128xf32> -> vector<9x128xf32>
    %cst_23 = arith.constant dense<0.000000e+00> : vector<32x128xf32>
    %173 = tpu.matmul %18, %172, %cst_23 {dimension_numbers = #tpu.dot_dimension_numbers<[1], [0], [0], [1], [0, 0, 1, 1], [], []>} : vector<32x9xf32>, vector<9x128xf32>, vector<32x128xf32> -> vector<32x128xf32>
    %174 = vector.broadcast %19 : vector<32x1xf32> to vector<32x128xf32>
    %175 = arith.addf %173, %174 : vector<32x128xf32>
    %176 = vector.extract_strided_slice %11 {offsets = [12, 0], sizes = [1, 128], strides = [1, 1]} : vector<16x128xf32> to vector<1x128xf32>
    %177 = vector.extract_strided_slice %11 {offsets = [13, 0], sizes = [1, 128], strides = [1, 1]} : vector<16x128xf32> to vector<1x128xf32>
    %178 = vector.extract_strided_slice %11 {offsets = [14, 0], sizes = [1, 128], strides = [1, 1]} : vector<16x128xf32> to vector<1x128xf32>
    %179 = vector.extract_strided_slice %14 {offsets = [12, 0], sizes = [1, 128], strides = [1, 1]} : vector<16x128xf32> to vector<1x128xf32>
    %180 = vector.extract_strided_slice %14 {offsets = [13, 0], sizes = [1, 128], strides = [1, 1]} : vector<16x128xf32> to vector<1x128xf32>
    %181 = vector.extract_strided_slice %14 {offsets = [14, 0], sizes = [1, 128], strides = [1, 1]} : vector<16x128xf32> to vector<1x128xf32>
    %182 = vector.extract_strided_slice %17 {offsets = [12, 0], sizes = [1, 128], strides = [1, 1]} : vector<16x128xf32> to vector<1x128xf32>
    %183 = vector.extract_strided_slice %17 {offsets = [13, 0], sizes = [1, 128], strides = [1, 1]} : vector<16x128xf32> to vector<1x128xf32>
    %184 = vector.extract_strided_slice %17 {offsets = [14, 0], sizes = [1, 128], strides = [1, 1]} : vector<16x128xf32> to vector<1x128xf32>
    %185 = tpu.concatenate %176, %177, %178, %179, %180, %181, %182, %183, %184 in 0 : vector<1x128xf32>, vector<1x128xf32>, vector<1x128xf32>, vector<1x128xf32>, vector<1x128xf32>, vector<1x128xf32>, vector<1x128xf32>, vector<1x128xf32>, vector<1x128xf32> -> vector<9x128xf32>
    %cst_24 = arith.constant dense<0.000000e+00> : vector<32x128xf32>
    %186 = tpu.matmul %18, %185, %cst_24 {dimension_numbers = #tpu.dot_dimension_numbers<[1], [0], [0], [1], [0, 0, 1, 1], [], []>} : vector<32x9xf32>, vector<9x128xf32>, vector<32x128xf32> -> vector<32x128xf32>
    %187 = vector.broadcast %19 : vector<32x1xf32> to vector<32x128xf32>
    %188 = arith.addf %186, %187 : vector<32x128xf32>
    %189 = vector.extract_strided_slice %11 {offsets = [13, 0], sizes = [1, 128], strides = [1, 1]} : vector<16x128xf32> to vector<1x128xf32>
    %190 = vector.extract_strided_slice %11 {offsets = [14, 0], sizes = [1, 128], strides = [1, 1]} : vector<16x128xf32> to vector<1x128xf32>
    %191 = vector.extract_strided_slice %11 {offsets = [15, 0], sizes = [1, 128], strides = [1, 1]} : vector<16x128xf32> to vector<1x128xf32>
    %192 = vector.extract_strided_slice %14 {offsets = [13, 0], sizes = [1, 128], strides = [1, 1]} : vector<16x128xf32> to vector<1x128xf32>
    %193 = vector.extract_strided_slice %14 {offsets = [14, 0], sizes = [1, 128], strides = [1, 1]} : vector<16x128xf32> to vector<1x128xf32>
    %194 = vector.extract_strided_slice %14 {offsets = [15, 0], sizes = [1, 128], strides = [1, 1]} : vector<16x128xf32> to vector<1x128xf32>
    %195 = vector.extract_strided_slice %17 {offsets = [13, 0], sizes = [1, 128], strides = [1, 1]} : vector<16x128xf32> to vector<1x128xf32>
    %196 = vector.extract_strided_slice %17 {offsets = [14, 0], sizes = [1, 128], strides = [1, 1]} : vector<16x128xf32> to vector<1x128xf32>
    %197 = vector.extract_strided_slice %17 {offsets = [15, 0], sizes = [1, 128], strides = [1, 1]} : vector<16x128xf32> to vector<1x128xf32>
    %198 = tpu.concatenate %189, %190, %191, %192, %193, %194, %195, %196, %197 in 0 : vector<1x128xf32>, vector<1x128xf32>, vector<1x128xf32>, vector<1x128xf32>, vector<1x128xf32>, vector<1x128xf32>, vector<1x128xf32>, vector<1x128xf32>, vector<1x128xf32> -> vector<9x128xf32>
    %cst_25 = arith.constant dense<0.000000e+00> : vector<32x128xf32>
    %199 = tpu.matmul %18, %198, %cst_25 {dimension_numbers = #tpu.dot_dimension_numbers<[1], [0], [0], [1], [0, 0, 1, 1], [], []>} : vector<32x9xf32>, vector<9x128xf32>, vector<32x128xf32> -> vector<32x128xf32>
    %200 = vector.broadcast %19 : vector<32x1xf32> to vector<32x128xf32>
    %201 = arith.addf %199, %200 : vector<32x128xf32>
    %cst_26 = arith.constant 0.000000e+00 : f32
    %202 = vector.broadcast %cst_26 : f32 to vector<32x1xf32>
    %cst_27 = arith.constant 0.000000e+00 : f32
    %203 = vector.broadcast %cst_27 : f32 to vector<32x2xf32>
    %c0_28 = arith.constant 0 : index
    %c0_29 = arith.constant 0 : index
    %204 = vector.load %arg7[%c0_28, %c0_29] : memref<32x288xf32, #tpu.memory_space<vmem>>, vector<32x288xf32>
    %c0_30 = arith.constant 0 : index
    %c0_31 = arith.constant 0 : index
    %205 = vector.load %arg8[%c0_30, %c0_31] : memref<32x1xf32, #tpu.memory_space<vmem>>, vector<32x1xf32>
    %206 = vector.extract_strided_slice %32 {offsets = [0, 1], sizes = [32, 127], strides = [1, 1]} : vector<32x128xf32> to vector<32x127xf32>
    %207 = tpu.concatenate %206, %202 in 1 : vector<32x127xf32>, vector<32x1xf32> -> vector<32x128xf32>
    %208 = vector.extract_strided_slice %45 {offsets = [0, 1], sizes = [32, 127], strides = [1, 1]} : vector<32x128xf32> to vector<32x127xf32>
    %209 = tpu.concatenate %208, %202 in 1 : vector<32x127xf32>, vector<32x1xf32> -> vector<32x128xf32>
    %210 = vector.extract_strided_slice %58 {offsets = [0, 1], sizes = [32, 127], strides = [1, 1]} : vector<32x128xf32> to vector<32x127xf32>
    %211 = tpu.concatenate %210, %202 in 1 : vector<32x127xf32>, vector<32x1xf32> -> vector<32x128xf32>
    %212 = vector.extract_strided_slice %71 {offsets = [0, 1], sizes = [32, 127], strides = [1, 1]} : vector<32x128xf32> to vector<32x127xf32>
    %213 = tpu.concatenate %212, %202 in 1 : vector<32x127xf32>, vector<32x1xf32> -> vector<32x128xf32>
    %214 = vector.extract_strided_slice %84 {offsets = [0, 1], sizes = [32, 127], strides = [1, 1]} : vector<32x128xf32> to vector<32x127xf32>
    %215 = tpu.concatenate %214, %202 in 1 : vector<32x127xf32>, vector<32x1xf32> -> vector<32x128xf32>
    %216 = vector.extract_strided_slice %97 {offsets = [0, 1], sizes = [32, 127], strides = [1, 1]} : vector<32x128xf32> to vector<32x127xf32>
    %217 = tpu.concatenate %216, %202 in 1 : vector<32x127xf32>, vector<32x1xf32> -> vector<32x128xf32>
    %218 = vector.extract_strided_slice %110 {offsets = [0, 1], sizes = [32, 127], strides = [1, 1]} : vector<32x128xf32> to vector<32x127xf32>
    %219 = tpu.concatenate %218, %202 in 1 : vector<32x127xf32>, vector<32x1xf32> -> vector<32x128xf32>
    %220 = vector.extract_strided_slice %123 {offsets = [0, 1], sizes = [32, 127], strides = [1, 1]} : vector<32x128xf32> to vector<32x127xf32>
    %221 = tpu.concatenate %220, %202 in 1 : vector<32x127xf32>, vector<32x1xf32> -> vector<32x128xf32>
    %222 = vector.extract_strided_slice %136 {offsets = [0, 1], sizes = [32, 127], strides = [1, 1]} : vector<32x128xf32> to vector<32x127xf32>
    %223 = tpu.concatenate %222, %202 in 1 : vector<32x127xf32>, vector<32x1xf32> -> vector<32x128xf32>
    %224 = vector.extract_strided_slice %149 {offsets = [0, 1], sizes = [32, 127], strides = [1, 1]} : vector<32x128xf32> to vector<32x127xf32>
    %225 = tpu.concatenate %224, %202 in 1 : vector<32x127xf32>, vector<32x1xf32> -> vector<32x128xf32>
    %226 = vector.extract_strided_slice %162 {offsets = [0, 1], sizes = [32, 127], strides = [1, 1]} : vector<32x128xf32> to vector<32x127xf32>
    %227 = tpu.concatenate %226, %202 in 1 : vector<32x127xf32>, vector<32x1xf32> -> vector<32x128xf32>
    %228 = vector.extract_strided_slice %175 {offsets = [0, 1], sizes = [32, 127], strides = [1, 1]} : vector<32x128xf32> to vector<32x127xf32>
    %229 = tpu.concatenate %228, %202 in 1 : vector<32x127xf32>, vector<32x1xf32> -> vector<32x128xf32>
    %230 = vector.extract_strided_slice %188 {offsets = [0, 1], sizes = [32, 127], strides = [1, 1]} : vector<32x128xf32> to vector<32x127xf32>
    %231 = tpu.concatenate %230, %202 in 1 : vector<32x127xf32>, vector<32x1xf32> -> vector<32x128xf32>
    %232 = vector.extract_strided_slice %201 {offsets = [0, 1], sizes = [32, 127], strides = [1, 1]} : vector<32x128xf32> to vector<32x127xf32>
    %233 = tpu.concatenate %232, %202 in 1 : vector<32x127xf32>, vector<32x1xf32> -> vector<32x128xf32>
    %234 = vector.extract_strided_slice %32 {offsets = [0, 2], sizes = [32, 126], strides = [1, 1]} : vector<32x128xf32> to vector<32x126xf32>
    %235 = tpu.concatenate %234, %203 in 1 : vector<32x126xf32>, vector<32x2xf32> -> vector<32x128xf32>
    %236 = vector.extract_strided_slice %45 {offsets = [0, 2], sizes = [32, 126], strides = [1, 1]} : vector<32x128xf32> to vector<32x126xf32>
    %237 = tpu.concatenate %236, %203 in 1 : vector<32x126xf32>, vector<32x2xf32> -> vector<32x128xf32>
    %238 = vector.extract_strided_slice %58 {offsets = [0, 2], sizes = [32, 126], strides = [1, 1]} : vector<32x128xf32> to vector<32x126xf32>
    %239 = tpu.concatenate %238, %203 in 1 : vector<32x126xf32>, vector<32x2xf32> -> vector<32x128xf32>
    %240 = vector.extract_strided_slice %71 {offsets = [0, 2], sizes = [32, 126], strides = [1, 1]} : vector<32x128xf32> to vector<32x126xf32>
    %241 = tpu.concatenate %240, %203 in 1 : vector<32x126xf32>, vector<32x2xf32> -> vector<32x128xf32>
    %242 = vector.extract_strided_slice %84 {offsets = [0, 2], sizes = [32, 126], strides = [1, 1]} : vector<32x128xf32> to vector<32x126xf32>
    %243 = tpu.concatenate %242, %203 in 1 : vector<32x126xf32>, vector<32x2xf32> -> vector<32x128xf32>
    %244 = vector.extract_strided_slice %97 {offsets = [0, 2], sizes = [32, 126], strides = [1, 1]} : vector<32x128xf32> to vector<32x126xf32>
    %245 = tpu.concatenate %244, %203 in 1 : vector<32x126xf32>, vector<32x2xf32> -> vector<32x128xf32>
    %246 = vector.extract_strided_slice %110 {offsets = [0, 2], sizes = [32, 126], strides = [1, 1]} : vector<32x128xf32> to vector<32x126xf32>
    %247 = tpu.concatenate %246, %203 in 1 : vector<32x126xf32>, vector<32x2xf32> -> vector<32x128xf32>
    %248 = vector.extract_strided_slice %123 {offsets = [0, 2], sizes = [32, 126], strides = [1, 1]} : vector<32x128xf32> to vector<32x126xf32>
    %249 = tpu.concatenate %248, %203 in 1 : vector<32x126xf32>, vector<32x2xf32> -> vector<32x128xf32>
    %250 = vector.extract_strided_slice %136 {offsets = [0, 2], sizes = [32, 126], strides = [1, 1]} : vector<32x128xf32> to vector<32x126xf32>
    %251 = tpu.concatenate %250, %203 in 1 : vector<32x126xf32>, vector<32x2xf32> -> vector<32x128xf32>
    %252 = vector.extract_strided_slice %149 {offsets = [0, 2], sizes = [32, 126], strides = [1, 1]} : vector<32x128xf32> to vector<32x126xf32>
    %253 = tpu.concatenate %252, %203 in 1 : vector<32x126xf32>, vector<32x2xf32> -> vector<32x128xf32>
    %254 = vector.extract_strided_slice %162 {offsets = [0, 2], sizes = [32, 126], strides = [1, 1]} : vector<32x128xf32> to vector<32x126xf32>
    %255 = tpu.concatenate %254, %203 in 1 : vector<32x126xf32>, vector<32x2xf32> -> vector<32x128xf32>
    %256 = vector.extract_strided_slice %175 {offsets = [0, 2], sizes = [32, 126], strides = [1, 1]} : vector<32x128xf32> to vector<32x126xf32>
    %257 = tpu.concatenate %256, %203 in 1 : vector<32x126xf32>, vector<32x2xf32> -> vector<32x128xf32>
    %258 = vector.extract_strided_slice %188 {offsets = [0, 2], sizes = [32, 126], strides = [1, 1]} : vector<32x128xf32> to vector<32x126xf32>
    %259 = tpu.concatenate %258, %203 in 1 : vector<32x126xf32>, vector<32x2xf32> -> vector<32x128xf32>
    %260 = vector.extract_strided_slice %201 {offsets = [0, 2], sizes = [32, 126], strides = [1, 1]} : vector<32x128xf32> to vector<32x126xf32>
    %261 = tpu.concatenate %260, %203 in 1 : vector<32x126xf32>, vector<32x2xf32> -> vector<32x128xf32>
    %262 = tpu.concatenate %32, %45, %58, %207, %209, %211, %235, %237, %239 in 0 : vector<32x128xf32>, vector<32x128xf32>, vector<32x128xf32>, vector<32x128xf32>, vector<32x128xf32>, vector<32x128xf32>, vector<32x128xf32>, vector<32x128xf32>, vector<32x128xf32> -> vector<288x128xf32>
    %cst_32 = arith.constant dense<0.000000e+00> : vector<32x128xf32>
    %263 = tpu.matmul %204, %262, %cst_32 {dimension_numbers = #tpu.dot_dimension_numbers<[1], [0], [0], [1], [0, 0, 1, 1], [], []>} : vector<32x288xf32>, vector<288x128xf32>, vector<32x128xf32> -> vector<32x128xf32>
    %264 = vector.broadcast %205 : vector<32x1xf32> to vector<32x128xf32>
    %265 = arith.addf %263, %264 : vector<32x128xf32>
    %cst_33 = arith.constant 0.000000e+00 : f32
    %266 = vector.broadcast %cst_33 : f32 to vector<32x128xf32>
    %267 = arith.maximumf %265, %266 : vector<32x128xf32>
    %268 = tpu.concatenate %45, %58, %71, %209, %211, %213, %237, %239, %241 in 0 : vector<32x128xf32>, vector<32x128xf32>, vector<32x128xf32>, vector<32x128xf32>, vector<32x128xf32>, vector<32x128xf32>, vector<32x128xf32>, vector<32x128xf32>, vector<32x128xf32> -> vector<288x128xf32>
    %cst_34 = arith.constant dense<0.000000e+00> : vector<32x128xf32>
    %269 = tpu.matmul %204, %268, %cst_34 {dimension_numbers = #tpu.dot_dimension_numbers<[1], [0], [0], [1], [0, 0, 1, 1], [], []>} : vector<32x288xf32>, vector<288x128xf32>, vector<32x128xf32> -> vector<32x128xf32>
    %270 = vector.broadcast %205 : vector<32x1xf32> to vector<32x128xf32>
    %271 = arith.addf %269, %270 : vector<32x128xf32>
    %cst_35 = arith.constant 0.000000e+00 : f32
    %272 = vector.broadcast %cst_35 : f32 to vector<32x128xf32>
    %273 = arith.maximumf %271, %272 : vector<32x128xf32>
    %274 = tpu.concatenate %58, %71, %84, %211, %213, %215, %239, %241, %243 in 0 : vector<32x128xf32>, vector<32x128xf32>, vector<32x128xf32>, vector<32x128xf32>, vector<32x128xf32>, vector<32x128xf32>, vector<32x128xf32>, vector<32x128xf32>, vector<32x128xf32> -> vector<288x128xf32>
    %cst_36 = arith.constant dense<0.000000e+00> : vector<32x128xf32>
    %275 = tpu.matmul %204, %274, %cst_36 {dimension_numbers = #tpu.dot_dimension_numbers<[1], [0], [0], [1], [0, 0, 1, 1], [], []>} : vector<32x288xf32>, vector<288x128xf32>, vector<32x128xf32> -> vector<32x128xf32>
    %276 = vector.broadcast %205 : vector<32x1xf32> to vector<32x128xf32>
    %277 = arith.addf %275, %276 : vector<32x128xf32>
    %cst_37 = arith.constant 0.000000e+00 : f32
    %278 = vector.broadcast %cst_37 : f32 to vector<32x128xf32>
    %279 = arith.maximumf %277, %278 : vector<32x128xf32>
    %280 = tpu.concatenate %71, %84, %97, %213, %215, %217, %241, %243, %245 in 0 : vector<32x128xf32>, vector<32x128xf32>, vector<32x128xf32>, vector<32x128xf32>, vector<32x128xf32>, vector<32x128xf32>, vector<32x128xf32>, vector<32x128xf32>, vector<32x128xf32> -> vector<288x128xf32>
    %cst_38 = arith.constant dense<0.000000e+00> : vector<32x128xf32>
    %281 = tpu.matmul %204, %280, %cst_38 {dimension_numbers = #tpu.dot_dimension_numbers<[1], [0], [0], [1], [0, 0, 1, 1], [], []>} : vector<32x288xf32>, vector<288x128xf32>, vector<32x128xf32> -> vector<32x128xf32>
    %282 = vector.broadcast %205 : vector<32x1xf32> to vector<32x128xf32>
    %283 = arith.addf %281, %282 : vector<32x128xf32>
    %cst_39 = arith.constant 0.000000e+00 : f32
    %284 = vector.broadcast %cst_39 : f32 to vector<32x128xf32>
    %285 = arith.maximumf %283, %284 : vector<32x128xf32>
    %286 = tpu.concatenate %84, %97, %110, %215, %217, %219, %243, %245, %247 in 0 : vector<32x128xf32>, vector<32x128xf32>, vector<32x128xf32>, vector<32x128xf32>, vector<32x128xf32>, vector<32x128xf32>, vector<32x128xf32>, vector<32x128xf32>, vector<32x128xf32> -> vector<288x128xf32>
    %cst_40 = arith.constant dense<0.000000e+00> : vector<32x128xf32>
    %287 = tpu.matmul %204, %286, %cst_40 {dimension_numbers = #tpu.dot_dimension_numbers<[1], [0], [0], [1], [0, 0, 1, 1], [], []>} : vector<32x288xf32>, vector<288x128xf32>, vector<32x128xf32> -> vector<32x128xf32>
    %288 = vector.broadcast %205 : vector<32x1xf32> to vector<32x128xf32>
    %289 = arith.addf %287, %288 : vector<32x128xf32>
    %cst_41 = arith.constant 0.000000e+00 : f32
    %290 = vector.broadcast %cst_41 : f32 to vector<32x128xf32>
    %291 = arith.maximumf %289, %290 : vector<32x128xf32>
    %292 = tpu.concatenate %97, %110, %123, %217, %219, %221, %245, %247, %249 in 0 : vector<32x128xf32>, vector<32x128xf32>, vector<32x128xf32>, vector<32x128xf32>, vector<32x128xf32>, vector<32x128xf32>, vector<32x128xf32>, vector<32x128xf32>, vector<32x128xf32> -> vector<288x128xf32>
    %cst_42 = arith.constant dense<0.000000e+00> : vector<32x128xf32>
    %293 = tpu.matmul %204, %292, %cst_42 {dimension_numbers = #tpu.dot_dimension_numbers<[1], [0], [0], [1], [0, 0, 1, 1], [], []>} : vector<32x288xf32>, vector<288x128xf32>, vector<32x128xf32> -> vector<32x128xf32>
    %294 = vector.broadcast %205 : vector<32x1xf32> to vector<32x128xf32>
    %295 = arith.addf %293, %294 : vector<32x128xf32>
    %cst_43 = arith.constant 0.000000e+00 : f32
    %296 = vector.broadcast %cst_43 : f32 to vector<32x128xf32>
    %297 = arith.maximumf %295, %296 : vector<32x128xf32>
    %298 = tpu.concatenate %110, %123, %136, %219, %221, %223, %247, %249, %251 in 0 : vector<32x128xf32>, vector<32x128xf32>, vector<32x128xf32>, vector<32x128xf32>, vector<32x128xf32>, vector<32x128xf32>, vector<32x128xf32>, vector<32x128xf32>, vector<32x128xf32> -> vector<288x128xf32>
    %cst_44 = arith.constant dense<0.000000e+00> : vector<32x128xf32>
    %299 = tpu.matmul %204, %298, %cst_44 {dimension_numbers = #tpu.dot_dimension_numbers<[1], [0], [0], [1], [0, 0, 1, 1], [], []>} : vector<32x288xf32>, vector<288x128xf32>, vector<32x128xf32> -> vector<32x128xf32>
    %300 = vector.broadcast %205 : vector<32x1xf32> to vector<32x128xf32>
    %301 = arith.addf %299, %300 : vector<32x128xf32>
    %cst_45 = arith.constant 0.000000e+00 : f32
    %302 = vector.broadcast %cst_45 : f32 to vector<32x128xf32>
    %303 = arith.maximumf %301, %302 : vector<32x128xf32>
    %304 = tpu.concatenate %123, %136, %149, %221, %223, %225, %249, %251, %253 in 0 : vector<32x128xf32>, vector<32x128xf32>, vector<32x128xf32>, vector<32x128xf32>, vector<32x128xf32>, vector<32x128xf32>, vector<32x128xf32>, vector<32x128xf32>, vector<32x128xf32> -> vector<288x128xf32>
    %cst_46 = arith.constant dense<0.000000e+00> : vector<32x128xf32>
    %305 = tpu.matmul %204, %304, %cst_46 {dimension_numbers = #tpu.dot_dimension_numbers<[1], [0], [0], [1], [0, 0, 1, 1], [], []>} : vector<32x288xf32>, vector<288x128xf32>, vector<32x128xf32> -> vector<32x128xf32>
    %306 = vector.broadcast %205 : vector<32x1xf32> to vector<32x128xf32>
    %307 = arith.addf %305, %306 : vector<32x128xf32>
    %cst_47 = arith.constant 0.000000e+00 : f32
    %308 = vector.broadcast %cst_47 : f32 to vector<32x128xf32>
    %309 = arith.maximumf %307, %308 : vector<32x128xf32>
    %310 = tpu.concatenate %136, %149, %162, %223, %225, %227, %251, %253, %255 in 0 : vector<32x128xf32>, vector<32x128xf32>, vector<32x128xf32>, vector<32x128xf32>, vector<32x128xf32>, vector<32x128xf32>, vector<32x128xf32>, vector<32x128xf32>, vector<32x128xf32> -> vector<288x128xf32>
    %cst_48 = arith.constant dense<0.000000e+00> : vector<32x128xf32>
    %311 = tpu.matmul %204, %310, %cst_48 {dimension_numbers = #tpu.dot_dimension_numbers<[1], [0], [0], [1], [0, 0, 1, 1], [], []>} : vector<32x288xf32>, vector<288x128xf32>, vector<32x128xf32> -> vector<32x128xf32>
    %312 = vector.broadcast %205 : vector<32x1xf32> to vector<32x128xf32>
    %313 = arith.addf %311, %312 : vector<32x128xf32>
    %cst_49 = arith.constant 0.000000e+00 : f32
    %314 = vector.broadcast %cst_49 : f32 to vector<32x128xf32>
    %315 = arith.maximumf %313, %314 : vector<32x128xf32>
    %316 = tpu.concatenate %149, %162, %175, %225, %227, %229, %253, %255, %257 in 0 : vector<32x128xf32>, vector<32x128xf32>, vector<32x128xf32>, vector<32x128xf32>, vector<32x128xf32>, vector<32x128xf32>, vector<32x128xf32>, vector<32x128xf32>, vector<32x128xf32> -> vector<288x128xf32>
    %cst_50 = arith.constant dense<0.000000e+00> : vector<32x128xf32>
    %317 = tpu.matmul %204, %316, %cst_50 {dimension_numbers = #tpu.dot_dimension_numbers<[1], [0], [0], [1], [0, 0, 1, 1], [], []>} : vector<32x288xf32>, vector<288x128xf32>, vector<32x128xf32> -> vector<32x128xf32>
    %318 = vector.broadcast %205 : vector<32x1xf32> to vector<32x128xf32>
    %319 = arith.addf %317, %318 : vector<32x128xf32>
    %cst_51 = arith.constant 0.000000e+00 : f32
    %320 = vector.broadcast %cst_51 : f32 to vector<32x128xf32>
    %321 = arith.maximumf %319, %320 : vector<32x128xf32>
    %322 = tpu.concatenate %162, %175, %188, %227, %229, %231, %255, %257, %259 in 0 : vector<32x128xf32>, vector<32x128xf32>, vector<32x128xf32>, vector<32x128xf32>, vector<32x128xf32>, vector<32x128xf32>, vector<32x128xf32>, vector<32x128xf32>, vector<32x128xf32> -> vector<288x128xf32>
    %cst_52 = arith.constant dense<0.000000e+00> : vector<32x128xf32>
    %323 = tpu.matmul %204, %322, %cst_52 {dimension_numbers = #tpu.dot_dimension_numbers<[1], [0], [0], [1], [0, 0, 1, 1], [], []>} : vector<32x288xf32>, vector<288x128xf32>, vector<32x128xf32> -> vector<32x128xf32>
    %324 = vector.broadcast %205 : vector<32x1xf32> to vector<32x128xf32>
    %325 = arith.addf %323, %324 : vector<32x128xf32>
    %cst_53 = arith.constant 0.000000e+00 : f32
    %326 = vector.broadcast %cst_53 : f32 to vector<32x128xf32>
    %327 = arith.maximumf %325, %326 : vector<32x128xf32>
    %328 = tpu.concatenate %175, %188, %201, %229, %231, %233, %257, %259, %261 in 0 : vector<32x128xf32>, vector<32x128xf32>, vector<32x128xf32>, vector<32x128xf32>, vector<32x128xf32>, vector<32x128xf32>, vector<32x128xf32>, vector<32x128xf32>, vector<32x128xf32> -> vector<288x128xf32>
    %cst_54 = arith.constant dense<0.000000e+00> : vector<32x128xf32>
    %329 = tpu.matmul %204, %328, %cst_54 {dimension_numbers = #tpu.dot_dimension_numbers<[1], [0], [0], [1], [0, 0, 1, 1], [], []>} : vector<32x288xf32>, vector<288x128xf32>, vector<32x128xf32> -> vector<32x128xf32>
    %330 = vector.broadcast %205 : vector<32x1xf32> to vector<32x128xf32>
    %331 = arith.addf %329, %330 : vector<32x128xf32>
    %cst_55 = arith.constant 0.000000e+00 : f32
    %332 = vector.broadcast %cst_55 : f32 to vector<32x128xf32>
    %333 = arith.maximumf %331, %332 : vector<32x128xf32>
    %c0_56 = arith.constant 0 : index
    %c0_57 = arith.constant 0 : index
    %334 = vector.load %arg9[%c0_56, %c0_57] : memref<32x288xf32, #tpu.memory_space<vmem>>, vector<32x288xf32>
    %c0_58 = arith.constant 0 : index
    %c0_59 = arith.constant 0 : index
    %335 = vector.load %arg10[%c0_58, %c0_59] : memref<32x1xf32, #tpu.memory_space<vmem>>, vector<32x1xf32>
    %336 = vector.extract_strided_slice %267 {offsets = [0, 1], sizes = [32, 127], strides = [1, 1]} : vector<32x128xf32> to vector<32x127xf32>
    %337 = tpu.concatenate %336, %202 in 1 : vector<32x127xf32>, vector<32x1xf32> -> vector<32x128xf32>
    %338 = vector.extract_strided_slice %273 {offsets = [0, 1], sizes = [32, 127], strides = [1, 1]} : vector<32x128xf32> to vector<32x127xf32>
    %339 = tpu.concatenate %338, %202 in 1 : vector<32x127xf32>, vector<32x1xf32> -> vector<32x128xf32>
    %340 = vector.extract_strided_slice %279 {offsets = [0, 1], sizes = [32, 127], strides = [1, 1]} : vector<32x128xf32> to vector<32x127xf32>
    %341 = tpu.concatenate %340, %202 in 1 : vector<32x127xf32>, vector<32x1xf32> -> vector<32x128xf32>
    %342 = vector.extract_strided_slice %285 {offsets = [0, 1], sizes = [32, 127], strides = [1, 1]} : vector<32x128xf32> to vector<32x127xf32>
    %343 = tpu.concatenate %342, %202 in 1 : vector<32x127xf32>, vector<32x1xf32> -> vector<32x128xf32>
    %344 = vector.extract_strided_slice %291 {offsets = [0, 1], sizes = [32, 127], strides = [1, 1]} : vector<32x128xf32> to vector<32x127xf32>
    %345 = tpu.concatenate %344, %202 in 1 : vector<32x127xf32>, vector<32x1xf32> -> vector<32x128xf32>
    %346 = vector.extract_strided_slice %297 {offsets = [0, 1], sizes = [32, 127], strides = [1, 1]} : vector<32x128xf32> to vector<32x127xf32>
    %347 = tpu.concatenate %346, %202 in 1 : vector<32x127xf32>, vector<32x1xf32> -> vector<32x128xf32>
    %348 = vector.extract_strided_slice %303 {offsets = [0, 1], sizes = [32, 127], strides = [1, 1]} : vector<32x128xf32> to vector<32x127xf32>
    %349 = tpu.concatenate %348, %202 in 1 : vector<32x127xf32>, vector<32x1xf32> -> vector<32x128xf32>
    %350 = vector.extract_strided_slice %309 {offsets = [0, 1], sizes = [32, 127], strides = [1, 1]} : vector<32x128xf32> to vector<32x127xf32>
    %351 = tpu.concatenate %350, %202 in 1 : vector<32x127xf32>, vector<32x1xf32> -> vector<32x128xf32>
    %352 = vector.extract_strided_slice %315 {offsets = [0, 1], sizes = [32, 127], strides = [1, 1]} : vector<32x128xf32> to vector<32x127xf32>
    %353 = tpu.concatenate %352, %202 in 1 : vector<32x127xf32>, vector<32x1xf32> -> vector<32x128xf32>
    %354 = vector.extract_strided_slice %321 {offsets = [0, 1], sizes = [32, 127], strides = [1, 1]} : vector<32x128xf32> to vector<32x127xf32>
    %355 = tpu.concatenate %354, %202 in 1 : vector<32x127xf32>, vector<32x1xf32> -> vector<32x128xf32>
    %356 = vector.extract_strided_slice %327 {offsets = [0, 1], sizes = [32, 127], strides = [1, 1]} : vector<32x128xf32> to vector<32x127xf32>
    %357 = tpu.concatenate %356, %202 in 1 : vector<32x127xf32>, vector<32x1xf32> -> vector<32x128xf32>
    %358 = vector.extract_strided_slice %333 {offsets = [0, 1], sizes = [32, 127], strides = [1, 1]} : vector<32x128xf32> to vector<32x127xf32>
    %359 = tpu.concatenate %358, %202 in 1 : vector<32x127xf32>, vector<32x1xf32> -> vector<32x128xf32>
    %360 = vector.extract_strided_slice %267 {offsets = [0, 2], sizes = [32, 126], strides = [1, 1]} : vector<32x128xf32> to vector<32x126xf32>
    %361 = tpu.concatenate %360, %203 in 1 : vector<32x126xf32>, vector<32x2xf32> -> vector<32x128xf32>
    %362 = vector.extract_strided_slice %273 {offsets = [0, 2], sizes = [32, 126], strides = [1, 1]} : vector<32x128xf32> to vector<32x126xf32>
    %363 = tpu.concatenate %362, %203 in 1 : vector<32x126xf32>, vector<32x2xf32> -> vector<32x128xf32>
    %364 = vector.extract_strided_slice %279 {offsets = [0, 2], sizes = [32, 126], strides = [1, 1]} : vector<32x128xf32> to vector<32x126xf32>
    %365 = tpu.concatenate %364, %203 in 1 : vector<32x126xf32>, vector<32x2xf32> -> vector<32x128xf32>
    %366 = vector.extract_strided_slice %285 {offsets = [0, 2], sizes = [32, 126], strides = [1, 1]} : vector<32x128xf32> to vector<32x126xf32>
    %367 = tpu.concatenate %366, %203 in 1 : vector<32x126xf32>, vector<32x2xf32> -> vector<32x128xf32>
    %368 = vector.extract_strided_slice %291 {offsets = [0, 2], sizes = [32, 126], strides = [1, 1]} : vector<32x128xf32> to vector<32x126xf32>
    %369 = tpu.concatenate %368, %203 in 1 : vector<32x126xf32>, vector<32x2xf32> -> vector<32x128xf32>
    %370 = vector.extract_strided_slice %297 {offsets = [0, 2], sizes = [32, 126], strides = [1, 1]} : vector<32x128xf32> to vector<32x126xf32>
    %371 = tpu.concatenate %370, %203 in 1 : vector<32x126xf32>, vector<32x2xf32> -> vector<32x128xf32>
    %372 = vector.extract_strided_slice %303 {offsets = [0, 2], sizes = [32, 126], strides = [1, 1]} : vector<32x128xf32> to vector<32x126xf32>
    %373 = tpu.concatenate %372, %203 in 1 : vector<32x126xf32>, vector<32x2xf32> -> vector<32x128xf32>
    %374 = vector.extract_strided_slice %309 {offsets = [0, 2], sizes = [32, 126], strides = [1, 1]} : vector<32x128xf32> to vector<32x126xf32>
    %375 = tpu.concatenate %374, %203 in 1 : vector<32x126xf32>, vector<32x2xf32> -> vector<32x128xf32>
    %376 = vector.extract_strided_slice %315 {offsets = [0, 2], sizes = [32, 126], strides = [1, 1]} : vector<32x128xf32> to vector<32x126xf32>
    %377 = tpu.concatenate %376, %203 in 1 : vector<32x126xf32>, vector<32x2xf32> -> vector<32x128xf32>
    %378 = vector.extract_strided_slice %321 {offsets = [0, 2], sizes = [32, 126], strides = [1, 1]} : vector<32x128xf32> to vector<32x126xf32>
    %379 = tpu.concatenate %378, %203 in 1 : vector<32x126xf32>, vector<32x2xf32> -> vector<32x128xf32>
    %380 = vector.extract_strided_slice %327 {offsets = [0, 2], sizes = [32, 126], strides = [1, 1]} : vector<32x128xf32> to vector<32x126xf32>
    %381 = tpu.concatenate %380, %203 in 1 : vector<32x126xf32>, vector<32x2xf32> -> vector<32x128xf32>
    %382 = vector.extract_strided_slice %333 {offsets = [0, 2], sizes = [32, 126], strides = [1, 1]} : vector<32x128xf32> to vector<32x126xf32>
    %383 = tpu.concatenate %382, %203 in 1 : vector<32x126xf32>, vector<32x2xf32> -> vector<32x128xf32>
    %384 = tpu.concatenate %267, %273, %279, %337, %339, %341, %361, %363, %365 in 0 : vector<32x128xf32>, vector<32x128xf32>, vector<32x128xf32>, vector<32x128xf32>, vector<32x128xf32>, vector<32x128xf32>, vector<32x128xf32>, vector<32x128xf32>, vector<32x128xf32> -> vector<288x128xf32>
    %cst_60 = arith.constant dense<0.000000e+00> : vector<32x128xf32>
    %385 = tpu.matmul %334, %384, %cst_60 {dimension_numbers = #tpu.dot_dimension_numbers<[1], [0], [0], [1], [0, 0, 1, 1], [], []>} : vector<32x288xf32>, vector<288x128xf32>, vector<32x128xf32> -> vector<32x128xf32>
    %386 = vector.broadcast %335 : vector<32x1xf32> to vector<32x128xf32>
    %387 = arith.addf %385, %386 : vector<32x128xf32>
    %cst_61 = arith.constant 0.000000e+00 : f32
    %388 = vector.broadcast %cst_61 : f32 to vector<32x128xf32>
    %389 = arith.maximumf %387, %388 : vector<32x128xf32>
    %390 = tpu.concatenate %273, %279, %285, %339, %341, %343, %363, %365, %367 in 0 : vector<32x128xf32>, vector<32x128xf32>, vector<32x128xf32>, vector<32x128xf32>, vector<32x128xf32>, vector<32x128xf32>, vector<32x128xf32>, vector<32x128xf32>, vector<32x128xf32> -> vector<288x128xf32>
    %cst_62 = arith.constant dense<0.000000e+00> : vector<32x128xf32>
    %391 = tpu.matmul %334, %390, %cst_62 {dimension_numbers = #tpu.dot_dimension_numbers<[1], [0], [0], [1], [0, 0, 1, 1], [], []>} : vector<32x288xf32>, vector<288x128xf32>, vector<32x128xf32> -> vector<32x128xf32>
    %392 = vector.broadcast %335 : vector<32x1xf32> to vector<32x128xf32>
    %393 = arith.addf %391, %392 : vector<32x128xf32>
    %cst_63 = arith.constant 0.000000e+00 : f32
    %394 = vector.broadcast %cst_63 : f32 to vector<32x128xf32>
    %395 = arith.maximumf %393, %394 : vector<32x128xf32>
    %396 = tpu.concatenate %279, %285, %291, %341, %343, %345, %365, %367, %369 in 0 : vector<32x128xf32>, vector<32x128xf32>, vector<32x128xf32>, vector<32x128xf32>, vector<32x128xf32>, vector<32x128xf32>, vector<32x128xf32>, vector<32x128xf32>, vector<32x128xf32> -> vector<288x128xf32>
    %cst_64 = arith.constant dense<0.000000e+00> : vector<32x128xf32>
    %397 = tpu.matmul %334, %396, %cst_64 {dimension_numbers = #tpu.dot_dimension_numbers<[1], [0], [0], [1], [0, 0, 1, 1], [], []>} : vector<32x288xf32>, vector<288x128xf32>, vector<32x128xf32> -> vector<32x128xf32>
    %398 = vector.broadcast %335 : vector<32x1xf32> to vector<32x128xf32>
    %399 = arith.addf %397, %398 : vector<32x128xf32>
    %cst_65 = arith.constant 0.000000e+00 : f32
    %400 = vector.broadcast %cst_65 : f32 to vector<32x128xf32>
    %401 = arith.maximumf %399, %400 : vector<32x128xf32>
    %402 = tpu.concatenate %285, %291, %297, %343, %345, %347, %367, %369, %371 in 0 : vector<32x128xf32>, vector<32x128xf32>, vector<32x128xf32>, vector<32x128xf32>, vector<32x128xf32>, vector<32x128xf32>, vector<32x128xf32>, vector<32x128xf32>, vector<32x128xf32> -> vector<288x128xf32>
    %cst_66 = arith.constant dense<0.000000e+00> : vector<32x128xf32>
    %403 = tpu.matmul %334, %402, %cst_66 {dimension_numbers = #tpu.dot_dimension_numbers<[1], [0], [0], [1], [0, 0, 1, 1], [], []>} : vector<32x288xf32>, vector<288x128xf32>, vector<32x128xf32> -> vector<32x128xf32>
    %404 = vector.broadcast %335 : vector<32x1xf32> to vector<32x128xf32>
    %405 = arith.addf %403, %404 : vector<32x128xf32>
    %cst_67 = arith.constant 0.000000e+00 : f32
    %406 = vector.broadcast %cst_67 : f32 to vector<32x128xf32>
    %407 = arith.maximumf %405, %406 : vector<32x128xf32>
    %408 = tpu.concatenate %291, %297, %303, %345, %347, %349, %369, %371, %373 in 0 : vector<32x128xf32>, vector<32x128xf32>, vector<32x128xf32>, vector<32x128xf32>, vector<32x128xf32>, vector<32x128xf32>, vector<32x128xf32>, vector<32x128xf32>, vector<32x128xf32> -> vector<288x128xf32>
    %cst_68 = arith.constant dense<0.000000e+00> : vector<32x128xf32>
    %409 = tpu.matmul %334, %408, %cst_68 {dimension_numbers = #tpu.dot_dimension_numbers<[1], [0], [0], [1], [0, 0, 1, 1], [], []>} : vector<32x288xf32>, vector<288x128xf32>, vector<32x128xf32> -> vector<32x128xf32>
    %410 = vector.broadcast %335 : vector<32x1xf32> to vector<32x128xf32>
    %411 = arith.addf %409, %410 : vector<32x128xf32>
    %cst_69 = arith.constant 0.000000e+00 : f32
    %412 = vector.broadcast %cst_69 : f32 to vector<32x128xf32>
    %413 = arith.maximumf %411, %412 : vector<32x128xf32>
    %414 = tpu.concatenate %297, %303, %309, %347, %349, %351, %371, %373, %375 in 0 : vector<32x128xf32>, vector<32x128xf32>, vector<32x128xf32>, vector<32x128xf32>, vector<32x128xf32>, vector<32x128xf32>, vector<32x128xf32>, vector<32x128xf32>, vector<32x128xf32> -> vector<288x128xf32>
    %cst_70 = arith.constant dense<0.000000e+00> : vector<32x128xf32>
    %415 = tpu.matmul %334, %414, %cst_70 {dimension_numbers = #tpu.dot_dimension_numbers<[1], [0], [0], [1], [0, 0, 1, 1], [], []>} : vector<32x288xf32>, vector<288x128xf32>, vector<32x128xf32> -> vector<32x128xf32>
    %416 = vector.broadcast %335 : vector<32x1xf32> to vector<32x128xf32>
    %417 = arith.addf %415, %416 : vector<32x128xf32>
    %cst_71 = arith.constant 0.000000e+00 : f32
    %418 = vector.broadcast %cst_71 : f32 to vector<32x128xf32>
    %419 = arith.maximumf %417, %418 : vector<32x128xf32>
    %420 = tpu.concatenate %303, %309, %315, %349, %351, %353, %373, %375, %377 in 0 : vector<32x128xf32>, vector<32x128xf32>, vector<32x128xf32>, vector<32x128xf32>, vector<32x128xf32>, vector<32x128xf32>, vector<32x128xf32>, vector<32x128xf32>, vector<32x128xf32> -> vector<288x128xf32>
    %cst_72 = arith.constant dense<0.000000e+00> : vector<32x128xf32>
    %421 = tpu.matmul %334, %420, %cst_72 {dimension_numbers = #tpu.dot_dimension_numbers<[1], [0], [0], [1], [0, 0, 1, 1], [], []>} : vector<32x288xf32>, vector<288x128xf32>, vector<32x128xf32> -> vector<32x128xf32>
    %422 = vector.broadcast %335 : vector<32x1xf32> to vector<32x128xf32>
    %423 = arith.addf %421, %422 : vector<32x128xf32>
    %cst_73 = arith.constant 0.000000e+00 : f32
    %424 = vector.broadcast %cst_73 : f32 to vector<32x128xf32>
    %425 = arith.maximumf %423, %424 : vector<32x128xf32>
    %426 = tpu.concatenate %309, %315, %321, %351, %353, %355, %375, %377, %379 in 0 : vector<32x128xf32>, vector<32x128xf32>, vector<32x128xf32>, vector<32x128xf32>, vector<32x128xf32>, vector<32x128xf32>, vector<32x128xf32>, vector<32x128xf32>, vector<32x128xf32> -> vector<288x128xf32>
    %cst_74 = arith.constant dense<0.000000e+00> : vector<32x128xf32>
    %427 = tpu.matmul %334, %426, %cst_74 {dimension_numbers = #tpu.dot_dimension_numbers<[1], [0], [0], [1], [0, 0, 1, 1], [], []>} : vector<32x288xf32>, vector<288x128xf32>, vector<32x128xf32> -> vector<32x128xf32>
    %428 = vector.broadcast %335 : vector<32x1xf32> to vector<32x128xf32>
    %429 = arith.addf %427, %428 : vector<32x128xf32>
    %cst_75 = arith.constant 0.000000e+00 : f32
    %430 = vector.broadcast %cst_75 : f32 to vector<32x128xf32>
    %431 = arith.maximumf %429, %430 : vector<32x128xf32>
    %432 = tpu.concatenate %315, %321, %327, %353, %355, %357, %377, %379, %381 in 0 : vector<32x128xf32>, vector<32x128xf32>, vector<32x128xf32>, vector<32x128xf32>, vector<32x128xf32>, vector<32x128xf32>, vector<32x128xf32>, vector<32x128xf32>, vector<32x128xf32> -> vector<288x128xf32>
    %cst_76 = arith.constant dense<0.000000e+00> : vector<32x128xf32>
    %433 = tpu.matmul %334, %432, %cst_76 {dimension_numbers = #tpu.dot_dimension_numbers<[1], [0], [0], [1], [0, 0, 1, 1], [], []>} : vector<32x288xf32>, vector<288x128xf32>, vector<32x128xf32> -> vector<32x128xf32>
    %434 = vector.broadcast %335 : vector<32x1xf32> to vector<32x128xf32>
    %435 = arith.addf %433, %434 : vector<32x128xf32>
    %cst_77 = arith.constant 0.000000e+00 : f32
    %436 = vector.broadcast %cst_77 : f32 to vector<32x128xf32>
    %437 = arith.maximumf %435, %436 : vector<32x128xf32>
    %438 = tpu.concatenate %321, %327, %333, %355, %357, %359, %379, %381, %383 in 0 : vector<32x128xf32>, vector<32x128xf32>, vector<32x128xf32>, vector<32x128xf32>, vector<32x128xf32>, vector<32x128xf32>, vector<32x128xf32>, vector<32x128xf32>, vector<32x128xf32> -> vector<288x128xf32>
    %cst_78 = arith.constant dense<0.000000e+00> : vector<32x128xf32>
    %439 = tpu.matmul %334, %438, %cst_78 {dimension_numbers = #tpu.dot_dimension_numbers<[1], [0], [0], [1], [0, 0, 1, 1], [], []>} : vector<32x288xf32>, vector<288x128xf32>, vector<32x128xf32> -> vector<32x128xf32>
    %440 = vector.broadcast %335 : vector<32x1xf32> to vector<32x128xf32>
    %441 = arith.addf %439, %440 : vector<32x128xf32>
    %cst_79 = arith.constant 0.000000e+00 : f32
    %442 = vector.broadcast %cst_79 : f32 to vector<32x128xf32>
    %443 = arith.maximumf %441, %442 : vector<32x128xf32>
    %c0_80 = arith.constant 0 : index
    %c0_81 = arith.constant 0 : index
    %444 = vector.load %arg11[%c0_80, %c0_81] : memref<32x288xf32, #tpu.memory_space<vmem>>, vector<32x288xf32>
    %c0_82 = arith.constant 0 : index
    %c0_83 = arith.constant 0 : index
    %445 = vector.load %arg12[%c0_82, %c0_83] : memref<32x1xf32, #tpu.memory_space<vmem>>, vector<32x1xf32>
    %446 = vector.extract_strided_slice %389 {offsets = [0, 1], sizes = [32, 127], strides = [1, 1]} : vector<32x128xf32> to vector<32x127xf32>
    %447 = tpu.concatenate %446, %202 in 1 : vector<32x127xf32>, vector<32x1xf32> -> vector<32x128xf32>
    %448 = vector.extract_strided_slice %395 {offsets = [0, 1], sizes = [32, 127], strides = [1, 1]} : vector<32x128xf32> to vector<32x127xf32>
    %449 = tpu.concatenate %448, %202 in 1 : vector<32x127xf32>, vector<32x1xf32> -> vector<32x128xf32>
    %450 = vector.extract_strided_slice %401 {offsets = [0, 1], sizes = [32, 127], strides = [1, 1]} : vector<32x128xf32> to vector<32x127xf32>
    %451 = tpu.concatenate %450, %202 in 1 : vector<32x127xf32>, vector<32x1xf32> -> vector<32x128xf32>
    %452 = vector.extract_strided_slice %407 {offsets = [0, 1], sizes = [32, 127], strides = [1, 1]} : vector<32x128xf32> to vector<32x127xf32>
    %453 = tpu.concatenate %452, %202 in 1 : vector<32x127xf32>, vector<32x1xf32> -> vector<32x128xf32>
    %454 = vector.extract_strided_slice %413 {offsets = [0, 1], sizes = [32, 127], strides = [1, 1]} : vector<32x128xf32> to vector<32x127xf32>
    %455 = tpu.concatenate %454, %202 in 1 : vector<32x127xf32>, vector<32x1xf32> -> vector<32x128xf32>
    %456 = vector.extract_strided_slice %419 {offsets = [0, 1], sizes = [32, 127], strides = [1, 1]} : vector<32x128xf32> to vector<32x127xf32>
    %457 = tpu.concatenate %456, %202 in 1 : vector<32x127xf32>, vector<32x1xf32> -> vector<32x128xf32>
    %458 = vector.extract_strided_slice %425 {offsets = [0, 1], sizes = [32, 127], strides = [1, 1]} : vector<32x128xf32> to vector<32x127xf32>
    %459 = tpu.concatenate %458, %202 in 1 : vector<32x127xf32>, vector<32x1xf32> -> vector<32x128xf32>
    %460 = vector.extract_strided_slice %431 {offsets = [0, 1], sizes = [32, 127], strides = [1, 1]} : vector<32x128xf32> to vector<32x127xf32>
    %461 = tpu.concatenate %460, %202 in 1 : vector<32x127xf32>, vector<32x1xf32> -> vector<32x128xf32>
    %462 = vector.extract_strided_slice %437 {offsets = [0, 1], sizes = [32, 127], strides = [1, 1]} : vector<32x128xf32> to vector<32x127xf32>
    %463 = tpu.concatenate %462, %202 in 1 : vector<32x127xf32>, vector<32x1xf32> -> vector<32x128xf32>
    %464 = vector.extract_strided_slice %443 {offsets = [0, 1], sizes = [32, 127], strides = [1, 1]} : vector<32x128xf32> to vector<32x127xf32>
    %465 = tpu.concatenate %464, %202 in 1 : vector<32x127xf32>, vector<32x1xf32> -> vector<32x128xf32>
    %466 = vector.extract_strided_slice %389 {offsets = [0, 2], sizes = [32, 126], strides = [1, 1]} : vector<32x128xf32> to vector<32x126xf32>
    %467 = tpu.concatenate %466, %203 in 1 : vector<32x126xf32>, vector<32x2xf32> -> vector<32x128xf32>
    %468 = vector.extract_strided_slice %395 {offsets = [0, 2], sizes = [32, 126], strides = [1, 1]} : vector<32x128xf32> to vector<32x126xf32>
    %469 = tpu.concatenate %468, %203 in 1 : vector<32x126xf32>, vector<32x2xf32> -> vector<32x128xf32>
    %470 = vector.extract_strided_slice %401 {offsets = [0, 2], sizes = [32, 126], strides = [1, 1]} : vector<32x128xf32> to vector<32x126xf32>
    %471 = tpu.concatenate %470, %203 in 1 : vector<32x126xf32>, vector<32x2xf32> -> vector<32x128xf32>
    %472 = vector.extract_strided_slice %407 {offsets = [0, 2], sizes = [32, 126], strides = [1, 1]} : vector<32x128xf32> to vector<32x126xf32>
    %473 = tpu.concatenate %472, %203 in 1 : vector<32x126xf32>, vector<32x2xf32> -> vector<32x128xf32>
    %474 = vector.extract_strided_slice %413 {offsets = [0, 2], sizes = [32, 126], strides = [1, 1]} : vector<32x128xf32> to vector<32x126xf32>
    %475 = tpu.concatenate %474, %203 in 1 : vector<32x126xf32>, vector<32x2xf32> -> vector<32x128xf32>
    %476 = vector.extract_strided_slice %419 {offsets = [0, 2], sizes = [32, 126], strides = [1, 1]} : vector<32x128xf32> to vector<32x126xf32>
    %477 = tpu.concatenate %476, %203 in 1 : vector<32x126xf32>, vector<32x2xf32> -> vector<32x128xf32>
    %478 = vector.extract_strided_slice %425 {offsets = [0, 2], sizes = [32, 126], strides = [1, 1]} : vector<32x128xf32> to vector<32x126xf32>
    %479 = tpu.concatenate %478, %203 in 1 : vector<32x126xf32>, vector<32x2xf32> -> vector<32x128xf32>
    %480 = vector.extract_strided_slice %431 {offsets = [0, 2], sizes = [32, 126], strides = [1, 1]} : vector<32x128xf32> to vector<32x126xf32>
    %481 = tpu.concatenate %480, %203 in 1 : vector<32x126xf32>, vector<32x2xf32> -> vector<32x128xf32>
    %482 = vector.extract_strided_slice %437 {offsets = [0, 2], sizes = [32, 126], strides = [1, 1]} : vector<32x128xf32> to vector<32x126xf32>
    %483 = tpu.concatenate %482, %203 in 1 : vector<32x126xf32>, vector<32x2xf32> -> vector<32x128xf32>
    %484 = vector.extract_strided_slice %443 {offsets = [0, 2], sizes = [32, 126], strides = [1, 1]} : vector<32x128xf32> to vector<32x126xf32>
    %485 = tpu.concatenate %484, %203 in 1 : vector<32x126xf32>, vector<32x2xf32> -> vector<32x128xf32>
    %486 = tpu.concatenate %389, %395, %401, %447, %449, %451, %467, %469, %471 in 0 : vector<32x128xf32>, vector<32x128xf32>, vector<32x128xf32>, vector<32x128xf32>, vector<32x128xf32>, vector<32x128xf32>, vector<32x128xf32>, vector<32x128xf32>, vector<32x128xf32> -> vector<288x128xf32>
    %cst_84 = arith.constant dense<0.000000e+00> : vector<32x128xf32>
    %487 = tpu.matmul %444, %486, %cst_84 {dimension_numbers = #tpu.dot_dimension_numbers<[1], [0], [0], [1], [0, 0, 1, 1], [], []>} : vector<32x288xf32>, vector<288x128xf32>, vector<32x128xf32> -> vector<32x128xf32>
    %488 = vector.broadcast %445 : vector<32x1xf32> to vector<32x128xf32>
    %489 = arith.addf %487, %488 : vector<32x128xf32>
    %cst_85 = arith.constant 0.000000e+00 : f32
    %490 = vector.broadcast %cst_85 : f32 to vector<32x128xf32>
    %491 = arith.maximumf %489, %490 : vector<32x128xf32>
    %492 = tpu.concatenate %395, %401, %407, %449, %451, %453, %469, %471, %473 in 0 : vector<32x128xf32>, vector<32x128xf32>, vector<32x128xf32>, vector<32x128xf32>, vector<32x128xf32>, vector<32x128xf32>, vector<32x128xf32>, vector<32x128xf32>, vector<32x128xf32> -> vector<288x128xf32>
    %cst_86 = arith.constant dense<0.000000e+00> : vector<32x128xf32>
    %493 = tpu.matmul %444, %492, %cst_86 {dimension_numbers = #tpu.dot_dimension_numbers<[1], [0], [0], [1], [0, 0, 1, 1], [], []>} : vector<32x288xf32>, vector<288x128xf32>, vector<32x128xf32> -> vector<32x128xf32>
    %494 = vector.broadcast %445 : vector<32x1xf32> to vector<32x128xf32>
    %495 = arith.addf %493, %494 : vector<32x128xf32>
    %cst_87 = arith.constant 0.000000e+00 : f32
    %496 = vector.broadcast %cst_87 : f32 to vector<32x128xf32>
    %497 = arith.maximumf %495, %496 : vector<32x128xf32>
    %498 = tpu.concatenate %401, %407, %413, %451, %453, %455, %471, %473, %475 in 0 : vector<32x128xf32>, vector<32x128xf32>, vector<32x128xf32>, vector<32x128xf32>, vector<32x128xf32>, vector<32x128xf32>, vector<32x128xf32>, vector<32x128xf32>, vector<32x128xf32> -> vector<288x128xf32>
    %cst_88 = arith.constant dense<0.000000e+00> : vector<32x128xf32>
    %499 = tpu.matmul %444, %498, %cst_88 {dimension_numbers = #tpu.dot_dimension_numbers<[1], [0], [0], [1], [0, 0, 1, 1], [], []>} : vector<32x288xf32>, vector<288x128xf32>, vector<32x128xf32> -> vector<32x128xf32>
    %500 = vector.broadcast %445 : vector<32x1xf32> to vector<32x128xf32>
    %501 = arith.addf %499, %500 : vector<32x128xf32>
    %cst_89 = arith.constant 0.000000e+00 : f32
    %502 = vector.broadcast %cst_89 : f32 to vector<32x128xf32>
    %503 = arith.maximumf %501, %502 : vector<32x128xf32>
    %504 = tpu.concatenate %407, %413, %419, %453, %455, %457, %473, %475, %477 in 0 : vector<32x128xf32>, vector<32x128xf32>, vector<32x128xf32>, vector<32x128xf32>, vector<32x128xf32>, vector<32x128xf32>, vector<32x128xf32>, vector<32x128xf32>, vector<32x128xf32> -> vector<288x128xf32>
    %cst_90 = arith.constant dense<0.000000e+00> : vector<32x128xf32>
    %505 = tpu.matmul %444, %504, %cst_90 {dimension_numbers = #tpu.dot_dimension_numbers<[1], [0], [0], [1], [0, 0, 1, 1], [], []>} : vector<32x288xf32>, vector<288x128xf32>, vector<32x128xf32> -> vector<32x128xf32>
    %506 = vector.broadcast %445 : vector<32x1xf32> to vector<32x128xf32>
    %507 = arith.addf %505, %506 : vector<32x128xf32>
    %cst_91 = arith.constant 0.000000e+00 : f32
    %508 = vector.broadcast %cst_91 : f32 to vector<32x128xf32>
    %509 = arith.maximumf %507, %508 : vector<32x128xf32>
    %510 = tpu.concatenate %413, %419, %425, %455, %457, %459, %475, %477, %479 in 0 : vector<32x128xf32>, vector<32x128xf32>, vector<32x128xf32>, vector<32x128xf32>, vector<32x128xf32>, vector<32x128xf32>, vector<32x128xf32>, vector<32x128xf32>, vector<32x128xf32> -> vector<288x128xf32>
    %cst_92 = arith.constant dense<0.000000e+00> : vector<32x128xf32>
    %511 = tpu.matmul %444, %510, %cst_92 {dimension_numbers = #tpu.dot_dimension_numbers<[1], [0], [0], [1], [0, 0, 1, 1], [], []>} : vector<32x288xf32>, vector<288x128xf32>, vector<32x128xf32> -> vector<32x128xf32>
    %512 = vector.broadcast %445 : vector<32x1xf32> to vector<32x128xf32>
    %513 = arith.addf %511, %512 : vector<32x128xf32>
    %cst_93 = arith.constant 0.000000e+00 : f32
    %514 = vector.broadcast %cst_93 : f32 to vector<32x128xf32>
    %515 = arith.maximumf %513, %514 : vector<32x128xf32>
    %516 = tpu.concatenate %419, %425, %431, %457, %459, %461, %477, %479, %481 in 0 : vector<32x128xf32>, vector<32x128xf32>, vector<32x128xf32>, vector<32x128xf32>, vector<32x128xf32>, vector<32x128xf32>, vector<32x128xf32>, vector<32x128xf32>, vector<32x128xf32> -> vector<288x128xf32>
    %cst_94 = arith.constant dense<0.000000e+00> : vector<32x128xf32>
    %517 = tpu.matmul %444, %516, %cst_94 {dimension_numbers = #tpu.dot_dimension_numbers<[1], [0], [0], [1], [0, 0, 1, 1], [], []>} : vector<32x288xf32>, vector<288x128xf32>, vector<32x128xf32> -> vector<32x128xf32>
    %518 = vector.broadcast %445 : vector<32x1xf32> to vector<32x128xf32>
    %519 = arith.addf %517, %518 : vector<32x128xf32>
    %cst_95 = arith.constant 0.000000e+00 : f32
    %520 = vector.broadcast %cst_95 : f32 to vector<32x128xf32>
    %521 = arith.maximumf %519, %520 : vector<32x128xf32>
    %522 = tpu.concatenate %425, %431, %437, %459, %461, %463, %479, %481, %483 in 0 : vector<32x128xf32>, vector<32x128xf32>, vector<32x128xf32>, vector<32x128xf32>, vector<32x128xf32>, vector<32x128xf32>, vector<32x128xf32>, vector<32x128xf32>, vector<32x128xf32> -> vector<288x128xf32>
    %cst_96 = arith.constant dense<0.000000e+00> : vector<32x128xf32>
    %523 = tpu.matmul %444, %522, %cst_96 {dimension_numbers = #tpu.dot_dimension_numbers<[1], [0], [0], [1], [0, 0, 1, 1], [], []>} : vector<32x288xf32>, vector<288x128xf32>, vector<32x128xf32> -> vector<32x128xf32>
    %524 = vector.broadcast %445 : vector<32x1xf32> to vector<32x128xf32>
    %525 = arith.addf %523, %524 : vector<32x128xf32>
    %cst_97 = arith.constant 0.000000e+00 : f32
    %526 = vector.broadcast %cst_97 : f32 to vector<32x128xf32>
    %527 = arith.maximumf %525, %526 : vector<32x128xf32>
    %528 = tpu.concatenate %431, %437, %443, %461, %463, %465, %481, %483, %485 in 0 : vector<32x128xf32>, vector<32x128xf32>, vector<32x128xf32>, vector<32x128xf32>, vector<32x128xf32>, vector<32x128xf32>, vector<32x128xf32>, vector<32x128xf32>, vector<32x128xf32> -> vector<288x128xf32>
    %cst_98 = arith.constant dense<0.000000e+00> : vector<32x128xf32>
    %529 = tpu.matmul %444, %528, %cst_98 {dimension_numbers = #tpu.dot_dimension_numbers<[1], [0], [0], [1], [0, 0, 1, 1], [], []>} : vector<32x288xf32>, vector<288x128xf32>, vector<32x128xf32> -> vector<32x128xf32>
    %530 = vector.broadcast %445 : vector<32x1xf32> to vector<32x128xf32>
    %531 = arith.addf %529, %530 : vector<32x128xf32>
    %cst_99 = arith.constant 0.000000e+00 : f32
    %532 = vector.broadcast %cst_99 : f32 to vector<32x128xf32>
    %533 = arith.maximumf %531, %532 : vector<32x128xf32>
    %c0_100 = arith.constant 0 : index
    %c0_101 = arith.constant 0 : index
    %534 = vector.load %arg13[%c0_100, %c0_101] : memref<120x128xf32, #tpu.memory_space<vmem>>, vector<120x128xf32>
    %c0_102 = arith.constant 0 : index
    %c0_103 = arith.constant 0 : index
    %535 = vector.load %arg14[%c0_102, %c0_103] : memref<1x128xf32, #tpu.memory_space<vmem>>, vector<1x128xf32>
    %c0_104 = arith.constant 0 : index
    %c0_105 = arith.constant 0 : index
    %536 = vector.load %arg15[%c0_104, %c0_105] : memref<128x30xf32, #tpu.memory_space<vmem>>, vector<128x30xf32>
    %c0_106 = arith.constant 0 : index
    %c0_107 = arith.constant 0 : index
    %537 = vector.load %arg16[%c0_106, %c0_107] : memref<1x30xf32, #tpu.memory_space<vmem>>, vector<1x30xf32>
    %538 = vector.extract_strided_slice %491 {offsets = [0, 0], sizes = [32, 120], strides = [1, 1]} : vector<32x128xf32> to vector<32x120xf32>
    %cst_108 = arith.constant dense<0.000000e+00> : vector<32x128xf32>
    %539 = tpu.matmul %538, %534, %cst_108 {dimension_numbers = #tpu.dot_dimension_numbers<[1], [0], [0], [1], [0, 0, 1, 1], [], []>} : vector<32x120xf32>, vector<120x128xf32>, vector<32x128xf32> -> vector<32x128xf32>
    %540 = vector.broadcast %535 : vector<1x128xf32> to vector<32x128xf32>
    %541 = arith.addf %539, %540 : vector<32x128xf32>
    %cst_109 = arith.constant 0.000000e+00 : f32
    %542 = vector.broadcast %cst_109 : f32 to vector<32x128xf32>
    %543 = arith.maximumf %541, %542 : vector<32x128xf32>
    %cst_110 = arith.constant dense<0.000000e+00> : vector<32x30xf32>
    %544 = tpu.matmul %543, %536, %cst_110 {dimension_numbers = #tpu.dot_dimension_numbers<[1], [0], [0], [1], [0, 0, 1, 1], [], []>} : vector<32x128xf32>, vector<128x30xf32>, vector<32x30xf32> -> vector<32x30xf32>
    %545 = vector.broadcast %537 : vector<1x30xf32> to vector<32x30xf32>
    %546 = arith.addf %544, %545 : vector<32x30xf32>
    %cst_111 = arith.constant 0.000000e+00 : f32
    %547 = vector.broadcast %cst_111 : f32 to vector<32x30xf32>
    %548 = arith.maximumf %546, %547 : vector<32x30xf32>
    %cst_112 = arith.constant dense<0xFF800000> : vector<32xf32>
    %549 = vector.multi_reduction <maximumf>, %548, %cst_112 [1] : vector<32x30xf32> to vector<32xf32>
    %550 = vector.shape_cast %549 : vector<32xf32> to vector<32x1xf32>
    %551 = vector.broadcast %550 : vector<32x1xf32> to vector<32x30xf32>
    %552 = arith.subf %548, %551 : vector<32x30xf32>
    %553 = math.exp %552 : vector<32x30xf32>
    %cst_113 = arith.constant dense<0.000000e+00> : vector<32xf32>
    %554 = vector.multi_reduction <add>, %553, %cst_113 [1] : vector<32x30xf32> to vector<32xf32>
    %555 = vector.shape_cast %554 : vector<32xf32> to vector<32x1xf32>
    %556 = math.log %555 : vector<32x1xf32>
    %557 = vector.broadcast %556 : vector<32x1xf32> to vector<32x30xf32>
    %558 = arith.subf %552, %557 : vector<32x30xf32>
    %559 = vector.extract_strided_slice %497 {offsets = [0, 0], sizes = [32, 120], strides = [1, 1]} : vector<32x128xf32> to vector<32x120xf32>
    %cst_114 = arith.constant dense<0.000000e+00> : vector<32x128xf32>
    %560 = tpu.matmul %559, %534, %cst_114 {dimension_numbers = #tpu.dot_dimension_numbers<[1], [0], [0], [1], [0, 0, 1, 1], [], []>} : vector<32x120xf32>, vector<120x128xf32>, vector<32x128xf32> -> vector<32x128xf32>
    %561 = vector.broadcast %535 : vector<1x128xf32> to vector<32x128xf32>
    %562 = arith.addf %560, %561 : vector<32x128xf32>
    %cst_115 = arith.constant 0.000000e+00 : f32
    %563 = vector.broadcast %cst_115 : f32 to vector<32x128xf32>
    %564 = arith.maximumf %562, %563 : vector<32x128xf32>
    %cst_116 = arith.constant dense<0.000000e+00> : vector<32x30xf32>
    %565 = tpu.matmul %564, %536, %cst_116 {dimension_numbers = #tpu.dot_dimension_numbers<[1], [0], [0], [1], [0, 0, 1, 1], [], []>} : vector<32x128xf32>, vector<128x30xf32>, vector<32x30xf32> -> vector<32x30xf32>
    %566 = vector.broadcast %537 : vector<1x30xf32> to vector<32x30xf32>
    %567 = arith.addf %565, %566 : vector<32x30xf32>
    %cst_117 = arith.constant 0.000000e+00 : f32
    %568 = vector.broadcast %cst_117 : f32 to vector<32x30xf32>
    %569 = arith.maximumf %567, %568 : vector<32x30xf32>
    %cst_118 = arith.constant dense<0xFF800000> : vector<32xf32>
    %570 = vector.multi_reduction <maximumf>, %569, %cst_118 [1] : vector<32x30xf32> to vector<32xf32>
    %571 = vector.shape_cast %570 : vector<32xf32> to vector<32x1xf32>
    %572 = vector.broadcast %571 : vector<32x1xf32> to vector<32x30xf32>
    %573 = arith.subf %569, %572 : vector<32x30xf32>
    %574 = math.exp %573 : vector<32x30xf32>
    %cst_119 = arith.constant dense<0.000000e+00> : vector<32xf32>
    %575 = vector.multi_reduction <add>, %574, %cst_119 [1] : vector<32x30xf32> to vector<32xf32>
    %576 = vector.shape_cast %575 : vector<32xf32> to vector<32x1xf32>
    %577 = math.log %576 : vector<32x1xf32>
    %578 = vector.broadcast %577 : vector<32x1xf32> to vector<32x30xf32>
    %579 = arith.subf %573, %578 : vector<32x30xf32>
    %580 = vector.extract_strided_slice %503 {offsets = [0, 0], sizes = [32, 120], strides = [1, 1]} : vector<32x128xf32> to vector<32x120xf32>
    %cst_120 = arith.constant dense<0.000000e+00> : vector<32x128xf32>
    %581 = tpu.matmul %580, %534, %cst_120 {dimension_numbers = #tpu.dot_dimension_numbers<[1], [0], [0], [1], [0, 0, 1, 1], [], []>} : vector<32x120xf32>, vector<120x128xf32>, vector<32x128xf32> -> vector<32x128xf32>
    %582 = vector.broadcast %535 : vector<1x128xf32> to vector<32x128xf32>
    %583 = arith.addf %581, %582 : vector<32x128xf32>
    %cst_121 = arith.constant 0.000000e+00 : f32
    %584 = vector.broadcast %cst_121 : f32 to vector<32x128xf32>
    %585 = arith.maximumf %583, %584 : vector<32x128xf32>
    %cst_122 = arith.constant dense<0.000000e+00> : vector<32x30xf32>
    %586 = tpu.matmul %585, %536, %cst_122 {dimension_numbers = #tpu.dot_dimension_numbers<[1], [0], [0], [1], [0, 0, 1, 1], [], []>} : vector<32x128xf32>, vector<128x30xf32>, vector<32x30xf32> -> vector<32x30xf32>
    %587 = vector.broadcast %537 : vector<1x30xf32> to vector<32x30xf32>
    %588 = arith.addf %586, %587 : vector<32x30xf32>
    %cst_123 = arith.constant 0.000000e+00 : f32
    %589 = vector.broadcast %cst_123 : f32 to vector<32x30xf32>
    %590 = arith.maximumf %588, %589 : vector<32x30xf32>
    %cst_124 = arith.constant dense<0xFF800000> : vector<32xf32>
    %591 = vector.multi_reduction <maximumf>, %590, %cst_124 [1] : vector<32x30xf32> to vector<32xf32>
    %592 = vector.shape_cast %591 : vector<32xf32> to vector<32x1xf32>
    %593 = vector.broadcast %592 : vector<32x1xf32> to vector<32x30xf32>
    %594 = arith.subf %590, %593 : vector<32x30xf32>
    %595 = math.exp %594 : vector<32x30xf32>
    %cst_125 = arith.constant dense<0.000000e+00> : vector<32xf32>
    %596 = vector.multi_reduction <add>, %595, %cst_125 [1] : vector<32x30xf32> to vector<32xf32>
    %597 = vector.shape_cast %596 : vector<32xf32> to vector<32x1xf32>
    %598 = math.log %597 : vector<32x1xf32>
    %599 = vector.broadcast %598 : vector<32x1xf32> to vector<32x30xf32>
    %600 = arith.subf %594, %599 : vector<32x30xf32>
    %601 = vector.extract_strided_slice %509 {offsets = [0, 0], sizes = [32, 120], strides = [1, 1]} : vector<32x128xf32> to vector<32x120xf32>
    %cst_126 = arith.constant dense<0.000000e+00> : vector<32x128xf32>
    %602 = tpu.matmul %601, %534, %cst_126 {dimension_numbers = #tpu.dot_dimension_numbers<[1], [0], [0], [1], [0, 0, 1, 1], [], []>} : vector<32x120xf32>, vector<120x128xf32>, vector<32x128xf32> -> vector<32x128xf32>
    %603 = vector.broadcast %535 : vector<1x128xf32> to vector<32x128xf32>
    %604 = arith.addf %602, %603 : vector<32x128xf32>
    %cst_127 = arith.constant 0.000000e+00 : f32
    %605 = vector.broadcast %cst_127 : f32 to vector<32x128xf32>
    %606 = arith.maximumf %604, %605 : vector<32x128xf32>
    %cst_128 = arith.constant dense<0.000000e+00> : vector<32x30xf32>
    %607 = tpu.matmul %606, %536, %cst_128 {dimension_numbers = #tpu.dot_dimension_numbers<[1], [0], [0], [1], [0, 0, 1, 1], [], []>} : vector<32x128xf32>, vector<128x30xf32>, vector<32x30xf32> -> vector<32x30xf32>
    %608 = vector.broadcast %537 : vector<1x30xf32> to vector<32x30xf32>
    %609 = arith.addf %607, %608 : vector<32x30xf32>
    %cst_129 = arith.constant 0.000000e+00 : f32
    %610 = vector.broadcast %cst_129 : f32 to vector<32x30xf32>
    %611 = arith.maximumf %609, %610 : vector<32x30xf32>
    %cst_130 = arith.constant dense<0xFF800000> : vector<32xf32>
    %612 = vector.multi_reduction <maximumf>, %611, %cst_130 [1] : vector<32x30xf32> to vector<32xf32>
    %613 = vector.shape_cast %612 : vector<32xf32> to vector<32x1xf32>
    %614 = vector.broadcast %613 : vector<32x1xf32> to vector<32x30xf32>
    %615 = arith.subf %611, %614 : vector<32x30xf32>
    %616 = math.exp %615 : vector<32x30xf32>
    %cst_131 = arith.constant dense<0.000000e+00> : vector<32xf32>
    %617 = vector.multi_reduction <add>, %616, %cst_131 [1] : vector<32x30xf32> to vector<32xf32>
    %618 = vector.shape_cast %617 : vector<32xf32> to vector<32x1xf32>
    %619 = math.log %618 : vector<32x1xf32>
    %620 = vector.broadcast %619 : vector<32x1xf32> to vector<32x30xf32>
    %621 = arith.subf %615, %620 : vector<32x30xf32>
    %622 = vector.extract_strided_slice %515 {offsets = [0, 0], sizes = [32, 120], strides = [1, 1]} : vector<32x128xf32> to vector<32x120xf32>
    %cst_132 = arith.constant dense<0.000000e+00> : vector<32x128xf32>
    %623 = tpu.matmul %622, %534, %cst_132 {dimension_numbers = #tpu.dot_dimension_numbers<[1], [0], [0], [1], [0, 0, 1, 1], [], []>} : vector<32x120xf32>, vector<120x128xf32>, vector<32x128xf32> -> vector<32x128xf32>
    %624 = vector.broadcast %535 : vector<1x128xf32> to vector<32x128xf32>
    %625 = arith.addf %623, %624 : vector<32x128xf32>
    %cst_133 = arith.constant 0.000000e+00 : f32
    %626 = vector.broadcast %cst_133 : f32 to vector<32x128xf32>
    %627 = arith.maximumf %625, %626 : vector<32x128xf32>
    %cst_134 = arith.constant dense<0.000000e+00> : vector<32x30xf32>
    %628 = tpu.matmul %627, %536, %cst_134 {dimension_numbers = #tpu.dot_dimension_numbers<[1], [0], [0], [1], [0, 0, 1, 1], [], []>} : vector<32x128xf32>, vector<128x30xf32>, vector<32x30xf32> -> vector<32x30xf32>
    %629 = vector.broadcast %537 : vector<1x30xf32> to vector<32x30xf32>
    %630 = arith.addf %628, %629 : vector<32x30xf32>
    %cst_135 = arith.constant 0.000000e+00 : f32
    %631 = vector.broadcast %cst_135 : f32 to vector<32x30xf32>
    %632 = arith.maximumf %630, %631 : vector<32x30xf32>
    %cst_136 = arith.constant dense<0xFF800000> : vector<32xf32>
    %633 = vector.multi_reduction <maximumf>, %632, %cst_136 [1] : vector<32x30xf32> to vector<32xf32>
    %634 = vector.shape_cast %633 : vector<32xf32> to vector<32x1xf32>
    %635 = vector.broadcast %634 : vector<32x1xf32> to vector<32x30xf32>
    %636 = arith.subf %632, %635 : vector<32x30xf32>
    %637 = math.exp %636 : vector<32x30xf32>
    %cst_137 = arith.constant dense<0.000000e+00> : vector<32xf32>
    %638 = vector.multi_reduction <add>, %637, %cst_137 [1] : vector<32x30xf32> to vector<32xf32>
    %639 = vector.shape_cast %638 : vector<32xf32> to vector<32x1xf32>
    %640 = math.log %639 : vector<32x1xf32>
    %641 = vector.broadcast %640 : vector<32x1xf32> to vector<32x30xf32>
    %642 = arith.subf %636, %641 : vector<32x30xf32>
    %643 = vector.extract_strided_slice %521 {offsets = [0, 0], sizes = [32, 120], strides = [1, 1]} : vector<32x128xf32> to vector<32x120xf32>
    %cst_138 = arith.constant dense<0.000000e+00> : vector<32x128xf32>
    %644 = tpu.matmul %643, %534, %cst_138 {dimension_numbers = #tpu.dot_dimension_numbers<[1], [0], [0], [1], [0, 0, 1, 1], [], []>} : vector<32x120xf32>, vector<120x128xf32>, vector<32x128xf32> -> vector<32x128xf32>
    %645 = vector.broadcast %535 : vector<1x128xf32> to vector<32x128xf32>
    %646 = arith.addf %644, %645 : vector<32x128xf32>
    %cst_139 = arith.constant 0.000000e+00 : f32
    %647 = vector.broadcast %cst_139 : f32 to vector<32x128xf32>
    %648 = arith.maximumf %646, %647 : vector<32x128xf32>
    %cst_140 = arith.constant dense<0.000000e+00> : vector<32x30xf32>
    %649 = tpu.matmul %648, %536, %cst_140 {dimension_numbers = #tpu.dot_dimension_numbers<[1], [0], [0], [1], [0, 0, 1, 1], [], []>} : vector<32x128xf32>, vector<128x30xf32>, vector<32x30xf32> -> vector<32x30xf32>
    %650 = vector.broadcast %537 : vector<1x30xf32> to vector<32x30xf32>
    %651 = arith.addf %649, %650 : vector<32x30xf32>
    %cst_141 = arith.constant 0.000000e+00 : f32
    %652 = vector.broadcast %cst_141 : f32 to vector<32x30xf32>
    %653 = arith.maximumf %651, %652 : vector<32x30xf32>
    %cst_142 = arith.constant dense<0xFF800000> : vector<32xf32>
    %654 = vector.multi_reduction <maximumf>, %653, %cst_142 [1] : vector<32x30xf32> to vector<32xf32>
    %655 = vector.shape_cast %654 : vector<32xf32> to vector<32x1xf32>
    %656 = vector.broadcast %655 : vector<32x1xf32> to vector<32x30xf32>
    %657 = arith.subf %653, %656 : vector<32x30xf32>
    %658 = math.exp %657 : vector<32x30xf32>
    %cst_143 = arith.constant dense<0.000000e+00> : vector<32xf32>
    %659 = vector.multi_reduction <add>, %658, %cst_143 [1] : vector<32x30xf32> to vector<32xf32>
    %660 = vector.shape_cast %659 : vector<32xf32> to vector<32x1xf32>
    %661 = math.log %660 : vector<32x1xf32>
    %662 = vector.broadcast %661 : vector<32x1xf32> to vector<32x30xf32>
    %663 = arith.subf %657, %662 : vector<32x30xf32>
    %664 = vector.extract_strided_slice %527 {offsets = [0, 0], sizes = [32, 120], strides = [1, 1]} : vector<32x128xf32> to vector<32x120xf32>
    %cst_144 = arith.constant dense<0.000000e+00> : vector<32x128xf32>
    %665 = tpu.matmul %664, %534, %cst_144 {dimension_numbers = #tpu.dot_dimension_numbers<[1], [0], [0], [1], [0, 0, 1, 1], [], []>} : vector<32x120xf32>, vector<120x128xf32>, vector<32x128xf32> -> vector<32x128xf32>
    %666 = vector.broadcast %535 : vector<1x128xf32> to vector<32x128xf32>
    %667 = arith.addf %665, %666 : vector<32x128xf32>
    %cst_145 = arith.constant 0.000000e+00 : f32
    %668 = vector.broadcast %cst_145 : f32 to vector<32x128xf32>
    %669 = arith.maximumf %667, %668 : vector<32x128xf32>
    %cst_146 = arith.constant dense<0.000000e+00> : vector<32x30xf32>
    %670 = tpu.matmul %669, %536, %cst_146 {dimension_numbers = #tpu.dot_dimension_numbers<[1], [0], [0], [1], [0, 0, 1, 1], [], []>} : vector<32x128xf32>, vector<128x30xf32>, vector<32x30xf32> -> vector<32x30xf32>
    %671 = vector.broadcast %537 : vector<1x30xf32> to vector<32x30xf32>
    %672 = arith.addf %670, %671 : vector<32x30xf32>
    %cst_147 = arith.constant 0.000000e+00 : f32
    %673 = vector.broadcast %cst_147 : f32 to vector<32x30xf32>
    %674 = arith.maximumf %672, %673 : vector<32x30xf32>
    %cst_148 = arith.constant dense<0xFF800000> : vector<32xf32>
    %675 = vector.multi_reduction <maximumf>, %674, %cst_148 [1] : vector<32x30xf32> to vector<32xf32>
    %676 = vector.shape_cast %675 : vector<32xf32> to vector<32x1xf32>
    %677 = vector.broadcast %676 : vector<32x1xf32> to vector<32x30xf32>
    %678 = arith.subf %674, %677 : vector<32x30xf32>
    %679 = math.exp %678 : vector<32x30xf32>
    %cst_149 = arith.constant dense<0.000000e+00> : vector<32xf32>
    %680 = vector.multi_reduction <add>, %679, %cst_149 [1] : vector<32x30xf32> to vector<32xf32>
    %681 = vector.shape_cast %680 : vector<32xf32> to vector<32x1xf32>
    %682 = math.log %681 : vector<32x1xf32>
    %683 = vector.broadcast %682 : vector<32x1xf32> to vector<32x30xf32>
    %684 = arith.subf %678, %683 : vector<32x30xf32>
    %685 = vector.extract_strided_slice %533 {offsets = [0, 0], sizes = [32, 120], strides = [1, 1]} : vector<32x128xf32> to vector<32x120xf32>
    %cst_150 = arith.constant dense<0.000000e+00> : vector<32x128xf32>
    %686 = tpu.matmul %685, %534, %cst_150 {dimension_numbers = #tpu.dot_dimension_numbers<[1], [0], [0], [1], [0, 0, 1, 1], [], []>} : vector<32x120xf32>, vector<120x128xf32>, vector<32x128xf32> -> vector<32x128xf32>
    %687 = vector.broadcast %535 : vector<1x128xf32> to vector<32x128xf32>
    %688 = arith.addf %686, %687 : vector<32x128xf32>
    %cst_151 = arith.constant 0.000000e+00 : f32
    %689 = vector.broadcast %cst_151 : f32 to vector<32x128xf32>
    %690 = arith.maximumf %688, %689 : vector<32x128xf32>
    %cst_152 = arith.constant dense<0.000000e+00> : vector<32x30xf32>
    %691 = tpu.matmul %690, %536, %cst_152 {dimension_numbers = #tpu.dot_dimension_numbers<[1], [0], [0], [1], [0, 0, 1, 1], [], []>} : vector<32x128xf32>, vector<128x30xf32>, vector<32x30xf32> -> vector<32x30xf32>
    %692 = vector.broadcast %537 : vector<1x30xf32> to vector<32x30xf32>
    %693 = arith.addf %691, %692 : vector<32x30xf32>
    %cst_153 = arith.constant 0.000000e+00 : f32
    %694 = vector.broadcast %cst_153 : f32 to vector<32x30xf32>
    %695 = arith.maximumf %693, %694 : vector<32x30xf32>
    %cst_154 = arith.constant dense<0xFF800000> : vector<32xf32>
    %696 = vector.multi_reduction <maximumf>, %695, %cst_154 [1] : vector<32x30xf32> to vector<32xf32>
    %697 = vector.shape_cast %696 : vector<32xf32> to vector<32x1xf32>
    %698 = vector.broadcast %697 : vector<32x1xf32> to vector<32x30xf32>
    %699 = arith.subf %695, %698 : vector<32x30xf32>
    %700 = math.exp %699 : vector<32x30xf32>
    %cst_155 = arith.constant dense<0.000000e+00> : vector<32xf32>
    %701 = vector.multi_reduction <add>, %700, %cst_155 [1] : vector<32x30xf32> to vector<32xf32>
    %702 = vector.shape_cast %701 : vector<32xf32> to vector<32x1xf32>
    %703 = math.log %702 : vector<32x1xf32>
    %704 = vector.broadcast %703 : vector<32x1xf32> to vector<32x30xf32>
    %705 = arith.subf %699, %704 : vector<32x30xf32>
    %706 = vector.shape_cast %558 : vector<32x30xf32> to vector<32x1x30xf32>
    %707 = vector.shape_cast %579 : vector<32x30xf32> to vector<32x1x30xf32>
    %708 = vector.shape_cast %600 : vector<32x30xf32> to vector<32x1x30xf32>
    %709 = vector.shape_cast %621 : vector<32x30xf32> to vector<32x1x30xf32>
    %710 = vector.shape_cast %642 : vector<32x30xf32> to vector<32x1x30xf32>
    %711 = vector.shape_cast %663 : vector<32x30xf32> to vector<32x1x30xf32>
    %712 = vector.shape_cast %684 : vector<32x30xf32> to vector<32x1x30xf32>
    %713 = vector.shape_cast %705 : vector<32x30xf32> to vector<32x1x30xf32>
    %714 = tpu.concatenate %706, %707, %708, %709, %710, %711, %712, %713 in 1 : vector<32x1x30xf32>, vector<32x1x30xf32>, vector<32x1x30xf32>, vector<32x1x30xf32>, vector<32x1x30xf32>, vector<32x1x30xf32>, vector<32x1x30xf32>, vector<32x1x30xf32> -> vector<32x8x30xf32>
    %c0_156 = arith.constant 0 : index
    %c0_157 = arith.constant 0 : index
    %c0_158 = arith.constant 0 : index
    %c0_159 = arith.constant 0 : index
    %715 = vector.load %arg17[%c0_156, %c0_157, %c0_158, %c0_159] : memref<1x32x8x30xf32, #tpu.memory_space<vmem>>, vector<1x32x8x30xf32>
    %716 = vector.shape_cast %715 : vector<1x32x8x30xf32> to vector<32x8x30xf32>
    %717 = vector.shape_cast %714 : vector<32x8x30xf32> to vector<1x32x8x30xf32>
    tpu.vector_store %arg17[%c0_156, %c0_157, %c0_158, %c0_159], %717 {strides = array<i32>} : memref<1x32x8x30xf32, #tpu.memory_space<vmem>>, vector<1x32x8x30xf32>,
    return
  }
  func.func @transform_0(%arg0: i32, %arg1: i32) -> (i32, i32, i32) {
    %c0_i32 = arith.constant 0 : i32
    %c0_i32_0 = arith.constant 0 : i32
    %c0_i32_1 = arith.constant 0 : i32
    return %arg0, %c0_i32, %c0_i32_0 : i32, i32, i32
  }
  func.func @transform_1(%arg0: i32, %arg1: i32) -> (i32, i32) {
    %c0_i32 = arith.constant 0 : i32
    %c0_i32_0 = arith.constant 0 : i32
    %c0_i32_1 = arith.constant 0 : i32
    return %c0_i32, %c0_i32_0 : i32, i32
  }
  func.func @transform_2(%arg0: i32, %arg1: i32) -> (i32, i32) {
    %c0_i32 = arith.constant 0 : i32
    %c0_i32_0 = arith.constant 0 : i32
    %c0_i32_1 = arith.constant 0 : i32
    return %c0_i32, %c0_i32_0 : i32, i32
  }
  func.func @transform_3(%arg0: i32, %arg1: i32) -> (i32, i32) {
    %c0_i32 = arith.constant 0 : i32
    %c0_i32_0 = arith.constant 0 : i32
    %c0_i32_1 = arith.constant 0 : i32
    return %c0_i32, %c0_i32_0 : i32, i32
  }
  func.func @transform_4(%arg0: i32, %arg1: i32) -> (i32, i32) {
    %c0_i32 = arith.constant 0 : i32
    %c0_i32_0 = arith.constant 0 : i32
    %c0_i32_1 = arith.constant 0 : i32
    return %c0_i32, %c0_i32_0 : i32, i32
  }
  func.func @transform_5(%arg0: i32, %arg1: i32) -> (i32, i32) {
    %c0_i32 = arith.constant 0 : i32
    %c0_i32_0 = arith.constant 0 : i32
    %c0_i32_1 = arith.constant 0 : i32
    return %c0_i32, %c0_i32_0 : i32, i32
  }
  func.func @transform_6(%arg0: i32, %arg1: i32) -> (i32, i32) {
    %c0_i32 = arith.constant 0 : i32
    %c0_i32_0 = arith.constant 0 : i32
    %c0_i32_1 = arith.constant 0 : i32
    return %c0_i32, %c0_i32_0 : i32, i32
  }
  func.func @transform_7(%arg0: i32, %arg1: i32) -> (i32, i32) {
    %c0_i32 = arith.constant 0 : i32
    %c0_i32_0 = arith.constant 0 : i32
    %c0_i32_1 = arith.constant 0 : i32
    return %c0_i32, %c0_i32_0 : i32, i32
  }
  func.func @transform_8(%arg0: i32, %arg1: i32) -> (i32, i32) {
    %c0_i32 = arith.constant 0 : i32
    %c0_i32_0 = arith.constant 0 : i32
    %c0_i32_1 = arith.constant 0 : i32
    return %c0_i32, %c0_i32_0 : i32, i32
  }
  func.func @transform_9(%arg0: i32, %arg1: i32) -> (i32, i32) {
    %c0_i32 = arith.constant 0 : i32
    %c0_i32_0 = arith.constant 0 : i32
    %c0_i32_1 = arith.constant 0 : i32
    return %c0_i32, %c0_i32_0 : i32, i32
  }
  func.func @transform_10(%arg0: i32, %arg1: i32) -> (i32, i32) {
    %c0_i32 = arith.constant 0 : i32
    %c0_i32_0 = arith.constant 0 : i32
    %c0_i32_1 = arith.constant 0 : i32
    return %c0_i32, %c0_i32_0 : i32, i32
  }
  func.func @transform_11(%arg0: i32, %arg1: i32) -> (i32, i32) {
    %c0_i32 = arith.constant 0 : i32
    %c0_i32_0 = arith.constant 0 : i32
    %c0_i32_1 = arith.constant 0 : i32
    return %c0_i32, %c0_i32_0 : i32, i32
  }
  func.func @transform_12(%arg0: i32, %arg1: i32) -> (i32, i32) {
    %c0_i32 = arith.constant 0 : i32
    %c0_i32_0 = arith.constant 0 : i32
    %c0_i32_1 = arith.constant 0 : i32
    return %c0_i32, %c0_i32_0 : i32, i32
  }
  func.func @transform_13(%arg0: i32, %arg1: i32) -> (i32, i32) {
    %c0_i32 = arith.constant 0 : i32
    %c0_i32_0 = arith.constant 0 : i32
    %c0_i32_1 = arith.constant 0 : i32
    return %c0_i32, %c0_i32_0 : i32, i32
  }
  func.func @transform_14(%arg0: i32, %arg1: i32) -> (i32, i32) {
    %c0_i32 = arith.constant 0 : i32
    %c0_i32_0 = arith.constant 0 : i32
    %c0_i32_1 = arith.constant 0 : i32
    return %c0_i32, %c0_i32_0 : i32, i32
  }
  func.func @transform_15(%arg0: i32, %arg1: i32) -> (i32, i32, i32, i32) {
    %c0_i32 = arith.constant 0 : i32
    %c0_i32_0 = arith.constant 0 : i32
    %c0_i32_1 = arith.constant 0 : i32
    return %arg0, %c0_i32, %arg1, %c0_i32_0 : i32, i32, i32, i32
  }
}

</mosaic_0001>

<bundles_post_ra>
// kernel: network_forward.1
= control target key start
LH: loop header
LB: loop body
LE: loop exit
PB: predicated region body
PF: predicated region fallthrough
CT: control target
= control target key end

     0   :  { %s21119_s18 = smov 0   ;;  %s21121_s19 = smov 0   ;;  %s27146_s0 = inlined_call_operand.vmem [shape: f32[2,16,128], index: 0, kind: input, shape index: {}]   ;;  %s27147_s1 = inlined_call_operand.vmem [shape: f32[128,128], index: 1, kind: input, shape index: {}]   ;;  %s27148_s2 = inlined_call_operand.vmem [shape: f32[1,128], index: 2, kind: input, shape index: {}]   ;;  %s27149_s3 = inlined_call_operand.vmem [shape: f32[32,9], index: 3, kind: input, shape index: {}]   ;;  %s27150_s4 = inlined_call_operand.vmem [shape: f32[32,1], index: 4, kind: input, shape index: {}]   ;;  %s27151_s5 = inlined_call_operand.vmem [shape: f32[32,288], index: 5, kind: input, shape index: {}]   ;;  %s27152_s6 = inlined_call_operand.vmem [shape: f32[32,1], index: 6, kind: input, shape index: {}]   ;;  %s27153_s7 = inlined_call_operand.vmem [shape: f32[32,288], index: 7, kind: input, shape index: {}]   ;;  %s27154_s8 = inlined_call_operand.vmem [shape: f32[32,1], index: 8, kind: input, shape index: {}]   ;;  %s27155_s9 = inlined_call_operand.vmem [shape: f32[32,288], index: 9, kind: input, shape index: {}]   ;;  %s27156_s10 = inlined_call_operand.vmem [shape: f32[32,1], index: 10, kind: input, shape index: {}]   ;;  %s27157_s11 = inlined_call_operand.vmem [shape: f32[120,128], index: 11, kind: input, shape index: {}]   ;;  %s27158_s12 = inlined_call_operand.vmem [shape: f32[1,128], index: 12, kind: input, shape index: {}]   ;;  %s27159_s13 = inlined_call_operand.vmem [shape: f32[128,30], index: 13, kind: input, shape index: {}]   ;;  %s27160_s14 = inlined_call_operand.vmem [shape: f32[1,30], index: 14, kind: input, shape index: {}]   ;;  %s27161_s15 = inlined_call_operand.vmem [shape: f32[2,32,8,30], index: 15, kind: output, shape index: {}]  }
   0x1   :  { %s21123_s20 = smov 0  }
   0x2 LB: > { %s37_s21 = sadd.s32 1, %s21028_s19  ;;  %p13779_p0 = scmp.ge.s32.totalorder %s21032_s20, 1  ;;  %s21032_s20 = sphi %s21123_s20, %s25_s20   ;;  %s21028_s19 = sphi %s21121_s19, %s27347_s19   ;;  %s21024_s18 = sphi %s21119_s18, %s27346_s18  }
   0x3   : > { %p39_p1 = scmp.ge.s32.totalorder %s37_s21, 2  ;;  %p451_p2 = scmp.lt.s32.totalorder %s21032_s20, 3 }
   0x5   : > { %s27349_s21 = smov (%p39_p1, %s37_s21), 0  ;;  %p452_p3 = pnand %p13779_p0, %p451_p2 }
   0x7   : > { %455 = sbr.rel (%p452_p3) target bundleno = 2915 (0xb63), region = 80 }
   0xe   : > { %v519_v0 = vld [vmem:[%s27147_s1] sm:$0xff]  ;;  %v520_v1 = vld [vmem:[%s27147_s1 + $0x8] sm:$0xff]  ;;  %v521_v2 = vld [vmem:[%s27147_s1 + $0x10] sm:$0xff]  ;;  %p502_p4 = scmp.lt.s32.totalorder %s21024_s18, 1  ;;  %s21034_s29 = smov 127   ;;  %vm683_vm0 = vcmask 72704  }
   0xf   : > { %v17894_v3 = vpack.c.bf16 %v520_v1, %v519_v0  ;;  %v522_v4 = vld [vmem:[%s27147_s1 + $0x18] sm:$0xff]  ;;  %v523_v6 = vld [vmem:[%s27147_s1 + $0x20] sm:$0xff]  ;;  %v524_v7 = vld [vmem:[%s27147_s1 + $0x28] sm:$0xff]  ;;  %s21035_s16 = smov 126   ;;  %v21036_v36 = vmov 0   ;;  %vm627_vm1 = vcmask 1039360  }
  0x10   : > { %v17898_v5 = vpack.c.bf16 %v522_v4, %v521_v2  ;;  %s27351_s18 = smov (!%p502_p4, %s21024_s18), 1  ;;  %v17902_v8 = vpack.c.bf16 %v524_v7, %v523_v6  ;;  %v525_v9 = vld [vmem:[%s27147_s1 + $0x30] sm:$0xff]  ;;  %v526_v10 = vld [vmem:[%s27147_s1 + $0x38] sm:$0xff]  ;;  %v527_v13 = vld [vmem:[%s27147_s1 + $0x40] sm:$0xff]  ;;  %20142 = vset.pattern.permute.xlu1 %v21036_v36  ;;  %20141 = vset.pattern.permute.xlu0 %v21036_v36  ;;  %vm636_vm2 = vcmask 1031168   ;;  %vm653_vm3 = vcmask 1042432  }
  0x11   : > { %17895 = vmatprep.subr.bf16.mxu0 %v17894_v3  ;;  %s14731_s23 = sshll.u32 %s27351_s18, 4  ;;  %v17906_v12 = vpack.c.bf16 %v526_v10, %v525_v9  ;;  %v528_v14 = vld [vmem:[%s27147_s1 + $0x48] sm:$0xff]  ;;  %v529_v16 = vld [vmem:[%s27147_s1 + $0x50] sm:$0xff]  ;;  %v530_v17 = vld [vmem:[%s27147_s1 + $0x58] sm:$0xff]  ;;  %vm790_vm4 = vcmask 1041408   ;;  %vm655_vm5 = vcmask 1043456  }
  0x12   : > { %17897 = vmatpush3.bf16.msra.mxu0 %v17894_v3  ;;  %s21161_s26 = scalar_lea.vmem %s27146_s0, %s14731_s23  ;;  %v17910_v15 = vpack.c.bf16 %v528_v14, %v527_v13  ;;  %v17914_v18 = vpack.c.bf16 %v530_v17, %v529_v16  ;;  %v531_v19 = vld [vmem:[%s27147_s1 + $0x60] sm:$0xff]  ;;  %v532_v20 = vld [vmem:[%s27147_s1 + $0x68] sm:$0xff]  ;;  %v533_v22 = vld [vmem:[%s27147_s1 + $0x70] sm:$0xff]  ;;  %vm657_vm6 = vcmask 1044480   ;;  %vm659_vm7 = vcmask 1045504   ;;  %s14732_s23 = sshll.u32 %s27351_s18, 8 }
  0x13   : > { %17899 = vmatprep.subr.bf16.mxu0 %v17898_v5  ;;  %v517_v11 = vld [vmem:[%s21161_s26] sm:$0xff]  ;;  %v17918_v21 = vpack.c.bf16 %v532_v20, %v531_v19  ;;  %v534_v23 = vld [vmem:[%s27147_s1 + $0x78] sm:$0xff]  ;;  %v518_v25 = vld [vmem:[%s21161_s26 + $0x8] sm:$0xff]  ;;  %vm661_vm8 = vcmask 1046528   ;;  %vm696_vm9 = vcmask 1040384   ;;  %vm21037_vm10 = vmmov 1   ;;  %s26879_s25 = scalar_lea.vmem %s27161_s15, %s14732_s23 }
  0x14   : > { %16739 = vmatprep.mubr.f32.mxu0 %v517_v11  ;;  %v17922_v24 = vpack.c.bf16 %v534_v23, %v533_v22  ;;  %v13784_v26 = vld [vmem:[%s27148_s2] ss:$0 sm:$0xff]  ;;  %v644_v34 = vld [vmem:[%s27150_s4 + $0x8] sm:$0xff]  ;;  %v645_v37 = vld [vmem:[%s27150_s4 + $0x10] sm:$0xff]  ;;  %vm2616_vm12 = vcmask 261120   ;;  %vm8776_vm15 = vcmask 982016  }
  0x15   : > { %v21209_v33 = vld [vmem:[%s27149_s3] sm:$0xff]  ;;  %v646_v38 = vld [vmem:[%s27150_s4 + $0x18] sm:$0xff]  ;;  %vm21281_vm11 = vmpackc.low %vm696_vm9, %vm21037_vm10 }
  0x16   : > { %17901 = vmatpush3.bf16.msra.mxu0 %v17898_v5  ;;  %16746 = vmatprep.mubr.msk.f32.mxu1 %vm683_vm0, %v21209_v33  ;;  %v643_v35 = vld [vmem:[%s27150_s4] sm:$0xff]  ;;  %vm21833_vm13 = vmpackc.low %vm627_vm1, %vm627_vm1 }
  0x17   : > { %17903 = vmatprep.subr.bf16.mxu0 %v17902_v8  ;;  %vm21858_vm14 = vmpackc.low %vm636_vm2, %vm636_vm2 }
  0x1a   : > { %17905 = vmatpush3.bf16.msra.mxu0 %v17902_v8 }
  0x1b   : > { %17907 = vmatprep.subr.bf16.mxu0 %v17906_v12 }
  0x1e   : > { %17909 = vmatpush3.bf16.msra.mxu0 %v17906_v12 }
  0x1f   : > { %17911 = vmatprep.subr.bf16.mxu0 %v17910_v15 }
  0x22   : > { %17913 = vmatpush3.bf16.msra.mxu0 %v17910_v15 }
  0x23   : > { %17915 = vmatprep.subr.bf16.mxu0 %v17914_v18 }
  0x26   : > { %17917 = vmatpush3.bf16.msra.mxu0 %v17914_v18 }
  0x27   : > { %17919 = vmatprep.subr.bf16.mxu0 %v17918_v21 }
  0x2a   : > { %17921 = vmatpush3.bf16.msra.mxu0 %v17918_v21 }
  0x2b   : > { %17923 = vmatprep.subr.bf16.mxu0 %v17922_v24 }
  0x2e   : > { %17925 = vmatpush3.bf16.msra.mxu0 %v17922_v24 }
  0x31   : > { %16740 = vmatmul.mubr.f32.vlgmr.msra.gmra.mrb[0].mxu0 %v518_v25 }
  0x32   : > { %16806 = vmatprep.mubr.msk.f32.mxu0 %vm683_vm0, %v21209_v33 }
 0x104   : > { %v16741_v27 = vpop.f32.mrb[0].mxu0 }
 0x105   : > { %v614_v28 = vadd.f32 %v16741_v27, %v13784_v26  ;;  %v608_v29 = vpop.f32.mrb[1].mxu0 }
 0x106   : > { %v609_v30 = vadd.f32 %v13784_v26, %v608_v29 }
 0x107   : > { %v21198_v31 = vmax.f32 %v614_v28, 0.0 }
 0x108   : > { %v21200_v32 = vmax.f32 %v609_v30, 0.0 }
 0x109   : > { %623 = vrot.lane.b32.xlu1 %v21198_v31, %s21034_s29  ;;  %v1280_v40 = vrot.slane %v21198_v31, 6  ;;  %v1682_v43 = vrot.slane %v21198_v31, 2  ;;  %v1878_v44 = vrot.slane %v21198_v31, 4 }
 0x10a   : > { %621 = vrot.lane.b32.xlu0 %v21200_v32, %s21034_s29  ;;  %v1278_v39 = vrot.slane %v21200_v32, 6  ;;  %v784_v42 = vrot.slane %v21200_v32, 1  ;;  %v884_v48 = vrot.slane %v21200_v32, 2  ;;  %v983_v49 = vrot.slane %v21200_v32, 3 }
 0x10c   : > { %v1287_v47 = vsel %vm790_vm4, %v1278_v39, %v1280_v40 }
 0x10d   : > { %632 = vrot.lane.b32.xlu1 %v21198_v31, %s21035_s16 }
 0x10e   : > { %630 = vrot.lane.b32.xlu0 %v21200_v32, %s21035_s16 }
 0x111   : > { %670 = vperm.xlu1 %20142, %v644_v34  }
 0x112   : > { %665 = vperm.xlu0 %20141, %v643_v35  }
 0x115   : > { %675 = vperm.xlu1 %20142, %v645_v37   ;;  %v21313_v37 = vld [vmem:[%s27149_s3 + $0x8] sm:$0xff] }
 0x116   : > { %680 = vperm.xlu0 %20141, %v646_v38  }
 0x17b   : > { %v624_v41 = vpop.permute.xlu1 %623 }
 0x17c   : > { %v21237_v45 = vsel %vm627_vm1, %v624_v41, 0.0  ;;  %v622_v46 = vpop.permute.xlu0 %621 }
 0x17d   : > { %v21243_v50 = vsel %vm627_vm1, %v622_v46, 0.0  ;;  %v1285_v51 = vrot.slane %v21237_v45, 3  ;;  %v1487_v52 = vrot.slane %v21237_v45, 5  ;;  %v1684_v53 = vrot.slane %v21237_v45, 7 }
 0x17e   : > { %v1282_v54 = vrot.slane %v21243_v50, 3  ;;  %v648_v55 = vrot.slane %v21243_v50, 5  ;;  %v786_v56 = vrot.slane %v21243_v50, 6  ;;  %v886_v57 = vrot.slane %v21243_v50, 7 }
 0x17f   : > { %v633_v58 = vpop.permute.xlu1 %632  ;;  %v1491_v59 = vsel %vm653_vm3, %v21198_v31, %v1487_v52  ;;  %v1689_v60 = vsel %vm653_vm3, %v1682_v43, %v1684_v53  ;;  %v1880_v61 = vrot.slane %v21237_v45, 1  ;;  %v988_v62 = vsel %vm653_vm3, %v983_v49, %v21243_v50 }
 0x180   : > { %v21259_v63 = vsel %vm636_vm2, %v633_v58, 0.0  ;;  %v631_v0 = vpop.permute.xlu0 %630  ;;  %v1288_v1 = vsel %vm653_vm3, %v1287_v47, %v1282_v54  ;;  %v654_v2 = vsel %vm653_vm3, %v21200_v32, %v648_v55  ;;  %v1492_v3 = vsel %vm655_vm5, %v1491_v59, %v1487_v52  ;;  %v21357_v58 = vld [vmem:[%s27149_s3 + $0x18] sm:$0xff] }
 0x181   : > { %v21266_v4 = vsel %vm636_vm2, %v631_v0, 0.0  ;;  %v1289_v5 = vsel %vm655_vm5, %v1288_v1, %v1282_v54  ;;  %v656_v6 = vsel %vm655_vm5, %v654_v2, %v648_v55  ;;  %v1489_v7 = vrot.slane %v21259_v63, 2 }
 0x182   : > { %v1290_v8 = vsel %vm657_vm6, %v1289_v5, %v1285_v51  ;;  %v651_v9 = vrot.slane %v21266_v4, 2  ;;  %v658_v10 = vsel %vm657_vm6, %v656_v6, %v648_v55  ;;  %v1493_v11 = vsel %vm657_vm6, %v1492_v3, %v1487_v52 }
 0x183   : > { %v1291_v12 = vsel %vm659_vm7, %v1290_v8, %v21266_v4  ;;  %v1494_v13 = vsel %vm659_vm7, %v1493_v11, %v1489_v7  ;;  %v788_v14 = vrot.slane %v21266_v4, 3  ;;  %v792_v15 = vsel %vm653_vm3, %v784_v42, %v786_v56 }
 0x184   : > { %v1292_v17 = vsel %vm661_vm8, %v1291_v12, %v21266_v4  ;;  %v660_v18 = vsel %vm659_vm7, %v658_v10, %v651_v9  ;;  %v1495_v19 = vsel %vm661_vm8, %v1494_v13, %v1489_v7  ;;  %v793_v20 = vsel %vm655_vm5, %v792_v15, %v786_v56 }
 0x185   : > { %v21291_v21 = vpack.c.bf16 %v21259_v63, %v1292_v17  ;;  %v662_v22 = vsel %vm661_vm8, %v660_v18, %v651_v9  ;;  %v17974_v23 = vpack.c.bf16 %v1489_v7, %v1495_v19  ;;  %v794_v24 = vsel %vm657_vm6, %v793_v20, %v786_v56  ;;  %v21347_v56 = vld [vmem:[%s27149_s3 + $0x10] sm:$0xff] }
 0x186   : > { %v17926_v25 = vpack.c.bf16 %v651_v9, %v662_v22  ;;  %v795_v26 = vsel %vm659_vm7, %v794_v24, %v788_v14  ;;  %v1686_v27 = vrot.slane %v21259_v63, 4  ;;  %v1690_v28 = vsel %vm655_vm5, %v1689_v60, %v1684_v53 }
 0x187   : > { %17964 = vmatprep.subr.msk.bf16.mxu0 %vm21281_vm11, %v21291_v21  ;;  %v796_v29 = vsel %vm661_vm8, %v795_v26, %v788_v14  ;;  %v1691_v30 = vsel %vm657_vm6, %v1690_v28, %v1684_v53  ;;  %v888_v34 = vrot.slane %v21266_v4, 4  ;;  %v891_v35 = vsel %vm653_vm3, %v884_v48, %v886_v57 }
 0x188   : > { %17928 = vmatprep.subr.msk.bf16.mxu1 %vm21281_vm11, %v17926_v25  ;;  %17967 = vmatpush3.bf16.msk.msra.mxu0 %vm21281_vm11, %v21291_v21  ;;  %v17932_v36 = vpack.c.bf16 %v788_v14, %v796_v29  ;;  %v1692_v38 = vsel %vm659_vm7, %v1691_v30, %v1686_v27  ;;  %v892_v39 = vsel %vm655_vm5, %v891_v35, %v886_v57  ;;  %v1882_v40 = vrot.slane %v21259_v63, 6 }
 0x189   : > { %17931 = vmatpush3.bf16.msk.msra.mxu1 %vm21281_vm11, %v17926_v25  ;;  %17976 = vmatprep.subr.msk.bf16.mxu0 %vm21281_vm11, %v17974_v23  ;;  %v1693_v41 = vsel %vm661_vm8, %v1692_v38, %v1686_v27  ;;  %v893_v42 = vsel %vm657_vm6, %v892_v39, %v886_v57  ;;  %v1885_v43 = vsel %vm653_vm3, %v1878_v44, %v1880_v61  ;;  %v1080_v46 = vrot.slane %v21200_v32, 4 }
 0x18a   : > { %17934 = vmatprep.subr.msk.bf16.mxu1 %vm21281_vm11, %v17932_v36  ;;  %v894_v47 = vsel %vm659_vm7, %v893_v42, %v888_v34  ;;  %v1886_v48 = vsel %vm655_vm5, %v1885_v43, %v1880_v61  ;;  %v985_v49 = vrot.slane %v21266_v4, 5  ;;  %v989_v51 = vsel %vm655_vm5, %v988_v62, %v21243_v50 }
 0x18b   : > { %16807 = vmatmul.mubr.msk.f32.vlgmr.msra.gmra.mrb[2].mxu0 %vm683_vm0, %v21313_v37  ;;  %v17986_v52 = vpack.c.bf16 %v1686_v27, %v1693_v41  ;;  %v895_v44 = vsel %vm661_vm8, %v894_v47, %v888_v34  ;;  %v1887_v53 = vsel %vm657_vm6, %v1886_v48, %v1880_v61  ;;  %v1082_v54 = vrot.slane %v21243_v50, 1 }
 0x18c   : > { %16747 = vmatmul.mubr.msk.f32.vlgmr.msra.gmra.mrb[0].mxu1 %vm683_vm0, %v21313_v37  ;;  %17979 = vmatpush3.bf16.msk.msra.mxu0 %vm21281_vm11, %v17974_v23  ;;  %v17938_v55 = vpack.c.bf16 %v888_v34, %v895_v44  ;;  %v1888_v57 = vsel %vm659_vm7, %v1887_v53, %v1882_v40  ;;  %v990_v60 = vsel %vm657_vm6, %v989_v51, %v21243_v50  ;;  %v1181_v3 = vrot.slane %v21243_v50, 2 }
 0x18d   : > { %17937 = vmatpush3.bf16.msk.msra.mxu1 %vm21281_vm11, %v17932_v36  ;;  %17988 = vmatprep.subr.msk.bf16.mxu0 %vm21281_vm11, %v17986_v52  ;;  %v1889_v59 = vsel %vm661_vm8, %v1888_v57, %v1882_v40  ;;  %v1087_v61 = vsel %vm653_vm3, %v1080_v46, %v1082_v54  ;;  %v991_v62 = vsel %vm659_vm7, %v990_v60, %v985_v49  ;;  %v1084_v5 = vrot.slane %v21266_v4, 6 }
 0x18e   : > { %17940 = vmatprep.subr.msk.bf16.mxu1 %vm21281_vm11, %v17938_v55  ;;  %16826 = vmatprep.mubr.msk.f32.mxu0 %vm683_vm0, %v21209_v33  ;;  %v17998_v0 = vpack.c.bf16 %v1882_v40, %v1889_v59  ;;  %v1088_v1 = vsel %vm655_vm5, %v1087_v61, %v1082_v54  ;;  %v992_v2 = vsel %vm661_vm8, %v991_v62, %v985_v49  ;;  %v1179_v7 = vrot.slane %v21200_v32, 5 }
 0x18f   : > { %16749 = vmatprep.mubr.msk.f32.mxu1 %vm683_vm0, %v21347_v56  ;;  %16827 = vmatmul.mubr.msk.f32.vlgmr.msra.gmra.mrb[4].mxu0 %vm683_vm0, %v21313_v37  ;;  %v1089_v6 = vsel %vm657_vm6, %v1088_v1, %v1082_v54  ;;  %v17944_v8 = vpack.c.bf16 %v985_v49, %v992_v2  ;;  %v1977_v9 = vrot.slane %v21198_v31, 5  ;;  %v1979_v10 = vrot.slane %v21237_v45, 2 }
 0x190   : > { %16750 = vmatmul.mubr.msk.f32.gmra.mrb[2].mxu1 %vm683_vm0, %v21357_v58  ;;  %17991 = vmatpush3.bf16.msk.msra.mxu0 %vm21281_vm11, %v17986_v52  ;;  %v1186_v11 = vsel %vm653_vm3, %v1179_v7, %v1181_v3  ;;  %v1981_v12 = vrot.slane %v21259_v63, 7  ;;  %v1090_v13 = vsel %vm659_vm7, %v1089_v6, %v1084_v5  ;;  %v1183_v22 = vrot.slane %v21266_v4, 7  ;;  %v21571_v62 = vpop.permute.xlu1 %670 }
 0x191   : > { %18000 = vmatprep.subr.msk.bf16.mxu0 %vm21281_vm11, %v17998_v0  ;;  %16829 = vmatprep.mubr.msk.f32.mxu0 %vm683_vm0, %v21347_v56  ;;  %v1984_v14 = vsel %vm653_vm3, %v1977_v9, %v1979_v10  ;;  %v1187_v17 = vsel %vm655_vm5, %v1186_v11, %v1181_v3  ;;  %v1091_v19 = vsel %vm661_vm8, %v1090_v13, %v1084_v5  ;;  %v1381_v27 = vrot.slane %v21200_v32, 7  ;;  %v21569_v16 = vpop.permute.xlu0 %665 }
 0x192   : > { %16756 = vmatprep.mubr.msk.f32.mxu1 %vm683_vm0, %v21209_v33  ;;  %v1985_v15 = vsel %vm655_vm5, %v1984_v14, %v1979_v10  ;;  %v1188_v24 = vsel %vm657_vm6, %v1187_v17, %v1181_v3  ;;  %v17950_v26 = vpack.c.bf16 %v1084_v5, %v1091_v19  ;;  %v1383_v28 = vrot.slane %v21198_v31, 7 }
 0x193   : > { %16830 = vmatmul.mubr.msk.f32.gmra.mrb[6].mxu0 %vm683_vm0, %v21357_v58  ;;  %v1986_v18 = vsel %vm657_vm6, %v1985_v15, %v1979_v10  ;;  %v1189_v29 = vsel %vm659_vm7, %v1188_v24, %v1183_v22  ;;  %v1385_v30 = vrot.slane %v21243_v50, 4  ;;  %v1387_v50 = vrot.slane %v21237_v45, 4 }
 0x194   : > { %16757 = vmatmul.mubr.msk.f32.vlgmr.msra.gmra.mrb[4].mxu1 %vm683_vm0, %v21313_v37  ;;  %16846 = vmatprep.mubr.msk.f32.mxu0 %vm683_vm0, %v21209_v33  ;;  %v1987_v20 = vsel %vm659_vm7, %v1986_v18, %v1981_v12  ;;  %v1190_v32 = vsel %vm661_vm8, %v1189_v29, %v1183_v22  ;;  %v1393_v34 = vsel %vm696_vm9, %v1381_v27, %v1383_v28  ;;  %v1585_v40 = vrot.slane %v21237_v45, 6 }
 0x195   : > { %17943 = vmatpush3.bf16.msk.msra.mxu1 %vm21281_vm11, %v17938_v55  ;;  %16759 = vmatprep.mubr.msk.f32.mxu1 %vm683_vm0, %v21347_v56  ;;  %v1988_v23 = vsel %vm661_vm8, %v1987_v20, %v1981_v12  ;;  %v17956_v35 = vpack.c.bf16 %v1183_v22, %v1190_v32  ;;  %v1394_v36 = vsel %vm790_vm4, %v1393_v34, %v1383_v28  ;;  %v1389_v41 = vrot.slane %v21266_v4, 1  ;;  %v21578_v6 = vpop.permute.xlu0 %680 }
 0x196   : > { %17946 = vmatprep.subr.msk.bf16.mxu1 %vm21281_vm11, %v17944_v8  ;;  %v21426_v25 = vpack.c.bf16 %v1981_v12, %v1988_v23  ;;  %v1395_v38 = vsel %vm653_vm3, %v1394_v36, %v1385_v30  ;;  %v1583_v43 = vrot.slane %v21198_v31, 1  ;;  %v1391_v47 = vrot.slane %v21259_v63, 1 }
 0x197   : > { %16847 = vmatmul.mubr.msk.f32.vlgmr.msra.gmra.mrb[8].mxu0 %vm683_vm0, %v21313_v37  ;;  %v1396_v39 = vsel %vm655_vm5, %v1395_v38, %v1387_v50  ;;  %v1781_v51 = vrot.slane %v21198_v31, 3  ;;  %v1587_v52 = vrot.slane %v21259_v63, 3  ;;  %v1783_v55 = vrot.slane %v21259_v63, 5 }
 0x198   : > { %18003 = vmatpush3.bf16.msk.msra.mxu0 %vm21281_vm11, %v17998_v0  ;;  %16760 = vmatmul.mubr.msk.f32.gmra.mrb[6].mxu1 %vm683_vm0, %v21357_v58  ;;  %v1397_v42 = vsel %vm657_vm6, %v1396_v39, %v1387_v50  ;;  %v1590_v46 = vsel %vm653_vm3, %v1583_v43, %v1585_v40 }
 0x199   : > { %16849 = vmatprep.mubr.msk.f32.mxu0 %vm683_vm0, %v21347_v56  ;;  %16766 = vmatprep.mubr.msk.f32.mxu1 %vm683_vm0, %v21209_v33  ;;  %v1398_v4 = vsel %vm659_vm7, %v1397_v42, %v1389_v41  ;;  %v1591_v48 = vsel %vm655_vm5, %v1590_v46, %v1585_v40  ;;  %v1786_v53 = vsel %vm653_vm3, %v1781_v51, %v21237_v45 }
 0x19a   : > { %v1399_v49 = vsel %vm661_vm8, %v1398_v4, %v1391_v47  ;;  %v1592_v44 = vsel %vm657_vm6, %v1591_v48, %v1585_v40  ;;  %v1787_v57 = vsel %vm655_vm5, %v1786_v53, %v21237_v45 }
 0x19b   : > { %16850 = vmatmul.mubr.msk.f32.gmra.mrb[10].mxu0 %vm683_vm0, %v21357_v58  ;;  %v17968_v54 = vpack.c.bf16 %v1391_v47, %v1399_v49  ;;  %v1593_v31 = vsel %vm659_vm7, %v1592_v44, %v1587_v52  ;;  %v1788_v59 = vsel %vm657_vm6, %v1787_v57, %v21237_v45 }
 0x19c   : > { %16767 = vmatmul.mubr.msk.f32.vlgmr.msra.gmra.mrb[8].mxu1 %vm683_vm0, %v21313_v37  ;;  %16866 = vmatprep.mubr.msk.f32.mxu0 %vm683_vm0, %v21209_v33  ;;  %v1789_v60 = vsel %vm659_vm7, %v1788_v59, %v1783_v55 }
 0x19d   : > { %17949 = vmatpush3.bf16.msk.msra.mxu1 %vm21281_vm11, %v17944_v8  ;;  %16769 = vmatprep.mubr.msk.f32.mxu1 %vm683_vm0, %v21347_v56  ;;  %v1790_v61 = vsel %vm661_vm8, %v1789_v60, %v1783_v55 }
 0x19e   : > { %17952 = vmatprep.subr.msk.bf16.mxu1 %vm21281_vm11, %v17950_v26  ;;  %v17992_v45 = vpack.c.bf16 %v1783_v55, %v1790_v61 }
 0x19f   : > { %16867 = vmatmul.mubr.msk.f32.vlgmr.msra.gmra.mrb[12].mxu0 %vm683_vm0, %v21313_v37 }
 0x1a0   : > { %16770 = vmatmul.mubr.msk.f32.gmra.mrb[10].mxu1 %vm683_vm0, %v21357_v58  ;;  %16869 = vmatprep.mubr.msk.f32.mxu0 %vm683_vm0, %v21347_v56 }
 0x1a1   : > { %16776 = vmatprep.mubr.msk.f32.mxu1 %vm683_vm0, %v21209_v33 }
 0x1a3   : > { %16870 = vmatmul.mubr.msk.f32.gmra.mrb[14].mxu0 %vm683_vm0, %v21357_v58 }
 0x1a4   : > { %16777 = vmatmul.mubr.msk.f32.vlgmr.msra.gmra.mrb[12].mxu1 %vm683_vm0, %v21313_v37 }
 0x1a5   : > { %17955 = vmatpush3.bf16.msk.msra.mxu1 %vm21281_vm11, %v17950_v26  ;;  %16779 = vmatprep.mubr.msk.f32.mxu1 %vm683_vm0, %v21347_v56 }
 0x1a6   : > { %17958 = vmatprep.subr.msk.bf16.mxu1 %vm21281_vm11, %v17956_v35 }
 0x1a8   : > { %16780 = vmatmul.mubr.msk.f32.gmra.mrb[14].mxu1 %vm683_vm0, %v21357_v58 }
 0x1a9   : > { %16786 = vmatprep.mubr.msk.f32.mxu1 %vm683_vm0, %v21209_v33 }
 0x1ac   : > { %16787 = vmatmul.mubr.msk.f32.vlgmr.msra.gmra.mrb[16].mxu1 %vm683_vm0, %v21313_v37 }
 0x1ad   : > { %17961 = vmatpush3.bf16.msk.msra.mxu1 %vm21281_vm11, %v17956_v35  ;;  %16789 = vmatprep.mubr.msk.f32.mxu1 %vm683_vm0, %v21347_v56 }
 0x1ae   : > { %20110 = vmatprep.subr.msk.bf16.mxu1 %vm21281_vm11, %v21291_v21 }
 0x1b0   : > { %16790 = vmatmul.mubr.msk.f32.gmra.mrb[18].mxu1 %vm683_vm0, %v21357_v58 }
 0x1b1   : > { %16796 = vmatprep.mubr.msk.f32.mxu1 %vm683_vm0, %v21209_v33 }
 0x1b4   : > { %16797 = vmatmul.mubr.msk.f32.vlgmr.msra.gmra.mrb[20].mxu1 %vm683_vm0, %v21313_v37 }
 0x1b5   : > { %20111 = vmatpush3.bf16.msk.msra.mxu1 %vm21281_vm11, %v21291_v21  ;;  %16799 = vmatprep.mubr.msk.f32.mxu1 %vm683_vm0, %v21347_v56  ;;  %v1594_v21 = vsel %vm661_vm8, %v1593_v31, %v1587_v52 }
 0x1b6   : > { %17970 = vmatprep.subr.msk.bf16.mxu1 %vm21281_vm11, %v17968_v54  ;;  %v17980_v63 = vpack.c.bf16 %v1587_v52, %v1594_v21 }
 0x1b8   : > { %16800 = vmatmul.mubr.msk.f32.gmra.mrb[22].mxu1 %vm683_vm0, %v21357_v58 }
 0x1b9   : > { %16809 = vmatprep.mubr.msk.f32.mxu1 %vm683_vm0, %v21347_v56 }
 0x1bc   : > { %16810 = vmatmul.mubr.msk.f32.vlgmr.msra.gmra.mrb[24].mxu1 %vm683_vm0, %v21357_v58 }
 0x1bd   : > { %17973 = vmatpush3.bf16.msk.msra.mxu1 %vm21281_vm11, %v17968_v54  ;;  %16816 = vmatprep.mubr.msk.f32.mxu1 %vm683_vm0, %v21209_v33 }
 0x1be   : > { %17982 = vmatprep.subr.msk.bf16.mxu1 %vm21281_vm11, %v17980_v63 }
 0x1c0   : > { %16817 = vmatmul.mubr.msk.f32.vlgmr.msra.gmra.mrb[26].mxu1 %vm683_vm0, %v21313_v37 }
 0x1c1   : > { %17985 = vmatpush3.bf16.msk.msra.mxu1 %vm21281_vm11, %v17980_v63  ;;  %16819 = vmatprep.mubr.msk.f32.mxu1 %vm683_vm0, %v21347_v56 }
 0x1c2   : > { %17994 = vmatprep.subr.msk.bf16.mxu1 %vm21281_vm11, %v17992_v45 }
 0x1c4   : > { %16820 = vmatmul.mubr.msk.f32.gmra.mrb[28].mxu1 %vm683_vm0, %v21357_v58 }
 0x1c5   : > { %16836 = vmatprep.mubr.msk.f32.mxu1 %vm683_vm0, %v21209_v33 }
 0x1c8   : > { %16837 = vmatmul.mubr.msk.f32.vlgmr.msra.gmra.mrb[30].mxu1 %vm683_vm0, %v21313_v37 }
 0x1c9   : > { %17997 = vmatpush3.bf16.msk.msra.mxu1 %vm21281_vm11, %v17992_v45  ;;  %16839 = vmatprep.mubr.msk.f32.mxu1 %vm683_vm0, %v21347_v56 }
 0x1ca   : > { %18006 = vmatprep.subr.msk.bf16.mxu1 %vm21281_vm11, %v21426_v25 }
 0x1cc   : > { %16840 = vmatmul.mubr.msk.f32.gmra.mrb[32].mxu1 %vm683_vm0, %v21357_v58 }
 0x1cd   : > { %16856 = vmatprep.mubr.msk.f32.mxu1 %vm683_vm0, %v21209_v33 }
 0x1d0   : > { %16857 = vmatmul.mubr.msk.f32.vlgmr.msra.gmra.mrb[34].mxu1 %vm683_vm0, %v21313_v37 }
 0x1d1   : > { %18009 = vmatpush3.bf16.msk.msra.mxu1 %vm21281_vm11, %v21426_v25  ;;  %16859 = vmatprep.mubr.msk.f32.mxu1 %vm683_vm0, %v21347_v56 }
 0x1d4   : > { %16860 = vmatmul.mubr.msk.f32.gmra.mrb[36].mxu1 %vm683_vm0, %v21357_v58 }
 0x1d5   : > { %16876 = vmatprep.mubr.msk.f32.mxu1 %vm683_vm0, %v21209_v33 }
 0x1d8   : > { %16877 = vmatmul.mubr.msk.f32.vlgmr.msra.gmra.mrb[38].mxu1 %vm683_vm0, %v21313_v37 }
 0x1d9   : > { %16879 = vmatprep.mubr.msk.f32.mxu1 %vm683_vm0, %v21347_v56 }
 0x1dc   : > { %16880 = vmatmul.mubr.msk.f32.gmra.mrb[40].mxu1 %vm683_vm0, %v21357_v58  ;;  %v21583_v58 = vpop.permute.xlu1 %675  ;;  %vm8973_vm0 = vcmask 244736  }
 0x25e   : > { %v16808_v0 = vpop.f32.mrb[2].mxu0 }
 0x25f   : > { %v16748_v1 = vpop.f32.mrb[0].mxu1  ;;  %v1368_v2 = vadd.f32 %v16808_v0, %v21571_v62  ;;  %v1362_v3 = vpop.f32.mrb[3].mxu0 }
 0x260   : > { %v765_v5 = vpop.f32.mrb[1].mxu1  ;;  %v1363_v33 = vadd.f32 %v1362_v3, %v21569_v16  ;;  %v21576_v37 = vadd.f32 %v16748_v1, %v21571_v62 }
 0x261   : > { %v21581_v56 = vadd.f32 %v765_v5, %v21569_v16 }
 0x262   : > { %v21585_v7 = vpack.c.bf16 %v1368_v2, %v1363_v33  ;;  %v16828_v8 = vpop.f32.mrb[4].mxu0  ;;  %v21587_v9 = vpack.i.bf16 %v1368_v2, %v1363_v33 }
 0x263   : > { %v16751_v10 = vpop.f32.mrb[2].mxu1  ;;  %v1570_v11 = vadd.f32 %v16828_v8, %v21571_v62  ;;  %v1564_v12 = vpop.f32.mrb[5].mxu0  ;;  %v21592_v13 = vpack.i.bf16 %v21576_v37, %v21581_v56  ;;  %v18013_v14 = vpack.c.bf16 %v21576_v37, %v21581_v56 }
 0x264   : > { %v775_v15 = vpop.f32.mrb[3].mxu1  ;;  %v1565_v17 = vadd.f32 %v1564_v12, %v21569_v16  ;;  %v21598_v18 = vadd.f32 %v16751_v10, %v21578_v6 }
 0x265   : > { %v21601_v19 = vadd.f32 %v775_v15, %v21583_v58 }
 0x266   : > { %v21603_v20 = vpack.c.bf16 %v1570_v11, %v1565_v17  ;;  %v16831_v22 = vpop.f32.mrb[6].mxu0  ;;  %v21605_v23 = vpack.i.bf16 %v1570_v11, %v1565_v17  ;;  %v21663_v17 = vld [vmem:[%s27151_s5 + $0x10] sm:$0xff] }
 0x267   : > { %v16758_v24 = vpop.f32.mrb[4].mxu1  ;;  %v1580_v25 = vadd.f32 %v16831_v22, %v21578_v6  ;;  %v1574_v26 = vpop.f32.mrb[7].mxu0  ;;  %v21610_v27 = vpack.i.bf16 %v21598_v18, %v21601_v19  ;;  %v18018_v28 = vpack.c.bf16 %v21598_v18, %v21601_v19  ;;  %16890 = vmatprep.mubr.msk.f32.mxu1 %vm2616_vm12, %v21663_v17 }
 0x268   : > { %v871_v29 = vadd.f32 %v16758_v24, %v21571_v62  ;;  %v865_v32 = vpop.f32.mrb[5].mxu1  ;;  %v1575_v30 = vadd.f32 %v1574_v26, %v21583_v58 }
 0x269   : > { %v866_v34 = vadd.f32 %v865_v32, %v21569_v16 }
 0x26a   : > { %v21617_v35 = vpack.c.bf16 %v1580_v25, %v1575_v30  ;;  %v16848_v36 = vpop.f32.mrb[8].mxu0  ;;  %v21619_v38 = vpack.i.bf16 %v1580_v25, %v1575_v30 }
 0x26b   : > { %v21621_v50 = vpack.c.bf16 %v871_v29, %v866_v34  ;;  %v16761_v39 = vpop.f32.mrb[6].mxu1  ;;  %v21623_v40 = vpack.i.bf16 %v871_v29, %v866_v34  ;;  %v1768_v41 = vadd.f32 %v16848_v36, %v21571_v62  ;;  %v1762_v42 = vpop.f32.mrb[9].mxu0 }
 0x26c   : > { %v881_v43 = vadd.f32 %v16761_v39, %v21578_v6  ;;  %v875_v46 = vpop.f32.mrb[7].mxu1  ;;  %v1763_v4 = vadd.f32 %v1762_v42, %v21569_v16 }
 0x26d   : > { %v876_v47 = vadd.f32 %v875_v46, %v21583_v58  ;;  %20144 = vrot.lane.b32.xlu0 %v21623_v40, %s21034_s29 }
 0x26e   : > { %v21631_v48 = vpack.c.bf16 %v1768_v41, %v1763_v4  ;;  %v16851_v49 = vpop.f32.mrb[10].mxu0  ;;  %v21633_v51 = vpack.i.bf16 %v1768_v41, %v1763_v4 }
 0x26f   : > { %v21635_v52 = vpack.c.bf16 %v881_v43, %v876_v47  ;;  %v16768_v44 = vpop.f32.mrb[8].mxu1  ;;  %v1778_v53 = vadd.f32 %v16851_v49, %v21578_v6  ;;  %v1772_v54 = vpop.f32.mrb[11].mxu0  ;;  %v21638_v31 = vpack.i.bf16 %v881_v43, %v876_v47 }
 0x270   : > { %v970_v55 = vadd.f32 %v16768_v44, %v21571_v62  ;;  %v964_v57 = vpop.f32.mrb[9].mxu1  ;;  %v1773_v21 = vadd.f32 %v1772_v54, %v21583_v58 }
 0x271   : > { %v965_v59 = vadd.f32 %v964_v57, %v21569_v16  ;;  %20149 = vrot.lane.b32.xlu0 %v21638_v31, %s21034_s29 }
 0x272   : > { %v21645_v60 = vpack.c.bf16 %v1778_v53, %v1773_v21  ;;  %v16868_v63 = vpop.f32.mrb[12].mxu0  ;;  %v21647_v61 = vpack.i.bf16 %v1778_v53, %v1773_v21 }
 0x273   : > { %v21649_v45 = vpack.c.bf16 %v970_v55, %v965_v59  ;;  %v1964_v0 = vadd.f32 %v16868_v63, %v21571_v62  ;;  %v16771_v1 = vpop.f32.mrb[10].mxu1  ;;  %v1958_v2 = vpop.f32.mrb[13].mxu0  ;;  %v20153_v3 = vpack.i.bf16 %v970_v55, %v965_v59 }
 0x274   : > { %v980_v5 = vadd.f32 %v16771_v1, %v21578_v6  ;;  %v1959_v33 = vadd.f32 %v1958_v2, %v21569_v16  ;;  %v974_v8 = vpop.f32.mrb[11].mxu1 }
 0x275   : > { %v975_v10 = vadd.f32 %v974_v8, %v21583_v58  ;;  %20154 = vrot.lane.b32.xlu1 %v20153_v3, %s21035_s16 }
 0x276   : > { %v21656_v11 = vpack.c.bf16 %v1964_v0, %v1959_v33  ;;  %v16871_v12 = vpop.f32.mrb[14].mxu0  ;;  %v21658_v15 = vpack.i.bf16 %v1964_v0, %v1959_v33 }
 0x277   : > { %v21665_v22 = vpack.c.bf16 %v980_v5, %v975_v10  ;;  %v1974_v24 = vadd.f32 %v16871_v12, %v21578_v6  ;;  %v16778_v25 = vpop.f32.mrb[12].mxu1  ;;  %v1968_v26 = vpop.f32.mrb[15].mxu0  ;;  %v20158_v29 = vpack.i.bf16 %v980_v5, %v975_v10 }
 0x278   : > { %v1067_v32 = vadd.f32 %v16778_v25, %v21571_v62  ;;  %v1969_v30 = vadd.f32 %v1968_v26, %v21583_v58  ;;  %v1061_v34 = vpop.f32.mrb[13].mxu1 }
 0x279   : > { %v1062_v36 = vadd.f32 %v1061_v34, %v21569_v16  ;;  %20159 = vrot.lane.b32.xlu1 %v20158_v29, %s21035_s16  ;;  %20169 = vrot.lane.b32.xlu0 %v20158_v29, %s21034_s29 }
 0x27a   : > { %v21675_v39 = vpack.c.bf16 %v1974_v24, %v1969_v30  ;;  %v21677_v41 = vpack.i.bf16 %v1974_v24, %v1969_v30 }
 0x27b   : > { %v21679_v42 = vpack.c.bf16 %v1067_v32, %v1062_v36  ;;  %v16781_v43 = vpop.f32.mrb[14].mxu1  ;;  %v20183_v46 = vpack.i.bf16 %v1067_v32, %v1062_v36 }
 0x27c   : > { %v1077_v4 = vadd.f32 %v16781_v43, %v21578_v6  ;;  %v1071_v47 = vpop.f32.mrb[15].mxu1 }
 0x27d   : > { %v1072_v49 = vadd.f32 %v1071_v47, %v21583_v58  ;;  %20164 = vrot.lane.b32.xlu1 %v20153_v3, %s21034_s29  ;;  %20174 = vrot.lane.b32.xlu0 %v21592_v13, %s21035_s16 }
 0x27f   : > { %v21686_v44 = vpack.c.bf16 %v1077_v4, %v1072_v49  ;;  %v16788_v53 = vpop.f32.mrb[16].mxu1  ;;  %v20188_v54 = vpack.i.bf16 %v1077_v4, %v1072_v49 }
 0x280   : > { %v1166_v55 = vadd.f32 %v16788_v53, %v21571_v62  ;;  %v1160_v57 = vpop.f32.mrb[17].mxu1 }
 0x281   : > { %v1161_v21 = vadd.f32 %v1160_v57, %v21569_v16  ;;  %20184 = vrot.lane.b32.xlu1 %v20183_v46, %s21034_s29  ;;  %20179 = vrot.lane.b32.xlu0 %v21610_v27, %s21035_s16 }
 0x283   : > { %v21693_v59 = vpack.c.bf16 %v1166_v55, %v1161_v21  ;;  %v16791_v63 = vpop.f32.mrb[18].mxu1  ;;  %v20228_v0 = vpack.i.bf16 %v1166_v55, %v1161_v21 }
 0x284   : > { %v1176_v1 = vadd.f32 %v16791_v63, %v21578_v6  ;;  %v1170_v2 = vpop.f32.mrb[19].mxu1 }
 0x285   : > { %v1171_v3 = vadd.f32 %v1170_v2, %v21583_v58  ;;  %20189 = vrot.lane.b32.xlu1 %v20188_v54, %s21034_s29  ;;  %20199 = vrot.lane.b32.xlu0 %v21592_v13, %s21034_s29  ;;  %v21713_v13 = vld [vmem:[%s27151_s5 + $0x8] sm:$0xff] }
 0x286   : > { %2693 = vmatprep.mubr.f32.mxu0 %v21713_v13 }
 0x287   : > { %v21700_v5 = vpack.c.bf16 %v1176_v1, %v1171_v3  ;;  %v16798_v33 = vpop.f32.mrb[20].mxu1  ;;  %v20238_v8 = vpack.i.bf16 %v1176_v1, %v1171_v3 }
 0x288   : > { %v1265_v10 = vadd.f32 %v16798_v33, %v21571_v62  ;;  %v1259_v12 = vpop.f32.mrb[21].mxu1 }
 0x289   : > { %v1260_v24 = vadd.f32 %v1259_v12, %v21569_v16  ;;  %20194 = vrot.lane.b32.xlu1 %v21623_v40, %s21035_s16  ;;  %20209 = vrot.lane.b32.xlu0 %v21610_v27, %s21034_s29 }
 0x28b   : > { %v21708_v25 = vpack.c.bf16 %v1265_v10, %v1260_v24  ;;  %v16801_v26 = vpop.f32.mrb[22].mxu1  ;;  %v20243_v29 = vpack.i.bf16 %v1265_v10, %v1260_v24 }
 0x28c   : > { %v1275_v32 = vadd.f32 %v16801_v26, %v21578_v6  ;;  %v1269_v30 = vpop.f32.mrb[23].mxu1 }
 0x28d   : > { %v1270_v34 = vadd.f32 %v1269_v30, %v21583_v58  ;;  %20204 = vrot.lane.b32.xlu1 %v21638_v31, %s21035_s16  ;;  %20219 = vrot.lane.b32.xlu0 %v20188_v54, %s21035_s16 }
 0x28f   : > { %v21721_v27 = vpack.c.bf16 %v1275_v32, %v1270_v34  ;;  %v16811_v40 = vpop.f32.mrb[24].mxu1  ;;  %v20248_v36 = vpack.i.bf16 %v1275_v32, %v1270_v34 }
 0x290   : > { %v1378_v43 = vadd.f32 %v16811_v40, %v21578_v6  ;;  %v1372_v4 = vpop.f32.mrb[25].mxu1 }
 0x291   : > { %v1373_v47 = vadd.f32 %v1372_v4, %v21583_v58  ;;  %20214 = vrot.lane.b32.xlu1 %v20183_v46, %s21035_s16  ;;  %20229 = vrot.lane.b32.xlu0 %v20228_v0, %s21035_s16 }
 0x293   : > { %v21727_v49 = vpack.c.bf16 %v1378_v43, %v1373_v47  ;;  %v16818_v53 = vpop.f32.mrb[26].mxu1  ;;  %v20268_v55 = vpack.i.bf16 %v1378_v43, %v1373_v47 }
 0x294   : > { %v1474_v31 = vadd.f32 %v16818_v53, %v21571_v62  ;;  %v1468_v54 = vpop.f32.mrb[27].mxu1 }
 0x295   : > { %v1469_v57 = vadd.f32 %v1468_v54, %v21569_v16  ;;  %20224 = vrot.lane.b32.xlu1 %v20228_v0, %s21034_s29  ;;  %20239 = vrot.lane.b32.xlu0 %v20238_v8, %s21035_s16 }
 0x297   : > { %v21733_v21 = vpack.c.bf16 %v1474_v31, %v1469_v57  ;;  %v16821_v63 = vpop.f32.mrb[28].mxu1  ;;  %v20283_v1 = vpack.i.bf16 %v1474_v31, %v1469_v57 }
 0x298   : > { %v1484_v46 = vadd.f32 %v16821_v63, %v21578_v6  ;;  %v1478_v2 = vpop.f32.mrb[29].mxu1 }
 0x299   : > { %v1479_v3 = vadd.f32 %v1478_v2, %v21583_v58  ;;  %20234 = vrot.lane.b32.xlu1 %v20238_v8, %s21034_s29  ;;  %20249 = vrot.lane.b32.xlu0 %v20248_v36, %s21034_s29 }
 0x29b   : > { %v21739_v33 = vpack.c.bf16 %v1484_v46, %v1479_v3  ;;  %v16838_v10 = vpop.f32.mrb[30].mxu1  ;;  %v20288_v12 = vpack.i.bf16 %v1484_v46, %v1479_v3 }
 0x29c   : > { %v1669_v0 = vadd.f32 %v16838_v10, %v21571_v62  ;;  %v1663_v24 = vpop.f32.mrb[31].mxu1 }
 0x29d   : > { %v1664_v26 = vadd.f32 %v1663_v24, %v21569_v16  ;;  %20244 = vrot.lane.b32.xlu1 %v20243_v29, %s21034_s29  ;;  %20259 = vrot.lane.b32.xlu0 %v21587_v9, %s21034_s29 }
 0x29f   : > { %v21746_v32 = vpack.c.bf16 %v1669_v0, %v1664_v26  ;;  %v16841_v30 = vpop.f32.mrb[32].mxu1  ;;  %v20323_v8 = vpack.i.bf16 %v1669_v0, %v1664_v26 }
 0x2a0   : > { %v1679_v34 = vadd.f32 %v16841_v30, %v21578_v6  ;;  %v1673_v40 = vpop.f32.mrb[33].mxu1 }
 0x2a1   : > { %v1674_v43 = vadd.f32 %v1673_v40, %v21583_v58  ;;  %20254 = vrot.lane.b32.xlu1 %v20243_v29, %s21035_s16  ;;  %20269 = vrot.lane.b32.xlu0 %v20268_v55, %s21034_s29 }
 0x2a3   : > { %v21752_v4 = vpack.c.bf16 %v1679_v34, %v1674_v43  ;;  %v16858_v47 = vpop.f32.mrb[34].mxu1  ;;  %v20328_v53 = vpack.i.bf16 %v1679_v34, %v1674_v43 }
 0x2a4   : > { %v1865_v31 = vadd.f32 %v16858_v47, %v21571_v62  ;;  %v1859_v54 = vpop.f32.mrb[35].mxu1 }
 0x2a5   : > { %v1860_v57 = vadd.f32 %v1859_v54, %v21569_v16  ;;  %20264 = vrot.lane.b32.xlu1 %v20248_v36, %s21035_s16  ;;  %20279 = vrot.lane.b32.xlu0 %v20268_v55, %s21035_s16 }
 0x2a7   : > { %v21758_v63 = vpack.c.bf16 %v1865_v31, %v1860_v57  ;;  %v16861_v46 = vpop.f32.mrb[36].mxu1  ;;  %v20363_v2 = vpack.i.bf16 %v1865_v31, %v1860_v57 }
 0x2a8   : > { %v1875_v29 = vadd.f32 %v16861_v46, %v21578_v6  ;;  %v1869_v3 = vpop.f32.mrb[37].mxu1 }
 0x2a9   : > { %v1870_v10 = vadd.f32 %v1869_v3, %v21583_v58  ;;  %20274 = vrot.lane.b32.xlu1 %v21587_v9, %s21035_s16  ;;  %20289 = vrot.lane.b32.xlu0 %v20288_v12, %s21034_s29 }
 0x2ab   : > { %v21765_v0 = vpack.c.bf16 %v1875_v29, %v1870_v10  ;;  %v16878_v24 = vpop.f32.mrb[38].mxu1  ;;  %v20368_v36 = vpack.i.bf16 %v1875_v29, %v1870_v10 }
 0x2ac   : > { %v21768_v55 = vadd.f32 %v16878_v24, %v21571_v62  ;;  %v2057_v26 = vpop.f32.mrb[39].mxu1 }
 0x2ad   : > { %v21771_v30 = vadd.f32 %v2057_v26, %v21569_v16  ;;  %20284 = vrot.lane.b32.xlu1 %v20283_v1, %s21034_s29  ;;  %20299 = vrot.lane.b32.xlu0 %v21605_v23, %s21034_s29 }
 0x2af   : > { %v18627_v9 = vpack.c.bf16 %v21768_v55, %v21771_v30  ;;  %v16881_v34 = vpop.f32.mrb[40].mxu1  ;;  %v20403_v40 = vpack.i.bf16 %v21768_v55, %v21771_v30 }
 0x2b0   : > { %v21781_v43 = vadd.f32 %v16881_v34, %v21578_v6  ;;  %v2067_v62 = vpop.f32.mrb[41].mxu1  ;;  %v2089_v6 = vld [vmem:[%s27152_s6 + $0x8] sm:$0xff] }
 0x2b1   : > { %v21784_v47 = vadd.f32 %v2067_v62, %v21583_v58  ;;  %20294 = vrot.lane.b32.xlu1 %v20283_v1, %s21035_s16  ;;  %20309 = vrot.lane.b32.xlu0 %v21619_v38, %s21034_s29  ;;  %v2088_v58 = vld [vmem:[%s27152_s6] sm:$0xff]  ;;  %v2091_v1 = vld [vmem:[%s27152_s6 + $0x18] sm:$0xff] }
 0x2b2   : > { %v21887_v62 = vld [vmem:[%s27151_s5 + $0x28] sm:$0xff] }
 0x2b3   : > { %v18632_v16 = vpack.c.bf16 %v21781_v43, %v21784_v47  ;;  %v20408_v31 = vpack.i.bf16 %v21781_v43, %v21784_v47 }
 0x2b5   : > { %20304 = vrot.lane.b32.xlu1 %v20288_v12, %s21035_s16  ;;  %20319 = vrot.lane.b32.xlu0 %v21619_v38, %s21035_s16 }
 0x2b9   : > { %20314 = vrot.lane.b32.xlu1 %v21605_v23, %s21035_s16  ;;  %20329 = vrot.lane.b32.xlu0 %v20328_v53, %s21034_s29  ;;  %v2090_v23 = vld [vmem:[%s27152_s6 + $0x10] sm:$0xff] }
 0x2bd   : > { %20324 = vrot.lane.b32.xlu1 %v20323_v8, %s21034_s29  ;;  %20344 = vrot.lane.b32.xlu0 %v20328_v53, %s21035_s16 }
 0x2c1   : > { %20334 = vrot.lane.b32.xlu1 %v20323_v8, %s21035_s16  ;;  %20349 = vrot.lane.b32.xlu0 %v21633_v51, %s21035_s16 }
 0x2c5   : > { %20339 = vrot.lane.b32.xlu1 %v21633_v51, %s21034_s29  ;;  %20359 = vrot.lane.b32.xlu0 %v21647_v61, %s21035_s16 }
 0x2c9   : > { %20354 = vrot.lane.b32.xlu1 %v21647_v61, %s21034_s29  ;;  %20369 = vrot.lane.b32.xlu0 %v20368_v36, %s21034_s29 }
 0x2cd   : > { %20364 = vrot.lane.b32.xlu1 %v20363_v2, %s21034_s29  ;;  %20384 = vrot.lane.b32.xlu0 %v20368_v36, %s21035_s16 }
 0x2d1   : > { %20374 = vrot.lane.b32.xlu1 %v20363_v2, %s21035_s16  ;;  %20389 = vrot.lane.b32.xlu0 %v21658_v15, %s21035_s16 }
 0x2d5   : > { %20379 = vrot.lane.b32.xlu1 %v21658_v15, %s21034_s29  ;;  %20399 = vrot.lane.b32.xlu0 %v21677_v41, %s21035_s16  ;;  %v8742_v15 = vld [vmem:[%s27157_s11 + $0x28] sm:$0xff] }
 0x2d9   : > { %20394 = vrot.lane.b32.xlu1 %v21677_v41, %s21034_s29  ;;  %2603 = vperm.xlu0 %20141, %v2089_v6  }
 0x2dd   : > { %2598 = vperm.xlu1 %20142, %v2088_v58   ;;  %2608 = vperm.xlu0 %20141, %v2090_v23  }
 0x2df   : > { %v20145_v38 = vpop.permute.xlu0 %20144 }
 0x2e0   : > { %v20147_v51 = vunpack.i.h.bf16 %v20145_v38  ;;  %v20146_v61 = vunpack.i.l.bf16 %v20145_v38 }
 0x2e1   : > { %20404 = vrot.lane.b32.xlu1 %v20403_v40, %s21034_s29  ;;  %20409 = vrot.lane.b32.xlu0 %v20408_v31, %s21034_s29 }
 0x2e2   : > { %v21839_v41 = vpack.c.bf16 %v20147_v51, %v20146_v61  ;;  %v21900_v51 = vld [vmem:[%s27151_s5 + $0x40] sm:$0xff] }
 0x2e3   : > { %v20150_v12 = vpop.permute.xlu0 %20149 }
 0x2e4   : > { %v20152_v8 = vunpack.i.h.bf16 %v20150_v12  ;;  %v20151_v53 = vunpack.i.l.bf16 %v20150_v12  ;;  %18012 = vmatprep.subr.msk.bf16.mxu0 %vm21833_vm13, %v21839_v41  ;;  %v21912_v12 = vld [vmem:[%s27151_s5 + $0x58] sm:$0xff] }
 0x2e5   : > { %2613 = vperm.xlu1 %20142, %v2091_v1   ;;  %20419 = vrot.lane.b32.xlu0 %v20408_v31, %s21035_s16 }
 0x2e6   : > { %v21848_v54 = vpack.c.bf16 %v20152_v8, %v20151_v53  ;;  %18014 = vmatpush3.bf16.msra.mxu0 %v18013_v14 }
 0x2e7   : > { %v20155_v57 = vpop.permute.xlu1 %20154 }
 0x2e8   : > { %v20157_v46 = vunpack.i.h.bf16 %v20155_v57  ;;  %v20156_v2 = vunpack.i.l.bf16 %v20155_v57  ;;  %18017 = vmatprep.subr.msk.bf16.mxu0 %vm21833_vm13, %v21848_v54 }
 0x2e9   : > { %20414 = vrot.lane.b32.xlu1 %v20403_v40, %s21035_s16 }
 0x2ea   : > { %v21863_v3 = vpack.c.bf16 %v20157_v46, %v20156_v2  ;;  %18019 = vmatpush3.bf16.msra.mxu0 %v18018_v28 }
 0x2eb   : > { %v20160_v37 = vpop.permute.xlu1 %20159  ;;  %v20170_v56 = vpop.permute.xlu0 %20169 }
 0x2ec   : > { %v20162_v14 = vunpack.i.h.bf16 %v20160_v37  ;;  %v20161_v10 = vunpack.i.l.bf16 %v20160_v37  ;;  %18054 = vmatprep.subr.msk.bf16.mxu1 %vm21858_vm14, %v21863_v3  ;;  %v20172_v34 = vunpack.i.h.bf16 %v20170_v56  ;;  %v20171_v40 = vunpack.i.l.bf16 %v20170_v56 }
 0x2ed   : > { %18057 = vmatpush3.bf16.msk.msra.mxu1 %vm21858_vm14, %v21863_v3 }
 0x2ee   : > { %v21874_v24 = vpack.c.bf16 %v20162_v14, %v20161_v10  ;;  %v21889_v58 = vpack.c.bf16 %v20172_v34, %v20171_v40 }
 0x2ef   : > { %v20165_v36 = vpop.permute.xlu1 %20164  ;;  %v20175_v26 = vpop.permute.xlu0 %20174 }
 0x2f0   : > { %v20167_v18 = vunpack.i.h.bf16 %v20165_v36  ;;  %v20166_v19 = vunpack.i.l.bf16 %v20165_v36  ;;  %18060 = vmatprep.subr.msk.bf16.mxu1 %vm21858_vm14, %v21874_v24  ;;  %v20177_v23 = vunpack.i.h.bf16 %v20175_v26  ;;  %v20176_v38 = vunpack.i.l.bf16 %v20175_v26 }
 0x2f1   : > { %18063 = vmatpush3.bf16.msk.msra.mxu1 %vm21858_vm14, %v21874_v24 }
 0x2f2   : > { %v21882_v28 = vpack.c.bf16 %v20167_v18, %v20166_v19  ;;  %v18030_v57 = vpack.c.bf16 %v20177_v23, %v20176_v38 }
 0x2f3   : > { %v20185_v31 = vpop.permute.xlu1 %20184  ;;  %v20180_v6 = vpop.permute.xlu0 %20179 }
 0x2f4   : > { %18022 = vmatprep.subr.msk.bf16.mxu0 %vm21833_vm13, %v21882_v28  ;;  %18066 = vmatprep.subr.msk.bf16.mxu1 %vm21833_vm13, %v21882_v28  ;;  %v20187_v61 = vunpack.i.h.bf16 %v20185_v31  ;;  %v20186_v1 = vunpack.i.l.bf16 %v20185_v31  ;;  %v20181_v46 = vunpack.i.l.bf16 %v20180_v6 }
 0x2f5   : > { %18024 = vmatpush3.bf16.msra.mxu0 %v21621_v50  ;;  %16891 = vmatmul.mubr.msk.f32.vlgmr.msra.gmra.mrb[42].mxu1 %vm2616_vm12, %v21887_v62 }
 0x2f6   : > { %18068 = vmatpush3.bf16.msra.mxu1 %v21621_v50  ;;  %18027 = vmatprep.subr.msk.bf16.mxu0 %vm21833_vm13, %v21889_v58  ;;  %v20182_v50 = vunpack.i.h.bf16 %v20180_v6  ;;  %v21919_v2 = vpack.c.bf16 %v20187_v61, %v20186_v1 }
 0x2f7   : > { %18071 = vmatprep.subr.msk.bf16.mxu1 %vm21833_vm13, %v21889_v58  ;;  %v20190_v8 = vpop.permute.xlu1 %20189  ;;  %v20200_v53 = vpop.permute.xlu0 %20199  ;;  %16893 = vmatprep.mubr.msk.f32.mxu1 %vm2616_vm12, %v21900_v51 }
 0x2f8   : > { %v20192_v37 = vunpack.i.h.bf16 %v20190_v8  ;;  %v20191_v56 = vunpack.i.l.bf16 %v20190_v8  ;;  %v18035_v10 = vpack.c.bf16 %v20182_v50, %v20181_v46  ;;  %v20201_v18 = vunpack.i.l.bf16 %v20200_v53 }
 0x2f9   : > { %18029 = vmatpush3.bf16.msra.mxu0 %v21635_v52  ;;  %16894 = vmatmul.mubr.msk.f32.gmra.mrb[44].mxu1 %vm2616_vm12, %v21912_v12 }
 0x2fa   : > { %18073 = vmatpush3.bf16.msra.mxu1 %v21635_v52  ;;  %18032 = vmatprep.subr.msk.bf16.mxu0 %vm21858_vm14, %v18030_v57  ;;  %v21931_v34 = vpack.c.bf16 %v20192_v37, %v20191_v56  ;;  %v20202_v52 = vunpack.i.h.bf16 %v20200_v53 }
 0x2fb   : > { %18076 = vmatprep.subr.msk.bf16.mxu1 %vm21833_vm13, %v21919_v2  ;;  %v20195_v14 = vpop.permute.xlu1 %20194  ;;  %2867 = vmatprep.mubr.f32.mxu1 %v21713_v13  ;;  %v20210_v40 = vpop.permute.xlu0 %20209 }
 0x2fc   : > { %v20197_v36 = vunpack.i.h.bf16 %v20195_v14  ;;  %v20196_v26 = vunpack.i.l.bf16 %v20195_v14  ;;  %v18043_v38 = vpack.c.bf16 %v20202_v52, %v20201_v18  ;;  %v20212_v61 = vunpack.i.h.bf16 %v20210_v40 }
 0x2fd   : > { %18034 = vmatpush3.bf16.msra.mxu0 %v21649_v45  ;;  %v20211_v1 = vunpack.i.l.bf16 %v20210_v40  ;;  %v21969_v40 = vld [vmem:[%s27151_s5 + $0x20] sm:$0xff] }
 0x2fe   : > { %18078 = vmatpush3.bf16.msra.mxu1 %v21649_v45  ;;  %18037 = vmatprep.subr.msk.bf16.mxu0 %vm21858_vm14, %v18035_v10  ;;  %v18040_v31 = vpack.c.bf16 %v20197_v36, %v20196_v26  ;;  %v21960_v26 = vld [vmem:[%s27151_s5] sm:$0xff] }
 0x2ff   : > { %18081 = vmatprep.subr.msk.bf16.mxu1 %vm21833_vm13, %v21931_v34  ;;  %v20205_v19 = vpop.permute.xlu1 %20204  ;;  %v20220_v8 = vpop.permute.xlu0 %20219  ;;  %v18049_v37 = vpack.c.bf16 %v20212_v61, %v20211_v1  ;;  %v22021_v61 = vld [vmem:[%s27151_s5 + $0x50] sm:$0xff] }
 0x300   : > { %v20207_v6 = vunpack.i.h.bf16 %v20205_v19  ;;  %v20206_v23 = vunpack.i.l.bf16 %v20205_v19  ;;  %v20222_v56 = vunpack.i.h.bf16 %v20220_v8  ;;  %v20221_v14 = vunpack.i.l.bf16 %v20220_v8 }
 0x301   : > { %18039 = vmatpush3.bf16.msra.mxu0 %v21665_v22 }
 0x302   : > { %18083 = vmatpush3.bf16.msra.mxu1 %v21665_v22  ;;  %18042 = vmatprep.subr.msk.bf16.mxu0 %vm21858_vm14, %v18040_v31  ;;  %v18046_v57 = vpack.c.bf16 %v20207_v6, %v20206_v23  ;;  %v21974_v52 = vpack.c.bf16 %v20222_v56, %v20221_v14  ;;  %v21995_v6 = vld [vmem:[%s27151_s5 + $0x38] sm:$0xff] }
 0x303   : > { %18086 = vmatprep.subr.msk.bf16.mxu1 %vm21858_vm14, %v18040_v31  ;;  %v20215_v53 = vpop.permute.xlu1 %20214  ;;  %v20230_v36 = vpop.permute.xlu0 %20229  ;;  %v21984_v31 = vld [vmem:[%s27151_s5 + $0x18] sm:$0xff] }
 0x304   : > { %v20217_v50 = vunpack.i.h.bf16 %v20215_v53  ;;  %v20216_v46 = vunpack.i.l.bf16 %v20215_v53  ;;  %v20232_v18 = vunpack.i.h.bf16 %v20230_v36  ;;  %v20231_v19 = vunpack.i.l.bf16 %v20230_v36 }
 0x305   : > { %18045 = vmatpush3.bf16.msk.msra.mxu0 %vm21833_vm13, %v18043_v38 }
 0x306   : > { %18088 = vmatpush3.bf16.msra.mxu1 %v21679_v42  ;;  %18048 = vmatprep.subr.msk.bf16.mxu0 %vm21858_vm14, %v18046_v57  ;;  %v21953_v10 = vpack.c.bf16 %v20217_v50, %v20216_v46  ;;  %v22000_v23 = vpack.c.bf16 %v20232_v18, %v20231_v19 }
 0x307   : > { %18091 = vmatprep.subr.msk.bf16.mxu1 %vm21858_vm14, %v18046_v57  ;;  %v20225_v38 = vpop.permute.xlu1 %20224  ;;  %v20240_v53 = vpop.permute.xlu0 %20239 }
 0x308   : > { %v20227_v1 = vunpack.i.h.bf16 %v20225_v38  ;;  %v20226_v8 = vunpack.i.l.bf16 %v20225_v38  ;;  %v20242_v50 = vunpack.i.h.bf16 %v20240_v53  ;;  %v20241_v46 = vunpack.i.l.bf16 %v20240_v53 }
 0x309   : > { %18051 = vmatpush3.bf16.msk.msra.mxu0 %vm21833_vm13, %v18049_v37 }
 0x30a   : > { %18093 = vmatpush3.bf16.msra.mxu1 %v21686_v44  ;;  %18108 = vmatprep.subr.msk.bf16.mxu0 %vm21858_vm14, %v21953_v10  ;;  %v22040_v37 = vpack.c.bf16 %v20227_v1, %v20226_v8 }
 0x30b   : > { %18096 = vmatprep.subr.msk.bf16.mxu1 %vm21858_vm14, %v21863_v3  ;;  %v20235_v57 = vpop.permute.xlu1 %20234  ;;  %v20250_v38 = vpop.permute.xlu0 %20249 }
 0x30c   : > { %2694 = vmatmul.mubr.f32.vlgmr.msra.gmra.mrb[16].mxu0 %v21960_v26  ;;  %v20237_v56 = vunpack.i.h.bf16 %v20235_v57  ;;  %v20236_v14 = vunpack.i.l.bf16 %v20235_v57  ;;  %v20251_v8 = vunpack.i.l.bf16 %v20250_v38 }
 0x30d   : > { %18111 = vmatpush3.bf16.msk.msra.mxu0 %vm21858_vm14, %v21953_v10  ;;  %2698 = vmatprep.mubr.f32.mxu0 %v21969_v40 }
 0x30e   : > { %18099 = vmatpush3.bf16.msk.msra.mxu1 %vm21833_vm13, %v21839_v41  ;;  %18114 = vmatprep.subr.msk.bf16.mxu0 %vm21858_vm14, %v21974_v52  ;;  %v22010_v41 = vld [vmem:[%s27151_s5 + $0x30] sm:$0xff]  ;;  %v22054_v36 = vpack.c.bf16 %v20237_v56, %v20236_v14 }
 0x30f   : > { %18102 = vmatprep.subr.msk.bf16.mxu1 %vm21858_vm14, %v21874_v24  ;;  %v20260_v14 = vpop.permute.xlu0 %20259 }
 0x310   : > { %2699 = vmatmul.mubr.f32.gmra.mrb[18].mxu0 %v21984_v31 }
 0x311   : > { %18117 = vmatpush3.bf16.msk.msra.mxu0 %vm21858_vm14, %v21974_v52  ;;  %2703 = vmatprep.mubr.f32.mxu0 %v21995_v6 }
 0x312   : > { %18105 = vmatpush3.bf16.msk.msra.mxu1 %vm21833_vm13, %v21848_v54  ;;  %18162 = vmatprep.subr.msk.bf16.mxu0 %vm21858_vm14, %v22000_v23  ;;  %v22032_v54 = vld [vmem:[%s27151_s5 + $0x48] sm:$0xff] }
 0x313   : > { %18120 = vmatprep.subr.msk.bf16.mxu1 %vm21833_vm13, %v21919_v2 }
 0x314   : > { %2704 = vmatmul.mubr.f32.gmra.mrb[20].mxu0 %v22010_v41 }
 0x315   : > { %2868 = vmatmul.mubr.f32.vlgmr.msra.gmra.mrb[46].mxu1 %v21960_v26  ;;  %2708 = vmatprep.mubr.f32.mxu0 %v22021_v61 }
 0x316   : > { %18122 = vmatpush3.bf16.msra.mxu1 %v21649_v45  ;;  %2872 = vmatprep.mubr.f32.mxu1 %v21969_v40  ;;  %v22050_v45 = vpack.c.bf16 %v20242_v50, %v20241_v46 }
 0x317   : > { %18125 = vmatprep.subr.msk.bf16.mxu1 %vm21833_vm13, %v21931_v34 }
 0x318   : > { %2709 = vmatmul.mubr.f32.gmra.mrb[22].mxu0 %v22032_v54 }
 0x319   : > { %2873 = vmatmul.mubr.f32.gmra.mrb[48].mxu1 %v21984_v31  ;;  %16904 = vmatprep.mubr.msk.f32.mxu0 %vm2616_vm12, %v21663_v17 }
 0x31a   : > { %18127 = vmatpush3.bf16.msra.mxu1 %v21665_v22  ;;  %2877 = vmatprep.mubr.f32.mxu1 %v21995_v6  ;;  %v20245_v22 = vpop.permute.xlu1 %20244 }
 0x31b   : > { %18130 = vmatprep.subr.msk.bf16.mxu1 %vm21833_vm13, %v22040_v37  ;;  %v20247_v18 = vunpack.i.h.bf16 %v20245_v22  ;;  %v20246_v19 = vunpack.i.l.bf16 %v20245_v22 }
 0x31c   : > { %16905 = vmatmul.mubr.msk.f32.vlgmr.msra.gmra.mrb[24].mxu0 %vm2616_vm12, %v21887_v62 }
 0x31d   : > { %2878 = vmatmul.mubr.f32.gmra.mrb[50].mxu1 %v22010_v41  ;;  %18165 = vmatpush3.bf16.msk.msra.mxu0 %vm21858_vm14, %v22000_v23  ;;  %v22098_v53 = vpack.c.bf16 %v20247_v18, %v20246_v19 }
 0x31e   : > { %18132 = vmatpush3.bf16.msra.mxu1 %v21679_v42  ;;  %18168 = vmatprep.subr.msk.bf16.mxu0 %vm21858_vm14, %v22050_v45  ;;  %v20255_v1 = vpop.permute.xlu1 %20254 }
 0x31f   : > { %18135 = vmatprep.subr.msk.bf16.mxu1 %vm21833_vm13, %v22054_v36  ;;  %2882 = vmatprep.mubr.f32.mxu1 %v22021_v61  ;;  %v20257_v57 = vunpack.i.h.bf16 %v20255_v1  ;;  %v20256_v50 = vunpack.i.l.bf16 %v20255_v1 }
 0x320   : > { %16907 = vmatprep.mubr.msk.f32.mxu0 %vm2616_vm12, %v21900_v51 }
 0x321   : > { %2883 = vmatmul.mubr.f32.gmra.mrb[52].mxu1 %v22032_v54  ;;  %16908 = vmatmul.mubr.msk.f32.gmra.mrb[26].mxu0 %vm2616_vm12, %v21912_v12 }
 0x322   : > { %18171 = vmatpush3.bf16.msk.msra.mxu0 %vm21858_vm14, %v22050_v45  ;;  %18137 = vmatpush3.bf16.msra.mxu1 %v21686_v44 }
 0x323   : > { %18174 = vmatprep.subr.msk.bf16.mxu0 %vm21833_vm13, %v22040_v37  ;;  %18140 = vmatprep.subr.msk.bf16.mxu1 %vm21858_vm14, %v21863_v3  ;;  %v20252_v3 = vunpack.i.h.bf16 %v20250_v38 }
 0x324   : > { %16918 = vmatprep.mubr.msk.f32.mxu0 %vm2616_vm12, %v21663_v17  ;;  %3041 = vmatprep.mubr.f32.mxu1 %v21713_v13 }
 0x325   : > { %16919 = vmatmul.mubr.msk.f32.vlgmr.msra.gmra.mrb[28].mxu0 %vm2616_vm12, %v21887_v62 }
 0x326   : > { %18176 = vmatpush3.bf16.msra.mxu0 %v21679_v42  ;;  %18142 = vmatpush3.bf16.msra.mxu1 %v21693_v59  ;;  %v20265_v42 = vpop.permute.xlu1 %20264 }
 0x327   : > { %18179 = vmatprep.subr.msk.bf16.mxu0 %vm21833_vm13, %v22054_v36  ;;  %18145 = vmatprep.subr.msk.bf16.mxu1 %vm21858_vm14, %v21874_v24  ;;  %v22111_v24 = vpack.c.bf16 %v20252_v3, %v20251_v8  ;;  %v20267_v46 = vunpack.i.h.bf16 %v20265_v42  ;;  %v20266_v56 = vunpack.i.l.bf16 %v20265_v42  ;;  %v20261_v3 = vunpack.i.l.bf16 %v20260_v14 }
 0x328   : > { %16921 = vmatprep.mubr.msk.f32.mxu0 %vm2616_vm12, %v21900_v51 }
 0x329   : > { %16922 = vmatmul.mubr.msk.f32.gmra.mrb[30].mxu0 %vm2616_vm12, %v21912_v12 }
 0x32a   : > { %18181 = vmatpush3.bf16.msra.mxu0 %v21686_v44  ;;  %18147 = vmatpush3.bf16.msra.mxu1 %v21700_v5  ;;  %v22123_v44 = vpack.c.bf16 %v20257_v57, %v20256_v50  ;;  %v20275_v22 = vpop.permute.xlu1 %20274 }
 0x32b   : > { %18184 = vmatprep.subr.msk.bf16.mxu0 %vm21833_vm13, %v22098_v53  ;;  %18150 = vmatprep.subr.msk.bf16.mxu1 %vm21858_vm14, %v21953_v10  ;;  %v20277_v18 = vunpack.i.h.bf16 %v20275_v22  ;;  %v20276_v19 = vunpack.i.l.bf16 %v20275_v22 }
 0x32c   : > { %3215 = vmatprep.mubr.f32.mxu0 %v21713_v13 }
 0x32e   : > { %18186 = vmatpush3.bf16.msra.mxu0 %v21693_v59  ;;  %18153 = vmatpush3.bf16.msk.msra.mxu1 %vm21833_vm13, %v21882_v28  ;;  %v22135_v28 = vpack.c.bf16 %v20267_v46, %v20266_v56  ;;  %v20285_v57 = vpop.permute.xlu1 %20284 }
 0x32f   : > { %18189 = vmatprep.subr.msk.bf16.mxu0 %vm21833_vm13, %v22111_v24  ;;  %18156 = vmatprep.subr.msk.bf16.mxu1 %vm21858_vm14, %v21974_v52  ;;  %v20286_v46 = vunpack.i.l.bf16 %v20285_v57 }
 0x332   : > { %18191 = vmatpush3.bf16.msra.mxu0 %v21700_v5  ;;  %18159 = vmatpush3.bf16.msk.msra.mxu1 %vm21833_vm13, %v21889_v58  ;;  %v20270_v58 = vpop.permute.xlu0 %20269 }
 0x333   : > { %18194 = vmatprep.subr.msk.bf16.mxu0 %vm21858_vm14, %v21953_v10  ;;  %18216 = vmatprep.subr.msk.bf16.mxu1 %vm21858_vm14, %v22123_v44  ;;  %v22149_v10 = vpack.c.bf16 %v20277_v18, %v20276_v19  ;;  %v20271_v42 = vunpack.i.l.bf16 %v20270_v58  ;;  %v20295_v18 = vpop.permute.xlu1 %20294 }
 0x334   : > { %v20296_v19 = vunpack.i.l.bf16 %v20295_v18 }
 0x335   : > { %3042 = vmatmul.mubr.f32.vlgmr.msra.gmra.mrb[54].mxu1 %v21960_v26 }
 0x336   : > { %18196 = vmatpush3.bf16.msra.mxu0 %v21708_v25  ;;  %18219 = vmatpush3.bf16.msk.msra.mxu1 %vm21858_vm14, %v22123_v44 }
 0x337   : > { %18199 = vmatprep.subr.msk.bf16.mxu0 %vm21858_vm14, %v21974_v52  ;;  %18222 = vmatprep.subr.msk.bf16.mxu1 %vm21858_vm14, %v22135_v28  ;;  %v20280_v52 = vpop.permute.xlu0 %20279 }
 0x338   : > { %3046 = vmatprep.mubr.f32.mxu1 %v21969_v40  ;;  %v20282_v38 = vunpack.i.h.bf16 %v20280_v52  ;;  %v20281_v1 = vunpack.i.l.bf16 %v20280_v52 }
 0x339   : > { %3047 = vmatmul.mubr.f32.gmra.mrb[56].mxu1 %v21984_v31 }
 0x33a   : > { %18201 = vmatpush3.bf16.msra.mxu0 %v21721_v27  ;;  %18225 = vmatpush3.bf16.msk.msra.mxu1 %vm21858_vm14, %v22135_v28  ;;  %v22180_v8 = vpack.c.bf16 %v20282_v38, %v20281_v1 }
 0x33b   : > { %18204 = vmatprep.subr.msk.bf16.mxu0 %vm21858_vm14, %v22000_v23  ;;  %18270 = vmatprep.subr.msk.bf16.mxu1 %vm21858_vm14, %v22149_v10  ;;  %v20290_v56 = vpop.permute.xlu0 %20289 }
 0x33c   : > { %3051 = vmatprep.mubr.f32.mxu1 %v21995_v6 }
 0x33d   : > { %3052 = vmatmul.mubr.f32.gmra.mrb[58].mxu1 %v22010_v41 }
 0x33e   : > { %18207 = vmatpush3.bf16.msk.msra.mxu0 %vm21833_vm13, %v21919_v2  ;;  %3056 = vmatprep.mubr.f32.mxu1 %v22021_v61  ;;  %v20262_v2 = vunpack.i.h.bf16 %v20260_v14  ;;  %v20291_v14 = vunpack.i.l.bf16 %v20290_v56 }
 0x33f   : > { %18210 = vmatprep.subr.msk.bf16.mxu0 %vm21858_vm14, %v22050_v45  ;;  %v20300_v52 = vpop.permute.xlu0 %20299 }
 0x341   : > { %3057 = vmatmul.mubr.f32.gmra.mrb[60].mxu1 %v22032_v54 }
 0x342   : > { %18213 = vmatpush3.bf16.msk.msra.mxu0 %vm21833_vm13, %v21931_v34  ;;  %16932 = vmatprep.mubr.msk.f32.mxu1 %vm2616_vm12, %v21663_v17  ;;  %v22198_v34 = vpack.c.bf16 %v20262_v2, %v20261_v3  ;;  %v20301_v3 = vunpack.i.l.bf16 %v20300_v52 }
 0x343   : > { %18228 = vmatprep.subr.msk.bf16.mxu0 %vm21833_vm13, %v22098_v53 }
 0x345   : > { %3216 = vmatmul.mubr.f32.vlgmr.msra.gmra.mrb[32].mxu0 %v21960_v26  ;;  %16933 = vmatmul.mubr.msk.f32.vlgmr.msra.gmra.mrb[62].mxu1 %vm2616_vm12, %v21887_v62 }
 0x346   : > { %18230 = vmatpush3.bf16.msra.mxu0 %v21693_v59  ;;  %18273 = vmatpush3.bf16.msk.msra.mxu1 %vm21858_vm14, %v22149_v10  ;;  %v20272_v59 = vunpack.i.h.bf16 %v20270_v58 }
 0x347   : > { %18233 = vmatprep.subr.msk.bf16.mxu0 %vm21833_vm13, %v22111_v24  ;;  %18276 = vmatprep.subr.msk.bf16.mxu1 %vm21858_vm14, %v22180_v8 }
 0x348   : > { %3220 = vmatprep.mubr.f32.mxu0 %v21969_v40  ;;  %16935 = vmatprep.mubr.msk.f32.mxu1 %vm2616_vm12, %v21900_v51  ;;  %v22216_v50 = vpack.c.bf16 %v20272_v59, %v20271_v42 }
 0x349   : > { %3221 = vmatmul.mubr.f32.gmra.mrb[34].mxu0 %v21984_v31  ;;  %16936 = vmatmul.mubr.msk.f32.gmra.mrb[64].mxu1 %vm2616_vm12, %v21912_v12 }
 0x34a   : > { %18235 = vmatpush3.bf16.msra.mxu0 %v21700_v5  ;;  %18279 = vmatpush3.bf16.msk.msra.mxu1 %vm21858_vm14, %v22180_v8  ;;  %v20287_v5 = vunpack.i.h.bf16 %v20285_v57 }
 0x34b   : > { %18238 = vmatprep.subr.msk.bf16.mxu0 %vm21833_vm13, %v22198_v34  ;;  %18282 = vmatprep.subr.msk.bf16.mxu1 %vm21833_vm13, %v22198_v34 }
 0x34c   : > { %3225 = vmatprep.mubr.f32.mxu0 %v21995_v6  ;;  %16946 = vmatprep.mubr.msk.f32.mxu1 %vm2616_vm12, %v21663_v17  ;;  %v20292_v17 = vunpack.i.h.bf16 %v20290_v56  ;;  %v22232_v22 = vpack.c.bf16 %v20287_v5, %v20286_v46 }
 0x34d   : > { %3226 = vmatmul.mubr.f32.gmra.mrb[36].mxu0 %v22010_v41  ;;  %16947 = vmatmul.mubr.msk.f32.vlgmr.msra.gmra.mrb[66].mxu1 %vm2616_vm12, %v21887_v62 }
 0x34e   : > { %18240 = vmatpush3.bf16.msra.mxu0 %v21708_v25  ;;  %18284 = vmatpush3.bf16.msra.mxu1 %v21708_v25  ;;  %v22247_v25 = vpack.c.bf16 %v20292_v17, %v20291_v14 }
 0x34f   : > { %18243 = vmatprep.subr.msk.bf16.mxu0 %vm21833_vm13, %v22216_v50  ;;  %18287 = vmatprep.subr.msk.bf16.mxu1 %vm21833_vm13, %v22216_v50 }
 0x350   : > { %3230 = vmatprep.mubr.f32.mxu0 %v22021_v61  ;;  %16949 = vmatprep.mubr.msk.f32.mxu1 %vm2616_vm12, %v21900_v51 }
 0x351   : > { %3231 = vmatmul.mubr.f32.gmra.mrb[38].mxu0 %v22032_v54  ;;  %16950 = vmatmul.mubr.msk.f32.gmra.mrb[68].mxu1 %vm2616_vm12, %v21912_v12 }
 0x352   : > { %18245 = vmatpush3.bf16.msra.mxu0 %v21721_v27  ;;  %18289 = vmatpush3.bf16.msra.mxu1 %v21721_v27  ;;  %v20305_v27 = vpop.permute.xlu1 %20304 }
 0x353   : > { %18248 = vmatprep.subr.msk.bf16.mxu0 %vm21858_vm14, %v22000_v23  ;;  %18292 = vmatprep.subr.msk.bf16.mxu1 %vm21833_vm13, %v22232_v22  ;;  %v20297_v23 = vunpack.i.h.bf16 %v20295_v18  ;;  %v20306_v58 = vunpack.i.l.bf16 %v20305_v27 }
 0x354   : > { %3389 = vmatprep.mubr.f32.mxu0 %v21713_v13  ;;  %3563 = vmatprep.mubr.f32.mxu1 %v21713_v13 }
 0x356   : > { %18250 = vmatpush3.bf16.msra.mxu0 %v21585_v7  ;;  %18294 = vmatpush3.bf16.msra.mxu1 %v21585_v7  ;;  %v20315_v38 = vpop.permute.xlu1 %20314 }
 0x357   : > { %18253 = vmatprep.subr.msk.bf16.mxu0 %vm21858_vm14, %v22050_v45  ;;  %18297 = vmatprep.subr.msk.bf16.mxu1 %vm21833_vm13, %v22247_v25  ;;  %v22275_v45 = vpack.c.bf16 %v20297_v23, %v20296_v19  ;;  %v20316_v1 = vunpack.i.l.bf16 %v20315_v38 }
 0x35a   : > { %18255 = vmatpush3.bf16.msra.mxu0 %v21727_v49  ;;  %18299 = vmatpush3.bf16.msra.mxu1 %v21727_v49 }
 0x35b   : > { %18258 = vmatprep.subr.msk.bf16.mxu0 %vm21858_vm14, %v22123_v44  ;;  %18302 = vmatprep.subr.msk.bf16.mxu1 %vm21858_vm14, %v22123_v44  ;;  %v20307_v44 = vunpack.i.h.bf16 %v20305_v27 }
 0x35e   : > { %18261 = vmatpush3.bf16.msk.msra.mxu0 %vm21833_vm13, %v22040_v37  ;;  %18304 = vmatpush3.bf16.msra.mxu1 %v21733_v21  ;;  %v22287_v37 = vpack.c.bf16 %v20307_v44, %v20306_v58 }
 0x35f   : > { %18264 = vmatprep.subr.msk.bf16.mxu0 %vm21858_vm14, %v22135_v28  ;;  %18307 = vmatprep.subr.msk.bf16.mxu1 %vm21858_vm14, %v22135_v28  ;;  %v20317_v28 = vunpack.i.h.bf16 %v20315_v38 }
 0x361   : > { %v22303_v2 = vpack.c.bf16 %v20317_v28, %v20316_v1 }
 0x362   : > { %18267 = vmatpush3.bf16.msk.msra.mxu0 %vm21833_vm13, %v22054_v36  ;;  %18309 = vmatpush3.bf16.msra.mxu1 %v21739_v33  ;;  %v20310_v36 = vpop.permute.xlu0 %20309 }
 0x363   : > { %18312 = vmatprep.subr.msk.bf16.mxu1 %vm21858_vm14, %v22149_v10  ;;  %18324 = vmatprep.subr.msk.bf16.mxu0 %vm21858_vm14, %v22275_v45  ;;  %v20312_v42 = vunpack.i.h.bf16 %v20310_v36  ;;  %v20311_v57 = vunpack.i.l.bf16 %v20310_v36 }
 0x365   : > { %3390 = vmatmul.mubr.f32.vlgmr.msra.gmra.mrb[40].mxu0 %v21960_v26  ;;  %v22343_v56 = vpack.c.bf16 %v20312_v42, %v20311_v57 }
 0x366   : > { %18315 = vmatpush3.bf16.msk.msra.mxu1 %vm21833_vm13, %v22098_v53  ;;  %18327 = vmatpush3.bf16.msk.msra.mxu0 %vm21858_vm14, %v22275_v45  ;;  %v20302_v53 = vunpack.i.h.bf16 %v20300_v52 }
 0x367   : > { %18318 = vmatprep.subr.msk.bf16.mxu1 %vm21858_vm14, %v22180_v8  ;;  %18330 = vmatprep.subr.msk.bf16.mxu0 %vm21858_vm14, %v22287_v37 }
 0x368   : > { %3394 = vmatprep.mubr.f32.mxu0 %v21969_v40  ;;  %v22327_v59 = vpack.c.bf16 %v20302_v53, %v20301_v3 }
 0x369   : > { %3395 = vmatmul.mubr.f32.gmra.mrb[42].mxu0 %v21984_v31 }
 0x36a   : > { %18321 = vmatpush3.bf16.msk.msra.mxu1 %vm21833_vm13, %v22111_v24  ;;  %18333 = vmatpush3.bf16.msk.msra.mxu0 %vm21858_vm14, %v22287_v37  ;;  %v20320_v24 = vpop.permute.xlu0 %20319 }
 0x36b   : > { %18336 = vmatprep.subr.msk.bf16.mxu1 %vm21833_vm13, %v22232_v22  ;;  %18378 = vmatprep.subr.msk.bf16.mxu0 %vm21858_vm14, %v22303_v2  ;;  %v20322_v5 = vunpack.i.h.bf16 %v20320_v24  ;;  %v20321_v46 = vunpack.i.l.bf16 %v20320_v24 }
 0x36c   : > { %3399 = vmatprep.mubr.f32.mxu0 %v21995_v6 }
 0x36d   : > { %3400 = vmatmul.mubr.f32.gmra.mrb[44].mxu0 %v22010_v41  ;;  %3564 = vmatmul.mubr.f32.vlgmr.msra.gmra.mrb[70].mxu1 %v21960_v26  ;;  %v22345_v17 = vpack.c.bf16 %v20322_v5, %v20321_v46 }
 0x36e   : > { %18338 = vmatpush3.bf16.msra.mxu1 %v21585_v7  ;;  %3404 = vmatprep.mubr.f32.mxu0 %v22021_v61  ;;  %v22339_v7 = vld [vmem:[%s27151_s5 + $0x10] sm:$0xff]  ;;  %v20330_v27 = vpop.permute.xlu0 %20329 }
 0x36f   : > { %18341 = vmatprep.subr.msk.bf16.mxu1 %vm21833_vm13, %v22247_v25  ;;  %3568 = vmatprep.mubr.f32.mxu1 %v21969_v40  ;;  %v20331_v23 = vunpack.i.l.bf16 %v20330_v27 }
 0x371   : > { %3405 = vmatmul.mubr.f32.gmra.mrb[46].mxu0 %v22032_v54  ;;  %3569 = vmatmul.mubr.f32.gmra.mrb[72].mxu1 %v21984_v31 }
 0x372   : > { %18343 = vmatpush3.bf16.msra.mxu1 %v21727_v49  ;;  %3573 = vmatprep.mubr.f32.mxu1 %v21995_v6  ;;  %v20325_v49 = vpop.permute.xlu1 %20324 }
 0x373   : > { %18346 = vmatprep.subr.msk.bf16.mxu1 %vm21833_vm13, %v22327_v59  ;;  %16960 = vmatprep.mubr.msk.f32.mxu0 %vm2616_vm12, %v22339_v7  ;;  %v20327_v14 = vunpack.i.h.bf16 %v20325_v49  ;;  %v20326_v18 = vunpack.i.l.bf16 %v20325_v49 }
 0x375   : > { %3574 = vmatmul.mubr.f32.gmra.mrb[74].mxu1 %v22010_v41  ;;  %16961 = vmatmul.mubr.msk.f32.vlgmr.msra.gmra.mrb[48].mxu0 %vm2616_vm12, %v21887_v62  ;;  %v22391_v19 = vpack.c.bf16 %v20327_v14, %v20326_v18 }
 0x376   : > { %18381 = vmatpush3.bf16.msk.msra.mxu0 %vm21858_vm14, %v22303_v2  ;;  %18348 = vmatpush3.bf16.msra.mxu1 %v21733_v21 }
 0x377   : > { %18384 = vmatprep.subr.msk.bf16.mxu0 %vm21858_vm14, %v22345_v17  ;;  %18351 = vmatprep.subr.msk.bf16.mxu1 %vm21833_vm13, %v22343_v56 }
 0x378   : > { %3578 = vmatprep.mubr.f32.mxu1 %v22021_v61  ;;  %16963 = vmatprep.mubr.msk.f32.mxu0 %vm2616_vm12, %v21900_v51 }
 0x379   : > { %3579 = vmatmul.mubr.f32.gmra.mrb[76].mxu1 %v22032_v54  ;;  %16964 = vmatmul.mubr.msk.f32.gmra.mrb[50].mxu0 %vm2616_vm12, %v21912_v12 }
 0x37a   : > { %18387 = vmatpush3.bf16.msk.msra.mxu0 %vm21858_vm14, %v22345_v17  ;;  %18353 = vmatpush3.bf16.msra.mxu1 %v21739_v33 }
 0x37b   : > { %18390 = vmatprep.subr.msk.bf16.mxu0 %vm21833_vm13, %v22327_v59  ;;  %18356 = vmatprep.subr.msk.bf16.mxu1 %vm21858_vm14, %v22149_v10  ;;  %v20332_v10 = vunpack.i.h.bf16 %v20330_v27 }
 0x37c   : > { %16974 = vmatprep.mubr.msk.f32.mxu0 %vm2616_vm12, %v22339_v7  ;;  %3737 = vmatprep.mubr.f32.mxu1 %v21713_v13 }
 0x37d   : > { %16975 = vmatmul.mubr.msk.f32.vlgmr.msra.gmra.mrb[52].mxu0 %vm2616_vm12, %v21887_v62  ;;  %v22404_v44 = vpack.c.bf16 %v20332_v10, %v20331_v23 }
 0x37e   : > { %18392 = vmatpush3.bf16.msra.mxu0 %v21733_v21  ;;  %18358 = vmatpush3.bf16.msra.mxu1 %v21603_v20  ;;  %v20335_v21 = vpop.permute.xlu1 %20334 }
 0x37f   : > { %18395 = vmatprep.subr.msk.bf16.mxu0 %vm21833_vm13, %v22343_v56  ;;  %18361 = vmatprep.subr.msk.bf16.mxu1 %vm21858_vm14, %v22180_v8  ;;  %v20345_v8 = vpop.permute.xlu0 %20344  ;;  %v20337_v58 = vunpack.i.h.bf16 %v20335_v21  ;;  %v20336_v52 = vunpack.i.l.bf16 %v20335_v21 }
 0x380   : > { %16977 = vmatprep.mubr.msk.f32.mxu0 %vm2616_vm12, %v21900_v51 }
 0x381   : > { %16978 = vmatmul.mubr.msk.f32.gmra.mrb[54].mxu0 %vm2616_vm12, %v21912_v12  ;;  %v22416_v38 = vpack.c.bf16 %v20337_v58, %v20336_v52 }
 0x382   : > { %18397 = vmatpush3.bf16.msra.mxu0 %v21739_v33  ;;  %18363 = vmatpush3.bf16.msra.mxu1 %v21617_v35  ;;  %v20347_v33 = vunpack.i.h.bf16 %v20345_v8 }
 0x383   : > { %18400 = vmatprep.subr.msk.bf16.mxu0 %vm21833_vm13, %v22391_v19  ;;  %18366 = vmatprep.subr.msk.bf16.mxu1 %vm21858_vm14, %v22275_v45  ;;  %v20350_v28 = vpop.permute.xlu0 %20349 }
 0x384   : > { %3911 = vmatprep.mubr.f32.mxu0 %v21713_v13  ;;  %v20346_v13 = vunpack.i.l.bf16 %v20345_v8  ;;  %v20352_v1 = vunpack.i.h.bf16 %v20350_v28  ;;  %v20351_v36 = vunpack.i.l.bf16 %v20350_v28 }
 0x386   : > { %18402 = vmatpush3.bf16.msra.mxu0 %v21603_v20  ;;  %18369 = vmatpush3.bf16.msk.msra.mxu1 %vm21833_vm13, %v22198_v34  ;;  %v22428_v34 = vpack.c.bf16 %v20347_v33, %v20346_v13 }
 0x387   : > { %18405 = vmatprep.subr.msk.bf16.mxu0 %vm21833_vm13, %v22404_v44  ;;  %18372 = vmatprep.subr.msk.bf16.mxu1 %vm21858_vm14, %v22287_v37 }
 0x38a   : > { %18407 = vmatpush3.bf16.msra.mxu0 %v21617_v35  ;;  %18375 = vmatpush3.bf16.msk.msra.mxu1 %vm21833_vm13, %v22216_v50  ;;  %v22442_v50 = vpack.c.bf16 %v20352_v1, %v20351_v36 }
 0x38b   : > { %18410 = vmatprep.subr.msk.bf16.mxu0 %vm21858_vm14, %v22275_v45  ;;  %18432 = vmatprep.subr.msk.bf16.mxu1 %vm21858_vm14, %v22416_v38  ;;  %v20340_v45 = vpop.permute.xlu1 %20339 }
 0x38c   : > { %v20342_v24 = vunpack.i.h.bf16 %v20340_v45  ;;  %v20341_v42 = vunpack.i.l.bf16 %v20340_v45 }
 0x38d   : > { %3738 = vmatmul.mubr.f32.vlgmr.msra.gmra.mrb[78].mxu1 %v21960_v26 }
 0x38e   : > { %18412 = vmatpush3.bf16.msra.mxu0 %v21746_v32  ;;  %18435 = vmatpush3.bf16.msk.msra.mxu1 %vm21858_vm14, %v22416_v38 }
 0x38f   : > { %18415 = vmatprep.subr.msk.bf16.mxu0 %vm21858_vm14, %v22287_v37  ;;  %18438 = vmatprep.subr.msk.bf16.mxu1 %vm21858_vm14, %v22428_v34  ;;  %v20360_v37 = vpop.permute.xlu0 %20359 }
 0x390   : > { %3742 = vmatprep.mubr.f32.mxu1 %v21969_v40  ;;  %v20362_v53 = vunpack.i.h.bf16 %v20360_v37  ;;  %v20361_v3 = vunpack.i.l.bf16 %v20360_v37 }
 0x391   : > { %3743 = vmatmul.mubr.f32.gmra.mrb[80].mxu1 %v21984_v31 }
 0x392   : > { %18417 = vmatpush3.bf16.msra.mxu0 %v21752_v4  ;;  %18441 = vmatpush3.bf16.msk.msra.mxu1 %vm21858_vm14, %v22428_v34  ;;  %v22473_v57 = vpack.c.bf16 %v20362_v53, %v20361_v3 }
 0x393   : > { %18420 = vmatprep.subr.msk.bf16.mxu0 %vm21858_vm14, %v22303_v2  ;;  %18486 = vmatprep.subr.msk.bf16.mxu1 %vm21858_vm14, %v22442_v50  ;;  %v20370_v18 = vpop.permute.xlu0 %20369 }
 0x394   : > { %3747 = vmatprep.mubr.f32.mxu1 %v21995_v6  ;;  %v20372_v27 = vunpack.i.h.bf16 %v20370_v18  ;;  %v20371_v10 = vunpack.i.l.bf16 %v20370_v18 }
 0x395   : > { %3748 = vmatmul.mubr.f32.gmra.mrb[82].mxu1 %v22010_v41 }
 0x396   : > { %18423 = vmatpush3.bf16.msk.msra.mxu0 %vm21833_vm13, %v22232_v22  ;;  %3752 = vmatprep.mubr.f32.mxu1 %v22021_v61  ;;  %v20355_v22 = vpop.permute.xlu1 %20354  ;;  %v22545_v21 = vpack.c.bf16 %v20372_v27, %v20371_v10 }
 0x397   : > { %18426 = vmatprep.subr.msk.bf16.mxu0 %vm21858_vm14, %v22345_v17  ;;  %v20356_v5 = vunpack.i.l.bf16 %v20355_v22 }
 0x399   : > { %3753 = vmatmul.mubr.f32.gmra.mrb[84].mxu1 %v22032_v54 }
 0x39a   : > { %18429 = vmatpush3.bf16.msk.msra.mxu0 %vm21833_vm13, %v22247_v25  ;;  %16988 = vmatprep.mubr.msk.f32.mxu1 %vm2616_vm12, %v22339_v7  ;;  %v22491_v25 = vpack.c.bf16 %v20342_v24, %v20341_v42  ;;  %v20365_v46 = vpop.permute.xlu1 %20364 }
 0x39b   : > { %18444 = vmatprep.subr.msk.bf16.mxu0 %vm21833_vm13, %v22391_v19  ;;  %v20366_v14 = vunpack.i.l.bf16 %v20365_v46 }
 0x39d   : > { %3912 = vmatmul.mubr.f32.vlgmr.msra.gmra.mrb[56].mxu0 %v21960_v26  ;;  %16989 = vmatmul.mubr.msk.f32.vlgmr.msra.gmra.mrb[86].mxu1 %vm2616_vm12, %v21887_v62 }
 0x39e   : > { %18446 = vmatpush3.bf16.msra.mxu0 %v21603_v20  ;;  %18489 = vmatpush3.bf16.msk.msra.mxu1 %vm21858_vm14, %v22442_v50  ;;  %v20357_v20 = vunpack.i.h.bf16 %v20355_v22 }
 0x39f   : > { %18449 = vmatprep.subr.msk.bf16.mxu0 %vm21833_vm13, %v22404_v44  ;;  %18492 = vmatprep.subr.msk.bf16.mxu1 %vm21858_vm14, %v22473_v57 }
 0x3a0   : > { %3916 = vmatprep.mubr.f32.mxu0 %v21969_v40  ;;  %16991 = vmatprep.mubr.msk.f32.mxu1 %vm2616_vm12, %v21900_v51  ;;  %v22509_v49 = vpack.c.bf16 %v20357_v20, %v20356_v5 }
 0x3a1   : > { %3917 = vmatmul.mubr.f32.gmra.mrb[58].mxu0 %v21984_v31  ;;  %16992 = vmatmul.mubr.msk.f32.gmra.mrb[88].mxu1 %vm2616_vm12, %v21912_v12 }
 0x3a2   : > { %18451 = vmatpush3.bf16.msra.mxu0 %v21617_v35  ;;  %18495 = vmatpush3.bf16.msk.msra.mxu1 %vm21858_vm14, %v22473_v57  ;;  %v20367_v35 = vunpack.i.h.bf16 %v20365_v46 }
 0x3a3   : > { %18454 = vmatprep.subr.msk.bf16.mxu0 %vm21833_vm13, %v22491_v25  ;;  %18498 = vmatprep.subr.msk.bf16.mxu1 %vm21833_vm13, %v22491_v25 }
 0x3a4   : > { %3921 = vmatprep.mubr.f32.mxu0 %v21995_v6  ;;  %17002 = vmatprep.mubr.msk.f32.mxu1 %vm2616_vm12, %v22339_v7  ;;  %v22525_v23 = vpack.c.bf16 %v20367_v35, %v20366_v14 }
 0x3a5   : > { %3922 = vmatmul.mubr.f32.gmra.mrb[60].mxu0 %v22010_v41  ;;  %17003 = vmatmul.mubr.msk.f32.vlgmr.msra.gmra.mrb[90].mxu1 %vm2616_vm12, %v21887_v62 }
 0x3a6   : > { %18456 = vmatpush3.bf16.msra.mxu0 %v21746_v32  ;;  %18500 = vmatpush3.bf16.msra.mxu1 %v21746_v32  ;;  %v22541_v32 = vld [vmem:[%s27151_s5 + $0x8] sm:$0xff] }
 0x3a7   : > { %18459 = vmatprep.subr.msk.bf16.mxu0 %vm21833_vm13, %v22509_v49  ;;  %18503 = vmatprep.subr.msk.bf16.mxu1 %vm21833_vm13, %v22509_v49 }
 0x3a8   : > { %3926 = vmatprep.mubr.f32.mxu0 %v22021_v61  ;;  %17005 = vmatprep.mubr.msk.f32.mxu1 %vm2616_vm12, %v21900_v51 }
 0x3a9   : > { %3927 = vmatmul.mubr.f32.gmra.mrb[62].mxu0 %v22032_v54  ;;  %17006 = vmatmul.mubr.msk.f32.gmra.mrb[92].mxu1 %vm2616_vm12, %v21912_v12 }
 0x3aa   : > { %18461 = vmatpush3.bf16.msra.mxu0 %v21752_v4  ;;  %18505 = vmatpush3.bf16.msra.mxu1 %v21752_v4  ;;  %v20375_v4 = vpop.permute.xlu1 %20374 }
 0x3ab   : > { %18464 = vmatprep.subr.msk.bf16.mxu0 %vm21858_vm14, %v22303_v2  ;;  %18508 = vmatprep.subr.msk.bf16.mxu1 %vm21833_vm13, %v22525_v23  ;;  %v20385_v2 = vpop.permute.xlu0 %20384  ;;  %v20377_v8 = vunpack.i.h.bf16 %v20375_v4 }
 0x3ac   : > { %4085 = vmatprep.mubr.f32.mxu0 %v22541_v32  ;;  %4259 = vmatprep.mubr.f32.mxu1 %v22541_v32  ;;  %v20387_v58 = vunpack.i.h.bf16 %v20385_v2  ;;  %v20386_v52 = vunpack.i.l.bf16 %v20385_v2  ;;  %v22705_v2 = vld [vmem:[%s27151_s5 + $0x58] sm:$0xff] }
 0x3ae   : > { %18466 = vmatpush3.bf16.msra.mxu0 %v21631_v48  ;;  %18510 = vmatpush3.bf16.msra.mxu1 %v21631_v48 }
 0x3af   : > { %18469 = vmatprep.subr.msk.bf16.mxu0 %vm21858_vm14, %v22345_v17  ;;  %18513 = vmatprep.subr.msk.bf16.mxu1 %vm21833_vm13, %v22545_v21  ;;  %v20376_v17 = vunpack.i.l.bf16 %v20375_v4  ;;  %v20390_v13 = vpop.permute.xlu0 %20389 }
 0x3b0   : > { %v20391_v28 = vunpack.i.l.bf16 %v20390_v13 }
 0x3b1   : > { %v22573_v33 = vpack.c.bf16 %v20377_v8, %v20376_v17 }
 0x3b2   : > { %18471 = vmatpush3.bf16.msra.mxu0 %v21645_v60  ;;  %18515 = vmatpush3.bf16.msra.mxu1 %v21645_v60 }
 0x3b3   : > { %18474 = vmatprep.subr.msk.bf16.mxu0 %vm21858_vm14, %v22416_v38  ;;  %18518 = vmatprep.subr.msk.bf16.mxu1 %vm21858_vm14, %v22416_v38  ;;  %v20392_v38 = vunpack.i.h.bf16 %v20390_v13  ;;  %v20400_v45 = vpop.permute.xlu0 %20399 }
 0x3b4   : > { %v20401_v22 = vunpack.i.l.bf16 %v20400_v45 }
 0x3b6   : > { %18477 = vmatpush3.bf16.msk.msra.mxu0 %vm21833_vm13, %v22327_v59  ;;  %18520 = vmatpush3.bf16.msra.mxu1 %v21758_v63  ;;  %v22585_v59 = vpack.c.bf16 %v20387_v58, %v20386_v52 }
 0x3b7   : > { %18480 = vmatprep.subr.msk.bf16.mxu0 %vm21858_vm14, %v22428_v34  ;;  %18523 = vmatprep.subr.msk.bf16.mxu1 %vm21858_vm14, %v22428_v34  ;;  %v20380_v34 = vpop.permute.xlu1 %20379  ;;  %v22633_v20 = vpop.permute.xlu0 %2603 }
 0x3b8   : > { %v20382_v1 = vunpack.i.h.bf16 %v20380_v34  ;;  %v20381_v36 = vunpack.i.l.bf16 %v20380_v34 }
 0x3ba   : > { %18483 = vmatpush3.bf16.msk.msra.mxu0 %vm21833_vm13, %v22343_v56  ;;  %18525 = vmatpush3.bf16.msra.mxu1 %v21765_v0  ;;  %v22601_v56 = vpack.c.bf16 %v20392_v38, %v20391_v28  ;;  %v18560_v3 = vpack.c.bf16 %v20382_v1, %v20381_v36 }
 0x3bb   : > { %18528 = vmatprep.subr.msk.bf16.mxu1 %vm21858_vm14, %v22442_v50  ;;  %18540 = vmatprep.subr.msk.bf16.mxu0 %vm21858_vm14, %v22573_v33  ;;  %v22659_v18 = vpop.permute.xlu0 %2608 }
 0x3bd   : > { %4086 = vmatmul.mubr.f32.vlgmr.msra.gmra.mrb[64].mxu0 %v21960_v26 }
 0x3be   : > { %18531 = vmatpush3.bf16.msk.msra.mxu1 %vm21833_vm13, %v22391_v19  ;;  %18543 = vmatpush3.bf16.msk.msra.mxu0 %vm21858_vm14, %v22573_v33  ;;  %v20395_v19 = vpop.permute.xlu1 %20394 }
 0x3bf   : > { %18534 = vmatprep.subr.msk.bf16.mxu1 %vm21858_vm14, %v22473_v57  ;;  %18546 = vmatprep.subr.msk.bf16.mxu0 %vm21858_vm14, %v22585_v59  ;;  %v20397_v24 = vunpack.i.h.bf16 %v20395_v19  ;;  %v20396_v42 = vunpack.i.l.bf16 %v20395_v19  ;;  %v20410_v27 = vpop.permute.xlu0 %20409 }
 0x3c0   : > { %4090 = vmatprep.mubr.f32.mxu0 %v21969_v40  ;;  %v20412_v4 = vunpack.i.h.bf16 %v20410_v27 }
 0x3c1   : > { %4091 = vmatmul.mubr.f32.gmra.mrb[66].mxu0 %v21984_v31  ;;  %v18565_v35 = vpack.c.bf16 %v20397_v24, %v20396_v42 }
 0x3c2   : > { %18537 = vmatpush3.bf16.msk.msra.mxu1 %vm21833_vm13, %v22404_v44  ;;  %18549 = vmatpush3.bf16.msk.msra.mxu0 %vm21858_vm14, %v22585_v59  ;;  %v20402_v44 = vunpack.i.h.bf16 %v20400_v45  ;;  %v22625_v37 = vpop.permute.xlu1 %2598 }
 0x3c3   : > { %18552 = vmatprep.subr.msk.bf16.mxu1 %vm21833_vm13, %v22525_v23  ;;  %18594 = vmatprep.subr.msk.bf16.mxu0 %vm21858_vm14, %v22601_v56  ;;  %v20420_v52 = vpop.permute.xlu0 %20419 }
 0x3c4   : > { %4095 = vmatprep.mubr.f32.mxu0 %v21995_v6  ;;  %v22643_v46 = vpack.c.bf16 %v20402_v44, %v20401_v22  ;;  %v20421_v38 = vunpack.i.l.bf16 %v20420_v52 }
 0x3c5   : > { %4096 = vmatmul.mubr.f32.gmra.mrb[68].mxu0 %v22010_v41  ;;  %4260 = vmatmul.mubr.f32.vlgmr.msra.gmra.mrb[94].mxu1 %v21960_v26 }
 0x3c6   : > { %18554 = vmatpush3.bf16.msra.mxu1 %v21631_v48  ;;  %4100 = vmatprep.mubr.f32.mxu0 %v22021_v61 }
 0x3c7   : > { %18557 = vmatprep.subr.msk.bf16.mxu1 %vm21833_vm13, %v22545_v21  ;;  %4264 = vmatprep.mubr.f32.mxu1 %v21969_v40 }
 0x3c8   : > { %v22627_v53 = vpop.f32.mrb[42].mxu1 }
 0x3c9   : > { %4101 = vmatmul.mubr.f32.gmra.mrb[70].mxu0 %v22032_v54  ;;  %4265 = vmatmul.mubr.f32.gmra.mrb[96].mxu1 %v21984_v31  ;;  %v22631_v48 = vpop.f32.mrb[43].mxu1 }
 0x3ca   : > { %18559 = vmatpush3.bf16.msra.mxu1 %v21645_v60  ;;  %4269 = vmatprep.mubr.f32.mxu1 %v21995_v6  ;;  %v20405_v60 = vpop.permute.xlu1 %20404 }
 0x3cb   : > { %18562 = vmatprep.subr.msk.bf16.mxu1 %vm21833_vm13, %v18560_v3  ;;  %17016 = vmatprep.mubr.msk.f32.mxu0 %vm2616_vm12, %v22339_v7 }
 0x3cc   : > { %v22641_v5 = vpop.f32.mrb[44].mxu1 }
 0x3cd   : > { %4270 = vmatmul.mubr.f32.gmra.mrb[98].mxu1 %v22010_v41  ;;  %17017 = vmatmul.mubr.msk.f32.vlgmr.msra.gmra.mrb[72].mxu0 %vm2616_vm12, %v21887_v62  ;;  %v22648_v14 = vpop.f32.mrb[45].mxu1 }
 0x3ce   : > { %18597 = vmatpush3.bf16.msk.msra.mxu0 %vm21858_vm14, %v22601_v56  ;;  %18564 = vmatpush3.bf16.msra.mxu1 %v21758_v63  ;;  %v22676_v62 = vpop.permute.xlu1 %2613 }
 0x3cf   : > { %18600 = vmatprep.subr.msk.bf16.mxu0 %vm21858_vm14, %v22643_v46  ;;  %18567 = vmatprep.subr.msk.bf16.mxu1 %vm21833_vm13, %v18565_v35 }
 0x3d0   : > { %4274 = vmatprep.mubr.f32.mxu1 %v22021_v61  ;;  %17019 = vmatprep.mubr.msk.f32.mxu0 %vm2616_vm12, %v21900_v51  ;;  %v20407_v51 = vunpack.i.h.bf16 %v20405_v60 }
 0x3d1   : > { %4275 = vmatmul.mubr.f32.gmra.mrb[100].mxu1 %v22032_v54  ;;  %17020 = vmatmul.mubr.msk.f32.gmra.mrb[74].mxu0 %vm2616_vm12, %v21912_v12  ;;  %v20406_v12 = vunpack.i.l.bf16 %v20405_v60  ;;  %v22684_v54 = vld [vmem:[%s27151_s5 + $0x28] sm:$0xff] }
 0x3d2   : > { %18603 = vmatpush3.bf16.msk.msra.mxu0 %vm21858_vm14, %v22643_v46  ;;  %18569 = vmatpush3.bf16.msra.mxu1 %v21765_v0 }
 0x3d3   : > { %18606 = vmatprep.subr.msk.bf16.mxu0 %vm21833_vm13, %v18560_v3  ;;  %18572 = vmatprep.subr.msk.bf16.mxu1 %vm21858_vm14, %v22442_v50  ;;  %v22698_v50 = vld [vmem:[%s27151_s5 + $0x40] sm:$0xff]  ;;  %v18614_v10 = vpack.c.bf16 %v20407_v51, %v20406_v12 }
 0x3d4   : > { %17030 = vmatprep.mubr.msk.f32.mxu0 %vm2616_vm12, %v22339_v7  ;;  %4433 = vmatprep.mubr.f32.mxu1 %v22541_v32 }
 0x3d5   : > { %17031 = vmatmul.mubr.msk.f32.vlgmr.msra.gmra.mrb[76].mxu0 %vm2616_vm12, %v22684_v54 }
 0x3d6   : > { %18608 = vmatpush3.bf16.msra.mxu0 %v21758_v63  ;;  %18574 = vmatpush3.bf16.msra.mxu1 %v21656_v11  ;;  %v20411_v63 = vunpack.i.l.bf16 %v20410_v27 }
 0x3d7   : > { %18611 = vmatprep.subr.msk.bf16.mxu0 %vm21833_vm13, %v18565_v35  ;;  %18577 = vmatprep.subr.msk.bf16.mxu1 %vm21858_vm14, %v22473_v57  ;;  %v20415_v57 = vpop.permute.xlu1 %20414 }
 0x3d8   : > { %17033 = vmatprep.mubr.msk.f32.mxu0 %vm2616_vm12, %v22698_v50  ;;  %v18619_v8 = vpack.c.bf16 %v20412_v4, %v20411_v63  ;;  %v20417_v17 = vunpack.i.h.bf16 %v20415_v57  ;;  %v20416_v58 = vunpack.i.l.bf16 %v20415_v57 }
 0x3d9   : > { %17034 = vmatmul.mubr.msk.f32.gmra.mrb[78].mxu0 %vm2616_vm12, %v22705_v2 }
 0x3da   : > { %18613 = vmatpush3.bf16.msra.mxu0 %v21765_v0  ;;  %18579 = vmatpush3.bf16.msra.mxu1 %v21675_v39  ;;  %v18646_v28 = vpack.c.bf16 %v20417_v17, %v20416_v58  ;;  %v20997_v58 = vld [vmem:[%s27151_s5] sm:$0xff] }
 0x3db   : > { %18616 = vmatprep.subr.msk.bf16.mxu0 %vm21833_vm13, %v18614_v10  ;;  %18582 = vmatprep.subr.msk.bf16.mxu1 %vm21858_vm14, %v22573_v33 }
 0x3dc   : > { %4607 = vmatprep.mubr.f32.mxu0 %v22541_v32  ;;  %v20422_v32 = vunpack.i.h.bf16 %v20420_v52 }
 0x3de   : > { %18618 = vmatpush3.bf16.msra.mxu0 %v21656_v11  ;;  %18585 = vmatpush3.bf16.msk.msra.mxu1 %vm21833_vm13, %v22491_v25  ;;  %v18652_v1 = vpack.c.bf16 %v20422_v32, %v20421_v38 }
 0x3df   : > { %18621 = vmatprep.subr.msk.bf16.mxu0 %vm21833_vm13, %v18619_v8  ;;  %18588 = vmatprep.subr.msk.bf16.mxu1 %vm21858_vm14, %v22585_v59  ;;  %v14867_v0 = vpop.f32.mrb[16].mxu0 }
 0x3e0   : > { %v14868_v13 = vpop.f32.mrb[17].mxu0 }
 0x3e1   : > { %v14869_v34 = vadd.f32 %v14868_v13, %v14867_v0 }
 0x3e2   : > { %18623 = vmatpush3.bf16.msra.mxu0 %v21675_v39  ;;  %18591 = vmatpush3.bf16.msk.msra.mxu1 %vm21833_vm13, %v22509_v49 }
 0x3e3   : > { %18626 = vmatprep.subr.msk.bf16.mxu0 %vm21858_vm14, %v22573_v33  ;;  %v2696_v11 = vadd.f32 %v14869_v34, %v22625_v37  ;;  %18648 = vmatprep.subr.msk.bf16.mxu1 %vm21858_vm14, %v18646_v28  ;;  %v14870_v25 = vpop.f32.mrb[18].mxu0 }
 0x3e4   : > { %v14871_v19 = vpop.f32.mrb[19].mxu0 }
 0x3e5   : > { %v2781_v36 = vadd.f32 %v22631_v48, %v2696_v11  ;;  %4434 = vmatmul.mubr.f32.vlgmr.msra.gmra.mrb[102].mxu1 %v21960_v26  ;;  %v14872_v39 = vadd.f32 %v14871_v19, %v14870_v25  ;;  %v20999_v25 = vld [vmem:[%s27151_s5 + $0x18] sm:$0xff] }
 0x3e6   : > { %18628 = vmatpush3.bf16.msra.mxu0 %v18627_v9  ;;  %18651 = vmatpush3.bf16.msk.msra.mxu1 %vm21858_vm14, %v18646_v28  ;;  %v20998_v28 = vld [vmem:[%s27151_s5 + $0x20] sm:$0xff] }
 0x3e7   : > { %18631 = vmatprep.subr.msk.bf16.mxu0 %vm21858_vm14, %v22585_v59  ;;  %v2701_v49 = vadd.f32 %v14872_v39, %v22633_v20  ;;  %18654 = vmatprep.subr.msk.bf16.mxu1 %vm21858_vm14, %v18652_v1  ;;  %v14873_v33 = vpop.f32.mrb[20].mxu0  ;;  %v2799_v44 = vmax.f32 %v2781_v36, 0.0  ;;  %v21000_v36 = vld [vmem:[%s27151_s5 + $0x38] sm:$0xff] }
 0x3e8   : > { %4438 = vmatprep.mubr.f32.mxu1 %v21969_v40  ;;  %v14919_v26 = vpop.f32.mrb[46].mxu1  ;;  %v14874_v45 = vpop.f32.mrb[21].mxu0 }
 0x3e9   : > { %v2786_v55 = vadd.f32 %v22627_v53, %v2701_v49  ;;  %4439 = vmatmul.mubr.f32.gmra.mrb[104].mxu1 %v21984_v31  ;;  %v14875_v30 = vadd.f32 %v14874_v45, %v14873_v33  ;;  %v14920_v9 = vpop.f32.mrb[47].mxu1  ;;  %v21001_v33 = vld [vmem:[%s27151_s5 + $0x30] sm:$0xff] }
 0x3ea   : > { %18633 = vmatpush3.bf16.msra.mxu0 %v18632_v16  ;;  %18657 = vmatpush3.bf16.msk.msra.mxu1 %vm21858_vm14, %v18652_v1  ;;  %v14921_v59 = vadd.f32 %v14920_v9, %v14919_v26 }
 0x3eb   : > { %v2800_v3 = vmax.f32 %v2786_v55, 0.0  ;;  %18636 = vmatprep.subr.msk.bf16.mxu0 %vm21858_vm14, %v22601_v56  ;;  %v2706_v40 = vadd.f32 %v14875_v30, %v22659_v18  ;;  %4443 = vmatprep.mubr.f32.mxu1 %v21995_v6  ;;  %v14876_v31 = vpop.f32.mrb[22].mxu0 }
 0x3ec   : > { %v14922_v53 = vpop.f32.mrb[48].mxu1  ;;  %v14877_v22 = vpop.f32.mrb[23].mxu0  ;;  %v2870_v48 = vadd.f32 %v14921_v59, %v22625_v37 }
 0x3ed   : > { %v2791_v43 = vadd.f32 %v22648_v14, %v2706_v40  ;;  %4444 = vmatmul.mubr.f32.gmra.mrb[106].mxu1 %v22010_v41  ;;  %v14878_v47 = vadd.f32 %v14877_v22, %v14876_v31  ;;  %v14923_v16 = vpop.f32.mrb[49].mxu1  ;;  %v22764_v24 = vpack.i.bf16 %v2800_v3, %v2799_v44  ;;  %v22770_v42 = vpack.c.bf16 %v2800_v3, %v2799_v44 }
 0x3ee   : > { %18639 = vmatpush3.bf16.msk.msra.mxu0 %vm21833_vm13, %v22525_v23  ;;  %v14924_v56 = vadd.f32 %v14923_v16, %v14922_v53  ;;  %4448 = vmatprep.mubr.f32.mxu1 %v22021_v61  ;;  %v20996_v61 = vld [vmem:[%s27151_s5 + $0x48] sm:$0xff] }
 0x3ef   : > { %18642 = vmatprep.subr.msk.bf16.mxu0 %vm21858_vm14, %v22643_v46  ;;  %v2711_v6 = vadd.f32 %v14878_v47, %v22676_v62  ;;  %v16906_v41 = vpop.f32.mrb[24].mxu0  ;;  %v2801_v10 = vmax.f32 %v2791_v43, 0.0 }
 0x3f0   : > { %v14925_v35 = vpop.f32.mrb[50].mxu1  ;;  %v2875_v14 = vadd.f32 %v14924_v56, %v22633_v20  ;;  %v2954_v60 = vpop.f32.mrb[25].mxu0 }
 0x3f1   : > { %v2796_v23 = vadd.f32 %v22641_v5, %v2711_v6  ;;  %4449 = vmatmul.mubr.f32.gmra.mrb[108].mxu1 %v20996_v61  ;;  %v14926_v51 = vpop.f32.mrb[51].mxu1  ;;  %v2955_v12 = vadd.f32 %v2954_v60, %v2870_v48 }
 0x3f2   : > { %18645 = vmatpush3.bf16.msk.msra.mxu0 %vm21833_vm13, %v22545_v21  ;;  %v2960_v46 = vadd.f32 %v16906_v41, %v2875_v14  ;;  %v14927_v27 = vadd.f32 %v14926_v51, %v14925_v35  ;;  %17044 = vmatprep.mubr.msk.f32.mxu1 %vm2616_vm12, %v22339_v7 }
 0x3f3   : > { %v2802_v4 = vmax.f32 %v2796_v23, 0.0  ;;  %v2973_v63 = vmax.f32 %v2955_v12, 0.0 }
 0x3f4   : > { %v2974_v5 = vmax.f32 %v2960_v46, 0.0  ;;  %v14928_v57 = vpop.f32.mrb[52].mxu1  ;;  %v16909_v8 = vpop.f32.mrb[26].mxu0  ;;  %v2880_v17 = vadd.f32 %v14927_v27, %v22659_v18 }
 0x3f5   : > { %4608 = vmatmul.mubr.f32.vlgmr.msra.gmra.mrb[80].mxu0 %v20997_v58  ;;  %v14929_v52 = vpop.f32.mrb[53].mxu1  ;;  %v2964_v21 = vpop.f32.mrb[27].mxu0  ;;  %17045 = vmatmul.mubr.msk.f32.vlgmr.msra.gmra.mrb[110].mxu1 %vm2616_vm12, %v22684_v54  ;;  %v22793_v0 = vpack.i.bf16 %v2802_v4, %v2801_v10  ;;  %v22795_v7 = vpack.c.bf16 %v2802_v4, %v2801_v10 }
 0x3f6   : > { %v22797_v13 = vpack.c.bf16 %v2974_v5, %v2973_v63  ;;  %v14930_v32 = vadd.f32 %v14929_v52, %v14928_v57  ;;  %v2965_v38 = vadd.f32 %v2964_v21, %v2880_v17  ;;  %4612 = vmatprep.mubr.f32.mxu0 %v20998_v28  ;;  %17047 = vmatprep.mubr.msk.f32.mxu1 %vm2616_vm12, %v22698_v50 }
 0x3f7   : > { %v22804_v34 = vpack.i.bf16 %v2974_v5, %v2973_v63 }
 0x3f8   : > { %v2885_v54 = vadd.f32 %v14930_v32, %v22676_v62  ;;  %v16920_v11 = vpop.f32.mrb[28].mxu0  ;;  %v2975_v39 = vmax.f32 %v2965_v38, 0.0 }
 0x3f9   : > { %4613 = vmatmul.mubr.f32.gmra.mrb[82].mxu0 %v20999_v25  ;;  %v3128_v19 = vpop.f32.mrb[29].mxu0  ;;  %17048 = vmatmul.mubr.msk.f32.gmra.mrb[112].mxu1 %vm2616_vm12, %v22705_v2  ;;  %v21002_v2 = vld [vmem:[%s27151_s5 + $0x50] sm:$0xff] }
 0x3fa   : > { %v2970_v1 = vadd.f32 %v16909_v8, %v2885_v54  ;;  %4617 = vmatprep.mubr.f32.mxu0 %v21000_v36 }
 0x3fc   : > { %v2976_v50 = vmax.f32 %v2970_v1, 0.0  ;;  %v16923_v49 = vpop.f32.mrb[30].mxu0 }
 0x3fd   : > { %4618 = vmatmul.mubr.f32.gmra.mrb[84].mxu0 %v21001_v33  ;;  %v3138_v26 = vpop.f32.mrb[31].mxu0 }
 0x3fe   : > { %v22818_v45 = vpack.c.bf16 %v2976_v50, %v2975_v39  ;;  %4622 = vmatprep.mubr.f32.mxu0 %v21002_v2  ;;  %v22823_v55 = vpack.i.bf16 %v2976_v50, %v2975_v39 }
 0x401   : > { %4623 = vmatmul.mubr.f32.gmra.mrb[86].mxu0 %v20996_v61 }
 0x408   : > { %v14971_v30 = vpop.f32.mrb[54].mxu1 }
 0x409   : > { %v14972_v9 = vpop.f32.mrb[55].mxu1 }
 0x40a   : > { %v14973_v59 = vadd.f32 %v14972_v9, %v14971_v30 }
 0x40c   : > { %v3044_v44 = vadd.f32 %v14973_v59, %v22625_v37  ;;  %v14974_v3 = vpop.f32.mrb[56].mxu1 }
 0x40d   : > { %v14975_v40 = vpop.f32.mrb[57].mxu1 }
 0x40e   : > { %v3129_v31 = vadd.f32 %v3128_v19, %v3044_v44  ;;  %v14976_v53 = vadd.f32 %v14975_v40, %v14974_v3  ;;  %v22845_v3 = vld [vmem:[%s27153_s7 + $0x10] sm:$0xff] }
 0x40f   : > { %17058 = vmatprep.mubr.msk.f32.mxu1 %vm2616_vm12, %v22845_v3 }
 0x410   : > { %v3049_v22 = vadd.f32 %v14976_v53, %v22633_v20  ;;  %v14977_v43 = vpop.f32.mrb[58].mxu1  ;;  %v3147_v6 = vmax.f32 %v3129_v31, 0.0 }
 0x411   : > { %v14978_v47 = vpop.f32.mrb[59].mxu1 }
 0x412   : > { %v3134_v16 = vadd.f32 %v16920_v11, %v3049_v22  ;;  %v14979_v56 = vadd.f32 %v14978_v47, %v14977_v43 }
 0x414   : > { %v3148_v41 = vmax.f32 %v3134_v16, 0.0  ;;  %v14980_v48 = vpop.f32.mrb[60].mxu1  ;;  %v3054_v35 = vadd.f32 %v14979_v56, %v22659_v18 }
 0x415   : > { %v14981_v14 = vpop.f32.mrb[61].mxu1 }
 0x416   : > { %v14982_v60 = vadd.f32 %v14981_v14, %v14980_v48  ;;  %v3139_v23 = vadd.f32 %v3138_v26, %v3054_v35  ;;  %v20423_v61 = vpack.i.bf16 %v3148_v41, %v3147_v6  ;;  %v22828_v51 = vpack.c.bf16 %v3148_v41, %v3147_v6 }
 0x418   : > { %v3059_v12 = vadd.f32 %v14982_v60, %v22676_v62  ;;  %v15023_v46 = vpop.f32.mrb[32].mxu0  ;;  %20424 = vrot.lane.b32.xlu1 %v20423_v61, %s21035_s16  ;;  %v16934_v27 = vpop.f32.mrb[62].mxu1  ;;  %v3149_v8 = vmax.f32 %v3139_v23, 0.0 }
 0x419   : > { %v15024_v10 = vpop.f32.mrb[33].mxu0  ;;  %v3302_v4 = vpop.f32.mrb[63].mxu1 }
 0x41a   : > { %v3144_v63 = vadd.f32 %v16923_v49, %v3059_v12  ;;  %v15025_v5 = vadd.f32 %v15024_v10, %v15023_v46 }
 0x41c   : > { %v3150_v57 = vmax.f32 %v3144_v63, 0.0  ;;  %v15026_v17 = vpop.f32.mrb[34].mxu0  ;;  %v3218_v58 = vadd.f32 %v15025_v5, %v22625_v37  ;;  %20434 = vrot.lane.b32.xlu1 %v20423_v61, %s21034_s29  ;;  %v16937_v52 = vpop.f32.mrb[64].mxu1 }
 0x41d   : > { %v15027_v21 = vpop.f32.mrb[35].mxu0  ;;  %v3312_v32 = vpop.f32.mrb[65].mxu1 }
 0x41e   : > { %v22834_v38 = vpack.c.bf16 %v3150_v57, %v3149_v8  ;;  %v15028_v28 = vadd.f32 %v15027_v21, %v15026_v17  ;;  %v3303_v54 = vadd.f32 %v3302_v4, %v3218_v58  ;;  %v20428_v11 = vpack.i.bf16 %v3150_v57, %v3149_v8 }
 0x420   : > { %v3223_v25 = vadd.f32 %v15028_v28, %v22633_v20  ;;  %v15029_v19 = vpop.f32.mrb[36].mxu0  ;;  %20429 = vrot.lane.b32.xlu0 %v20428_v11, %s21035_s16  ;;  %v16948_v1 = vpop.f32.mrb[66].mxu1  ;;  %v3321_v26 = vmax.f32 %v3303_v54, 0.0 }
 0x421   : > { %v15030_v36 = vpop.f32.mrb[37].mxu0  ;;  %v3476_v50 = vpop.f32.mrb[67].mxu1 }
 0x422   : > { %v3308_v39 = vadd.f32 %v16934_v27, %v3223_v25  ;;  %v15031_v49 = vadd.f32 %v15030_v36, %v15029_v19 }
 0x424   : > { %v3322_v33 = vmax.f32 %v3308_v39, 0.0  ;;  %v15032_v2 = vpop.f32.mrb[38].mxu0  ;;  %v3228_v30 = vadd.f32 %v15031_v49, %v22659_v18  ;;  %20439 = vrot.lane.b32.xlu0 %v20428_v11, %s21034_s29  ;;  %v22840_v9 = vpop.f32.mrb[68].mxu1 }
 0x425   : > { %v15033_v59 = vpop.f32.mrb[39].mxu0  ;;  %v3486_v44 = vpop.f32.mrb[69].mxu1 }
 0x426   : > { %v22847_v40 = vpack.c.bf16 %v3322_v33, %v3321_v26  ;;  %v15034_v31 = vadd.f32 %v15033_v59, %v15032_v2  ;;  %v3313_v53 = vadd.f32 %v3312_v32, %v3228_v30  ;;  %v22849_v22 = vpack.i.bf16 %v3322_v33, %v3321_v26 }
 0x428   : > { %v3233_v43 = vadd.f32 %v15034_v31, %v22676_v62  ;;  %20454 = vrot.lane.b32.xlu1 %v22849_v22, %s21034_s29  ;;  %20444 = vrot.lane.b32.xlu0 %v22804_v34, %s21034_s29  ;;  %v3323_v56 = vmax.f32 %v3313_v53, 0.0 }
 0x42a   : > { %v3318_v47 = vadd.f32 %v16937_v52, %v3233_v43 }
 0x42c   : > { %v3324_v16 = vmax.f32 %v3318_v47, 0.0  ;;  %20449 = vrot.lane.b32.xlu0 %v22823_v55, %s21034_s29 }
 0x42e   : > { %v22860_v6 = vpack.c.bf16 %v3324_v16, %v3323_v56  ;;  %v22862_v41 = vpack.i.bf16 %v3324_v16, %v3323_v56 }
 0x430   : > { %20459 = vrot.lane.b32.xlu1 %v22862_v41, %s21034_s29  ;;  %20469 = vrot.lane.b32.xlu0 %v22823_v55, %s21035_s16 }
 0x434   : > { %20464 = vrot.lane.b32.xlu1 %v22804_v34, %s21035_s16  ;;  %20479 = vrot.lane.b32.xlu0 %v22793_v0, %s21035_s16  ;;  %v22882_v34 = vld [vmem:[%s27153_s7 + $0x8] sm:$0xff] }
 0x435   : > { %5261 = vmatprep.mubr.f32.mxu0 %v22882_v34 }
 0x438   : > { %v15075_v48 = vpop.f32.mrb[40].mxu0  ;;  %20474 = vrot.lane.b32.xlu1 %v22764_v24, %s21035_s16  ;;  %20489 = vrot.lane.b32.xlu0 %v22793_v0, %s21034_s29 }
 0x439   : > { %v15076_v35 = vpop.f32.mrb[41].mxu0 }
 0x43a   : > { %v15077_v14 = vadd.f32 %v15076_v35, %v15075_v48 }
 0x43c   : > { %v3392_v60 = vadd.f32 %v15077_v14, %v22625_v37  ;;  %v15078_v23 = vpop.f32.mrb[42].mxu0  ;;  %20484 = vrot.lane.b32.xlu1 %v22764_v24, %s21034_s29 }
 0x43d   : > { %v15079_v55 = vpop.f32.mrb[43].mxu0 }
 0x43e   : > { %v3477_v61 = vadd.f32 %v3476_v50, %v3392_v60  ;;  %v15080_v12 = vadd.f32 %v15079_v55, %v15078_v23 }
 0x440   : > { %v3397_v0 = vadd.f32 %v15080_v12, %v22633_v20  ;;  %v15081_v46 = vpop.f32.mrb[44].mxu0  ;;  %v15127_v27 = vpop.f32.mrb[70].mxu1  ;;  %v3495_v24 = vmax.f32 %v3477_v61, 0.0 }
 0x441   : > { %v15082_v10 = vpop.f32.mrb[45].mxu0  ;;  %v15128_v4 = vpop.f32.mrb[71].mxu1 }
 0x442   : > { %v3482_v63 = vadd.f32 %v16948_v1, %v3397_v0  ;;  %v15083_v5 = vadd.f32 %v15082_v10, %v15081_v46  ;;  %v15129_v57 = vadd.f32 %v15128_v4, %v15127_v27 }
 0x444   : > { %v3496_v8 = vmax.f32 %v3482_v63, 0.0  ;;  %v3402_v17 = vadd.f32 %v15083_v5, %v22659_v18  ;;  %v15084_v58 = vpop.f32.mrb[46].mxu0  ;;  %v15130_v52 = vpop.f32.mrb[72].mxu1  ;;  %v3566_v49 = vadd.f32 %v15129_v57, %v22625_v37 }
 0x445   : > { %v15085_v21 = vpop.f32.mrb[47].mxu0  ;;  %v15131_v32 = vpop.f32.mrb[73].mxu1 }
 0x446   : > { %v3487_v28 = vadd.f32 %v3486_v44, %v3402_v17  ;;  %v15086_v54 = vadd.f32 %v15085_v21, %v15084_v58  ;;  %v15132_v11 = vadd.f32 %v15131_v32, %v15130_v52  ;;  %v20493_v25 = vpack.i.bf16 %v3496_v8, %v3495_v24 }
 0x447   : > { %v22887_v19 = vpack.c.bf16 %v3496_v8, %v3495_v24 }
 0x448   : > { %v3407_v36 = vadd.f32 %v15086_v54, %v22676_v62  ;;  %v15133_v50 = vpop.f32.mrb[74].mxu1  ;;  %v3571_v1 = vadd.f32 %v15132_v11, %v22633_v20  ;;  %v16962_v39 = vpop.f32.mrb[48].mxu0  ;;  %20494 = vrot.lane.b32.xlu1 %v20493_v25, %s21034_s29  ;;  %v3497_v31 = vmax.f32 %v3487_v28, 0.0 }
 0x449   : > { %v15134_v33 = vpop.f32.mrb[75].mxu1  ;;  %v3650_v26 = vpop.f32.mrb[49].mxu0 }
 0x44a   : > { %v3492_v2 = vadd.f32 %v22840_v9, %v3407_v36  ;;  %v3656_v30 = vadd.f32 %v16962_v39, %v3571_v1  ;;  %v15135_v59 = vadd.f32 %v15134_v33, %v15133_v50  ;;  %v3651_v44 = vadd.f32 %v3650_v26, %v3566_v49 }
 0x44c   : > { %v3498_v53 = vmax.f32 %v3492_v2, 0.0  ;;  %v3670_v43 = vmax.f32 %v3656_v30, 0.0  ;;  %v3669_v47 = vmax.f32 %v3651_v44, 0.0  ;;  %v15136_v16 = vpop.f32.mrb[76].mxu1  ;;  %v16965_v56 = vpop.f32.mrb[50].mxu0  ;;  %20504 = vrot.lane.b32.xlu1 %v22849_v22, %s21035_s16  ;;  %v3576_v48 = vadd.f32 %v15135_v59, %v22659_v18 }
 0x44d   : > { %v15137_v35 = vpop.f32.mrb[77].mxu1  ;;  %v3660_v14 = vpop.f32.mrb[51].mxu0 }
 0x44e   : > { %v22897_v60 = vpack.c.bf16 %v3670_v43, %v3669_v47  ;;  %v15138_v23 = vadd.f32 %v15137_v35, %v15136_v16  ;;  %v3661_v9 = vadd.f32 %v3660_v14, %v3576_v48  ;;  %v20498_v55 = vpack.i.bf16 %v3498_v53, %v3497_v31 }
 0x44f   : > { %v20523_v61 = vpack.i.bf16 %v3670_v43, %v3669_v47  ;;  %v22899_v12 = vpack.c.bf16 %v3498_v53, %v3497_v31 }
 0x450   : > { %v3581_v0 = vadd.f32 %v15138_v23, %v22676_v62  ;;  %20499 = vrot.lane.b32.xlu0 %v20498_v55, %s21034_s29  ;;  %20514 = vrot.lane.b32.xlu1 %v20493_v25, %s21035_s16  ;;  %v16976_v46 = vpop.f32.mrb[52].mxu0  ;;  %v3671_v4 = vmax.f32 %v3661_v9, 0.0 }
 0x451   : > { %v3824_v22 = vpop.f32.mrb[53].mxu0 }
 0x452   : > { %v3666_v27 = vadd.f32 %v16965_v56, %v3581_v0 }
 0x454   : > { %v3672_v10 = vmax.f32 %v3666_v27, 0.0  ;;  %20509 = vrot.lane.b32.xlu0 %v22862_v41, %s21035_s16  ;;  %20524 = vrot.lane.b32.xlu1 %v20523_v61, %s21034_s29  ;;  %v16979_v63 = vpop.f32.mrb[54].mxu0 }
 0x455   : > { %v3834_v5 = vpop.f32.mrb[55].mxu0 }
 0x456   : > { %v22907_v57 = vpack.c.bf16 %v3672_v10, %v3671_v4  ;;  %v20528_v24 = vpack.i.bf16 %v3672_v10, %v3671_v4 }
 0x458   : > { %20519 = vrot.lane.b32.xlu0 %v20498_v55, %s21035_s16  ;;  %20534 = vrot.lane.b32.xlu1 %v20523_v61, %s21035_s16 }
 0x45c   : > { %20529 = vrot.lane.b32.xlu0 %v20528_v24, %s21034_s29  ;;  %20539 = vrot.lane.b32.xlu1 %v20528_v24, %s21035_s16 }
 0x460   : > { %v15179_v8 = vpop.f32.mrb[78].mxu1 }
 0x461   : > { %v15180_v17 = vpop.f32.mrb[79].mxu1 }
 0x462   : > { %v15181_v58 = vadd.f32 %v15180_v17, %v15179_v8 }
 0x464   : > { %v15182_v52 = vpop.f32.mrb[80].mxu1  ;;  %v3740_v41 = vadd.f32 %v15181_v58, %v22625_v37 }
 0x465   : > { %v15183_v21 = vpop.f32.mrb[81].mxu1 }
 0x466   : > { %v15184_v32 = vadd.f32 %v15183_v21, %v15182_v52  ;;  %v3825_v28 = vadd.f32 %v3824_v22, %v3740_v41 }
 0x468   : > { %v3745_v54 = vadd.f32 %v15184_v32, %v22633_v20  ;;  %v15185_v11 = vpop.f32.mrb[82].mxu1  ;;  %v3843_v39 = vmax.f32 %v3825_v28, 0.0 }
 0x469   : > { %v15186_v25 = vpop.f32.mrb[83].mxu1 }
 0x46a   : > { %v3830_v36 = vadd.f32 %v16976_v46, %v3745_v54  ;;  %v15187_v50 = vadd.f32 %v15186_v25, %v15185_v11 }
 0x46c   : > { %v3844_v1 = vmax.f32 %v3830_v36, 0.0  ;;  %v15188_v49 = vpop.f32.mrb[84].mxu1  ;;  %v3750_v33 = vadd.f32 %v15187_v50, %v22659_v18 }
 0x46d   : > { %v15189_v26 = vpop.f32.mrb[85].mxu1 }
 0x46e   : > { %v22916_v2 = vpack.c.bf16 %v3844_v1, %v3843_v39  ;;  %v15190_v30 = vadd.f32 %v15189_v26, %v15188_v49  ;;  %v3835_v59 = vadd.f32 %v3834_v5, %v3750_v33  ;;  %v20543_v44 = vpack.i.bf16 %v3844_v1, %v3843_v39 }
 0x470   : > { %v3755_v31 = vadd.f32 %v15190_v30, %v22676_v62  ;;  %v15231_v53 = vpop.f32.mrb[56].mxu0  ;;  %20544 = vrot.lane.b32.xlu0 %v20543_v44, %s21034_s29  ;;  %v16990_v43 = vpop.f32.mrb[86].mxu1  ;;  %20554 = vrot.lane.b32.xlu1 %v20543_v44, %s21035_s16  ;;  %v3845_v14 = vmax.f32 %v3835_v59, 0.0 }
 0x471   : > { %v15232_v47 = vpop.f32.mrb[57].mxu0  ;;  %v3998_v16 = vpop.f32.mrb[87].mxu1 }
 0x472   : > { %v3840_v56 = vadd.f32 %v16979_v63, %v3755_v31  ;;  %v15233_v48 = vadd.f32 %v15232_v47, %v15231_v53 }
 0x474   : > { %v3846_v35 = vmax.f32 %v3840_v56, 0.0  ;;  %v15234_v23 = vpop.f32.mrb[58].mxu0  ;;  %v3914_v9 = vadd.f32 %v15233_v48, %v22625_v37  ;;  %v16993_v55 = vpop.f32.mrb[88].mxu1 }
 0x475   : > { %v15235_v61 = vpop.f32.mrb[59].mxu0  ;;  %v4008_v0 = vpop.f32.mrb[89].mxu1 }
 0x476   : > { %v22922_v46 = vpack.c.bf16 %v3846_v35, %v3845_v14  ;;  %v15236_v22 = vadd.f32 %v15235_v61, %v15234_v23  ;;  %v3999_v27 = vadd.f32 %v3998_v16, %v3914_v9  ;;  %v20548_v10 = vpack.i.bf16 %v3846_v35, %v3845_v14 }
 0x478   : > { %v3919_v4 = vadd.f32 %v15236_v22, %v22633_v20  ;;  %v15237_v5 = vpop.f32.mrb[60].mxu0  ;;  %20549 = vrot.lane.b32.xlu0 %v20548_v10, %s21034_s29  ;;  %v17004_v63 = vpop.f32.mrb[90].mxu1  ;;  %v4017_v41 = vmax.f32 %v3999_v27, 0.0 }
 0x479   : > { %v15238_v24 = vpop.f32.mrb[61].mxu0  ;;  %v4172_v8 = vpop.f32.mrb[91].mxu1 }
 0x47a   : > { %v4004_v17 = vadd.f32 %v16990_v43, %v3919_v4  ;;  %v15239_v58 = vadd.f32 %v15238_v24, %v15237_v5 }
 0x47c   : > { %v4018_v52 = vmax.f32 %v4004_v17, 0.0  ;;  %v15240_v21 = vpop.f32.mrb[62].mxu0  ;;  %v3924_v32 = vadd.f32 %v15239_v58, %v22659_v18  ;;  %20559 = vrot.lane.b32.xlu0 %v20548_v10, %s21035_s16  ;;  %v22928_v28 = vpop.f32.mrb[92].mxu1 }
 0x47d   : > { %v15241_v54 = vpop.f32.mrb[63].mxu0  ;;  %v22930_v11 = vpop.f32.mrb[93].mxu1 }
 0x47e   : > { %v20573_v25 = vpack.i.bf16 %v4018_v52, %v4017_v41  ;;  %v22932_v36 = vpack.c.bf16 %v4018_v52, %v4017_v41  ;;  %v15242_v50 = vadd.f32 %v15241_v54, %v15240_v21  ;;  %v4009_v1 = vadd.f32 %v4008_v0, %v3924_v32 }
 0x480   : > { %v3929_v39 = vadd.f32 %v15242_v50, %v22676_v62  ;;  %20564 = vrot.lane.b32.xlu1 %v20573_v25, %s21034_s29  ;;  %v4019_v26 = vmax.f32 %v4009_v1, 0.0 }
 0x482   : > { %v4014_v49 = vadd.f32 %v16993_v55, %v3929_v39 }
 0x484   : > { %v4020_v33 = vmax.f32 %v4014_v49, 0.0  ;;  %20574 = vrot.lane.b32.xlu1 %v20573_v25, %s21035_s16  ;;  %v22972_v25 = vld [vmem:[%s27153_s7 + $0x40] sm:$0xff] }
 0x486   : > { %v20578_v30 = vpack.i.bf16 %v4020_v33, %v4019_v26  ;;  %v22937_v59 = vpack.c.bf16 %v4020_v33, %v4019_v26 }
 0x488   : > { %20569 = vrot.lane.b32.xlu0 %v20578_v30, %s21034_s29 }
 0x48a   : > { %v20425_v44 = vpop.permute.xlu1 %20424 }
 0x48b   : > { %v20427_v31 = vunpack.i.h.bf16 %v20425_v44  ;;  %v20426_v53 = vunpack.i.l.bf16 %v20425_v44 }
 0x48c   : > { %20579 = vrot.lane.b32.xlu0 %v20578_v30, %s21035_s16 }
 0x48d   : > { %v22941_v43 = vpack.c.bf16 %v20427_v31, %v20426_v53 }
 0x48e   : > { %v20435_v16 = vpop.permute.xlu1 %20434 }
 0x48f   : > { %18702 = vmatprep.subr.msk.bf16.mxu1 %vm21858_vm14, %v22941_v43  ;;  %v20437_v14 = vunpack.i.h.bf16 %v20435_v16  ;;  %v20436_v23 = vunpack.i.l.bf16 %v20435_v16 }
 0x490   : > { %v15283_v47 = vpop.f32.mrb[64].mxu0  ;;  %18705 = vmatpush3.bf16.msk.msra.mxu1 %vm21858_vm14, %v22941_v43 }
 0x491   : > { %v15284_v56 = vpop.f32.mrb[65].mxu0  ;;  %v22952_v24 = vpack.c.bf16 %v20437_v14, %v20436_v23 }
 0x492   : > { %v15285_v48 = vadd.f32 %v15284_v56, %v15283_v47  ;;  %v20430_v35 = vpop.permute.xlu0 %20429 }
 0x493   : > { %v20432_v9 = vunpack.i.h.bf16 %v20430_v35  ;;  %v20431_v55 = vunpack.i.l.bf16 %v20430_v35 }
 0x494   : > { %v15286_v61 = vpop.f32.mrb[66].mxu0  ;;  %v4088_v0 = vadd.f32 %v15285_v48, %v22625_v37 }
 0x495   : > { %v22950_v22 = vpack.c.bf16 %v20432_v9, %v20431_v55  ;;  %v15287_v27 = vpop.f32.mrb[67].mxu0 }
 0x496   : > { %v15288_v10 = vadd.f32 %v15287_v27, %v15286_v61  ;;  %v4173_v4 = vadd.f32 %v4172_v8, %v4088_v0  ;;  %v20440_v5 = vpop.permute.xlu0 %20439  ;;  %v22964_v8 = vld [vmem:[%s27153_s7 + $0x28] sm:$0xff] }
 0x497   : > { %v20442_v17 = vunpack.i.h.bf16 %v20440_v5  ;;  %v20441_v58 = vunpack.i.l.bf16 %v20440_v5  ;;  %18708 = vmatprep.subr.msk.bf16.mxu1 %vm21858_vm14, %v22950_v22 }
 0x498   : > { %v4093_v52 = vadd.f32 %v15288_v10, %v22633_v20  ;;  %v15289_v41 = vpop.f32.mrb[68].mxu0  ;;  %v15335_v21 = vpop.f32.mrb[94].mxu1  ;;  %18711 = vmatpush3.bf16.msk.msra.mxu1 %vm21858_vm14, %v22950_v22  ;;  %v4191_v26 = vmax.f32 %v4173_v4, 0.0 }
 0x499   : > { %v15290_v32 = vpop.f32.mrb[69].mxu0  ;;  %v15336_v54 = vpop.f32.mrb[95].mxu1  ;;  %18714 = vmatprep.subr.msk.bf16.mxu1 %vm21833_vm13, %v22952_v24  ;;  %v22974_v30 = vpack.c.bf16 %v20442_v17, %v20441_v58 }
 0x49a   : > { %v4178_v50 = vadd.f32 %v17004_v63, %v4093_v52  ;;  %v15291_v1 = vadd.f32 %v15290_v32, %v15289_v41  ;;  %v15337_v39 = vadd.f32 %v15336_v54, %v15335_v21  ;;  %v20455_v49 = vpop.permute.xlu1 %20454  ;;  %v20445_v33 = vpop.permute.xlu0 %20444  ;;  %v22985_v63 = vld [vmem:[%s27153_s7 + $0x58] sm:$0xff] }
 0x49b   : > { %v20447_v44 = vunpack.i.h.bf16 %v20445_v33  ;;  %v20446_v31 = vunpack.i.l.bf16 %v20445_v33  ;;  %17059 = vmatmul.mubr.msk.f32.vlgmr.msra.gmra.mrb[114].mxu1 %vm2616_vm12, %v22964_v8  ;;  %v20457_v16 = vunpack.i.h.bf16 %v20455_v49  ;;  %v20456_v56 = vunpack.i.l.bf16 %v20455_v49 }
 0x49c   : > { %v4192_v53 = vmax.f32 %v4178_v50, 0.0  ;;  %v4098_v47 = vadd.f32 %v15291_v1, %v22659_v18  ;;  %v15292_v48 = vpop.f32.mrb[70].mxu0  ;;  %v15338_v35 = vpop.f32.mrb[96].mxu1  ;;  %18716 = vmatpush3.bf16.msra.mxu1 %v22797_v13  ;;  %17061 = vmatprep.mubr.msk.f32.mxu1 %vm2616_vm12, %v22972_v25 }
 0x49d   : > { %v22987_v14 = vpack.c.bf16 %v20447_v44, %v20446_v31  ;;  %v15293_v23 = vpop.f32.mrb[71].mxu0  ;;  %v15339_v9 = vpop.f32.mrb[97].mxu1  ;;  %18719 = vmatprep.subr.msk.bf16.mxu1 %vm21833_vm13, %v22974_v30  ;;  %v23002_v58 = vpack.c.bf16 %v20457_v16, %v20456_v56 }
 0x49e   : > { %v20588_v55 = vpack.i.bf16 %v4192_v53, %v4191_v26  ;;  %v22992_v61 = vpack.c.bf16 %v4192_v53, %v4191_v26  ;;  %v22995_v0 = vadd.f32 %v22930_v11, %v4098_v47  ;;  %v20450_v27 = vpop.permute.xlu0 %20449  ;;  %v15294_v10 = vadd.f32 %v15293_v23, %v15292_v48 }
 0x49f   : > { %v15340_v4 = vadd.f32 %v15339_v9, %v15338_v35  ;;  %v20452_v5 = vunpack.i.h.bf16 %v20450_v27  ;;  %v20451_v17 = vunpack.i.l.bf16 %v20450_v27  ;;  %18660 = vmatprep.subr.msk.bf16.mxu0 %vm21833_vm13, %v22987_v14  ;;  %17062 = vmatmul.mubr.msk.f32.gmra.mrb[116].mxu1 %vm2616_vm12, %v22985_v63  ;;  %v4262_v11 = vadd.f32 %v15337_v39, %v22625_v37 }
 0x4a0   : > { %v15341_v52 = vpop.f32.mrb[98].mxu1  ;;  %v17018_v41 = vpop.f32.mrb[72].mxu0  ;;  %20589 = vrot.lane.b32.xlu0 %v20588_v55, %s21035_s16  ;;  %20584 = vrot.lane.b32.xlu1 %v20588_v55, %s21034_s29  ;;  %v4103_v21 = vadd.f32 %v15294_v10, %v22676_v62  ;;  %v4193_v35 = vmax.f32 %v22995_v0, 0.0 }
 0x4a1   : > { %v4267_v32 = vadd.f32 %v15340_v4, %v22633_v20  ;;  %v23009_v54 = vpack.c.bf16 %v20452_v5, %v20451_v17  ;;  %v15342_v50 = vpop.f32.mrb[99].mxu1  ;;  %v4346_v1 = vpop.f32.mrb[73].mxu0  ;;  %18662 = vmatpush3.bf16.msra.mxu0 %v22770_v42  ;;  %18721 = vmatpush3.bf16.msra.mxu1 %v22818_v45 }
 0x4a2   : > { %v15343_v49 = vadd.f32 %v15342_v50, %v15341_v52  ;;  %v4347_v33 = vadd.f32 %v4346_v1, %v4262_v11  ;;  %v20460_v26 = vpop.permute.xlu1 %20459  ;;  %18724 = vmatprep.subr.msk.bf16.mxu1 %vm21833_vm13, %v23002_v58  ;;  %5435 = vmatprep.mubr.f32.mxu1 %v22882_v34  ;;  %v4188_v39 = vadd.f32 %v22928_v28, %v4103_v21  ;;  %v20470_v47 = vpop.permute.xlu0 %20469 }
 0x4a3   : > { %v4352_v44 = vadd.f32 %v17018_v41, %v4267_v32  ;;  %v20462_v31 = vunpack.i.h.bf16 %v20460_v26  ;;  %v20461_v53 = vunpack.i.l.bf16 %v20460_v26  ;;  %18665 = vmatprep.subr.msk.bf16.mxu0 %vm21833_vm13, %v23009_v54  ;;  %v20472_v10 = vunpack.i.h.bf16 %v20470_v47 }
 0x4a4   : > { %v4365_v42 = vmax.f32 %v4347_v33, 0.0  ;;  %v15344_v16 = vpop.f32.mrb[100].mxu1  ;;  %v17021_v56 = vpop.f32.mrb[74].mxu0  ;;  %v4272_v48 = vadd.f32 %v15343_v49, %v22659_v18  ;;  %v4194_v23 = vmax.f32 %v4188_v39, 0.0  ;;  %v20471_v4 = vunpack.i.l.bf16 %v20470_v47 }
 0x4a5   : > { %v4366_v9 = vmax.f32 %v4352_v44, 0.0  ;;  %v23023_v55 = vpack.c.bf16 %v20462_v31, %v20461_v53  ;;  %v15345_v28 = vpop.f32.mrb[101].mxu1  ;;  %v4356_v27 = vpop.f32.mrb[75].mxu0  ;;  %18667 = vmatpush3.bf16.msra.mxu0 %v22795_v7  ;;  %18726 = vmatpush3.bf16.msra.mxu1 %v22828_v51 }
 0x4a6   : > { %v15346_v5 = vadd.f32 %v15345_v28, %v15344_v16  ;;  %v4357_v17 = vadd.f32 %v4356_v27, %v4272_v48  ;;  %v20465_v52 = vpop.permute.xlu1 %20464  ;;  %18670 = vmatprep.subr.msk.bf16.mxu0 %vm21833_vm13, %v22952_v24  ;;  %v20598_v32 = vpack.i.bf16 %v4194_v23, %v4193_v35  ;;  %v20480_v1 = vpop.permute.xlu0 %20479  ;;  %v23042_v33 = vpack.c.bf16 %v4194_v23, %v4193_v35 }
 0x4a7   : > { %v20613_v0 = vpack.i.bf16 %v4366_v9, %v4365_v42  ;;  %v23030_v41 = vpack.c.bf16 %v4366_v9, %v4365_v42  ;;  %v20467_v11 = vunpack.i.h.bf16 %v20465_v52  ;;  %18729 = vmatprep.subr.msk.bf16.mxu1 %vm21833_vm13, %v23023_v55  ;;  %v20466_v21 = vunpack.i.l.bf16 %v20465_v52 }
 0x4a8   : > { %v4277_v7 = vadd.f32 %v15346_v5, %v22676_v62  ;;  %v23036_v50 = vpop.f32.mrb[76].mxu0  ;;  %20599 = vrot.lane.b32.xlu0 %v20598_v32, %s21035_s16  ;;  %v18694_v31 = vpack.c.bf16 %v20472_v10, %v20471_v4  ;;  %20594 = vrot.lane.b32.xlu1 %v20598_v32, %s21034_s29  ;;  %v4367_v42 = vmax.f32 %v4357_v17, 0.0  ;;  %v20482_v16 = vunpack.i.h.bf16 %v20480_v1 }
 0x4a9   : > { %18672 = vmatpush3.bf16.msra.mxu0 %v22797_v13  ;;  %18731 = vmatpush3.bf16.msra.mxu1 %v22834_v38  ;;  %v23040_v49 = vpop.f32.mrb[77].mxu0  ;;  %v18688_v39 = vpack.c.bf16 %v20467_v11, %v20466_v21  ;;  %v20481_v48 = vunpack.i.l.bf16 %v20480_v1 }
 0x4aa   : > { %v4362_v26 = vadd.f32 %v17021_v56, %v4277_v7  ;;  %v20475_v44 = vpop.permute.xlu1 %20474  ;;  %18675 = vmatprep.subr.msk.bf16.mxu0 %vm21833_vm13, %v22974_v30  ;;  %v20490_v5 = vpop.permute.xlu0 %20489 }
 0x4ab   : > { %v20477_v53 = vunpack.i.h.bf16 %v20475_v44  ;;  %v20476_v13 = vunpack.i.l.bf16 %v20475_v44  ;;  %18734 = vmatprep.subr.msk.bf16.mxu1 %vm21858_vm14, %v18688_v39  ;;  %v18683_v27 = vpack.c.bf16 %v20482_v16, %v20481_v48  ;;  %v20492_v17 = vunpack.i.h.bf16 %v20490_v5 }
 0x4ac   : > { %v4368_v47 = vmax.f32 %v4362_v26, 0.0  ;;  %v23051_v56 = vpop.f32.mrb[78].mxu0  ;;  %20604 = vrot.lane.b32.xlu1 %v20613_v0, %s21034_s29  ;;  %v20491_v52 = vunpack.i.l.bf16 %v20490_v5  ;;  %v23101_v26 = vld [vmem:[%s27153_s7 + $0x20] sm:$0xff] }
 0x4ad   : > { %v18678_v35 = vpack.c.bf16 %v20477_v53, %v20476_v13  ;;  %18677 = vmatpush3.bf16.msra.mxu0 %v22818_v45  ;;  %18736 = vmatpush3.bf16.msra.mxu1 %v22847_v40  ;;  %v23055_v23 = vpop.f32.mrb[79].mxu0 }
 0x4ae   : > { %v20618_v9 = vpack.i.bf16 %v4368_v47, %v4367_v42  ;;  %v23057_v28 = vpack.c.bf16 %v4368_v47, %v4367_v42  ;;  %18739 = vmatprep.subr.msk.bf16.mxu1 %vm21858_vm14, %v18694_v31  ;;  %v20485_v10 = vpop.permute.xlu1 %20484  ;;  %v18697_v1 = vpack.c.bf16 %v20492_v17, %v20491_v52 }
 0x4af   : > { %18680 = vmatprep.subr.msk.bf16.mxu0 %vm21858_vm14, %v18678_v35  ;;  %v20487_v45 = vunpack.i.h.bf16 %v20485_v10  ;;  %v20486_v4 = vunpack.i.l.bf16 %v20485_v10 }
 0x4b0   : > { %20609 = vrot.lane.b32.xlu0 %v20618_v9, %s21034_s29  ;;  %20614 = vrot.lane.b32.xlu1 %v20613_v0, %s21035_s16 }
 0x4b1   : > { %18682 = vmatpush3.bf16.msra.mxu0 %v22828_v51  ;;  %18741 = vmatpush3.bf16.msra.mxu1 %v22860_v6  ;;  %v18691_v11 = vpack.c.bf16 %v20487_v45, %v20486_v4  ;;  %v23135_v4 = vld [vmem:[%s27153_s7 + $0x30] sm:$0xff] }
 0x4b2   : > { %18685 = vmatprep.subr.msk.bf16.mxu0 %vm21858_vm14, %v18683_v27  ;;  %18744 = vmatprep.subr.msk.bf16.mxu1 %vm21858_vm14, %v22941_v43 }
 0x4b4   : > { %20619 = vrot.lane.b32.xlu0 %v20618_v9, %s21035_s16 }
 0x4b5   : > { %18687 = vmatpush3.bf16.msra.mxu0 %v22834_v38  ;;  %18747 = vmatpush3.bf16.msk.msra.mxu1 %vm21833_vm13, %v22987_v14  ;;  %v23091_v14 = vld [vmem:[%s27153_s7] sm:$0xff] }
 0x4b6   : > { %18690 = vmatprep.subr.msk.bf16.mxu0 %vm21858_vm14, %v18688_v39  ;;  %18750 = vmatprep.subr.msk.bf16.mxu1 %vm21858_vm14, %v22950_v22 }
 0x4b8   : > { %v15387_v0 = vpop.f32.mrb[102].mxu1 }
 0x4b9   : > { %v15388_v7 = vpop.f32.mrb[103].mxu1  ;;  %18693 = vmatpush3.bf16.msk.msra.mxu0 %vm21833_vm13, %v18691_v11  ;;  %18753 = vmatpush3.bf16.msk.msra.mxu1 %vm21833_vm13, %v23009_v54 }
 0x4ba   : > { %v15389_v21 = vadd.f32 %v15388_v7, %v15387_v0  ;;  %18768 = vmatprep.subr.msk.bf16.mxu1 %vm21833_vm13, %v23002_v58  ;;  %v20495_v32 = vpop.permute.xlu1 %20494  ;;  %18696 = vmatprep.subr.msk.bf16.mxu0 %vm21858_vm14, %v18694_v31  ;;  %v23111_v31 = vld [vmem:[%s27153_s7 + $0x18] sm:$0xff]  ;;  %v23148_v7 = vld [vmem:[%s27153_s7 + $0x50] sm:$0xff] }
 0x4bb   : > { %v20497_v54 = vunpack.i.h.bf16 %v20495_v32  ;;  %v20496_v39 = vunpack.i.l.bf16 %v20495_v32 }
 0x4bc   : > { %v15390_v44 = vpop.f32.mrb[104].mxu1  ;;  %v4436_v53 = vadd.f32 %v15389_v21, %v22625_v37  ;;  %5436 = vmatmul.mubr.f32.vlgmr.msra.gmra.mrb[118].mxu1 %v23091_v14 }
 0x4bd   : > { %v15391_v13 = vpop.f32.mrb[105].mxu1  ;;  %18699 = vmatpush3.bf16.msk.msra.mxu0 %vm21833_vm13, %v18697_v1  ;;  %18770 = vmatpush3.bf16.msra.mxu1 %v22828_v51  ;;  %v23121_v51 = vld [vmem:[%s27153_s7 + $0x38] sm:$0xff]  ;;  %v23123_v9 = vpack.c.bf16 %v20497_v54, %v20496_v39 }
 0x4be   : > { %v15392_v47 = vadd.f32 %v15391_v13, %v15390_v44  ;;  %v4521_v42 = vadd.f32 %v23040_v49, %v4436_v53  ;;  %18773 = vmatprep.subr.msk.bf16.mxu1 %vm21833_vm13, %v23023_v55  ;;  %v20505_v16 = vpop.permute.xlu1 %20504  ;;  %5440 = vmatprep.mubr.f32.mxu1 %v23101_v26 }
 0x4bf   : > { %v20507_v48 = vunpack.i.h.bf16 %v20505_v16  ;;  %v20506_v35 = vunpack.i.l.bf16 %v20505_v16  ;;  %v23165_v16 = vld [vmem:[%s27153_s7 + $0x48] sm:$0xff] }
 0x4c0   : > { %v4441_v27 = vadd.f32 %v15392_v47, %v22633_v20  ;;  %v15393_v10 = vpop.f32.mrb[106].mxu1  ;;  %5262 = vmatmul.mubr.f32.vlgmr.msra.gmra.mrb[88].mxu0 %v23091_v14  ;;  %5441 = vmatmul.mubr.f32.gmra.mrb[120].mxu1 %v23111_v31  ;;  %v4539_v21 = vmax.f32 %v4521_v42, 0.0 }
 0x4c1   : > { %v23128_v49 = vpack.c.bf16 %v20507_v48, %v20506_v35  ;;  %v15394_v45 = vpop.f32.mrb[107].mxu1  ;;  %18775 = vmatpush3.bf16.msra.mxu1 %v22834_v38  ;;  %5266 = vmatprep.mubr.f32.mxu0 %v23101_v26 }
 0x4c2   : > { %v4526_v5 = vadd.f32 %v23036_v50, %v4441_v27  ;;  %v15395_v17 = vadd.f32 %v15394_v45, %v15393_v10  ;;  %v20500_v52 = vpop.permute.xlu0 %20499  ;;  %v20515_v11 = vpop.permute.xlu1 %20514  ;;  %18778 = vmatprep.subr.msk.bf16.mxu1 %vm21833_vm13, %v23123_v9  ;;  %5445 = vmatprep.mubr.f32.mxu1 %v23121_v51 }
 0x4c3   : > { %v20502_v0 = vunpack.i.h.bf16 %v20500_v52  ;;  %v20501_v38 = vunpack.i.l.bf16 %v20500_v52  ;;  %18756 = vmatprep.subr.msk.bf16.mxu0 %vm21858_vm14, %v23128_v49  ;;  %v20517_v39 = vunpack.i.h.bf16 %v20515_v11  ;;  %v20516_v48 = vunpack.i.l.bf16 %v20515_v11 }
 0x4c4   : > { %v4540_v50 = vmax.f32 %v4526_v5, 0.0  ;;  %v15396_v32 = vpop.f32.mrb[108].mxu1  ;;  %v4446_v1 = vadd.f32 %v15395_v17, %v22659_v18  ;;  %5267 = vmatmul.mubr.f32.gmra.mrb[90].mxu0 %v23111_v31  ;;  %5446 = vmatmul.mubr.f32.gmra.mrb[122].mxu1 %v23135_v4 }
 0x4c5   : > { %v23153_v54 = vpack.c.bf16 %v20502_v0, %v20501_v38  ;;  %v15397_v44 = vpop.f32.mrb[109].mxu1  ;;  %18759 = vmatpush3.bf16.msk.msra.mxu0 %vm21858_vm14, %v23128_v49  ;;  %18780 = vmatpush3.bf16.msra.mxu1 %v22847_v40 }
 0x4c6   : > { %v20628_v53 = vpack.i.bf16 %v4540_v50, %v4539_v21  ;;  %v23159_v13 = vpack.c.bf16 %v4540_v50, %v4539_v21  ;;  %v15398_v47 = vadd.f32 %v15397_v44, %v15396_v32  ;;  %v20510_v42 = vpop.permute.xlu0 %20509  ;;  %5450 = vmatprep.mubr.f32.mxu1 %v23148_v7  ;;  %v4531_v35 = vadd.f32 %v23055_v23, %v4446_v1  ;;  %v23184_v32 = vpop.permute.xlu1 %20524 }
 0x4c7   : > { %v20512_v27 = vunpack.i.h.bf16 %v20510_v42  ;;  %v20511_v10 = vunpack.i.l.bf16 %v20510_v42  ;;  %5271 = vmatprep.mubr.f32.mxu0 %v23121_v51  ;;  %18783 = vmatprep.subr.msk.bf16.mxu1 %vm21833_vm13, %v23153_v54  ;;  %v23182_v21 = vpack.c.bf16 %v20517_v39, %v20516_v48 }
 0x4c8   : > { %v4451_v45 = vadd.f32 %v15398_v47, %v22676_v62  ;;  %v15439_v5 = vpop.f32.mrb[80].mxu0  ;;  %20629 = vrot.lane.b32.xlu0 %v20628_v53, %s21035_s16  ;;  %20624 = vrot.lane.b32.xlu1 %v20628_v53, %s21034_s29  ;;  %v17046_v17 = vpop.f32.mrb[110].mxu1 }
 0x4c9   : > { %v23175_v52 = vpack.c.bf16 %v20512_v27, %v20511_v10  ;;  %v15440_v11 = vpop.f32.mrb[81].mxu0  ;;  %5272 = vmatmul.mubr.f32.gmra.mrb[92].mxu0 %v23135_v4  ;;  %5451 = vmatmul.mubr.f32.gmra.mrb[124].mxu1 %v23165_v16  ;;  %v4694_v23 = vpop.f32.mrb[111].mxu1 }
 0x4ca   : > { %v4536_v0 = vadd.f32 %v23051_v56, %v4451_v45  ;;  %v15441_v38 = vadd.f32 %v15440_v11, %v15439_v5  ;;  %18785 = vmatpush3.bf16.msra.mxu1 %v22860_v6  ;;  %v20520_v50 = vpop.permute.xlu0 %20519  ;;  %5276 = vmatprep.mubr.f32.mxu0 %v23148_v7  ;;  %v4541_v56 = vmax.f32 %v4531_v35, 0.0 }
 0x4cb   : > { %18788 = vmatprep.subr.msk.bf16.mxu1 %vm21858_vm14, %v22941_v43  ;;  %18762 = vmatprep.subr.msk.bf16.mxu0 %vm21858_vm14, %v23175_v52  ;;  %v20522_v47 = vunpack.i.h.bf16 %v20520_v50  ;;  %v20521_v42 = vunpack.i.l.bf16 %v20520_v50 }
 0x4cc   : > { %v4542_v1 = vmax.f32 %v4536_v0, 0.0  ;;  %v15442_v44 = vpop.f32.mrb[82].mxu0  ;;  %v4610_v53 = vadd.f32 %v15441_v38, %v22625_v37  ;;  %18765 = vmatpush3.bf16.msk.msra.mxu0 %vm21858_vm14, %v23175_v52  ;;  %v17049_v39 = vpop.f32.mrb[112].mxu1  ;;  %5609 = vmatprep.mubr.f32.mxu1 %v22882_v34 }
 0x4cd   : > { %v15443_v48 = vpop.f32.mrb[83].mxu0  ;;  %5277 = vmatmul.mubr.f32.gmra.mrb[94].mxu0 %v23165_v16  ;;  %18810 = vmatprep.subr.msk.bf16.mxu0 %vm21858_vm14, %v23182_v21  ;;  %v4704_v43 = vpop.f32.mrb[113].mxu1  ;;  %v23212_v11 = vpack.c.bf16 %v20522_v47, %v20521_v42 }
 0x4ce   : > { %v20638_v35 = vpack.i.bf16 %v4542_v1, %v4541_v56  ;;  %v23201_v27 = vpack.c.bf16 %v4542_v1, %v4541_v56  ;;  %v15444_v37 = vadd.f32 %v15443_v48, %v15442_v44  ;;  %18790 = vmatpush3.bf16.msra.mxu1 %v22887_v19  ;;  %v4695_v10 = vadd.f32 %v4694_v23, %v4610_v53  ;;  %v20535_v23 = vpop.permute.xlu1 %20534 }
 0x4cf   : > { %18793 = vmatprep.subr.msk.bf16.mxu1 %vm21858_vm14, %v22950_v22  ;;  %17072 = vmatprep.mubr.msk.f32.mxu0 %vm2616_vm12, %v22845_v3  ;;  %v20537_v42 = vunpack.i.h.bf16 %v20535_v23  ;;  %v20536_v48 = vunpack.i.l.bf16 %v20535_v23 }
 0x4d0   : > { %v4615_v45 = vadd.f32 %v15444_v37, %v22633_v20  ;;  %v15445_v5 = vpop.f32.mrb[84].mxu0  ;;  %20639 = vrot.lane.b32.xlu0 %v20638_v35, %s21035_s16  ;;  %20634 = vrot.lane.b32.xlu1 %v20638_v35, %s21034_s29  ;;  %v4713_v22 = vmax.f32 %v4695_v10, 0.0  ;;  %v20527_v10 = vunpack.i.h.bf16 %v23184_v32 }
 0x4d1   : > { %v15446_v0 = vpop.f32.mrb[85].mxu0  ;;  %17073 = vmatmul.mubr.msk.f32.vlgmr.msra.gmra.mrb[96].mxu0 %vm2616_vm12, %v22964_v8 }
 0x4d2   : > { %v4700_v38 = vadd.f32 %v17046_v17, %v4615_v45  ;;  %v15447_v50 = vadd.f32 %v15446_v0, %v15445_v5  ;;  %18813 = vmatpush3.bf16.msk.msra.mxu0 %vm21858_vm14, %v23182_v21  ;;  %18795 = vmatpush3.bf16.msra.mxu1 %v22899_v12  ;;  %v23253_v5 = vpack.c.bf16 %v20537_v42, %v20536_v48  ;;  %v4732_v42 = vld [vmem:[%s27154_s8 + $0x18] sm:$0xff] }
 0x4d3   : > { %18816 = vmatprep.subr.msk.bf16.mxu0 %vm21858_vm14, %v23212_v11  ;;  %18798 = vmatprep.subr.msk.bf16.mxu1 %vm21858_vm14, %v23128_v49 }
 0x4d4   : > { %v4714_v20 = vmax.f32 %v4700_v38, 0.0  ;;  %v15448_v1 = vpop.f32.mrb[86].mxu0  ;;  %v4620_v17 = vadd.f32 %v15447_v50, %v22659_v18  ;;  %17075 = vmatprep.mubr.msk.f32.mxu0 %vm2616_vm12, %v22972_v25  ;;  %v20540_v18 = vpop.permute.xlu1 %20539  ;;  %v4729_v50 = vld [vmem:[%s27154_s8] sm:$0xff] }
 0x4d5   : > { %v15449_v56 = vpop.f32.mrb[87].mxu0  ;;  %17076 = vmatmul.mubr.msk.f32.gmra.mrb[98].mxu0 %vm2616_vm12, %v22985_v63  ;;  %v20541_v0 = vunpack.i.l.bf16 %v20540_v18 }
 0x4d6   : > { %v20653_v44 = vpack.i.bf16 %v4714_v20, %v4713_v22  ;;  %v23231_v53 = vpack.c.bf16 %v4714_v20, %v4713_v22  ;;  %v15450_v47 = vadd.f32 %v15449_v56, %v15448_v1  ;;  %18819 = vmatpush3.bf16.msk.msra.mxu0 %vm21858_vm14, %v23212_v11  ;;  %v4705_v35 = vadd.f32 %v4704_v43, %v4620_v17 }
 0x4d7   : > { %18801 = vmatpush3.bf16.msk.msra.mxu1 %vm21833_vm13, %v22952_v24  ;;  %18822 = vmatprep.subr.msk.bf16.mxu0 %vm21833_vm13, %v23123_v9  ;;  %v20526_v43 = vunpack.i.l.bf16 %v23184_v32  ;;  %v20530_v24 = vpop.permute.xlu0 %20529 }
 0x4d8   : > { %v4625_v37 = vadd.f32 %v15450_v47, %v22676_v62  ;;  %20644 = vrot.lane.b32.xlu1 %v20653_v44, %s21034_s29  ;;  %18804 = vmatprep.subr.msk.bf16.mxu1 %vm21858_vm14, %v23175_v52  ;;  %v20542_v62 = vunpack.i.h.bf16 %v20540_v18  ;;  %v4715_v32 = vmax.f32 %v4705_v35, 0.0  ;;  %v4730_v47 = vld [vmem:[%s27154_s8 + $0x8] sm:$0xff] }
 0x4d9   : > { %17086 = vmatprep.mubr.msk.f32.mxu0 %vm2616_vm12, %v22845_v3  ;;  %v23263_v3 = vpack.c.bf16 %v20527_v10, %v20526_v43 }
 0x4da   : > { %v4710_v45 = vadd.f32 %v17049_v39, %v4625_v37  ;;  %17087 = vmatmul.mubr.msk.f32.vlgmr.msra.gmra.mrb[100].mxu0 %vm2616_vm12, %v22964_v8  ;;  %v20532_v39 = vunpack.i.h.bf16 %v20530_v24  ;;  %v23278_v20 = vpack.c.bf16 %v20542_v62, %v20541_v0 }
 0x4db   : > { %18824 = vmatpush3.bf16.msra.mxu0 %v22847_v40  ;;  %18807 = vmatpush3.bf16.msk.msra.mxu1 %vm21833_vm13, %v22974_v30  ;;  %v20531_v40 = vunpack.i.l.bf16 %v20530_v24 }
 0x4dc   : > { %v4716_v23 = vmax.f32 %v4710_v45, 0.0  ;;  %18827 = vmatprep.subr.msk.bf16.mxu0 %vm21833_vm13, %v23153_v54  ;;  %20654 = vrot.lane.b32.xlu1 %v20653_v44, %s21035_s16 }
 0x4dd   : > { %18864 = vmatprep.subr.msk.bf16.mxu1 %vm21858_vm14, %v23253_v5  ;;  %17089 = vmatprep.mubr.msk.f32.mxu0 %vm2616_vm12, %v22972_v25  ;;  %v23291_v22 = vpack.c.bf16 %v20532_v39, %v20531_v40 }
 0x4de   : > { %v20658_v30 = vpack.i.bf16 %v4716_v23, %v4715_v32  ;;  %v23270_v38 = vpack.c.bf16 %v4716_v23, %v4715_v32  ;;  %5610 = vmatmul.mubr.f32.vlgmr.msra.gmra.mrb[126].mxu1 %v23091_v14  ;;  %17090 = vmatmul.mubr.msk.f32.gmra.mrb[102].mxu0 %vm2616_vm12, %v22985_v63 }
 0x4df   : > { %18829 = vmatpush3.bf16.msra.mxu0 %v22860_v6  ;;  %18867 = vmatpush3.bf16.msk.msra.mxu1 %vm21858_vm14, %v23253_v5  ;;  %v4731_v6 = vld [vmem:[%s27154_s8 + $0x10] sm:$0xff] }
 0x4e0   : > { %18832 = vmatprep.subr.msk.bf16.mxu0 %vm21833_vm13, %v23263_v3  ;;  %20649 = vrot.lane.b32.xlu0 %v20658_v30, %s21034_s29 }
 0x4e1   : > { %5167 = vperm.xlu1 %20142, %v4729_v50   ;;  %18870 = vmatprep.subr.msk.bf16.mxu1 %vm21858_vm14, %v23278_v20  ;;  %v23401_v50 = vld [vmem:[%s27153_s7 + $0x8] sm:$0xff] }
 0x4e2   : > { %5614 = vmatprep.mubr.f32.mxu1 %v23101_v26  ;;  %5783 = vmatprep.mubr.f32.mxu0 %v22882_v34  ;;  %v20555_v1 = vpop.permute.xlu1 %20554  ;;  %v20545_v44 = vpop.permute.xlu0 %20544 }
 0x4e3   : > { %5615 = vmatmul.mubr.f32.gmra.mrb[128].mxu1 %v23111_v31  ;;  %18834 = vmatpush3.bf16.msra.mxu0 %v22887_v19  ;;  %v20557_v17 = vunpack.i.h.bf16 %v20555_v1  ;;  %v20556_v56 = vunpack.i.l.bf16 %v20555_v1  ;;  %v20547_v10 = vunpack.i.h.bf16 %v20545_v44  ;;  %v20546_v43 = vunpack.i.l.bf16 %v20545_v44 }
 0x4e4   : > { %18837 = vmatprep.subr.msk.bf16.mxu0 %vm21833_vm13, %v23291_v22  ;;  %18873 = vmatpush3.bf16.msk.msra.mxu1 %vm21858_vm14, %v23278_v20 }
 0x4e5   : > { %20659 = vrot.lane.b32.xlu0 %v20658_v30, %s21035_s16  ;;  %5177 = vperm.xlu1 %20142, %v4731_v6   ;;  %v23307_v34 = vpack.c.bf16 %v20557_v17, %v20556_v56  ;;  %v23356_v24 = vpack.c.bf16 %v20547_v10, %v20546_v43 }
 0x4e6   : > { %5619 = vmatprep.mubr.f32.mxu1 %v23121_v51 }
 0x4e7   : > { %5620 = vmatmul.mubr.f32.gmra.mrb[130].mxu1 %v23135_v4  ;;  %18839 = vmatpush3.bf16.msra.mxu0 %v22899_v12 }
 0x4e8   : > { %18842 = vmatprep.subr.msk.bf16.mxu0 %vm21858_vm14, %v23128_v49  ;;  %5624 = vmatprep.mubr.f32.mxu1 %v23148_v7  ;;  %v23333_v49 = vld [vmem:[%s27153_s7 + $0x10] sm:$0xff] }
 0x4e9   : > { %5172 = vperm.xlu0 %20141, %v4730_v47   ;;  %18918 = vmatprep.subr.msk.bf16.mxu1 %vm21858_vm14, %v23307_v34 }
 0x4ea   : > { %v20550_v48 = vpop.permute.xlu0 %20549 }
 0x4eb   : > { %5625 = vmatmul.mubr.f32.gmra.mrb[132].mxu1 %v23165_v16  ;;  %18844 = vmatpush3.bf16.msra.mxu0 %v22897_v60  ;;  %v20552_v45 = vunpack.i.h.bf16 %v20550_v48  ;;  %v20551_v62 = vunpack.i.l.bf16 %v20550_v48 }
 0x4ec   : > { %18847 = vmatprep.subr.msk.bf16.mxu0 %vm21858_vm14, %v23175_v52  ;;  %17100 = vmatprep.mubr.msk.f32.mxu1 %vm2616_vm12, %v23333_v49 }
 0x4ed   : > { %5182 = vperm.xlu0 %20141, %v4732_v42  }
 0x4ee   : > { %v20560_v35 = vpop.permute.xlu0 %20559 }
 0x4ef   : > { %18849 = vmatpush3.bf16.msra.mxu0 %v22907_v57  ;;  %17101 = vmatmul.mubr.msk.f32.vlgmr.msra.gmra.mrb[134].mxu1 %vm2616_vm12, %v22964_v8  ;;  %v20562_v18 = vunpack.i.h.bf16 %v20560_v35  ;;  %v20561_v37 = vunpack.i.l.bf16 %v20560_v35 }
 0x4f0   : > { %18921 = vmatpush3.bf16.msk.msra.mxu1 %vm21858_vm14, %v23307_v34  ;;  %18852 = vmatprep.subr.msk.bf16.mxu0 %vm21858_vm14, %v23182_v21 }
 0x4f1   : > { %v23346_v52 = vpack.c.bf16 %v20562_v18, %v20561_v37  ;;  %17103 = vmatprep.mubr.msk.f32.mxu1 %vm2616_vm12, %v22972_v25 }
 0x4f2   : > { %v20565_v0 = vpop.permute.xlu1 %20564 }
 0x4f3   : > { %18855 = vmatpush3.bf16.msk.msra.mxu0 %vm21833_vm13, %v23002_v58  ;;  %18924 = vmatprep.subr.msk.bf16.mxu1 %vm21858_vm14, %v23346_v52  ;;  %v23374_v58 = vpack.c.bf16 %v20552_v45, %v20551_v62  ;;  %v20567_v23 = vunpack.i.h.bf16 %v20565_v0  ;;  %v20566_v32 = vunpack.i.l.bf16 %v20565_v0 }
 0x4f4   : > { %18858 = vmatprep.subr.msk.bf16.mxu0 %vm21858_vm14, %v23212_v11  ;;  %17104 = vmatmul.mubr.msk.f32.gmra.mrb[136].mxu1 %vm2616_vm12, %v22985_v63 }
 0x4f5   : > { %18927 = vmatpush3.bf16.msk.msra.mxu1 %vm21858_vm14, %v23346_v52  ;;  %17114 = vmatprep.mubr.msk.f32.mxu1 %vm2616_vm12, %v23333_v49 }
 0x4f6   : > { %18930 = vmatprep.subr.msk.bf16.mxu1 %vm21833_vm13, %v23356_v24 }
 0x4f7   : > { %18861 = vmatpush3.bf16.msk.msra.mxu0 %vm21833_vm13, %v23023_v55  ;;  %v23390_v55 = vpack.c.bf16 %v20567_v23, %v20566_v32 }
 0x4f8   : > { %18876 = vmatprep.subr.msk.bf16.mxu0 %vm21833_vm13, %v23263_v3  ;;  %17115 = vmatmul.mubr.msk.f32.vlgmr.msra.gmra.mrb[138].mxu1 %vm2616_vm12, %v22964_v8 }
 0x4f9   : > { %18932 = vmatpush3.bf16.msra.mxu1 %v22897_v60  ;;  %17117 = vmatprep.mubr.msk.f32.mxu1 %vm2616_vm12, %v22972_v25 }
 0x4fa   : > { %5784 = vmatmul.mubr.f32.vlgmr.msra.gmra.mrb[104].mxu0 %v23091_v14  ;;  %v20570_v39 = vpop.permute.xlu0 %20569  ;;  %18935 = vmatprep.subr.msk.bf16.mxu1 %vm21833_vm13, %v23374_v58 }
 0x4fb   : > { %18878 = vmatpush3.bf16.msra.mxu0 %v22887_v19  ;;  %5788 = vmatprep.mubr.f32.mxu0 %v23101_v26  ;;  %v20572_v40 = vunpack.i.h.bf16 %v20570_v39  ;;  %v20571_v30 = vunpack.i.l.bf16 %v20570_v39 }
 0x4fc   : > { %18881 = vmatprep.subr.msk.bf16.mxu0 %vm21833_vm13, %v23291_v22  ;;  %17118 = vmatmul.mubr.msk.f32.gmra.mrb[140].mxu1 %vm2616_vm12, %v22985_v63 }
 0x4fd   : > { %18937 = vmatpush3.bf16.msra.mxu1 %v22907_v57  ;;  %6131 = vmatprep.mubr.f32.mxu1 %v23401_v50  ;;  %v23410_v19 = vpack.c.bf16 %v20572_v40, %v20571_v30 }
 0x4fe   : > { %5789 = vmatmul.mubr.f32.gmra.mrb[106].mxu0 %v23111_v31  ;;  %18940 = vmatprep.subr.msk.bf16.mxu1 %vm21833_vm13, %v23390_v55 }
 0x4ff   : > { %18883 = vmatpush3.bf16.msra.mxu0 %v22899_v12  ;;  %5793 = vmatprep.mubr.f32.mxu0 %v23121_v51 }
 0x500   : > { %18886 = vmatprep.subr.msk.bf16.mxu0 %vm21833_vm13, %v23356_v24 }
 0x501   : > { %18942 = vmatpush3.bf16.msra.mxu1 %v22916_v2 }
 0x502   : > { %5794 = vmatmul.mubr.f32.gmra.mrb[108].mxu0 %v23135_v4  ;;  %18945 = vmatprep.subr.msk.bf16.mxu1 %vm21833_vm13, %v23410_v19 }
 0x503   : > { %18888 = vmatpush3.bf16.msra.mxu0 %v22897_v60  ;;  %5798 = vmatprep.mubr.f32.mxu0 %v23148_v7  ;;  %v20575_v60 = vpop.permute.xlu1 %20574 }
 0x504   : > { %18891 = vmatprep.subr.msk.bf16.mxu0 %vm21833_vm13, %v23374_v58  ;;  %v20577_v12 = vunpack.i.h.bf16 %v20575_v60 }
 0x505   : > { %18947 = vmatpush3.bf16.msra.mxu1 %v22922_v46 }
 0x506   : > { %5799 = vmatmul.mubr.f32.gmra.mrb[110].mxu0 %v23165_v16  ;;  %18950 = vmatprep.subr.msk.bf16.mxu1 %vm21858_vm14, %v23253_v5 }
 0x507   : > { %18893 = vmatpush3.bf16.msra.mxu0 %v22907_v57  ;;  %5957 = vmatprep.mubr.f32.mxu0 %v23401_v50  ;;  %v20576_v57 = vunpack.i.l.bf16 %v20575_v60 }
 0x508   : > { %18896 = vmatprep.subr.msk.bf16.mxu0 %vm21858_vm14, %v23182_v21  ;;  %v20580_v21 = vpop.permute.xlu0 %20579 }
 0x509   : > { %18952 = vmatpush3.bf16.msra.mxu1 %v22932_v36  ;;  %v20581_v6 = vunpack.i.l.bf16 %v20580_v21 }
 0x50a   : > { %18955 = vmatprep.subr.msk.bf16.mxu1 %vm21858_vm14, %v23278_v20 }
 0x50b   : > { %18898 = vmatpush3.bf16.msra.mxu0 %v22916_v2 }
 0x50c   : > { %18901 = vmatprep.subr.msk.bf16.mxu0 %vm21858_vm14, %v23212_v11 }
 0x50d   : > { %18957 = vmatpush3.bf16.msra.mxu1 %v22937_v59 }
 0x50e   : > { %18960 = vmatprep.subr.msk.bf16.mxu1 %vm21858_vm14, %v23307_v34 }
 0x50f   : > { %18903 = vmatpush3.bf16.msra.mxu0 %v22922_v46 }
 0x510   : > { %18906 = vmatprep.subr.msk.bf16.mxu0 %vm21858_vm14, %v23253_v5  ;;  %v23466_v5 = vpack.c.bf16 %v20577_v12, %v20576_v57 }
 0x511   : > { %18963 = vmatpush3.bf16.msk.msra.mxu1 %vm21833_vm13, %v23263_v3  ;;  %v20582_v3 = vunpack.i.h.bf16 %v20580_v21 }
 0x512   : > { %18966 = vmatprep.subr.msk.bf16.mxu1 %vm21858_vm14, %v23346_v52  ;;  %v20585_v11 = vpop.permute.xlu1 %20584  ;;  %v20590_v1 = vpop.permute.xlu0 %20589 }
 0x513   : > { %18909 = vmatpush3.bf16.msk.msra.mxu0 %vm21833_vm13, %v23123_v9  ;;  %v20587_v9 = vunpack.i.h.bf16 %v20585_v11  ;;  %v20592_v17 = vunpack.i.h.bf16 %v20590_v1  ;;  %v20591_v56 = vunpack.i.l.bf16 %v20590_v1  ;;  %v23639_v1 = vld [vmem:[%s27153_s7 + $0x28] sm:$0xff] }
 0x514   : > { %18912 = vmatprep.subr.msk.bf16.mxu0 %vm21858_vm14, %v23278_v20  ;;  %v20586_v20 = vunpack.i.l.bf16 %v20585_v11 }
 0x515   : > { %18969 = vmatpush3.bf16.msk.msra.mxu1 %vm21833_vm13, %v23291_v22  ;;  %v23480_v22 = vpack.c.bf16 %v20582_v3, %v20581_v6  ;;  %v23498_v44 = vpack.c.bf16 %v20592_v17, %v20591_v56 }
 0x516   : > { %18984 = vmatprep.subr.msk.bf16.mxu1 %vm21833_vm13, %v23390_v55 }
 0x517   : > { %18915 = vmatpush3.bf16.msk.msra.mxu0 %vm21833_vm13, %v23153_v54  ;;  %v23490_v54 = vpack.c.bf16 %v20587_v9, %v20586_v20  ;;  %v23649_v20 = vld [vmem:[%s27153_s7 + $0x40] sm:$0xff] }
 0x518   : > { %18972 = vmatprep.subr.msk.bf16.mxu0 %vm21858_vm14, %v23466_v5  ;;  %6132 = vmatmul.mubr.f32.vlgmr.msra.gmra.mrb[142].mxu1 %v23091_v14 }
 0x519   : > { %18986 = vmatpush3.bf16.msra.mxu1 %v22916_v2  ;;  %6136 = vmatprep.mubr.f32.mxu1 %v23101_v26 }
 0x51a   : > { %5958 = vmatmul.mubr.f32.vlgmr.msra.gmra.mrb[112].mxu0 %v23091_v14  ;;  %18989 = vmatprep.subr.msk.bf16.mxu1 %vm21833_vm13, %v23410_v19  ;;  %v20595_v2 = vpop.permute.xlu1 %20594 }
 0x51b   : > { %18975 = vmatpush3.bf16.msk.msra.mxu0 %vm21858_vm14, %v23466_v5  ;;  %5962 = vmatprep.mubr.f32.mxu0 %v23101_v26  ;;  %v20597_v47 = vunpack.i.h.bf16 %v20595_v2  ;;  %v20596_v42 = vunpack.i.l.bf16 %v20595_v2  ;;  %v23665_v2 = vld [vmem:[%s27153_s7 + $0x58] sm:$0xff] }
 0x51c   : > { %18978 = vmatprep.subr.msk.bf16.mxu0 %vm21858_vm14, %v23480_v22  ;;  %6137 = vmatmul.mubr.f32.gmra.mrb[144].mxu1 %v23111_v31 }
 0x51d   : > { %18991 = vmatpush3.bf16.msra.mxu1 %v22922_v46  ;;  %6141 = vmatprep.mubr.f32.mxu1 %v23121_v51  ;;  %v23508_v48 = vpack.c.bf16 %v20597_v47, %v20596_v42  ;;  %v20600_v46 = vpop.permute.xlu0 %20599 }
 0x51e   : > { %5963 = vmatmul.mubr.f32.gmra.mrb[114].mxu0 %v23111_v31  ;;  %18994 = vmatprep.subr.msk.bf16.mxu1 %vm21833_vm13, %v23490_v54  ;;  %v20602_v35 = vunpack.i.h.bf16 %v20600_v46  ;;  %v20601_v18 = vunpack.i.l.bf16 %v20600_v46  ;;  %v20605_v37 = vpop.permute.xlu1 %20604 }
 0x51f   : > { %18981 = vmatpush3.bf16.msk.msra.mxu0 %vm21858_vm14, %v23480_v22  ;;  %5967 = vmatprep.mubr.f32.mxu0 %v23121_v51  ;;  %v20607_v0 = vunpack.i.h.bf16 %v20605_v37  ;;  %v20606_v23 = vunpack.i.l.bf16 %v20605_v37 }
 0x520   : > { %19026 = vmatprep.subr.msk.bf16.mxu0 %vm21858_vm14, %v23498_v44  ;;  %6142 = vmatmul.mubr.f32.gmra.mrb[146].mxu1 %v23135_v4  ;;  %v23531_v10 = vpack.c.bf16 %v20602_v35, %v20601_v18 }
 0x521   : > { %18996 = vmatpush3.bf16.msra.mxu1 %v22932_v36  ;;  %6146 = vmatprep.mubr.f32.mxu1 %v23148_v7 }
 0x522   : > { %5968 = vmatmul.mubr.f32.gmra.mrb[116].mxu0 %v23135_v4  ;;  %18999 = vmatprep.subr.msk.bf16.mxu1 %vm21833_vm13, %v23508_v48  ;;  %v20610_v43 = vpop.permute.xlu0 %20609 }
 0x523   : > { %5972 = vmatprep.mubr.f32.mxu0 %v23148_v7  ;;  %v20611_v30 = vunpack.i.l.bf16 %v20610_v43 }
 0x524   : > { %6147 = vmatmul.mubr.f32.gmra.mrb[148].mxu1 %v23165_v16 }
 0x525   : > { %19001 = vmatpush3.bf16.msra.mxu1 %v22937_v59  ;;  %6305 = vmatprep.mubr.f32.mxu1 %v23401_v50 }
 0x526   : > { %5973 = vmatmul.mubr.f32.gmra.mrb[118].mxu0 %v23165_v16  ;;  %19004 = vmatprep.subr.msk.bf16.mxu1 %vm21858_vm14, %v23307_v34  ;;  %v20615_v34 = vpop.permute.xlu1 %20614  ;;  %v20620_v62 = vpop.permute.xlu0 %20619 }
 0x527   : > { %17128 = vmatprep.mubr.msk.f32.mxu0 %vm2616_vm12, %v23333_v49  ;;  %v20616_v45 = vunpack.i.l.bf16 %v20615_v34  ;;  %v20622_v39 = vunpack.i.h.bf16 %v20620_v62  ;;  %v20621_v40 = vunpack.i.l.bf16 %v20620_v62 }
 0x529   : > { %19006 = vmatpush3.bf16.msra.mxu1 %v22992_v61 }
 0x52a   : > { %17129 = vmatmul.mubr.msk.f32.vlgmr.msra.gmra.mrb[120].mxu0 %vm2616_vm12, %v22964_v8  ;;  %19009 = vmatprep.subr.msk.bf16.mxu1 %vm21858_vm14, %v23346_v52  ;;  %v20617_v52 = vunpack.i.h.bf16 %v20615_v34 }
 0x52b   : > { %19029 = vmatpush3.bf16.msk.msra.mxu0 %vm21858_vm14, %v23498_v44  ;;  %17131 = vmatprep.mubr.msk.f32.mxu0 %vm2616_vm12, %v22972_v25 }
 0x52c   : > { %19032 = vmatprep.subr.msk.bf16.mxu0 %vm21858_vm14, %v23531_v10  ;;  %v23571_v32 = vpack.c.bf16 %v20617_v52, %v20616_v45 }
 0x52d   : > { %19011 = vmatpush3.bf16.msra.mxu1 %v23042_v33 }
 0x52e   : > { %17132 = vmatmul.mubr.msk.f32.gmra.mrb[122].mxu0 %vm2616_vm12, %v22985_v63  ;;  %19014 = vmatprep.subr.msk.bf16.mxu1 %vm21858_vm14, %v23466_v5 }
 0x52f   : > { %19035 = vmatpush3.bf16.msk.msra.mxu0 %vm21858_vm14, %v23531_v10  ;;  %17142 = vmatprep.mubr.msk.f32.mxu0 %vm2616_vm12, %v23333_v49 }
 0x530   : > { %19038 = vmatprep.subr.msk.bf16.mxu0 %vm21833_vm13, %v23490_v54 }
 0x531   : > { %19017 = vmatpush3.bf16.msk.msra.mxu1 %vm21833_vm13, %v23356_v24  ;;  %v20612_v24 = vunpack.i.h.bf16 %v20610_v43 }
 0x532   : > { %17143 = vmatmul.mubr.msk.f32.vlgmr.msra.gmra.mrb[124].mxu0 %vm2616_vm12, %v22964_v8  ;;  %19020 = vmatprep.subr.msk.bf16.mxu1 %vm21858_vm14, %v23480_v22  ;;  %v23579_v8 = vpack.c.bf16 %v20607_v0, %v20606_v23 }
 0x533   : > { %19040 = vmatpush3.bf16.msra.mxu0 %v22932_v36  ;;  %17145 = vmatprep.mubr.msk.f32.mxu0 %vm2616_vm12, %v22972_v25  ;;  %v23588_v36 = vpack.c.bf16 %v20622_v39, %v20621_v40  ;;  %v23598_v25 = vpack.c.bf16 %v20612_v24, %v20611_v30 }
 0x534   : > { %19043 = vmatprep.subr.msk.bf16.mxu0 %vm21833_vm13, %v23508_v48 }
 0x535   : > { %19023 = vmatpush3.bf16.msk.msra.mxu1 %vm21833_vm13, %v23374_v58 }
 0x536   : > { %19080 = vmatprep.subr.msk.bf16.mxu1 %vm21858_vm14, %v23571_v32  ;;  %17146 = vmatmul.mubr.msk.f32.gmra.mrb[126].mxu0 %vm2616_vm12, %v22985_v63 }
 0x537   : > { %19045 = vmatpush3.bf16.msra.mxu0 %v22937_v59  ;;  %6479 = vmatprep.mubr.f32.mxu0 %v23401_v50 }
 0x538   : > { %19048 = vmatprep.subr.msk.bf16.mxu0 %vm21833_vm13, %v23579_v8  ;;  %6306 = vmatmul.mubr.f32.vlgmr.msra.gmra.mrb[150].mxu1 %v23091_v14 }
 0x539   : > { %19083 = vmatpush3.bf16.msk.msra.mxu1 %vm21858_vm14, %v23571_v32  ;;  %6310 = vmatprep.mubr.f32.mxu1 %v23101_v26 }
 0x53a   : > { %v20630_v63 = vpop.permute.xlu0 %20629  ;;  %19086 = vmatprep.subr.msk.bf16.mxu1 %vm21858_vm14, %v23588_v36  ;;  %v20625_v11 = vpop.permute.xlu1 %20624 }
 0x53b   : > { %19050 = vmatpush3.bf16.msra.mxu0 %v22992_v61  ;;  %v20632_v59 = vunpack.i.h.bf16 %v20630_v63  ;;  %v20631_v58 = vunpack.i.l.bf16 %v20630_v63  ;;  %v20626_v3 = vunpack.i.l.bf16 %v20625_v11 }
 0x53c   : > { %19053 = vmatprep.subr.msk.bf16.mxu0 %vm21833_vm13, %v23598_v25  ;;  %6311 = vmatmul.mubr.f32.gmra.mrb[152].mxu1 %v23111_v31 }
 0x53d   : > { %v23608_v60 = vpack.c.bf16 %v20632_v59, %v20631_v58  ;;  %19089 = vmatpush3.bf16.msk.msra.mxu1 %vm21858_vm14, %v23588_v36  ;;  %6315 = vmatprep.mubr.f32.mxu1 %v23121_v51 }
 0x53f   : > { %19055 = vmatpush3.bf16.msra.mxu0 %v23042_v33  ;;  %19134 = vmatprep.subr.msk.bf16.mxu1 %vm21858_vm14, %v23608_v60 }
 0x540   : > { %19058 = vmatprep.subr.msk.bf16.mxu0 %vm21858_vm14, %v23466_v5  ;;  %6316 = vmatmul.mubr.f32.gmra.mrb[154].mxu1 %v23135_v4  ;;  %v20627_v5 = vunpack.i.h.bf16 %v20625_v11 }
 0x541   : > { %6320 = vmatprep.mubr.f32.mxu1 %v23148_v7 }
 0x542   : > { %v20640_v12 = vpop.permute.xlu0 %20639  ;;  %v20635_v9 = vpop.permute.xlu1 %20634 }
 0x543   : > { %19060 = vmatpush3.bf16.msra.mxu0 %v23030_v41  ;;  %v20642_v57 = vunpack.i.h.bf16 %v20640_v12  ;;  %v20641_v21 = vunpack.i.l.bf16 %v20640_v12  ;;  %v20637_v17 = vunpack.i.h.bf16 %v20635_v9  ;;  %v20636_v56 = vunpack.i.l.bf16 %v20635_v9 }
 0x544   : > { %19063 = vmatprep.subr.msk.bf16.mxu0 %vm21858_vm14, %v23480_v22  ;;  %6321 = vmatmul.mubr.f32.gmra.mrb[156].mxu1 %v23165_v16  ;;  %v19100_v22 = vpack.c.bf16 %v20627_v5, %v20626_v3 }
 0x545   : > { %17156 = vmatprep.mubr.msk.f32.mxu1 %vm2616_vm12, %v23333_v49  ;;  %v23631_v6 = vpack.c.bf16 %v20642_v57, %v20641_v21 }
 0x547   : > { %19065 = vmatpush3.bf16.msra.mxu0 %v23057_v28 }
 0x548   : > { %19068 = vmatprep.subr.msk.bf16.mxu0 %vm21858_vm14, %v23498_v44  ;;  %17157 = vmatmul.mubr.msk.f32.vlgmr.msra.gmra.mrb[158].mxu1 %vm2616_vm12, %v23639_v1 }
 0x549   : > { %19137 = vmatpush3.bf16.msk.msra.mxu1 %vm21858_vm14, %v23608_v60  ;;  %17159 = vmatprep.mubr.msk.f32.mxu1 %vm2616_vm12, %v23649_v20 }
 0x54a   : > { %19140 = vmatprep.subr.msk.bf16.mxu1 %vm21858_vm14, %v23631_v6  ;;  %v20645_v47 = vpop.permute.xlu1 %20644 }
 0x54b   : > { %19071 = vmatpush3.bf16.msk.msra.mxu0 %vm21833_vm13, %v23390_v55  ;;  %v19105_v55 = vpack.c.bf16 %v20637_v17, %v20636_v56  ;;  %v20647_v42 = vunpack.i.h.bf16 %v20645_v47  ;;  %v20646_v46 = vunpack.i.l.bf16 %v20645_v47 }
 0x54c   : > { %19074 = vmatprep.subr.msk.bf16.mxu0 %vm21858_vm14, %v23531_v10  ;;  %17160 = vmatmul.mubr.msk.f32.gmra.mrb[160].mxu1 %vm2616_vm12, %v23665_v2 }
 0x54d   : > { %19143 = vmatpush3.bf16.msk.msra.mxu1 %vm21858_vm14, %v23631_v6  ;;  %17170 = vmatprep.mubr.msk.f32.mxu1 %vm2616_vm12, %v23333_v49 }
 0x54e   : > { %19146 = vmatprep.subr.msk.bf16.mxu1 %vm21833_vm13, %v19100_v22 }
 0x54f   : > { %19077 = vmatpush3.bf16.msk.msra.mxu0 %vm21833_vm13, %v23410_v19  ;;  %v19154_v19 = vpack.c.bf16 %v20647_v42, %v20646_v46 }
 0x550   : > { %19092 = vmatprep.subr.msk.bf16.mxu0 %vm21833_vm13, %v23579_v8  ;;  %17171 = vmatmul.mubr.msk.f32.vlgmr.msra.gmra.mrb[162].mxu1 %vm2616_vm12, %v23639_v1 }
 0x551   : > { %19148 = vmatpush3.bf16.msra.mxu1 %v23030_v41  ;;  %17173 = vmatprep.mubr.msk.f32.mxu1 %vm2616_vm12, %v23649_v20 }
 0x552   : > { %6480 = vmatmul.mubr.f32.vlgmr.msra.gmra.mrb[128].mxu0 %v23091_v14  ;;  %v20650_v35 = vpop.permute.xlu0 %20649  ;;  %19151 = vmatprep.subr.msk.bf16.mxu1 %vm21833_vm13, %v19105_v55 }
 0x553   : > { %19094 = vmatpush3.bf16.msra.mxu0 %v22992_v61  ;;  %6484 = vmatprep.mubr.f32.mxu0 %v23101_v26  ;;  %v20652_v18 = vunpack.i.h.bf16 %v20650_v35  ;;  %v20651_v37 = vunpack.i.l.bf16 %v20650_v35 }
 0x554   : > { %19097 = vmatprep.subr.msk.bf16.mxu0 %vm21833_vm13, %v23598_v25  ;;  %17174 = vmatmul.mubr.msk.f32.gmra.mrb[164].mxu1 %vm2616_vm12, %v23665_v2 }
 0x555   : > { %19153 = vmatpush3.bf16.msra.mxu1 %v23057_v28  ;;  %6827 = vmatprep.mubr.f32.mxu1 %v23401_v50  ;;  %v19159_v61 = vpack.c.bf16 %v20652_v18, %v20651_v37 }
 0x556   : > { %6485 = vmatmul.mubr.f32.gmra.mrb[130].mxu0 %v23111_v31  ;;  %19156 = vmatprep.subr.msk.bf16.mxu1 %vm21833_vm13, %v19154_v19 }
 0x557   : > { %19099 = vmatpush3.bf16.msra.mxu0 %v23042_v33  ;;  %6489 = vmatprep.mubr.f32.mxu0 %v23121_v51 }
 0x558   : > { %19102 = vmatprep.subr.msk.bf16.mxu0 %vm21833_vm13, %v19100_v22 }
 0x559   : > { %19158 = vmatpush3.bf16.msra.mxu1 %v23159_v13 }
 0x55a   : > { %6490 = vmatmul.mubr.f32.gmra.mrb[132].mxu0 %v23135_v4  ;;  %19161 = vmatprep.subr.msk.bf16.mxu1 %vm21833_vm13, %v19159_v61 }
 0x55b   : > { %19104 = vmatpush3.bf16.msra.mxu0 %v23030_v41  ;;  %6494 = vmatprep.mubr.f32.mxu0 %v23148_v7  ;;  %v20655_v41 = vpop.permute.xlu1 %20654 }
 0x55c   : > { %19107 = vmatprep.subr.msk.bf16.mxu0 %vm21833_vm13, %v19105_v55  ;;  %v20657_v33 = vunpack.i.h.bf16 %v20655_v41 }
 0x55d   : > { %19163 = vmatpush3.bf16.msra.mxu1 %v23201_v27 }
 0x55e   : > { %6495 = vmatmul.mubr.f32.gmra.mrb[134].mxu0 %v23165_v16  ;;  %19166 = vmatprep.subr.msk.bf16.mxu1 %vm21858_vm14, %v23571_v32 }
 0x55f   : > { %19109 = vmatpush3.bf16.msra.mxu0 %v23057_v28  ;;  %6653 = vmatprep.mubr.f32.mxu0 %v23401_v50  ;;  %v20656_v28 = vunpack.i.l.bf16 %v20655_v41 }
 0x560   : > { %19112 = vmatprep.subr.msk.bf16.mxu0 %vm21858_vm14, %v23498_v44  ;;  %v23790_v52 = vpop.permute.xlu1 %5167 }
 0x561   : > { %19168 = vmatpush3.bf16.msra.mxu1 %v23231_v53 }
 0x562   : > { %19171 = vmatprep.subr.msk.bf16.mxu1 %vm21858_vm14, %v23588_v36 }
 0x563   : > { %19114 = vmatpush3.bf16.msra.mxu0 %v23159_v13  ;;  %v20660_v13 = vpop.permute.xlu0 %20659 }
 0x564   : > { %19117 = vmatprep.subr.msk.bf16.mxu0 %vm21858_vm14, %v23531_v10  ;;  %v20662_v53 = vunpack.i.h.bf16 %v20660_v13  ;;  %v23796_v12 = vpop.permute.xlu1 %5177 }
 0x565   : > { %19173 = vmatpush3.bf16.msra.mxu1 %v23270_v38  ;;  %v20661_v38 = vunpack.i.l.bf16 %v20660_v13 }
 0x566   : > { %19176 = vmatprep.subr.msk.bf16.mxu1 %vm21858_vm14, %v23608_v60 }
 0x567   : > { %19119 = vmatpush3.bf16.msra.mxu0 %v23201_v27  ;;  %v19186_v27 = vpack.c.bf16 %v20657_v33, %v20656_v28 }
 0x568   : > { %19122 = vmatprep.subr.msk.bf16.mxu0 %vm21858_vm14, %v23571_v32 }
 0x569   : > { %19179 = vmatpush3.bf16.msk.msra.mxu1 %vm21833_vm13, %v23579_v8  ;;  %v23793_v8 = vpop.permute.xlu0 %5172 }
 0x56a   : > { %19182 = vmatprep.subr.msk.bf16.mxu1 %vm21858_vm14, %v23631_v6 }
 0x56b   : > { %19125 = vmatpush3.bf16.msk.msra.mxu0 %vm21833_vm13, %v23490_v54  ;;  %v19192_v54 = vpack.c.bf16 %v20662_v53, %v20661_v38 }
 0x56c   : > { %19128 = vmatprep.subr.msk.bf16.mxu0 %vm21858_vm14, %v23588_v36 }
 0x56d   : > { %19185 = vmatpush3.bf16.msk.msra.mxu1 %vm21833_vm13, %v23598_v25  ;;  %v23803_v22 = vpop.permute.xlu0 %5182 }
 0x56e   : > { %v17060_v50 = vpop.f32.mrb[114].mxu1 }
 0x56f   : > { %19131 = vmatpush3.bf16.msk.msra.mxu0 %vm21833_vm13, %v23508_v48  ;;  %v5348_v44 = vpop.f32.mrb[115].mxu1 }
 0x570   : > { %19188 = vmatprep.subr.msk.bf16.mxu0 %vm21858_vm14, %v19186_v27  ;;  %6828 = vmatmul.mubr.f32.vlgmr.msra.gmra.mrb[166].mxu1 %v23091_v14 }
 0x571   : > { %6832 = vmatprep.mubr.f32.mxu1 %v23101_v26 }
 0x572   : > { %6654 = vmatmul.mubr.f32.vlgmr.msra.gmra.mrb[136].mxu0 %v23091_v14  ;;  %v23763_v10 = vpop.f32.mrb[116].mxu1 }
 0x573   : > { %19191 = vmatpush3.bf16.msk.msra.mxu0 %vm21858_vm14, %v19186_v27  ;;  %6658 = vmatprep.mubr.f32.mxu0 %v23101_v26  ;;  %v5358_v43 = vpop.f32.mrb[117].mxu1 }
 0x574   : > { %19194 = vmatprep.subr.msk.bf16.mxu0 %vm21858_vm14, %v19192_v54  ;;  %6833 = vmatmul.mubr.f32.gmra.mrb[168].mxu1 %v23111_v31 }
 0x575   : > { %6837 = vmatprep.mubr.f32.mxu1 %v23121_v51 }
 0x576   : > { %6659 = vmatmul.mubr.f32.gmra.mrb[138].mxu0 %v23111_v31 }
 0x577   : > { %19197 = vmatpush3.bf16.msk.msra.mxu0 %vm21858_vm14, %v19192_v54  ;;  %6663 = vmatprep.mubr.f32.mxu0 %v23121_v51 }
 0x578   : > { %6838 = vmatmul.mubr.f32.gmra.mrb[170].mxu1 %v23135_v4 }
 0x579   : > { %6842 = vmatprep.mubr.f32.mxu1 %v23148_v7 }
 0x57a   : > { %6664 = vmatmul.mubr.f32.gmra.mrb[140].mxu0 %v23135_v4 }
 0x57b   : > { %6668 = vmatprep.mubr.f32.mxu0 %v23148_v7 }
 0x57c   : > { %6843 = vmatmul.mubr.f32.gmra.mrb[172].mxu1 %v23165_v16 }
 0x57e   : > { %6669 = vmatmul.mubr.f32.gmra.mrb[142].mxu0 %v23165_v16 }
 0x57f   : > { %17184 = vmatprep.mubr.msk.f32.mxu0 %vm2616_vm12, %v23333_v49 }
 0x582   : > { %17185 = vmatmul.mubr.msk.f32.vlgmr.msra.gmra.mrb[144].mxu0 %vm2616_vm12, %v23639_v1 }
 0x583   : > { %17187 = vmatprep.mubr.msk.f32.mxu0 %vm2616_vm12, %v23649_v20 }
 0x586   : > { %17188 = vmatmul.mubr.msk.f32.gmra.mrb[146].mxu0 %vm2616_vm12, %v23665_v2 }
 0x58f   : > { %v15543_v14 = vpop.f32.mrb[118].mxu1 }
 0x590   : > { %v15544_v26 = vpop.f32.mrb[119].mxu1 }
 0x591   : > { %v15545_v31 = vadd.f32 %v15544_v26, %v15543_v14 }
 0x593   : > { %v15491_v51 = vpop.f32.mrb[88].mxu0  ;;  %v15546_v4 = vpop.f32.mrb[120].mxu1  ;;  %v5438_v47 = vadd.f32 %v15545_v31, %v23790_v52 }
 0x594   : > { %v15492_v7 = vpop.f32.mrb[89].mxu0  ;;  %v15547_v48 = vpop.f32.mrb[121].mxu1 }
 0x595   : > { %v15493_v16 = vadd.f32 %v15492_v7, %v15491_v51  ;;  %v15548_v34 = vadd.f32 %v15547_v48, %v15546_v4 }
 0x597   : > { %v5264_v49 = vadd.f32 %v15493_v16, %v23790_v52  ;;  %v15494_v45 = vpop.f32.mrb[90].mxu0  ;;  %v15549_v62 = vpop.f32.mrb[122].mxu1  ;;  %v5443_v17 = vadd.f32 %v15548_v34, %v23793_v8 }
 0x598   : > { %v15495_v0 = vpop.f32.mrb[91].mxu0  ;;  %v15550_v23 = vpop.f32.mrb[123].mxu1 }
 0x599   : > { %v5349_v32 = vadd.f32 %v5348_v44, %v5264_v49  ;;  %v15496_v39 = vadd.f32 %v15495_v0, %v15494_v45  ;;  %v15551_v40 = vadd.f32 %v15550_v23, %v15549_v62 }
 0x59b   : > { %v5269_v24 = vadd.f32 %v15496_v39, %v23793_v8  ;;  %v5367_v57 = vmax.f32 %v5349_v32, 0.0  ;;  %v5448_v33 = vadd.f32 %v15551_v40, %v23796_v12 }
 0x59c   : > { %v15497_v30 = vpop.f32.mrb[92].mxu0  ;;  %v15552_v36 = vpop.f32.mrb[124].mxu1 }
 0x59d   : > { %v5354_v25 = vadd.f32 %v17060_v50, %v5269_v24  ;;  %v15498_v63 = vpop.f32.mrb[93].mxu0  ;;  %v15553_v59 = vpop.f32.mrb[125].mxu1 }
 0x59e   : > { %v15499_v58 = vadd.f32 %v15498_v63, %v15497_v30  ;;  %v15554_v60 = vadd.f32 %v15553_v59, %v15552_v36 }
 0x59f   : > { %v5368_v21 = vmax.f32 %v5354_v25, 0.0 }
 0x5a0   : > { %v5274_v11 = vadd.f32 %v15499_v58, %v23796_v12  ;;  %v15500_v5 = vpop.f32.mrb[94].mxu0  ;;  %v5453_v18 = vadd.f32 %v15554_v60, %v23803_v22 }
 0x5a1   : > { %v15501_v3 = vpop.f32.mrb[95].mxu0  ;;  %v23799_v6 = vpack.i.bf16 %v5368_v21, %v5367_v57  ;;  %v23801_v1 = vpack.c.bf16 %v5368_v21, %v5367_v57 }
 0x5a2   : > { %v5359_v9 = vadd.f32 %v5358_v43, %v5274_v11  ;;  %v15502_v20 = vadd.f32 %v15501_v3, %v15500_v5 }
 0x5a4   : > { %v5279_v56 = vadd.f32 %v15502_v20, %v23803_v22  ;;  %v17074_v2 = vpop.f32.mrb[96].mxu0  ;;  %v5369_v28 = vmax.f32 %v5359_v9, 0.0 }
 0x5a5   : > { %v5528_v55 = vadd.f32 %v17074_v2, %v5443_v17  ;;  %v5522_v42 = vpop.f32.mrb[97].mxu0 }
 0x5a6   : > { %v5364_v46 = vadd.f32 %v23763_v10, %v5279_v56  ;;  %v5523_v35 = vadd.f32 %v5522_v42, %v5438_v47 }
 0x5a7   : > { %v5542_v19 = vmax.f32 %v5528_v55, 0.0 }
 0x5a8   : > { %v5370_v37 = vmax.f32 %v5364_v46, 0.0  ;;  %v5541_v61 = vmax.f32 %v5523_v35, 0.0  ;;  %v17077_v41 = vpop.f32.mrb[98].mxu0 }
 0x5a9   : > { %v5538_v13 = vadd.f32 %v17077_v41, %v5453_v18  ;;  %v5532_v27 = vpop.f32.mrb[99].mxu0 }
 0x5aa   : > { %v20693_v53 = vpack.i.bf16 %v5542_v19, %v5541_v61  ;;  %v23811_v38 = vpack.c.bf16 %v5542_v19, %v5541_v61  ;;  %v5533_v50 = vadd.f32 %v5532_v27, %v5448_v33  ;;  %v23813_v54 = vpack.i.bf16 %v5370_v37, %v5369_v28 }
 0x5ab   : > { %v5544_v44 = vmax.f32 %v5538_v13, 0.0  ;;  %v23815_v10 = vpack.c.bf16 %v5370_v37, %v5369_v28 }
 0x5ac   : > { %v5543_v43 = vmax.f32 %v5533_v50, 0.0  ;;  %20664 = vrot.lane.b32.xlu1 %v20693_v53, %s21034_s29 }
 0x5ad   : > { %v17088_v14 = vpop.f32.mrb[100].mxu0 }
 0x5ae   : > { %v20708_v26 = vpack.i.bf16 %v5544_v44, %v5543_v43  ;;  %v23818_v31 = vpack.c.bf16 %v5544_v44, %v5543_v43  ;;  %v5696_v51 = vpop.f32.mrb[101].mxu0 }
 0x5b0   : > { %20669 = vrot.lane.b32.xlu0 %v20708_v26, %s21034_s29 }
 0x5b1   : > { %v15595_v4 = vpop.f32.mrb[126].mxu1  ;;  %v17091_v7 = vpop.f32.mrb[102].mxu0 }
 0x5b2   : > { %v15596_v48 = vpop.f32.mrb[127].mxu1  ;;  %v5706_v16 = vpop.f32.mrb[103].mxu0 }
 0x5b3   : > { %v15597_v34 = vadd.f32 %v15596_v48, %v15595_v4 }
 0x5b5   : > { %v5612_v49 = vadd.f32 %v15597_v34, %v23790_v52  ;;  %v23858_v34 = vld [vmem:[%s27155_s9 + $0x8] sm:$0xff] }
 0x5b6   : > { %v15598_v45 = vpop.f32.mrb[128].mxu1  ;;  %7409 = vmatprep.mubr.f32.mxu1 %v23858_v34 }
 0x5b7   : > { %v5697_v62 = vadd.f32 %v5696_v51, %v5612_v49  ;;  %v15599_v0 = vpop.f32.mrb[129].mxu1 }
 0x5b8   : > { %v15600_v23 = vadd.f32 %v15599_v0, %v15598_v45 }
 0x5b9   : > { %v5715_v36 = vmax.f32 %v5697_v62, 0.0 }
 0x5ba   : > { %v5617_v32 = vadd.f32 %v15600_v23, %v23793_v8  ;;  %v15601_v39 = vpop.f32.mrb[130].mxu1 }
 0x5bb   : > { %v15602_v40 = vpop.f32.mrb[131].mxu1 }
 0x5bc   : > { %v5702_v24 = vadd.f32 %v17088_v14, %v5617_v32  ;;  %v15603_v30 = vadd.f32 %v15602_v40, %v15601_v39 }
 0x5be   : > { %v5716_v25 = vmax.f32 %v5702_v24, 0.0  ;;  %v15604_v63 = vpop.f32.mrb[132].mxu1  ;;  %v5622_v59 = vadd.f32 %v15603_v30, %v23796_v12 }
 0x5bf   : > { %v15605_v58 = vpop.f32.mrb[133].mxu1 }
 0x5c0   : > { %v15606_v60 = vadd.f32 %v15605_v58, %v15604_v63  ;;  %v5707_v57 = vadd.f32 %v5706_v16, %v5622_v59  ;;  %v20673_v21 = vpack.i.bf16 %v5716_v25, %v5715_v36  ;;  %v23824_v11 = vpack.c.bf16 %v5716_v25, %v5715_v36  ;;  %v23853_v16 = vld [vmem:[%s27155_s9 + $0x10] sm:$0xff] }
 0x5c1   : > { %17198 = vmatprep.mubr.msk.f32.mxu0 %vm2616_vm12, %v23853_v16 }
 0x5c2   : > { %v5627_v5 = vadd.f32 %v15606_v60, %v23803_v22  ;;  %20674 = vrot.lane.b32.xlu1 %v20673_v21, %s21034_s29  ;;  %v17102_v3 = vpop.f32.mrb[134].mxu1  ;;  %v5717_v56 = vmax.f32 %v5707_v57, 0.0 }
 0x5c3   : > { %v5870_v9 = vpop.f32.mrb[135].mxu1 }
 0x5c4   : > { %v5712_v20 = vadd.f32 %v17091_v7, %v5627_v5 }
 0x5c6   : > { %v5718_v17 = vmax.f32 %v5712_v20, 0.0  ;;  %20684 = vrot.lane.b32.xlu1 %v23799_v6, %s21035_s16 }
 0x5c7   : > { %v17105_v2 = vpop.f32.mrb[136].mxu1 }
 0x5c8   : > { %v20713_v47 = vpack.i.bf16 %v5718_v17, %v5717_v56  ;;  %v23830_v55 = vpack.c.bf16 %v5718_v17, %v5717_v56  ;;  %v5880_v42 = vpop.f32.mrb[137].mxu1 }
 0x5ca   : > { %20679 = vrot.lane.b32.xlu0 %v20713_v47, %s21034_s29  ;;  %20694 = vrot.lane.b32.xlu1 %v20693_v53, %s21035_s16 }
 0x5cb   : > { %v23834_v46 = vpop.f32.mrb[138].mxu1 }
 0x5cc   : > { %v6044_v35 = vpop.f32.mrb[139].mxu1 }
 0x5cd   : > { %v15647_v19 = vpop.f32.mrb[104].mxu0 }
 0x5ce   : > { %v15648_v18 = vpop.f32.mrb[105].mxu0  ;;  %20689 = vrot.lane.b32.xlu0 %v23813_v54, %s21035_s16  ;;  %20704 = vrot.lane.b32.xlu1 %v23799_v6, %s21034_s29 }
 0x5cf   : > { %v15649_v37 = vadd.f32 %v15648_v18, %v15647_v19  ;;  %v23840_v61 = vpop.f32.mrb[140].mxu1 }
 0x5d0   : > { %v23842_v41 = vpop.f32.mrb[141].mxu1 }
 0x5d1   : > { %v15650_v33 = vpop.f32.mrb[106].mxu0  ;;  %v5786_v28 = vadd.f32 %v15649_v37, %v23790_v52 }
 0x5d2   : > { %v15651_v13 = vpop.f32.mrb[107].mxu0  ;;  %20699 = vrot.lane.b32.xlu0 %v20673_v21, %s21035_s16  ;;  %20714 = vrot.lane.b32.xlu1 %v20713_v47, %s21035_s16 }
 0x5d3   : > { %v15652_v27 = vadd.f32 %v15651_v13, %v15650_v33  ;;  %v5871_v53 = vadd.f32 %v5870_v9, %v5786_v28 }
 0x5d5   : > { %v5791_v50 = vadd.f32 %v15652_v27, %v23793_v8  ;;  %v15653_v44 = vpop.f32.mrb[108].mxu0  ;;  %v5889_v4 = vmax.f32 %v5871_v53, 0.0 }
 0x5d6   : > { %v15654_v43 = vpop.f32.mrb[109].mxu0  ;;  %20709 = vrot.lane.b32.xlu0 %v20708_v26, %s21035_s16 }
 0x5d7   : > { %v5876_v6 = vadd.f32 %v17102_v3, %v5791_v50  ;;  %v15655_v14 = vadd.f32 %v15654_v43, %v15653_v44 }
 0x5d9   : > { %v5890_v51 = vmax.f32 %v5876_v6, 0.0  ;;  %v15656_v7 = vpop.f32.mrb[110].mxu0  ;;  %v5796_v48 = vadd.f32 %v15655_v14, %v23796_v12 }
 0x5da   : > { %v15657_v49 = vpop.f32.mrb[111].mxu0  ;;  %20719 = vrot.lane.b32.xlu0 %v23813_v54, %s21034_s29 }
 0x5db   : > { %v20733_v26 = vpack.i.bf16 %v5890_v51, %v5889_v4  ;;  %v23864_v45 = vpack.c.bf16 %v5890_v51, %v5889_v4  ;;  %v15658_v62 = vadd.f32 %v15657_v49, %v15656_v7  ;;  %v5881_v0 = vadd.f32 %v5880_v42, %v5796_v48 }
 0x5dd   : > { %v5801_v23 = vadd.f32 %v15658_v62, %v23803_v22  ;;  %20724 = vrot.lane.b32.xlu1 %v20733_v26, %s21034_s29  ;;  %v5891_v40 = vmax.f32 %v5881_v0, 0.0 }
 0x5df   : > { %v5886_v32 = vadd.f32 %v17105_v2, %v5801_v23 }
 0x5e1   : > { %v5892_v39 = vmax.f32 %v5886_v32, 0.0  ;;  %20734 = vrot.lane.b32.xlu1 %v20733_v26, %s21035_s16 }
 0x5e3   : > { %v20738_v54 = vpack.i.bf16 %v5892_v39, %v5891_v40  ;;  %v23870_v24 = vpack.c.bf16 %v5892_v39, %v5891_v40 }
 0x5e5   : > { %20729 = vrot.lane.b32.xlu0 %v20738_v54, %s21034_s29 }
 0x5e9   : > { %20739 = vrot.lane.b32.xlu0 %v20738_v54, %s21035_s16 }
 0x5eb   : > { %v15751_v30 = vpop.f32.mrb[142].mxu1 }
 0x5ec   : > { %v15752_v36 = vpop.f32.mrb[143].mxu1 }
 0x5ed   : > { %v15699_v25 = vpop.f32.mrb[112].mxu0  ;;  %v15753_v63 = vadd.f32 %v15752_v36, %v15751_v30 }
 0x5ee   : > { %v15700_v59 = vpop.f32.mrb[113].mxu0 }
 0x5ef   : > { %v15701_v58 = vadd.f32 %v15700_v59, %v15699_v25  ;;  %v15754_v60 = vpop.f32.mrb[144].mxu1  ;;  %v6134_v49 = vadd.f32 %v15753_v63, %v23790_v52 }
 0x5f0   : > { %v15755_v57 = vpop.f32.mrb[145].mxu1 }
 0x5f1   : > { %v5960_v21 = vadd.f32 %v15701_v58, %v23790_v52  ;;  %v15702_v5 = vpop.f32.mrb[114].mxu0  ;;  %v15756_v3 = vadd.f32 %v15755_v57, %v15754_v60 }
 0x5f2   : > { %v15703_v9 = vpop.f32.mrb[115].mxu0 }
 0x5f3   : > { %v6045_v20 = vadd.f32 %v6044_v35, %v5960_v21  ;;  %v15704_v17 = vadd.f32 %v15703_v9, %v15702_v5  ;;  %v15757_v56 = vpop.f32.mrb[146].mxu1  ;;  %v6139_v4 = vadd.f32 %v15756_v3, %v23793_v8 }
 0x5f4   : > { %v15758_v2 = vpop.f32.mrb[147].mxu1 }
 0x5f5   : > { %v5965_v47 = vadd.f32 %v15704_v17, %v23793_v8  ;;  %v15705_v42 = vpop.f32.mrb[116].mxu0  ;;  %v15759_v19 = vadd.f32 %v15758_v2, %v15757_v56  ;;  %v6063_v27 = vmax.f32 %v6045_v20, 0.0 }
 0x5f6   : > { %v15706_v18 = vpop.f32.mrb[117].mxu0 }
 0x5f7   : > { %v6050_v37 = vadd.f32 %v23834_v46, %v5965_v47  ;;  %v15707_v33 = vadd.f32 %v15706_v18, %v15705_v42  ;;  %v15760_v28 = vpop.f32.mrb[148].mxu1  ;;  %v6144_v30 = vadd.f32 %v15759_v19, %v23796_v12 }
 0x5f8   : > { %v15761_v13 = vpop.f32.mrb[149].mxu1 }
 0x5f9   : > { %v6064_v53 = vmax.f32 %v6050_v37, 0.0  ;;  %v5970_v50 = vadd.f32 %v15707_v33, %v23796_v12  ;;  %v15708_v44 = vpop.f32.mrb[118].mxu0  ;;  %v15762_v43 = vadd.f32 %v15761_v13, %v15760_v28 }
 0x5fa   : > { %v15709_v35 = vpop.f32.mrb[119].mxu0 }
 0x5fb   : > { %v6055_v6 = vadd.f32 %v23842_v41, %v5970_v50  ;;  %v15710_v14 = vadd.f32 %v15709_v35, %v15708_v44  ;;  %v20743_v51 = vpack.i.bf16 %v6064_v53, %v6063_v27  ;;  %v23880_v7 = vpack.c.bf16 %v6064_v53, %v6063_v27 }
 0x5fc   : > { %v6149_v41 = vadd.f32 %v15762_v43, %v23803_v22 }
 0x5fd   : > { %v5975_v46 = vadd.f32 %v15710_v14, %v23803_v22  ;;  %v17130_v48 = vpop.f32.mrb[120].mxu0  ;;  %20744 = vrot.lane.b32.xlu1 %v20743_v51, %s21034_s29  ;;  %v6065_v36 = vmax.f32 %v6055_v6, 0.0 }
 0x5fe   : > { %v6224_v26 = vadd.f32 %v17130_v48, %v6139_v4  ;;  %v6218_v62 = vpop.f32.mrb[121].mxu0 }
 0x5ff   : > { %v6060_v0 = vadd.f32 %v23840_v61, %v5975_v46  ;;  %v6219_v23 = vadd.f32 %v6218_v62, %v6134_v49 }
 0x600   : > { %v6238_v32 = vmax.f32 %v6224_v26, 0.0 }
 0x601   : > { %v6066_v39 = vmax.f32 %v6060_v0, 0.0  ;;  %v6237_v40 = vmax.f32 %v6219_v23, 0.0  ;;  %v17133_v54 = vpop.f32.mrb[122].mxu0  ;;  %20754 = vrot.lane.b32.xlu1 %v20743_v51, %s21035_s16 }
 0x602   : > { %v6234_v25 = vadd.f32 %v17133_v54, %v6149_v41  ;;  %v6228_v59 = vpop.f32.mrb[123].mxu0 }
 0x603   : > { %v20773_v58 = vpack.i.bf16 %v6238_v32, %v6237_v40  ;;  %v23889_v63 = vpack.c.bf16 %v6238_v32, %v6237_v40  ;;  %v6229_v60 = vadd.f32 %v6228_v59, %v6144_v30  ;;  %v20748_v61 = vpack.i.bf16 %v6066_v39, %v6065_v36 }
 0x604   : > { %v6240_v57 = vmax.f32 %v6234_v25, 0.0  ;;  %v23891_v21 = vpack.c.bf16 %v6066_v39, %v6065_v36 }
 0x605   : > { %v6239_v5 = vmax.f32 %v6229_v60, 0.0  ;;  %20764 = vrot.lane.b32.xlu1 %v20773_v58, %s21034_s29  ;;  %v17144_v3 = vpop.f32.mrb[124].mxu0  ;;  %20749 = vrot.lane.b32.xlu0 %v20748_v61, %s21034_s29 }
 0x606   : > { %v6392_v9 = vpop.f32.mrb[125].mxu0 }
 0x607   : > { %v20778_v20 = vpack.i.bf16 %v6240_v57, %v6239_v5  ;;  %v23895_v17 = vpack.c.bf16 %v6240_v57, %v6239_v5 }
 0x609   : > { %20774 = vrot.lane.b32.xlu1 %v20773_v58, %s21035_s16  ;;  %v17147_v56 = vpop.f32.mrb[126].mxu0  ;;  %20759 = vrot.lane.b32.xlu0 %v20748_v61, %s21035_s16 }
 0x60a   : > { %v6402_v2 = vpop.f32.mrb[127].mxu0 }
 0x60b   : > { %v15803_v47 = vpop.f32.mrb[150].mxu1 }
 0x60c   : > { %v15804_v42 = vpop.f32.mrb[151].mxu1 }
 0x60d   : > { %v15805_v19 = vadd.f32 %v15804_v42, %v15803_v47  ;;  %20769 = vrot.lane.b32.xlu0 %v20778_v20, %s21034_s29 }
 0x60f   : > { %v15806_v18 = vpop.f32.mrb[152].mxu1  ;;  %v6308_v37 = vadd.f32 %v15805_v19, %v23790_v52 }
 0x610   : > { %v15807_v33 = vpop.f32.mrb[153].mxu1 }
 0x611   : > { %v15808_v28 = vadd.f32 %v15807_v33, %v15806_v18  ;;  %v6393_v13 = vadd.f32 %v6392_v9, %v6308_v37  ;;  %20779 = vrot.lane.b32.xlu0 %v20778_v20, %s21035_s16 }
 0x613   : > { %v6313_v27 = vadd.f32 %v15808_v28, %v23793_v8  ;;  %v15809_v53 = vpop.f32.mrb[154].mxu1  ;;  %v6411_v6 = vmax.f32 %v6393_v13, 0.0 }
 0x614   : > { %v15810_v50 = vpop.f32.mrb[155].mxu1 }
 0x615   : > { %v6398_v44 = vadd.f32 %v17144_v3, %v6313_v27  ;;  %v15811_v43 = vadd.f32 %v15810_v50, %v15809_v53 }
 0x617   : > { %v6412_v35 = vmax.f32 %v6398_v44, 0.0  ;;  %v15812_v14 = vpop.f32.mrb[156].mxu1  ;;  %v6318_v51 = vadd.f32 %v15811_v43, %v23796_v12 }
 0x618   : > { %v15813_v4 = vpop.f32.mrb[157].mxu1 }
 0x619   : > { %v20793_v46 = vpack.i.bf16 %v6412_v35, %v6411_v6  ;;  %v23904_v48 = vpack.c.bf16 %v6412_v35, %v6411_v6  ;;  %v15814_v49 = vadd.f32 %v15813_v4, %v15812_v14  ;;  %v6403_v26 = vadd.f32 %v6402_v2, %v6318_v51 }
 0x61b   : > { %v6323_v62 = vadd.f32 %v15814_v49, %v23803_v22  ;;  %20784 = vrot.lane.b32.xlu1 %v20793_v46, %s21034_s29  ;;  %v17158_v0 = vpop.f32.mrb[158].mxu1  ;;  %v6413_v40 = vmax.f32 %v6403_v26, 0.0 }
 0x61c   : > { %v6566_v23 = vpop.f32.mrb[159].mxu1 }
 0x61d   : > { %v6408_v32 = vadd.f32 %v17147_v56, %v6323_v62 }
 0x61e   : > { %v20665_v41 = vpop.permute.xlu1 %20664 }
 0x61f   : > { %v6414_v39 = vmax.f32 %v6408_v32, 0.0  ;;  %v20667_v54 = vunpack.i.h.bf16 %v20665_v41  ;;  %v20666_v30 = vunpack.i.l.bf16 %v20665_v41  ;;  %20794 = vrot.lane.b32.xlu1 %v20793_v46, %s21035_s16  ;;  %v17161_v36 = vpop.f32.mrb[160].mxu1 }
 0x620   : > { %v6576_v25 = vpop.f32.mrb[161].mxu1 }
 0x621   : > { %v20798_v59 = vpack.i.bf16 %v6414_v39, %v6413_v40  ;;  %v23909_v58 = vpack.c.bf16 %v6414_v39, %v6413_v40  ;;  %v23911_v60 = vpack.c.bf16 %v20667_v54, %v20666_v30 }
 0x622   : > { %v20670_v57 = vpop.permute.xlu0 %20669 }
 0x623   : > { %v20672_v61 = vunpack.i.h.bf16 %v20670_v57  ;;  %v20671_v5 = vunpack.i.l.bf16 %v20670_v57  ;;  %19200 = vmatprep.subr.msk.bf16.mxu1 %vm21833_vm13, %v23911_v60  ;;  %20789 = vrot.lane.b32.xlu0 %v20798_v59, %s21034_s29  ;;  %v23917_v3 = vpop.f32.mrb[162].mxu1 }
 0x624   : > { %19202 = vmatpush3.bf16.msra.mxu1 %v23801_v1  ;;  %v23920_v9 = vpop.f32.mrb[163].mxu1 }
 0x625   : > { %v15855_v20 = vpop.f32.mrb[128].mxu0  ;;  %v23922_v56 = vpack.c.bf16 %v20672_v61, %v20671_v5 }
 0x626   : > { %v15856_v2 = vpop.f32.mrb[129].mxu0 }
 0x627   : > { %v15857_v47 = vadd.f32 %v15856_v2, %v15855_v20  ;;  %20799 = vrot.lane.b32.xlu0 %v20798_v59, %s21035_s16  ;;  %19205 = vmatprep.subr.msk.bf16.mxu1 %vm21833_vm13, %v23922_v56  ;;  %v23928_v42 = vpop.f32.mrb[164].mxu1 }
 0x628   : > { %19207 = vmatpush3.bf16.msra.mxu1 %v23815_v10  ;;  %v23931_v19 = vpop.f32.mrb[165].mxu1 }
 0x629   : > { %v15858_v1 = vpop.f32.mrb[130].mxu0  ;;  %v6482_v18 = vadd.f32 %v15857_v47, %v23790_v52 }
 0x62a   : > { %v15859_v37 = vpop.f32.mrb[131].mxu0 }
 0x62b   : > { %v15860_v33 = vadd.f32 %v15859_v37, %v15858_v1  ;;  %v6567_v28 = vadd.f32 %v6566_v23, %v6482_v18 }
 0x62d   : > { %v6487_v13 = vadd.f32 %v15860_v33, %v23793_v8  ;;  %v15861_v27 = vpop.f32.mrb[132].mxu0  ;;  %v6585_v35 = vmax.f32 %v6567_v28, 0.0 }
 0x62e   : > { %v15862_v53 = vpop.f32.mrb[133].mxu0 }
 0x62f   : > { %v6572_v50 = vadd.f32 %v17158_v0, %v6487_v13  ;;  %v15863_v44 = vadd.f32 %v15862_v53, %v15861_v27 }
 0x631   : > { %v6586_v43 = vmax.f32 %v6572_v50, 0.0  ;;  %v15864_v6 = vpop.f32.mrb[134].mxu0  ;;  %v6492_v14 = vadd.f32 %v15863_v44, %v23796_v12 }
 0x632   : > { %v15865_v10 = vpop.f32.mrb[135].mxu0 }
 0x633   : > { %v20813_v51 = vpack.i.bf16 %v6586_v43, %v6585_v35  ;;  %v23936_v4 = vpack.c.bf16 %v6586_v43, %v6585_v35  ;;  %v15866_v46 = vadd.f32 %v15865_v10, %v15864_v6  ;;  %v6577_v49 = vadd.f32 %v6576_v25, %v6492_v14 }
 0x634   : > { %v20675_v26 = vpop.permute.xlu1 %20674 }
 0x635   : > { %v6497_v62 = vadd.f32 %v15866_v46, %v23803_v22  ;;  %v20677_v23 = vunpack.i.h.bf16 %v20675_v26  ;;  %v20676_v32 = vunpack.i.l.bf16 %v20675_v26  ;;  %20804 = vrot.lane.b32.xlu1 %v20813_v51, %s21034_s29  ;;  %v6587_v54 = vmax.f32 %v6577_v49, 0.0 }
 0x637   : > { %v6582_v0 = vadd.f32 %v17161_v36, %v6497_v62  ;;  %v23940_v41 = vpack.c.bf16 %v20677_v23, %v20676_v32 }
 0x638   : > { %v20685_v39 = vpop.permute.xlu1 %20684 }
 0x639   : > { %v6588_v40 = vmax.f32 %v6582_v0, 0.0  ;;  %20814 = vrot.lane.b32.xlu1 %v20813_v51, %s21035_s16  ;;  %19210 = vmatprep.subr.msk.bf16.mxu1 %vm21833_vm13, %v23940_v41  ;;  %v20687_v61 = vunpack.i.h.bf16 %v20685_v39  ;;  %v20686_v36 = vunpack.i.l.bf16 %v20685_v39 }
 0x63a   : > { %19212 = vmatpush3.bf16.msra.mxu1 %v23811_v38 }
 0x63b   : > { %v20818_v30 = vpack.i.bf16 %v6588_v40, %v6587_v54  ;;  %v23947_v25 = vpack.c.bf16 %v6588_v40, %v6587_v54  ;;  %v19218_v18 = vpack.c.bf16 %v20687_v61, %v20686_v36 }
 0x63c   : > { %v20680_v59 = vpop.permute.xlu0 %20679  ;;  %v20695_v57 = vpop.permute.xlu1 %20694 }
 0x63d   : > { %v20682_v5 = vunpack.i.h.bf16 %v20680_v59  ;;  %v20681_v20 = vunpack.i.l.bf16 %v20680_v59  ;;  %20809 = vrot.lane.b32.xlu0 %v20818_v30, %s21034_s29  ;;  %v20697_v13 = vunpack.i.h.bf16 %v20695_v57  ;;  %v20696_v27 = vunpack.i.l.bf16 %v20695_v57 }
 0x63f   : > { %v23950_v2 = vpack.c.bf16 %v20682_v5, %v20681_v20  ;;  %v23966_v32 = vpack.c.bf16 %v20697_v13, %v20696_v27 }
 0x640   : > { %v20690_v47 = vpop.permute.xlu0 %20689  ;;  %v20705_v1 = vpop.permute.xlu1 %20704 }
 0x641   : > { %20819 = vrot.lane.b32.xlu0 %v20818_v30, %s21035_s16  ;;  %v20692_v37 = vunpack.i.h.bf16 %v20690_v47  ;;  %v20691_v33 = vunpack.i.l.bf16 %v20690_v47  ;;  %19215 = vmatprep.subr.msk.bf16.mxu1 %vm21833_vm13, %v23950_v2  ;;  %v20707_v0 = vunpack.i.h.bf16 %v20705_v1  ;;  %v20706_v39 = vunpack.i.l.bf16 %v20705_v1 }
 0x642   : > { %19217 = vmatpush3.bf16.msra.mxu1 %v23818_v31 }
 0x643   : > { %19220 = vmatprep.subr.msk.bf16.mxu1 %vm21858_vm14, %v19218_v18  ;;  %v15959_v28 = vpop.f32.mrb[166].mxu1  ;;  %v19223_v53 = vpack.c.bf16 %v20692_v37, %v20691_v33  ;;  %v19231_v37 = vpack.c.bf16 %v20707_v0, %v20706_v39 }
 0x644   : > { %v20700_v50 = vpop.permute.xlu0 %20699  ;;  %v20715_v44 = vpop.permute.xlu1 %20714 }
 0x645   : > { %v15907_v43 = vpop.f32.mrb[136].mxu0  ;;  %v20702_v35 = vunpack.i.h.bf16 %v20700_v50  ;;  %v20701_v6 = vunpack.i.l.bf16 %v20700_v50  ;;  %v20717_v14 = vunpack.i.h.bf16 %v20715_v44  ;;  %v20716_v10 = vunpack.i.l.bf16 %v20715_v44  ;;  %v15960_v51 = vpop.f32.mrb[167].mxu1 }
 0x646   : > { %v15908_v46 = vpop.f32.mrb[137].mxu0  ;;  %v23959_v49 = vadd.f32 %v15960_v51, %v15959_v28  ;;  %19222 = vmatpush3.bf16.msra.mxu1 %v23824_v11 }
 0x647   : > { %v23962_v26 = vpack.c.bf16 %v20702_v35, %v20701_v6  ;;  %v15909_v62 = vadd.f32 %v15908_v46, %v15907_v43  ;;  %19225 = vmatprep.subr.msk.bf16.mxu1 %vm21858_vm14, %v19223_v53  ;;  %v15962_v23 = vpop.f32.mrb[168].mxu1  ;;  %v23968_v40 = vpack.c.bf16 %v20717_v14, %v20716_v10  ;;  %v23998_v35 = vld [vmem:[%s27155_s9 + $0x28] sm:$0xff] }
 0x648   : > { %v20710_v54 = vpop.permute.xlu0 %20709  ;;  %v15963_v30 = vpop.f32.mrb[169].mxu1 }
 0x649   : > { %v6656_v59 = vadd.f32 %v15909_v62, %v23790_v52  ;;  %v15910_v57 = vpop.f32.mrb[138].mxu0  ;;  %v20712_v61 = vunpack.i.h.bf16 %v20710_v54  ;;  %v20711_v36 = vunpack.i.l.bf16 %v20710_v54  ;;  %v15964_v5 = vadd.f32 %v15963_v30, %v15962_v23  ;;  %19242 = vmatprep.subr.msk.bf16.mxu0 %vm21858_vm14, %v23962_v26 }
 0x64a   : > { %v15911_v20 = vpop.f32.mrb[139].mxu0  ;;  %19227 = vmatpush3.bf16.msra.mxu1 %v23830_v55  ;;  %19245 = vmatpush3.bf16.msk.msra.mxu0 %vm21858_vm14, %v23962_v26 }
 0x64b   : > { %v6741_v47 = vadd.f32 %v23920_v9, %v6656_v59  ;;  %v15912_v1 = vadd.f32 %v15911_v20, %v15910_v57  ;;  %19230 = vmatprep.subr.msk.bf16.mxu1 %vm21858_vm14, %v23966_v32  ;;  %19248 = vmatprep.subr.msk.bf16.mxu0 %vm21858_vm14, %v23968_v40  ;;  %v15965_v18 = vpop.f32.mrb[170].mxu1  ;;  %v23985_v13 = vpack.c.bf16 %v20712_v61, %v20711_v36  ;;  %v24013_v57 = vld [vmem:[%s27155_s9 + $0x40] sm:$0xff] }
 0x64c   : > { %v20720_v33 = vpop.permute.xlu0 %20719  ;;  %v15966_v28 = vpop.f32.mrb[171].mxu1  ;;  %v24021_v36 = vld [vmem:[%s27155_s9] sm:$0xff] }
 0x64d   : > { %v6661_v27 = vadd.f32 %v15912_v1, %v23793_v8  ;;  %v15913_v53 = vpop.f32.mrb[140].mxu0  ;;  %v20722_v50 = vunpack.i.h.bf16 %v20720_v33  ;;  %v20721_v9 = vunpack.i.l.bf16 %v20720_v33  ;;  %v23988_v43 = vadd.f32 %v15966_v28, %v15965_v18 }
 0x64e   : > { %v15914_v44 = vpop.f32.mrb[141].mxu0  ;;  %19233 = vmatpush3.bf16.msk.msra.mxu1 %vm21833_vm13, %v19231_v37  ;;  %19251 = vmatpush3.bf16.msk.msra.mxu0 %vm21858_vm14, %v23968_v40  ;;  %v6759_v62 = vmax.f32 %v6741_v47, 0.0  ;;  %v6835_v18 = vadd.f32 %v15964_v5, %v23793_v8 }
 0x64f   : > { %v6746_v6 = vadd.f32 %v23917_v3, %v6661_v27  ;;  %v19237_v14 = vpack.c.bf16 %v20722_v50, %v20721_v9  ;;  %v15915_v10 = vadd.f32 %v15914_v44, %v15913_v53  ;;  %v20725_v51 = vpop.permute.xlu1 %20724  ;;  %19236 = vmatprep.subr.msk.bf16.mxu1 %vm21858_vm14, %v23985_v13  ;;  %19254 = vmatprep.subr.msk.bf16.mxu0 %vm21833_vm13, %v23940_v41  ;;  %v15968_v46 = vpop.f32.mrb[172].mxu1 }
 0x650   : > { %v20727_v23 = vunpack.i.h.bf16 %v20725_v51  ;;  %v15969_v0 = vpop.f32.mrb[173].mxu1  ;;  %v20726_v30 = vunpack.i.l.bf16 %v20725_v51  ;;  %v6830_v50 = vadd.f32 %v23959_v49, %v23790_v52 }
 0x651   : > { %v6760_v39 = vmax.f32 %v6746_v6, 0.0  ;;  %v6666_v54 = vadd.f32 %v15915_v10, %v23796_v12  ;;  %v15916_v3 = vpop.f32.mrb[142].mxu0  ;;  %v15970_v59 = vadd.f32 %v15969_v0, %v15968_v46  ;;  %17199 = vmatmul.mubr.msk.f32.vlgmr.msra.gmra.mrb[148].mxu0 %vm2616_vm12, %v23998_v35 }
 0x652   : > { %v15917_v61 = vpop.f32.mrb[143].mxu0  ;;  %19239 = vmatpush3.bf16.msk.msra.mxu1 %vm21833_vm13, %v19237_v14  ;;  %19256 = vmatpush3.bf16.msra.mxu0 %v23811_v38  ;;  %v24033_v38 = vld [vmem:[%s27155_s9 + $0x20] sm:$0xff]  ;;  %v24044_v53 = vpack.c.bf16 %v20727_v23, %v20726_v30  ;;  %v24058_v14 = vld [vmem:[%s27155_s9 + $0x18] sm:$0xff] }
 0x653   : > { %v24024_v20 = vadd.f32 %v23931_v19, %v6666_v54  ;;  %v15918_v47 = vadd.f32 %v15917_v61, %v15916_v3  ;;  %v20735_v1 = vpop.permute.xlu1 %20734  ;;  %19259 = vmatprep.subr.msk.bf16.mxu0 %vm21833_vm13, %v23950_v2  ;;  %v20823_v37 = vpack.i.bf16 %v6760_v39, %v6759_v62  ;;  %17201 = vmatprep.mubr.msk.f32.mxu0 %vm2616_vm12, %v24013_v57  ;;  %v24040_v19 = vld [vmem:[%s27155_s9 + $0x58] sm:$0xff]  ;;  %v24090_v61 = vld [vmem:[%s27155_s9 + $0x30] sm:$0xff] }
 0x654   : > { %v20737_v33 = vunpack.i.h.bf16 %v20735_v1  ;;  %v20736_v28 = vunpack.i.l.bf16 %v20735_v1  ;;  %v24042_v27 = vpack.c.bf16 %v6760_v39, %v6759_v62  ;;  %v6845_v62 = vadd.f32 %v15970_v59, %v23803_v22 }
 0x655   : > { %v6671_v8 = vadd.f32 %v15918_v47, %v23803_v22  ;;  %v17186_v5 = vpop.f32.mrb[144].mxu0  ;;  %20824 = vrot.lane.b32.xlu1 %v20823_v37, %s21035_s16  ;;  %7410 = vmatmul.mubr.f32.vlgmr.msra.gmra.mrb[174].mxu1 %v24021_v36  ;;  %v6840_v54 = vadd.f32 %v23988_v43, %v23796_v12  ;;  %v6761_v22 = vmax.f32 %v24024_v20, 0.0 }
 0x656   : > { %v24051_v9 = vpack.c.bf16 %v20737_v33, %v20736_v28  ;;  %v6920_v44 = vadd.f32 %v17186_v5, %v6835_v18  ;;  %v6914_v6 = vpop.f32.mrb[145].mxu0  ;;  %19261 = vmatpush3.bf16.msra.mxu0 %v23818_v31  ;;  %7414 = vmatprep.mubr.f32.mxu1 %v24033_v38  ;;  %v24101_v28 = vld [vmem:[%s27155_s9 + $0x50] sm:$0xff] }
 0x657   : > { %v6756_v10 = vadd.f32 %v23928_v42, %v6671_v8  ;;  %v6915_v51 = vadd.f32 %v6914_v6, %v6830_v50  ;;  %v20730_v46 = vpop.permute.xlu0 %20729  ;;  %19264 = vmatprep.subr.msk.bf16.mxu0 %vm21833_vm13, %v24044_v53  ;;  %17202 = vmatmul.mubr.msk.f32.gmra.mrb[150].mxu0 %vm2616_vm12, %v24040_v19  ;;  %v24073_v42 = vld [vmem:[%s27155_s9 + $0x38] sm:$0xff]  ;;  %v24117_v6 = vld [vmem:[%s27155_s9 + $0x48] sm:$0xff] }
 0x658   : > { %v6934_v52 = vmax.f32 %v6920_v44, 0.0  ;;  %v20732_v31 = vunpack.i.h.bf16 %v20730_v46  ;;  %v20731_v49 = vunpack.i.l.bf16 %v20730_v46  ;;  %19296 = vmatprep.subr.msk.bf16.mxu1 %vm21858_vm14, %v24051_v9  ;;  %7583 = vmatprep.mubr.f32.mxu0 %v23858_v34  ;;  %v6949_v44 = vld [vmem:[%s27156_s10] sm:$0xff] }
 0x659   : > { %v6762_v23 = vmax.f32 %v6756_v10, 0.0  ;;  %v6933_v0 = vmax.f32 %v6915_v51, 0.0  ;;  %v17189_v39 = vpop.f32.mrb[146].mxu0  ;;  %20834 = vrot.lane.b32.xlu1 %v20823_v37, %s21034_s29  ;;  %7415 = vmatmul.mubr.f32.gmra.mrb[176].mxu1 %v24058_v14 }
 0x65a   : > { %v24081_v30 = vpack.c.bf16 %v20732_v31, %v20731_v49  ;;  %v6930_v3 = vadd.f32 %v17189_v39, %v6845_v62  ;;  %v6924_v59 = vpop.f32.mrb[147].mxu0  ;;  %19299 = vmatpush3.bf16.msk.msra.mxu1 %vm21858_vm14, %v24051_v9  ;;  %19266 = vmatpush3.bf16.msra.mxu0 %v23824_v11 }
 0x65b   : > { %v20853_v12 = vpack.i.bf16 %v6934_v52, %v6933_v0  ;;  %v24092_v43 = vpack.c.bf16 %v6934_v52, %v6933_v0  ;;  %v6925_v47 = vadd.f32 %v6924_v59, %v6840_v54  ;;  %v20740_v20 = vpop.permute.xlu0 %20739  ;;  %7419 = vmatprep.mubr.f32.mxu1 %v24073_v42  ;;  %v20828_v33 = vpack.i.bf16 %v6762_v23, %v6761_v22  ;;  %v6952_v52 = vld [vmem:[%s27156_s10 + $0x18] sm:$0xff] }
 0x65c   : > { %v6936_v1 = vmax.f32 %v6930_v3, 0.0  ;;  %v20742_v18 = vunpack.i.h.bf16 %v20740_v20  ;;  %v20741_v37 = vunpack.i.l.bf16 %v20740_v20  ;;  %19269 = vmatprep.subr.msk.bf16.mxu0 %vm21833_vm13, %v24081_v30  ;;  %v24105_v5 = vpack.c.bf16 %v6762_v23, %v6761_v22 }
 0x65d   : > { %v6935_v8 = vmax.f32 %v6925_v47, 0.0  ;;  %20844 = vrot.lane.b32.xlu1 %v20853_v12, %s21034_s29  ;;  %7420 = vmatmul.mubr.f32.gmra.mrb[178].mxu1 %v24090_v61 }
 0x65e   : > { %v24107_v50 = vpack.c.bf16 %v20742_v18, %v20741_v37  ;;  %20829 = vrot.lane.b32.xlu0 %v20828_v33, %s21035_s16  ;;  %19271 = vmatpush3.bf16.msra.mxu0 %v23830_v55 }
 0x65f   : > { %v20858_v10 = vpack.i.bf16 %v6936_v1, %v6935_v8  ;;  %v24119_v51 = vpack.c.bf16 %v6936_v1, %v6935_v8  ;;  %19274 = vmatprep.subr.msk.bf16.mxu0 %vm21858_vm14, %v23966_v32  ;;  %7424 = vmatprep.mubr.f32.mxu1 %v24101_v28  ;;  %v6951_v32 = vld [vmem:[%s27156_s10 + $0x10] sm:$0xff] }
 0x660   : > { %19302 = vmatprep.subr.msk.bf16.mxu1 %vm21858_vm14, %v24107_v50 }
 0x661   : > { %7315 = vperm.xlu1 %20142, %v6949_v44   ;;  %7425 = vmatmul.mubr.f32.gmra.mrb[180].mxu1 %v24117_v6 }
 0x662   : > { %20839 = vrot.lane.b32.xlu0 %v20828_v33, %s21034_s29  ;;  %19305 = vmatpush3.bf16.msk.msra.mxu1 %vm21858_vm14, %v24107_v50 }
 0x663   : > { %19276 = vmatpush3.bf16.msra.mxu0 %v23864_v45  ;;  %17212 = vmatprep.mubr.msk.f32.mxu1 %vm2616_vm12, %v23853_v16 }
 0x664   : > { %19279 = vmatprep.subr.msk.bf16.mxu0 %vm21858_vm14, %v23985_v13  ;;  %v6950_v13 = vld [vmem:[%s27156_s10 + $0x8] sm:$0xff] }
 0x665   : > { %20854 = vrot.lane.b32.xlu1 %v20853_v12, %s21035_s16  ;;  %17213 = vmatmul.mubr.msk.f32.vlgmr.msra.gmra.mrb[182].mxu1 %vm2616_vm12, %v23998_v35 }
 0x666   : > { %20849 = vrot.lane.b32.xlu0 %v20858_v10, %s21034_s29  ;;  %17215 = vmatprep.mubr.msk.f32.mxu1 %vm2616_vm12, %v24013_v57 }
 0x667   : > { %19281 = vmatpush3.bf16.msra.mxu0 %v23870_v24 }
 0x668   : > { %19284 = vmatprep.subr.msk.bf16.mxu0 %vm21858_vm14, %v23962_v26 }
 0x669   : > { %7325 = vperm.xlu1 %20142, %v6951_v32   ;;  %17216 = vmatmul.mubr.msk.f32.gmra.mrb[184].mxu1 %vm2616_vm12, %v24040_v19 }
 0x66a   : > { %7320 = vperm.xlu0 %20141, %v6950_v13   ;;  %17226 = vmatprep.mubr.msk.f32.mxu1 %vm2616_vm12, %v23853_v16 }
 0x66b   : > { %19287 = vmatpush3.bf16.msk.msra.mxu0 %vm21833_vm13, %v23911_v60 }
 0x66c   : > { %19290 = vmatprep.subr.msk.bf16.mxu0 %vm21858_vm14, %v23968_v40 }
 0x66e   : > { %20859 = vrot.lane.b32.xlu0 %v20858_v10, %s21035_s16 }
 0x66f   : > { %19293 = vmatpush3.bf16.msk.msra.mxu0 %vm21833_vm13, %v23922_v56  ;;  %v20745_v46 = vpop.permute.xlu1 %20744 }
 0x670   : > { %19308 = vmatprep.subr.msk.bf16.mxu0 %vm21833_vm13, %v24044_v53  ;;  %v20747_v60 = vunpack.i.h.bf16 %v20745_v46  ;;  %v20746_v31 = vunpack.i.l.bf16 %v20745_v46 }
 0x672   : > { %7330 = vperm.xlu0 %20141, %v6952_v52   ;;  %7584 = vmatmul.mubr.f32.vlgmr.msra.gmra.mrb[152].mxu0 %v24021_v36  ;;  %v24181_v23 = vpack.c.bf16 %v20747_v60, %v20746_v31 }
 0x673   : > { %19310 = vmatpush3.bf16.msra.mxu0 %v23824_v11  ;;  %v20755_v49 = vpop.permute.xlu1 %20754  ;;  %7588 = vmatprep.mubr.f32.mxu0 %v24033_v38 }
 0x674   : > { %v20757_v56 = vunpack.i.h.bf16 %v20755_v49  ;;  %v20756_v62 = vunpack.i.l.bf16 %v20755_v49  ;;  %19313 = vmatprep.subr.msk.bf16.mxu0 %vm21833_vm13, %v24081_v30 }
 0x676   : > { %v24183_v0 = vpack.c.bf16 %v20757_v56, %v20756_v62  ;;  %7589 = vmatmul.mubr.f32.gmra.mrb[154].mxu0 %v24058_v14 }
 0x677   : > { %19315 = vmatpush3.bf16.msra.mxu0 %v23830_v55  ;;  %7593 = vmatprep.mubr.f32.mxu0 %v24073_v42  ;;  %v20750_v11 = vpop.permute.xlu0 %20749  ;;  %v20765_v47 = vpop.permute.xlu1 %20764 }
 0x678   : > { %19318 = vmatprep.subr.msk.bf16.mxu0 %vm21833_vm13, %v24181_v23  ;;  %19350 = vmatprep.subr.msk.bf16.mxu1 %vm21858_vm14, %v24183_v0  ;;  %v20752_v39 = vunpack.i.h.bf16 %v20750_v11  ;;  %v20751_v54 = vunpack.i.l.bf16 %v20750_v11  ;;  %v20766_v20 = vunpack.i.l.bf16 %v20765_v47 }
 0x679   : > { %19353 = vmatpush3.bf16.msk.msra.mxu1 %vm21858_vm14, %v24183_v0 }
 0x67a   : > { %7594 = vmatmul.mubr.f32.gmra.mrb[156].mxu0 %v24090_v61  ;;  %v24198_v55 = vpack.c.bf16 %v20752_v39, %v20751_v54 }
 0x67b   : > { %19320 = vmatpush3.bf16.msra.mxu0 %v23864_v45  ;;  %7598 = vmatprep.mubr.f32.mxu0 %v24101_v28  ;;  %v20760_v22 = vpop.permute.xlu0 %20759  ;;  %v20775_v18 = vpop.permute.xlu1 %20774 }
 0x67c   : > { %v20762_v3 = vunpack.i.h.bf16 %v20760_v22  ;;  %v20761_v59 = vunpack.i.l.bf16 %v20760_v22  ;;  %19323 = vmatprep.subr.msk.bf16.mxu0 %vm21833_vm13, %v24198_v55  ;;  %v20776_v8 = vunpack.i.l.bf16 %v20775_v18 }
 0x67e   : > { %7599 = vmatmul.mubr.f32.gmra.mrb[158].mxu0 %v24117_v6  ;;  %v24206_v12 = vpack.c.bf16 %v20762_v3, %v20761_v59 }
 0x67f   : > { %19325 = vmatpush3.bf16.msra.mxu0 %v23870_v24  ;;  %7757 = vmatprep.mubr.f32.mxu0 %v23858_v34  ;;  %v20770_v1 = vpop.permute.xlu0 %20769 }
 0x680   : > { %19328 = vmatprep.subr.msk.bf16.mxu0 %vm21858_vm14, %v23962_v26  ;;  %19356 = vmatprep.subr.msk.bf16.mxu1 %vm21858_vm14, %v24206_v12  ;;  %v20767_v26 = vunpack.i.h.bf16 %v20765_v47  ;;  %v20772_v37 = vunpack.i.h.bf16 %v20770_v1  ;;  %v20771_v33 = vunpack.i.l.bf16 %v20770_v1 }
 0x681   : > { %19359 = vmatpush3.bf16.msk.msra.mxu1 %vm21858_vm14, %v24206_v12 }
 0x682   : > { %19362 = vmatprep.subr.msk.bf16.mxu1 %vm21833_vm13, %v24181_v23  ;;  %v24253_v10 = vpack.c.bf16 %v20772_v37, %v20771_v33 }
 0x683   : > { %19330 = vmatpush3.bf16.msra.mxu0 %v23880_v7  ;;  %v20780_v44 = vpop.permute.xlu0 %20779 }
 0x684   : > { %19333 = vmatprep.subr.msk.bf16.mxu0 %vm21858_vm14, %v23968_v40  ;;  %17227 = vmatmul.mubr.msk.f32.vlgmr.msra.gmra.mrb[186].mxu1 %vm2616_vm12, %v23998_v35  ;;  %v24238_v40 = vpack.c.bf16 %v20767_v26, %v20766_v20 }
 0x685   : > { %19364 = vmatpush3.bf16.msra.mxu1 %v23864_v45  ;;  %17229 = vmatprep.mubr.msk.f32.mxu1 %vm2616_vm12, %v24013_v57  ;;  %v20777_v45 = vunpack.i.h.bf16 %v20775_v18 }
 0x686   : > { %19367 = vmatprep.subr.msk.bf16.mxu1 %vm21833_vm13, %v24198_v55 }
 0x687   : > { %19335 = vmatpush3.bf16.msra.mxu0 %v23891_v21  ;;  %v24255_v13 = vpack.c.bf16 %v20777_v45, %v20776_v8 }
 0x688   : > { %19338 = vmatprep.subr.msk.bf16.mxu0 %vm21858_vm14, %v24051_v9  ;;  %17230 = vmatmul.mubr.msk.f32.gmra.mrb[188].mxu1 %vm2616_vm12, %v24040_v19 }
 0x689   : > { %19369 = vmatpush3.bf16.msra.mxu1 %v23870_v24  ;;  %7931 = vmatprep.mubr.f32.mxu1 %v23858_v34  ;;  %v20782_v24 = vunpack.i.h.bf16 %v20780_v44  ;;  %v20781_v34 = vunpack.i.l.bf16 %v20780_v44 }
 0x68a   : > { %19372 = vmatprep.subr.msk.bf16.mxu1 %vm21833_vm13, %v24238_v40 }
 0x68b   : > { %19341 = vmatpush3.bf16.msk.msra.mxu0 %vm21833_vm13, %v23940_v41  ;;  %v24267_v46 = vpack.c.bf16 %v20782_v24, %v20781_v34  ;;  %v24478_v34 = vld [vmem:[%s27155_s9 + $0x10] sm:$0xff] }
 0x68c   : > { %19344 = vmatprep.subr.msk.bf16.mxu0 %vm21858_vm14, %v24107_v50 }
 0x68d   : > { %v20785_v32 = vpop.permute.xlu1 %20784  ;;  %19374 = vmatpush3.bf16.msra.mxu1 %v23880_v7 }
 0x68e   : > { %19377 = vmatprep.subr.msk.bf16.mxu1 %vm21833_vm13, %v24253_v10  ;;  %v20787_v56 = vunpack.i.h.bf16 %v20785_v32  ;;  %v20786_v62 = vunpack.i.l.bf16 %v20785_v32 }
 0x68f   : > { %19347 = vmatpush3.bf16.msk.msra.mxu0 %vm21833_vm13, %v23950_v2 }
 0x690   : > { %19404 = vmatprep.subr.msk.bf16.mxu0 %vm21858_vm14, %v24255_v13 }
 0x691   : > { %v20795_v41 = vpop.permute.xlu1 %20794  ;;  %19379 = vmatpush3.bf16.msra.mxu1 %v23891_v21 }
 0x692   : > { %7758 = vmatmul.mubr.f32.vlgmr.msra.gmra.mrb[160].mxu0 %v24021_v36  ;;  %v20797_v52 = vunpack.i.h.bf16 %v20795_v41  ;;  %v20796_v60 = vunpack.i.l.bf16 %v20795_v41  ;;  %19382 = vmatprep.subr.msk.bf16.mxu1 %vm21858_vm14, %v24051_v9 }
 0x693   : > { %19407 = vmatpush3.bf16.msk.msra.mxu0 %vm21858_vm14, %v24255_v13  ;;  %7762 = vmatprep.mubr.f32.mxu0 %v24033_v38 }
 0x694   : > { %v24277_v2 = vpack.c.bf16 %v20797_v52, %v20796_v60  ;;  %19410 = vmatprep.subr.msk.bf16.mxu0 %vm21858_vm14, %v24267_v46 }
 0x695   : > { %v20790_v31 = vpop.permute.xlu0 %20789  ;;  %19384 = vmatpush3.bf16.msra.mxu1 %v23889_v63 }
 0x696   : > { %7763 = vmatmul.mubr.f32.gmra.mrb[162].mxu0 %v24058_v14  ;;  %19387 = vmatprep.subr.msk.bf16.mxu1 %vm21858_vm14, %v24107_v50  ;;  %v20791_v39 = vunpack.i.l.bf16 %v20790_v31 }
 0x697   : > { %19413 = vmatpush3.bf16.msk.msra.mxu0 %vm21858_vm14, %v24267_v46  ;;  %7767 = vmatprep.mubr.f32.mxu0 %v24073_v42 }
 0x698   : > { %19458 = vmatprep.subr.msk.bf16.mxu0 %vm21858_vm14, %v24277_v2 }
 0x699   : > { %19389 = vmatpush3.bf16.msra.mxu1 %v23895_v17  ;;  %v20800_v9 = vpop.permute.xlu0 %20799 }
 0x69a   : > { %7768 = vmatmul.mubr.f32.gmra.mrb[164].mxu0 %v24090_v61  ;;  %19392 = vmatprep.subr.msk.bf16.mxu1 %vm21858_vm14, %v24183_v0  ;;  %v20802_v50 = vunpack.i.h.bf16 %v20800_v9  ;;  %v20801_v49 = vunpack.i.l.bf16 %v20800_v9 }
 0x69b   : > { %7772 = vmatprep.mubr.f32.mxu0 %v24101_v28 }
 0x69c   : > { %v24310_v11 = vpack.c.bf16 %v20802_v50, %v20801_v49 }
 0x69d   : > { %19395 = vmatpush3.bf16.msk.msra.mxu1 %vm21833_vm13, %v24044_v53  ;;  %v24329_v53 = vpack.c.bf16 %v20787_v56, %v20786_v62 }
 0x69e   : > { %7773 = vmatmul.mubr.f32.gmra.mrb[166].mxu0 %v24117_v6  ;;  %19398 = vmatprep.subr.msk.bf16.mxu1 %vm21858_vm14, %v24206_v12 }
 0x69f   : > { %17240 = vmatprep.mubr.msk.f32.mxu0 %vm2616_vm12, %v23853_v16 }
 0x6a1   : > { %19401 = vmatpush3.bf16.msk.msra.mxu1 %vm21833_vm13, %v24081_v30  ;;  %v20792_v30 = vunpack.i.h.bf16 %v20790_v31 }
 0x6a2   : > { %17241 = vmatmul.mubr.msk.f32.vlgmr.msra.gmra.mrb[168].mxu0 %vm2616_vm12, %v23998_v35  ;;  %19416 = vmatprep.subr.msk.bf16.mxu1 %vm21833_vm13, %v24238_v40 }
 0x6a3   : > { %19461 = vmatpush3.bf16.msk.msra.mxu0 %vm21858_vm14, %v24277_v2  ;;  %17243 = vmatprep.mubr.msk.f32.mxu0 %vm2616_vm12, %v24013_v57 }
 0x6a4   : > { %19464 = vmatprep.subr.msk.bf16.mxu0 %vm21858_vm14, %v24310_v11  ;;  %7932 = vmatmul.mubr.f32.vlgmr.msra.gmra.mrb[190].mxu1 %v24021_v36 }
 0x6a5   : > { %19418 = vmatpush3.bf16.msra.mxu1 %v23880_v7  ;;  %7936 = vmatprep.mubr.f32.mxu1 %v24033_v38  ;;  %v24347_v7 = vpack.c.bf16 %v20792_v30, %v20791_v39 }
 0x6a6   : > { %17244 = vmatmul.mubr.msk.f32.gmra.mrb[170].mxu0 %vm2616_vm12, %v24040_v19  ;;  %19421 = vmatprep.subr.msk.bf16.mxu1 %vm21833_vm13, %v24253_v10 }
 0x6a7   : > { %19467 = vmatpush3.bf16.msk.msra.mxu0 %vm21858_vm14, %v24310_v11  ;;  %v20805_v54 = vpop.permute.xlu1 %20804  ;;  %17254 = vmatprep.mubr.msk.f32.mxu0 %vm2616_vm12, %v23853_v16 }
 0x6a8   : > { %19470 = vmatprep.subr.msk.bf16.mxu0 %vm21833_vm13, %v24329_v53  ;;  %7937 = vmatmul.mubr.f32.gmra.mrb[192].mxu1 %v24058_v14  ;;  %v20807_v22 = vunpack.i.h.bf16 %v20805_v54  ;;  %v20806_v3 = vunpack.i.l.bf16 %v20805_v54 }
 0x6a9   : > { %19423 = vmatpush3.bf16.msra.mxu1 %v23891_v21  ;;  %7941 = vmatprep.mubr.f32.mxu1 %v24073_v42 }
 0x6aa   : > { %17255 = vmatmul.mubr.msk.f32.vlgmr.msra.gmra.mrb[172].mxu0 %vm2616_vm12, %v23998_v35  ;;  %19426 = vmatprep.subr.msk.bf16.mxu1 %vm21833_vm13, %v24329_v53  ;;  %v24363_v16 = vpack.c.bf16 %v20807_v22, %v20806_v3 }
 0x6ab   : > { %19472 = vmatpush3.bf16.msra.mxu0 %v23889_v63  ;;  %17257 = vmatprep.mubr.msk.f32.mxu0 %vm2616_vm12, %v24013_v57 }
 0x6ac   : > { %19475 = vmatprep.subr.msk.bf16.mxu0 %vm21833_vm13, %v24347_v7  ;;  %7942 = vmatmul.mubr.f32.gmra.mrb[194].mxu1 %v24090_v61 }
 0x6ad   : > { %19428 = vmatpush3.bf16.msra.mxu1 %v23889_v63  ;;  %7946 = vmatprep.mubr.f32.mxu1 %v24101_v28  ;;  %v24380_v63 = vld [vmem:[%s27155_s9 + $0x8] sm:$0xff] }
 0x6ae   : > { %19431 = vmatprep.subr.msk.bf16.mxu1 %vm21833_vm13, %v24347_v7  ;;  %17258 = vmatmul.mubr.msk.f32.gmra.mrb[174].mxu0 %vm2616_vm12, %v24040_v19 }
 0x6af   : > { %19477 = vmatpush3.bf16.msra.mxu0 %v23895_v17  ;;  %v20810_v21 = vpop.permute.xlu0 %20809  ;;  %8279 = vmatprep.mubr.f32.mxu0 %v24380_v63 }
 0x6b0   : > { %v20812_v59 = vunpack.i.h.bf16 %v20810_v21  ;;  %v20811_v47 = vunpack.i.l.bf16 %v20810_v21  ;;  %19480 = vmatprep.subr.msk.bf16.mxu0 %vm21833_vm13, %v24363_v16  ;;  %7947 = vmatmul.mubr.f32.gmra.mrb[196].mxu1 %v24117_v6  ;;  %v8739_v21 = vld [vmem:[%s27157_s11 + $0x10] sm:$0xff] }
 0x6b1   : > { %19433 = vmatpush3.bf16.msra.mxu1 %v23895_v17  ;;  %8105 = vmatprep.mubr.f32.mxu1 %v24380_v63  ;;  %v20815_v17 = vpop.permute.xlu1 %20814 }
 0x6b2   : > { %v24383_v26 = vpack.c.bf16 %v20812_v59, %v20811_v47  ;;  %19436 = vmatprep.subr.msk.bf16.mxu1 %vm21858_vm14, %v24183_v0  ;;  %v20817_v0 = vunpack.i.h.bf16 %v20815_v17  ;;  %v20816_v20 = vunpack.i.l.bf16 %v20815_v17  ;;  %v8740_v59 = vld [vmem:[%s27157_s11 + $0x18] sm:$0xff]  ;;  %v24673_v17 = vld [vmem:[%s27157_s11 + $0x70] sm:$0xff] }
 0x6b3   : > { %19482 = vmatpush3.bf16.msra.mxu0 %v23904_v48  ;;  %v24603_v29 = vpack.c.bf16 %v8740_v59, %v8739_v21  ;;  %v8748_v47 = vld [vmem:[%s27157_s11 + $0x58] sm:$0xff] }
 0x6b4   : > { %19485 = vmatprep.subr.msk.bf16.mxu0 %vm21833_vm13, %v24383_v26  ;;  %v24420_v1 = vpack.c.bf16 %v20817_v0, %v20816_v20 }
 0x6b5   : > { %19438 = vmatpush3.bf16.msra.mxu1 %v23904_v48 }
 0x6b6   : > { %19441 = vmatprep.subr.msk.bf16.mxu1 %vm21858_vm14, %v24206_v12  ;;  %v20820_v12 = vpop.permute.xlu0 %20819 }
 0x6b7   : > { %19487 = vmatpush3.bf16.msra.mxu0 %v23909_v58  ;;  %v20822_v18 = vunpack.i.h.bf16 %v20820_v12  ;;  %v20821_v37 = vunpack.i.l.bf16 %v20820_v12 }
 0x6b8   : > { %19490 = vmatprep.subr.msk.bf16.mxu0 %vm21858_vm14, %v24255_v13 }
 0x6b9   : > { %19443 = vmatpush3.bf16.msra.mxu1 %v23909_v58 }
 0x6ba   : > { %19446 = vmatprep.subr.msk.bf16.mxu1 %vm21858_vm14, %v24255_v13 }
 0x6bb   : > { %19492 = vmatpush3.bf16.msra.mxu0 %v23936_v4 }
 0x6bc   : > { %19495 = vmatprep.subr.msk.bf16.mxu0 %vm21858_vm14, %v24267_v46 }
 0x6bd   : > { %19449 = vmatpush3.bf16.msk.msra.mxu1 %vm21833_vm13, %v24181_v23  ;;  %v24434_v23 = vpack.c.bf16 %v20822_v18, %v20821_v37 }
 0x6be   : > { %19452 = vmatprep.subr.msk.bf16.mxu1 %vm21858_vm14, %v24267_v46 }
 0x6bf   : > { %19497 = vmatpush3.bf16.msra.mxu0 %v23947_v25 }
 0x6c0   : > { %19500 = vmatprep.subr.msk.bf16.mxu0 %vm21858_vm14, %v24277_v2 }
 0x6c1   : > { %19455 = vmatpush3.bf16.msk.msra.mxu1 %vm21833_vm13, %v24198_v55 }
 0x6c2   : > { %19512 = vmatprep.subr.msk.bf16.mxu1 %vm21858_vm14, %v24420_v1 }
 0x6c3   : > { %19503 = vmatpush3.bf16.msk.msra.mxu0 %vm21833_vm13, %v24238_v40 }
 0x6c4   : > { %19506 = vmatprep.subr.msk.bf16.mxu0 %vm21858_vm14, %v24310_v11  ;;  %8106 = vmatmul.mubr.f32.vlgmr.msra.gmra.mrb[198].mxu1 %v24021_v36 }
 0x6c5   : > { %19515 = vmatpush3.bf16.msk.msra.mxu1 %vm21858_vm14, %v24420_v1  ;;  %8110 = vmatprep.mubr.f32.mxu1 %v24033_v38 }
 0x6c6   : > { %19518 = vmatprep.subr.msk.bf16.mxu1 %vm21858_vm14, %v24434_v23 }
 0x6c7   : > { %19509 = vmatpush3.bf16.msk.msra.mxu0 %vm21833_vm13, %v24253_v10  ;;  %v20825_v55 = vpop.permute.xlu1 %20824 }
 0x6c8   : > { %v20827_v40 = vunpack.i.h.bf16 %v20825_v55  ;;  %v20826_v33 = vunpack.i.l.bf16 %v20825_v55  ;;  %19524 = vmatprep.subr.msk.bf16.mxu0 %vm21833_vm13, %v24363_v16  ;;  %8111 = vmatmul.mubr.f32.gmra.mrb[200].mxu1 %v24058_v14 }
 0x6c9   : > { %19521 = vmatpush3.bf16.msk.msra.mxu1 %vm21858_vm14, %v24434_v23  ;;  %8115 = vmatprep.mubr.f32.mxu1 %v24073_v42 }
 0x6ca   : > { %v24451_v45 = vpack.c.bf16 %v20827_v40, %v20826_v33  ;;  %8280 = vmatmul.mubr.f32.vlgmr.msra.gmra.mrb[176].mxu0 %v24021_v36 }
 0x6cb   : > { %19526 = vmatpush3.bf16.msra.mxu0 %v23904_v48  ;;  %v20835_v8 = vpop.permute.xlu1 %20834  ;;  %8284 = vmatprep.mubr.f32.mxu0 %v24033_v38 }
 0x6cc   : > { %v20837_v44 = vunpack.i.h.bf16 %v20835_v8  ;;  %v20836_v10 = vunpack.i.l.bf16 %v20835_v8  ;;  %19529 = vmatprep.subr.msk.bf16.mxu0 %vm21833_vm13, %v24383_v26  ;;  %19566 = vmatprep.subr.msk.bf16.mxu1 %vm21858_vm14, %v24451_v45 }
 0x6cd   : > { %8116 = vmatmul.mubr.f32.gmra.mrb[202].mxu1 %v24090_v61 }
 0x6ce   : > { %v19532_v32 = vpack.c.bf16 %v20837_v44, %v20836_v10  ;;  %8285 = vmatmul.mubr.f32.gmra.mrb[178].mxu0 %v24058_v14  ;;  %8120 = vmatprep.mubr.f32.mxu1 %v24101_v28 }
 0x6cf   : > { %19531 = vmatpush3.bf16.msra.mxu0 %v23909_v58  ;;  %8289 = vmatprep.mubr.f32.mxu0 %v24073_v42  ;;  %v20845_v31 = vpop.permute.xlu1 %20844 }
 0x6d0   : > { %v20830_v48 = vpop.permute.xlu0 %20829  ;;  %19534 = vmatprep.subr.msk.bf16.mxu0 %vm21833_vm13, %v19532_v32  ;;  %v20847_v9 = vunpack.i.h.bf16 %v20845_v31  ;;  %v20846_v50 = vunpack.i.l.bf16 %v20845_v31 }
 0x6d1   : > { %v20832_v13 = vunpack.i.h.bf16 %v20830_v48  ;;  %v20831_v24 = vunpack.i.l.bf16 %v20830_v48  ;;  %8121 = vmatmul.mubr.f32.gmra.mrb[204].mxu1 %v24117_v6 }
 0x6d2   : > { %8290 = vmatmul.mubr.f32.gmra.mrb[180].mxu0 %v24090_v61  ;;  %17268 = vmatprep.mubr.msk.f32.mxu1 %vm2616_vm12, %v24478_v34  ;;  %v19586_v56 = vpack.c.bf16 %v20847_v9, %v20846_v50 }
 0x6d3   : > { %19536 = vmatpush3.bf16.msra.mxu0 %v23936_v4  ;;  %8294 = vmatprep.mubr.f32.mxu0 %v24101_v28  ;;  %v24484_v41 = vpack.c.bf16 %v20832_v13, %v20831_v24 }
 0x6d4   : > { %v20840_v58 = vpop.permute.xlu0 %20839 }
 0x6d5   : > { %v20842_v46 = vunpack.i.h.bf16 %v20840_v58  ;;  %v20841_v52 = vunpack.i.l.bf16 %v20840_v58  ;;  %17269 = vmatmul.mubr.msk.f32.vlgmr.msra.gmra.mrb[206].mxu1 %vm2616_vm12, %v23998_v35 }
 0x6d6   : > { %8295 = vmatmul.mubr.f32.gmra.mrb[182].mxu0 %v24117_v6  ;;  %19569 = vmatpush3.bf16.msk.msra.mxu1 %vm21858_vm14, %v24451_v45 }
 0x6d7   : > { %v19537_v60 = vpack.c.bf16 %v20842_v46, %v20841_v52  ;;  %19572 = vmatprep.subr.msk.bf16.mxu1 %vm21858_vm14, %v24484_v41  ;;  %17271 = vmatprep.mubr.msk.f32.mxu1 %vm2616_vm12, %v24013_v57 }
 0x6d8   : > { %8453 = vmatprep.mubr.f32.mxu0 %v24380_v63  ;;  %v20850_v49 = vpop.permute.xlu0 %20849 }
 0x6d9   : > { %19539 = vmatprep.subr.msk.bf16.mxu0 %vm21833_vm13, %v19537_v60  ;;  %17272 = vmatmul.mubr.msk.f32.gmra.mrb[208].mxu1 %vm2616_vm12, %v24040_v19  ;;  %v20852_v62 = vunpack.i.h.bf16 %v20850_v49  ;;  %v20851_v30 = vunpack.i.l.bf16 %v20850_v49 }
 0x6da   : > { %19541 = vmatpush3.bf16.msra.mxu0 %v23947_v25  ;;  %19575 = vmatpush3.bf16.msk.msra.mxu1 %vm21858_vm14, %v24484_v41 }
 0x6db   : > { %19544 = vmatprep.subr.msk.bf16.mxu0 %vm21858_vm14, %v24277_v2  ;;  %19578 = vmatprep.subr.msk.bf16.mxu1 %vm21833_vm13, %v19532_v32 }
 0x6dc   : > { %17282 = vmatprep.mubr.msk.f32.mxu1 %vm2616_vm12, %v24478_v34 }
 0x6dd   : > { %17283 = vmatmul.mubr.msk.f32.vlgmr.msra.gmra.mrb[210].mxu1 %vm2616_vm12, %v23998_v35 }
 0x6de   : > { %19546 = vmatpush3.bf16.msra.mxu0 %v24042_v27  ;;  %19580 = vmatpush3.bf16.msra.mxu1 %v23936_v4 }
 0x6df   : > { %19549 = vmatprep.subr.msk.bf16.mxu0 %vm21858_vm14, %v24310_v11  ;;  %19583 = vmatprep.subr.msk.bf16.mxu1 %vm21833_vm13, %v19537_v60  ;;  %v19591_v11 = vpack.c.bf16 %v20852_v62, %v20851_v30 }
 0x6e0   : > { %v24522_v2 = vpop.permute.xlu1 %7315  ;;  %17285 = vmatprep.mubr.msk.f32.mxu1 %vm2616_vm12, %v24013_v57 }
 0x6e1   : > { %17286 = vmatmul.mubr.msk.f32.gmra.mrb[212].mxu1 %vm2616_vm12, %v24040_v19 }
 0x6e2   : > { %19551 = vmatpush3.bf16.msra.mxu0 %v24105_v5  ;;  %19585 = vmatpush3.bf16.msra.mxu1 %v23947_v25 }
 0x6e3   : > { %19554 = vmatprep.subr.msk.bf16.mxu0 %vm21858_vm14, %v24420_v1  ;;  %19588 = vmatprep.subr.msk.bf16.mxu1 %vm21833_vm13, %v19586_v56 }
 0x6e4   : > { %v20855_v4 = vpop.permute.xlu1 %20854  ;;  %8627 = vmatprep.mubr.f32.mxu1 %v24380_v63  ;;  %v8749_v63 = vld [vmem:[%s27157_s11 + $0x60] sm:$0xff] }
 0x6e5   : > { %v20857_v39 = vunpack.i.h.bf16 %v20855_v4  ;;  %v20856_v54 = vunpack.i.l.bf16 %v20855_v4 }
 0x6e6   : > { %19557 = vmatpush3.bf16.msk.msra.mxu0 %vm21833_vm13, %v24329_v53  ;;  %19590 = vmatpush3.bf16.msra.mxu1 %v24042_v27 }
 0x6e7   : > { %v19618_v25 = vpack.c.bf16 %v20857_v39, %v20856_v54  ;;  %19560 = vmatprep.subr.msk.bf16.mxu0 %vm21858_vm14, %v24434_v23  ;;  %19593 = vmatprep.subr.msk.bf16.mxu1 %vm21833_vm13, %v19591_v11 }
 0x6e9   : > { %v24545_v22 = vpop.permute.xlu0 %7320 }
 0x6ea   : > { %19563 = vmatpush3.bf16.msk.msra.mxu0 %vm21833_vm13, %v24347_v7  ;;  %19595 = vmatpush3.bf16.msra.mxu1 %v24105_v5 }
 0x6eb   : > { %19598 = vmatprep.subr.msk.bf16.mxu1 %vm21858_vm14, %v24420_v1  ;;  %19620 = vmatprep.subr.msk.bf16.mxu0 %vm21858_vm14, %v19618_v25 }
 0x6ed   : > { %v20860_v27 = vpop.permute.xlu0 %20859  ;;  %8454 = vmatmul.mubr.f32.vlgmr.msra.gmra.mrb[184].mxu0 %v24021_v36 }
 0x6ee   : > { %v20862_v53 = vunpack.i.h.bf16 %v20860_v27  ;;  %v20861_v3 = vunpack.i.l.bf16 %v20860_v27  ;;  %19600 = vmatpush3.bf16.msra.mxu1 %v24092_v43  ;;  %19623 = vmatpush3.bf16.msk.msra.mxu0 %vm21858_vm14, %v19618_v25  ;;  %v8737_v43 = vld [vmem:[%s27157_s11] sm:$0xff] }
 0x6ef   : > { %19603 = vmatprep.subr.msk.bf16.mxu1 %vm21858_vm14, %v24434_v23  ;;  %8458 = vmatprep.mubr.f32.mxu0 %v24033_v38 }
 0x6f0   : > { %v19624_v5 = vpack.c.bf16 %v20862_v53, %v20861_v3 }
 0x6f1   : > { %8459 = vmatmul.mubr.f32.gmra.mrb[186].mxu0 %v24058_v14  ;;  %v24686_v9 = vpop.permute.xlu0 %7330 }
 0x6f2   : > { %19605 = vmatpush3.bf16.msra.mxu1 %v24119_v51  ;;  %19626 = vmatprep.subr.msk.bf16.mxu0 %vm21858_vm14, %v19624_v5  ;;  %v8738_v51 = vld [vmem:[%s27157_s11 + $0x8] sm:$0xff] }
 0x6f3   : > { %19608 = vmatprep.subr.msk.bf16.mxu1 %vm21858_vm14, %v24451_v45  ;;  %19629 = vmatpush3.bf16.msk.msra.mxu0 %vm21858_vm14, %v19624_v5  ;;  %v24588_v7 = vpack.c.bf16 %v8738_v51, %v8737_v43 }
 0x6f4   : > { %8463 = vmatprep.mubr.f32.mxu0 %v24073_v42 }
 0x6f5   : > { %8464 = vmatmul.mubr.f32.gmra.mrb[188].mxu0 %v24090_v61 }
 0x6f6   : > { %19611 = vmatpush3.bf16.msk.msra.mxu1 %vm21833_vm13, %v24363_v16  ;;  %8468 = vmatprep.mubr.f32.mxu0 %v24101_v28  ;;  %v8741_v16 = vld [vmem:[%s27157_s11 + $0x20] sm:$0xff] }
 0x6f7   : > { %19614 = vmatprep.subr.msk.bf16.mxu1 %vm21858_vm14, %v24484_v41 }
 0x6f9   : > { %8469 = vmatmul.mubr.f32.gmra.mrb[190].mxu0 %v24117_v6 }
 0x6fa   : > { %19617 = vmatpush3.bf16.msk.msra.mxu1 %vm21833_vm13, %v24383_v26  ;;  %17296 = vmatprep.mubr.msk.f32.mxu0 %vm2616_vm12, %v24478_v34  ;;  %v24682_v34 = vpop.permute.xlu1 %7325 }
 0x6fb   : > { %19631 = vmatprep.subr.bf16.mxu1 %v24588_v7 }
 0x6fd   : > { %8628 = vmatmul.mubr.f32.vlgmr.msra.gmra.mrb[214].mxu1 %v24021_v36  ;;  %17297 = vmatmul.mubr.msk.f32.vlgmr.msra.gmra.mrb[192].mxu0 %vm2616_vm12, %v23998_v35  ;;  %v24619_v36 = vpack.c.bf16 %v8742_v15, %v8741_v16  ;;  %v8743_v35 = vld [vmem:[%s27157_s11 + $0x30] sm:$0xff] }
 0x6fe   : > { %8632 = vmatprep.mubr.f32.mxu1 %v24033_v38  ;;  %17299 = vmatprep.mubr.msk.f32.mxu0 %vm2616_vm12, %v24013_v57  ;;  %v8744_v38 = vld [vmem:[%s27157_s11 + $0x38] sm:$0xff] }
 0x6ff   : > { %19633 = vmatpush3.bf16.msra.mxu1 %v24588_v7  ;;  %v24633_v57 = vpack.c.bf16 %v8744_v38, %v8743_v35 }
 0x700   : > { %19635 = vmatprep.subr.bf16.mxu1 %v24603_v29 }
 0x701   : > { %8633 = vmatmul.mubr.f32.gmra.mrb[216].mxu1 %v24058_v14  ;;  %17300 = vmatmul.mubr.msk.f32.gmra.mrb[194].mxu0 %vm2616_vm12, %v24040_v19  ;;  %v8745_v19 = vld [vmem:[%s27157_s11 + $0x40] sm:$0xff]  ;;  %v8746_v14 = vld [vmem:[%s27157_s11 + $0x48] sm:$0xff] }
 0x702   : > { %8637 = vmatprep.mubr.f32.mxu1 %v24073_v42  ;;  %v24645_v42 = vpack.c.bf16 %v8746_v14, %v8745_v19 }
 0x703   : > { %19637 = vmatpush3.bf16.msra.mxu1 %v24603_v29 }
 0x704   : > { %19639 = vmatprep.subr.bf16.mxu1 %v24619_v36 }
 0x705   : > { %8638 = vmatmul.mubr.f32.gmra.mrb[218].mxu1 %v24090_v61  ;;  %v8747_v61 = vld [vmem:[%s27157_s11 + $0x50] sm:$0xff] }
 0x706   : > { %8642 = vmatprep.mubr.f32.mxu1 %v24101_v28  ;;  %v24656_v28 = vpack.c.bf16 %v8748_v47, %v8747_v61 }
 0x707   : > { %19641 = vmatpush3.bf16.msra.mxu1 %v24619_v36 }
 0x708   : > { %19643 = vmatprep.subr.bf16.mxu1 %v24633_v57 }
 0x709   : > { %8643 = vmatmul.mubr.f32.gmra.mrb[220].mxu1 %v24117_v6  ;;  %v8750_v6 = vld [vmem:[%s27157_s11 + $0x68] sm:$0xff] }
 0x70a   : > { %v24666_v26 = vpack.c.bf16 %v8750_v6, %v8749_v63 }
 0x70b   : > { %19645 = vmatpush3.bf16.msra.mxu1 %v24633_v57 }
 0x70c   : > { %19647 = vmatprep.subr.bf16.mxu1 %v24645_v42 }
 0x70f   : > { %19649 = vmatpush3.bf16.msra.mxu1 %v24645_v42 }
 0x710   : > { %19651 = vmatprep.subr.bf16.mxu1 %v24656_v28 }
 0x713   : > { %19653 = vmatpush3.bf16.msra.mxu1 %v24656_v28 }
 0x714   : > { %19655 = vmatprep.subr.bf16.mxu1 %v24666_v26 }
 0x717   : > { %19657 = vmatpush3.bf16.msra.mxu1 %v24666_v26 }
 0x718   : > { %17330 = vmatprep.subr.mxu1 %v24673_v17 }
 0x71b   : > { %17331 = vmatpush3.msra.mxu1 %v24673_v17 }
 0x71c   : > { %19691 = vmatprep.subr.bf16.mxu1 %v24588_v7 }
 0x724   : > { %v17200_v0 = vpop.f32.mrb[148].mxu0 }
 0x725   : > { %v7496_v20 = vpop.f32.mrb[149].mxu0 }
 0x728   : > { %v16011_v12 = vpop.f32.mrb[174].mxu1 }
 0x729   : > { %v16012_v1 = vpop.f32.mrb[175].mxu1 }
 0x72a   : > { %v16013_v18 = vadd.f32 %v16012_v1, %v16011_v12  ;;  %v17203_v37 = vpop.f32.mrb[150].mxu0 }
 0x72b   : > { %v7506_v23 = vpop.f32.mrb[151].mxu0 }
 0x72c   : > { %v7412_v55 = vadd.f32 %v16013_v18, %v24522_v2  ;;  %v16014_v40 = vpop.f32.mrb[176].mxu1 }
 0x72d   : > { %v16015_v33 = vpop.f32.mrb[177].mxu1 }
 0x72e   : > { %v7497_v45 = vadd.f32 %v7496_v20, %v7412_v55  ;;  %v16016_v8 = vadd.f32 %v16015_v33, %v16014_v40 }
 0x730   : > { %v7515_v44 = vmax.f32 %v7497_v45, 0.0  ;;  %v7417_v10 = vadd.f32 %v16016_v8, %v24545_v22  ;;  %v16017_v32 = vpop.f32.mrb[178].mxu1 }
 0x731   : > { %v16018_v48 = vpop.f32.mrb[179].mxu1 }
 0x732   : > { %v7502_v13 = vadd.f32 %v17200_v0, %v7417_v10  ;;  %v16019_v24 = vadd.f32 %v16018_v48, %v16017_v32  ;;  %17332 = vmatprep.mubr.msk.f32.mxu1 %vm8776_vm15, %v7515_v44 }
 0x734   : > { %v7516_v58 = vmax.f32 %v7502_v13, 0.0  ;;  %v16020_v41 = vpop.f32.mrb[180].mxu1  ;;  %v7422_v46 = vadd.f32 %v16019_v24, %v24682_v34 }
 0x735   : > { %v16021_v52 = vpop.f32.mrb[181].mxu1 }
 0x736   : > { %v16022_v60 = vadd.f32 %v16021_v52, %v16020_v41  ;;  %v7507_v31 = vadd.f32 %v7506_v23, %v7422_v46  ;;  %17333 = vmatmul.mubr.msk.f32.vlgmr.msra.gmra.mrb[222].mxu1 %vm8776_vm15, %v7516_v58 }
 0x737   : > { %19693 = vmatpush3.bf16.msra.mxu1 %v24588_v7 }
 0x738   : > { %v7427_v50 = vadd.f32 %v16022_v60, %v24686_v9  ;;  %v7517_v49 = vmax.f32 %v7507_v31, 0.0  ;;  %19695 = vmatprep.subr.bf16.mxu1 %v24603_v29  ;;  %v17214_v56 = vpop.f32.mrb[182].mxu1  ;;  %v8753_v60 = vld [vmem:[%s27159_s13] sm:$0xff]  ;;  %v8754_v31 = vld [vmem:[%s27159_s13 + $0x8] sm:$0xff] }
 0x739   : > { %v7670_v62 = vpop.f32.mrb[183].mxu1 }
 0x73a   : > { %v7512_v30 = vadd.f32 %v17203_v37, %v7427_v50  ;;  %17335 = vmatprep.mubr.msk.f32.mxu1 %vm8776_vm15, %v7517_v49 }
 0x73b   : > { %19697 = vmatpush3.bf16.msra.mxu1 %v24603_v29 }
 0x73c   : > { %v7518_v4 = vmax.f32 %v7512_v30, 0.0  ;;  %19699 = vmatprep.subr.bf16.mxu1 %v24619_v36  ;;  %v17217_v11 = vpop.f32.mrb[184].mxu1 }
 0x73d   : > { %v7680_v39 = vpop.f32.mrb[185].mxu1 }
 0x73e   : > { %17336 = vmatmul.mubr.msk.f32.gmra.mrb[224].mxu1 %vm8776_vm15, %v7518_v4 }
 0x73f   : > { %19701 = vmatpush3.bf16.msra.mxu1 %v24619_v36 }
 0x740   : > { %19703 = vmatprep.subr.bf16.mxu1 %v24633_v57 }
 0x743   : > { %19705 = vmatpush3.bf16.msra.mxu1 %v24633_v57 }
 0x744   : > { %19707 = vmatprep.subr.bf16.mxu1 %v24645_v42 }
 0x745   : > { %v16063_v54 = vpop.f32.mrb[152].mxu0 }
 0x746   : > { %v16064_v25 = vpop.f32.mrb[153].mxu0 }
 0x747   : > { %v16065_v27 = vadd.f32 %v16064_v25, %v16063_v54  ;;  %19709 = vmatpush3.bf16.msra.mxu1 %v24645_v42  ;;  %v8756_v54 = vld [vmem:[%s27159_s13 + $0x18] sm:$0xff] }
 0x748   : > { %19711 = vmatprep.subr.bf16.mxu1 %v24656_v28 }
 0x749   : > { %v16066_v53 = vpop.f32.mrb[154].mxu0  ;;  %v7586_v3 = vadd.f32 %v16065_v27, %v24522_v2 }
 0x74a   : > { %v16067_v5 = vpop.f32.mrb[155].mxu0 }
 0x74b   : > { %v16068_v43 = vadd.f32 %v16067_v5, %v16066_v53  ;;  %v7671_v51 = vadd.f32 %v7670_v62, %v7586_v3  ;;  %19713 = vmatpush3.bf16.msra.mxu1 %v24656_v28  ;;  %v24740_v62 = vpack.c.bf16 %v8754_v31, %v8753_v60 }
 0x74c   : > { %19715 = vmatprep.subr.bf16.mxu1 %v24666_v26 }
 0x74d   : > { %v7591_v21 = vadd.f32 %v16068_v43, %v24545_v22  ;;  %v7689_v59 = vmax.f32 %v7671_v51, 0.0  ;;  %v16069_v16 = vpop.f32.mrb[156].mxu0  ;;  %19659 = vmatprep.subr.bf16.mxu0 %v24740_v62 }
 0x74e   : > { %v16070_v15 = vpop.f32.mrb[157].mxu0  ;;  %19661 = vmatpush3.bf16.msra.mxu0 %v24740_v62 }
 0x74f   : > { %v7676_v35 = vadd.f32 %v17214_v56, %v7591_v21  ;;  %v16071_v38 = vadd.f32 %v16070_v15, %v16069_v16  ;;  %19717 = vmatpush3.bf16.msra.mxu1 %v24666_v26  ;;  %17406 = vmatprep.mubr.msk.f32.mxu1 %vm8776_vm15, %v7689_v59  ;;  %v8757_v21 = vld [vmem:[%s27159_s13 + $0x20] sm:$0xff]  ;;  %v8758_v59 = vld [vmem:[%s27159_s13 + $0x28] sm:$0xff] }
 0x750   : > { %17404 = vmatprep.subr.mxu1 %v24673_v17 }
 0x751   : > { %v7690_v19 = vmax.f32 %v7676_v35, 0.0  ;;  %v16072_v14 = vpop.f32.mrb[158].mxu0  ;;  %v7596_v61 = vadd.f32 %v16071_v38, %v24682_v34  ;;  %v24768_v38 = vpack.c.bf16 %v8758_v59, %v8757_v21 }
 0x752   : > { %v16073_v47 = vpop.f32.mrb[159].mxu0 }
 0x753   : > { %v16074_v63 = vadd.f32 %v16073_v47, %v16072_v14  ;;  %v7681_v6 = vadd.f32 %v7680_v39, %v7596_v61  ;;  %17405 = vmatpush3.msra.mxu1 %v24673_v17  ;;  %v8755_v39 = vld [vmem:[%s27159_s13 + $0x10] sm:$0xff] }
 0x754   : > { %17407 = vmatmul.mubr.msk.f32.vlgmr.msra.gmra.mrb[226].mxu1 %vm8776_vm15, %v7690_v19  ;;  %19751 = vmatprep.subr.bf16.mxu1 %v24588_v7  ;;  %v24755_v3 = vpack.c.bf16 %v8756_v54, %v8755_v39  ;;  %v8767_v39 = vld [vmem:[%s27159_s13 + $0x70] sm:$0xff]  ;;  %v8768_v54 = vld [vmem:[%s27159_s13 + $0x78] sm:$0xff] }
 0x755   : > { %v7601_v0 = vadd.f32 %v16074_v63, %v24686_v9  ;;  %v7691_v20 = vmax.f32 %v7681_v6, 0.0  ;;  %19753 = vmatpush3.bf16.msra.mxu1 %v24588_v7  ;;  %v8759_v63 = vld [vmem:[%s27159_s13 + $0x30] sm:$0xff]  ;;  %v8760_v6 = vld [vmem:[%s27159_s13 + $0x38] sm:$0xff] }
 0x756   : > { %19755 = vmatprep.subr.bf16.mxu1 %v24603_v29  ;;  %19663 = vmatprep.subr.bf16.mxu0 %v24755_v3 }
 0x757   : > { %v7686_v12 = vadd.f32 %v17217_v11, %v7601_v0  ;;  %17409 = vmatprep.mubr.msk.f32.mxu1 %vm8776_vm15, %v7691_v20  ;;  %v17228_v1 = vpop.f32.mrb[186].mxu1  ;;  %19665 = vmatpush3.bf16.msra.mxu0 %v24755_v3 }
 0x758   : > { %v7844_v37 = vpop.f32.mrb[187].mxu1  ;;  %19667 = vmatprep.subr.bf16.mxu0 %v24768_v38 }
 0x759   : > { %v7692_v18 = vmax.f32 %v7686_v12, 0.0  ;;  %19757 = vmatpush3.bf16.msra.mxu1 %v24603_v29  ;;  %v24784_v12 = vpack.c.bf16 %v8760_v6, %v8759_v63 }
 0x75a   : > { %19759 = vmatprep.subr.bf16.mxu1 %v24619_v36 }
 0x75b   : > { %17410 = vmatmul.mubr.msk.f32.gmra.mrb[228].mxu1 %vm8776_vm15, %v7692_v18  ;;  %v17231_v23 = vpop.f32.mrb[188].mxu1  ;;  %19669 = vmatpush3.bf16.msra.mxu0 %v24768_v38 }
 0x75c   : > { %v7854_v55 = vpop.f32.mrb[189].mxu1  ;;  %19671 = vmatprep.subr.bf16.mxu0 %v24784_v12 }
 0x75d   : > { %19761 = vmatpush3.bf16.msra.mxu1 %v24619_v36 }
 0x75e   : > { %19763 = vmatprep.subr.bf16.mxu1 %v24633_v57 }
 0x75f   : > { %19673 = vmatpush3.bf16.msra.mxu0 %v24784_v12 }
 0x761   : > { %19765 = vmatpush3.bf16.msra.mxu1 %v24633_v57 }
 0x762   : > { %19767 = vmatprep.subr.bf16.mxu1 %v24645_v42 }
 0x765   : > { %v16115_v40 = vpop.f32.mrb[160].mxu0  ;;  %19769 = vmatpush3.bf16.msra.mxu1 %v24645_v42 }
 0x766   : > { %v16116_v33 = vpop.f32.mrb[161].mxu0  ;;  %19771 = vmatprep.subr.bf16.mxu1 %v24656_v28 }
 0x767   : > { %v16117_v45 = vadd.f32 %v16116_v33, %v16115_v40  ;;  %v8761_v33 = vld [vmem:[%s27159_s13 + $0x40] sm:$0xff] }
 0x769   : > { %v16118_v8 = vpop.f32.mrb[162].mxu0  ;;  %19773 = vmatpush3.bf16.msra.mxu1 %v24656_v28  ;;  %v7760_v44 = vadd.f32 %v16117_v45, %v24522_v2  ;;  %v8762_v45 = vld [vmem:[%s27159_s13 + $0x48] sm:$0xff] }
 0x76a   : > { %v16119_v10 = vpop.f32.mrb[163].mxu0  ;;  %19775 = vmatprep.subr.bf16.mxu1 %v24666_v26 }
 0x76b   : > { %v16120_v32 = vadd.f32 %v16119_v10, %v16118_v8  ;;  %v7845_v48 = vadd.f32 %v7844_v37, %v7760_v44  ;;  %v24799_v44 = vpack.c.bf16 %v8762_v45, %v8761_v33 }
 0x76d   : > { %v7765_v13 = vadd.f32 %v16120_v32, %v24545_v22  ;;  %v7863_v24 = vmax.f32 %v7845_v48, 0.0  ;;  %v16121_v58 = vpop.f32.mrb[164].mxu0  ;;  %19777 = vmatpush3.bf16.msra.mxu1 %v24666_v26  ;;  %19675 = vmatprep.subr.bf16.mxu0 %v24799_v44 }
 0x76e   : > { %v16122_v41 = vpop.f32.mrb[165].mxu0  ;;  %17478 = vmatprep.subr.mxu1 %v24673_v17  ;;  %19677 = vmatpush3.bf16.msra.mxu0 %v24799_v44 }
 0x76f   : > { %v7850_v46 = vadd.f32 %v17228_v1, %v7765_v13  ;;  %v16123_v52 = vadd.f32 %v16122_v41, %v16121_v58  ;;  %17480 = vmatprep.mubr.msk.f32.mxu1 %vm8776_vm15, %v7863_v24  ;;  %v8763_v41 = vld [vmem:[%s27159_s13 + $0x50] sm:$0xff] }
 0x771   : > { %v7864_v50 = vmax.f32 %v7850_v46, 0.0  ;;  %v16124_v49 = vpop.f32.mrb[166].mxu0  ;;  %17479 = vmatpush3.msra.mxu1 %v24673_v17  ;;  %v7770_v56 = vadd.f32 %v16123_v52, %v24682_v34  ;;  %v8764_v46 = vld [vmem:[%s27159_s13 + $0x58] sm:$0xff] }
 0x772   : > { %v16125_v30 = vpop.f32.mrb[167].mxu0  ;;  %19811 = vmatprep.subr.bf16.mxu1 %v24588_v7  ;;  %v24817_v60 = vpack.c.bf16 %v8764_v46, %v8763_v41 }
 0x773   : > { %v16126_v4 = vadd.f32 %v16125_v30, %v16124_v49  ;;  %v7855_v11 = vadd.f32 %v7854_v55, %v7770_v56  ;;  %17481 = vmatmul.mubr.msk.f32.vlgmr.msra.gmra.mrb[230].mxu1 %vm8776_vm15, %v7864_v50  ;;  %v8765_v56 = vld [vmem:[%s27159_s13 + $0x60] sm:$0xff]  ;;  %v8766_v30 = vld [vmem:[%s27159_s13 + $0x68] sm:$0xff] }
 0x774   : > { %19813 = vmatpush3.bf16.msra.mxu1 %v24588_v7  ;;  %19679 = vmatprep.subr.bf16.mxu0 %v24817_v60 }
 0x775   : > { %v7775_v25 = vadd.f32 %v16126_v4, %v24686_v9  ;;  %v7865_v27 = vmax.f32 %v7855_v11, 0.0  ;;  %19815 = vmatprep.subr.bf16.mxu1 %v24603_v29  ;;  %v17242_v53 = vpop.f32.mrb[168].mxu0  ;;  %19681 = vmatpush3.bf16.msra.mxu0 %v24817_v60  ;;  %v24830_v4 = vpack.c.bf16 %v8766_v30, %v8765_v56 }
 0x776   : > { %v8018_v5 = vpop.f32.mrb[169].mxu0 }
 0x777   : > { %v7860_v43 = vadd.f32 %v17231_v23, %v7775_v25  ;;  %17483 = vmatprep.mubr.msk.f32.mxu1 %vm8776_vm15, %v7865_v27  ;;  %v16167_v51 = vpop.f32.mrb[190].mxu1  ;;  %19683 = vmatprep.subr.bf16.mxu0 %v24830_v4  ;;  %v24842_v25 = vpack.c.bf16 %v8768_v54, %v8767_v39 }
 0x778   : > { %19817 = vmatpush3.bf16.msra.mxu1 %v24603_v29  ;;  %v16168_v15 = vpop.f32.mrb[191].mxu1 }
 0x779   : > { %v7866_v16 = vmax.f32 %v7860_v43, 0.0  ;;  %19819 = vmatprep.subr.bf16.mxu1 %v24619_v36  ;;  %v17245_v35 = vpop.f32.mrb[170].mxu0  ;;  %v16169_v19 = vadd.f32 %v16168_v15, %v16167_v51  ;;  %19685 = vmatpush3.bf16.msra.mxu0 %v24830_v4 }
 0x77a   : > { %v8028_v14 = vpop.f32.mrb[171].mxu0  ;;  %19687 = vmatprep.subr.bf16.mxu0 %v24842_v25 }
 0x77b   : > { %17484 = vmatmul.mubr.msk.f32.gmra.mrb[232].mxu1 %vm8776_vm15, %v7866_v16  ;;  %v16170_v61 = vpop.f32.mrb[192].mxu1  ;;  %v7934_v47 = vadd.f32 %v16169_v19, %v24522_v2 }
 0x77c   : > { %19821 = vmatpush3.bf16.msra.mxu1 %v24619_v36  ;;  %v16171_v0 = vpop.f32.mrb[193].mxu1 }
 0x77d   : > { %19823 = vmatprep.subr.bf16.mxu1 %v24633_v57  ;;  %v24782_v20 = vpop.f32.mrb[172].mxu0  ;;  %v16172_v1 = vadd.f32 %v16171_v0, %v16170_v61  ;;  %v8019_v18 = vadd.f32 %v8018_v5, %v7934_v47  ;;  %19689 = vmatpush3.bf16.msra.mxu0 %v24842_v25 }
 0x77e   : > { %v24786_v37 = vpop.f32.mrb[173].mxu0  ;;  %19719 = vmatprep.subr.bf16.mxu0 %v24740_v62 }
 0x77f   : > { %v7939_v23 = vadd.f32 %v16172_v1, %v24545_v22  ;;  %v8037_v55 = vmax.f32 %v8019_v18, 0.0  ;;  %v16173_v40 = vpop.f32.mrb[194].mxu1 }
 0x780   : > { %19825 = vmatpush3.bf16.msra.mxu1 %v24633_v57  ;;  %v16174_v8 = vpop.f32.mrb[195].mxu1 }
 0x781   : > { %19827 = vmatprep.subr.bf16.mxu1 %v24645_v42  ;;  %v8024_v10 = vadd.f32 %v17242_v53, %v7939_v23  ;;  %v16175_v32 = vadd.f32 %v16174_v8, %v16173_v40  ;;  %17554 = vmatprep.mubr.msk.f32.mxu1 %vm8776_vm15, %v8037_v55  ;;  %v24802_v48 = vpop.f32.mrb[174].mxu0 }
 0x782   : > { %v24807_v58 = vpop.f32.mrb[175].mxu0 }
 0x783   : > { %v16176_v13 = vpop.f32.mrb[196].mxu1  ;;  %v7944_v24 = vadd.f32 %v16175_v32, %v24682_v34  ;;  %v8038_v27 = vmax.f32 %v8024_v10, 0.0 }
 0x784   : > { %19829 = vmatpush3.bf16.msra.mxu1 %v24645_v42  ;;  %v16177_v52 = vpop.f32.mrb[197].mxu1 }
 0x785   : > { %19831 = vmatprep.subr.bf16.mxu1 %v24656_v28  ;;  %v16178_v31 = vadd.f32 %v16177_v52, %v16176_v13  ;;  %v8029_v50 = vadd.f32 %v8028_v14, %v7944_v24 }
 0x787   : > { %v7949_v49 = vadd.f32 %v16178_v31, %v24686_v9  ;;  %v8039_v53 = vmax.f32 %v8029_v50, 0.0 }
 0x788   : > { %19833 = vmatpush3.bf16.msra.mxu1 %v24656_v28 }
 0x789   : > { %19835 = vmatprep.subr.bf16.mxu1 %v24666_v26  ;;  %v8034_v11 = vadd.f32 %v17245_v35, %v7949_v49 }
 0x78b   : > { %v8040_v5 = vmax.f32 %v8034_v11, 0.0 }
 0x78c   : > { %19837 = vmatpush3.bf16.msra.mxu1 %v24666_v26 }
 0x78d   : > { %17552 = vmatprep.subr.mxu1 %v24673_v17 }
 0x790   : > { %17553 = vmatpush3.msra.mxu1 %v24673_v17 }
 0x791   : > { %17555 = vmatmul.mubr.msk.f32.vlgmr.msra.gmra.mrb[234].mxu1 %vm8776_vm15, %v8038_v27  ;;  %19871 = vmatprep.subr.bf16.mxu1 %v24588_v7 }
 0x792   : > { %17557 = vmatprep.mubr.msk.f32.mxu1 %vm8776_vm15, %v8039_v53  ;;  %19873 = vmatpush3.bf16.msra.mxu1 %v24588_v7 }
 0x793   : > { %19875 = vmatprep.subr.bf16.mxu1 %v24603_v29 }
 0x795   : > { %17558 = vmatmul.mubr.msk.f32.gmra.mrb[236].mxu1 %vm8776_vm15, %v8040_v5 }
 0x796   : > { %19877 = vmatpush3.bf16.msra.mxu1 %v24603_v29 }
 0x797   : > { %19879 = vmatprep.subr.bf16.mxu1 %v24619_v36  ;;  %v16219_v43 = vpop.f32.mrb[198].mxu1 }
 0x798   : > { %v16220_v51 = vpop.f32.mrb[199].mxu1 }
 0x799   : > { %v16221_v21 = vadd.f32 %v16220_v51, %v16219_v43 }
 0x79a   : > { %19881 = vmatpush3.bf16.msra.mxu1 %v24619_v36 }
 0x79b   : > { %19883 = vmatprep.subr.bf16.mxu1 %v24633_v57  ;;  %v8108_v59 = vadd.f32 %v16221_v21, %v24522_v2  ;;  %v16222_v16 = vpop.f32.mrb[200].mxu1 }
 0x79c   : > { %v16223_v35 = vpop.f32.mrb[201].mxu1 }
 0x79d   : > { %v16271_v15 = vpop.f32.mrb[176].mxu0  ;;  %v8193_v19 = vadd.f32 %v24786_v37, %v8108_v59  ;;  %v16224_v14 = vadd.f32 %v16223_v35, %v16222_v16 }
 0x79e   : > { %v16272_v61 = vpop.f32.mrb[177].mxu0  ;;  %19885 = vmatpush3.bf16.msra.mxu1 %v24633_v57 }
 0x79f   : > { %v16273_v47 = vadd.f32 %v16272_v61, %v16271_v15  ;;  %19887 = vmatprep.subr.bf16.mxu1 %v24645_v42  ;;  %v8211_v63 = vmax.f32 %v8193_v19, 0.0  ;;  %v8113_v6 = vadd.f32 %v16224_v14, %v24545_v22 }
 0x7a0   : > { %v16225_v0 = vpop.f32.mrb[202].mxu1 }
 0x7a1   : > { %v16274_v1 = vpop.f32.mrb[178].mxu0  ;;  %v16226_v18 = vpop.f32.mrb[203].mxu1  ;;  %v8198_v23 = vadd.f32 %v24782_v20, %v8113_v6  ;;  %17628 = vmatprep.mubr.msk.f32.mxu1 %vm8776_vm15, %v8211_v63  ;;  %v8282_v31 = vadd.f32 %v16273_v47, %v24522_v2 }
 0x7a2   : > { %v16227_v55 = vadd.f32 %v16226_v18, %v16225_v0  ;;  %v16275_v40 = vpop.f32.mrb[179].mxu0  ;;  %19889 = vmatpush3.bf16.msra.mxu1 %v24645_v42 }
 0x7a3   : > { %v16276_v37 = vadd.f32 %v16275_v40, %v16274_v1  ;;  %19891 = vmatprep.subr.bf16.mxu1 %v24656_v28  ;;  %v8212_v53 = vmax.f32 %v8198_v23, 0.0 }
 0x7a4   : > { %v8118_v33 = vadd.f32 %v16227_v55, %v24682_v34  ;;  %v16228_v45 = vpop.f32.mrb[204].mxu1 }
 0x7a5   : > { %v16277_v8 = vpop.f32.mrb[180].mxu0  ;;  %v16229_v10 = vpop.f32.mrb[205].mxu1  ;;  %v8287_v41 = vadd.f32 %v16276_v37, %v24545_v22 }
 0x7a6   : > { %v8203_v32 = vadd.f32 %v24807_v58, %v8118_v33  ;;  %v16230_v13 = vadd.f32 %v16229_v10, %v16228_v45  ;;  %v16278_v24 = vpop.f32.mrb[181].mxu0  ;;  %19893 = vmatpush3.bf16.msra.mxu1 %v24656_v28 }
 0x7a7   : > { %v16279_v20 = vadd.f32 %v16278_v24, %v16277_v8  ;;  %19895 = vmatprep.subr.bf16.mxu1 %v24666_v26 }
 0x7a8   : > { %v8123_v46 = vadd.f32 %v16230_v13, %v24686_v9  ;;  %v17270_v52 = vpop.f32.mrb[206].mxu1  ;;  %v8213_v51 = vmax.f32 %v8203_v32, 0.0 }
 0x7a9   : > { %v16280_v50 = vpop.f32.mrb[182].mxu0  ;;  %v8372_v49 = vadd.f32 %v17270_v52, %v8287_v41  ;;  %v8366_v56 = vpop.f32.mrb[207].mxu1  ;;  %v8292_v27 = vadd.f32 %v16279_v20, %v24682_v34 }
 0x7aa   : > { %v8208_v30 = vadd.f32 %v24802_v48, %v8123_v46  ;;  %v16281_v58 = vpop.f32.mrb[183].mxu0  ;;  %v8367_v11 = vadd.f32 %v8366_v56, %v8282_v31  ;;  %19897 = vmatpush3.bf16.msra.mxu1 %v24666_v26 }
 0x7ab   : > { %v16282_v39 = vadd.f32 %v16281_v58, %v16280_v50  ;;  %17626 = vmatprep.subr.mxu1 %v24673_v17  ;;  %v8386_v8 = vmax.f32 %v8372_v49, 0.0 }
 0x7ac   : > { %v17273_v54 = vpop.f32.mrb[208].mxu1  ;;  %v8214_v16 = vmax.f32 %v8208_v30, 0.0  ;;  %v8385_v35 = vmax.f32 %v8367_v11, 0.0 }
 0x7ad   : > { %v8297_v5 = vadd.f32 %v16282_v39, %v24686_v9  ;;  %v8376_v43 = vpop.f32.mrb[209].mxu1 }
 0x7ae   : > { %v8377_v21 = vadd.f32 %v8376_v43, %v8292_v27  ;;  %17627 = vmatpush3.msra.mxu1 %v24673_v17 }
 0x7af   : > { %v8382_v59 = vadd.f32 %v17273_v54, %v8297_v5  ;;  %17629 = vmatmul.mubr.msk.f32.vlgmr.msra.gmra.mrb[238].mxu1 %vm8776_vm15, %v8212_v53  ;;  %19931 = vmatprep.subr.bf16.mxu1 %v24588_v7 }
 0x7b0   : > { %17631 = vmatprep.mubr.msk.f32.mxu1 %vm8776_vm15, %v8213_v51  ;;  %19933 = vmatpush3.bf16.msra.mxu1 %v24588_v7  ;;  %v17284_v48 = vpop.f32.mrb[210].mxu1  ;;  %v8387_v10 = vmax.f32 %v8377_v21, 0.0 }
 0x7b1   : > { %19935 = vmatprep.subr.bf16.mxu1 %v24603_v29  ;;  %v8540_v15 = vpop.f32.mrb[211].mxu1  ;;  %v8388_v46 = vmax.f32 %v8382_v59, 0.0 }
 0x7b3   : > { %17632 = vmatmul.mubr.msk.f32.gmra.mrb[240].mxu1 %vm8776_vm15, %v8214_v16 }
 0x7b4   : > { %19937 = vmatpush3.bf16.msra.mxu1 %v24603_v29  ;;  %17702 = vmatprep.mubr.msk.f32.mxu1 %vm8776_vm15, %v8385_v35  ;;  %v17287_v19 = vpop.f32.mrb[212].mxu1 }
 0x7b5   : > { %19939 = vmatprep.subr.bf16.mxu1 %v24619_v36  ;;  %v8550_v14 = vpop.f32.mrb[213].mxu1 }
 0x7b8   : > { %19941 = vmatpush3.bf16.msra.mxu1 %v24619_v36 }
 0x7b9   : > { %19943 = vmatprep.subr.bf16.mxu1 %v24633_v57 }
 0x7bc   : > { %19945 = vmatpush3.bf16.msra.mxu1 %v24633_v57 }
 0x7bd   : > { %19947 = vmatprep.subr.bf16.mxu1 %v24645_v42 }
 0x7c0   : > { %v16323_v61 = vpop.f32.mrb[184].mxu0  ;;  %19949 = vmatpush3.bf16.msra.mxu1 %v24645_v42 }
 0x7c1   : > { %v16324_v47 = vpop.f32.mrb[185].mxu0  ;;  %19951 = vmatprep.subr.bf16.mxu1 %v24656_v28 }
 0x7c2   : > { %v16325_v63 = vadd.f32 %v16324_v47, %v16323_v61 }
 0x7c4   : > { %v16326_v6 = vpop.f32.mrb[186].mxu0  ;;  %19953 = vmatpush3.bf16.msra.mxu1 %v24656_v28  ;;  %v8456_v0 = vadd.f32 %v16325_v63, %v24522_v2 }
 0x7c5   : > { %v16327_v1 = vpop.f32.mrb[187].mxu0  ;;  %19955 = vmatprep.subr.bf16.mxu1 %v24666_v26 }
 0x7c6   : > { %v16328_v18 = vadd.f32 %v16327_v1, %v16326_v6  ;;  %v8541_v23 = vadd.f32 %v8540_v15, %v8456_v0 }
 0x7c8   : > { %v8461_v55 = vadd.f32 %v16328_v18, %v24545_v22  ;;  %v16329_v40 = vpop.f32.mrb[188].mxu0  ;;  %19957 = vmatpush3.bf16.msra.mxu1 %v24666_v26  ;;  %v8559_v52 = vmax.f32 %v8541_v23, 0.0 }
 0x7c9   : > { %v16330_v37 = vpop.f32.mrb[189].mxu0  ;;  %17700 = vmatprep.subr.mxu1 %v24673_v17 }
 0x7ca   : > { %v8546_v33 = vadd.f32 %v17284_v48, %v8461_v55  ;;  %v16331_v45 = vadd.f32 %v16330_v37, %v16329_v40 }
 0x7cc   : > { %v16332_v32 = vpop.f32.mrb[190].mxu0  ;;  %17701 = vmatpush3.msra.mxu1 %v24673_v17  ;;  %v8466_v13 = vadd.f32 %v16331_v45, %v24682_v34  ;;  %v8560_v63 = vmax.f32 %v8546_v33, 0.0 }
 0x7cd   : > { %v16333_v24 = vpop.f32.mrb[191].mxu0  ;;  %17703 = vmatmul.mubr.msk.f32.vlgmr.msra.gmra.mrb[242].mxu1 %vm8776_vm15, %v8386_v8  ;;  %19991 = vmatprep.subr.bf16.mxu1 %v24588_v7 }
 0x7ce   : > { %v16334_v20 = vadd.f32 %v16333_v24, %v16332_v32  ;;  %v8551_v41 = vadd.f32 %v8550_v14, %v8466_v13  ;;  %17705 = vmatprep.mubr.msk.f32.mxu1 %vm8776_vm15, %v8387_v10  ;;  %19993 = vmatpush3.bf16.msra.mxu1 %v24588_v7 }
 0x7cf   : > { %19995 = vmatprep.subr.bf16.mxu1 %v24603_v29 }
 0x7d0   : > { %v8471_v31 = vadd.f32 %v16334_v20, %v24686_v9  ;;  %v16375_v50 = vpop.f32.mrb[214].mxu1  ;;  %v17298_v49 = vpop.f32.mrb[192].mxu0 }
 0x7d1   : > { %v16376_v56 = vpop.f32.mrb[215].mxu1  ;;  %17706 = vmatmul.mubr.msk.f32.gmra.mrb[244].mxu1 %vm8776_vm15, %v8388_v46  ;;  %v8714_v30 = vpop.f32.mrb[193].mxu0 }
 0x7d2   : > { %v8556_v58 = vadd.f32 %v17287_v19, %v8471_v31  ;;  %v16377_v11 = vadd.f32 %v16376_v56, %v16375_v50  ;;  %19997 = vmatpush3.bf16.msra.mxu1 %v24603_v29  ;;  %17776 = vmatprep.mubr.msk.f32.mxu1 %vm8776_vm15, %v8559_v52 }
 0x7d3   : > { %19999 = vmatprep.subr.bf16.mxu1 %v24619_v36 }
 0x7d4   : > { %v16378_v39 = vpop.f32.mrb[216].mxu1  ;;  %v8630_v54 = vadd.f32 %v16377_v11, %v24522_v2  ;;  %v17301_v27 = vpop.f32.mrb[194].mxu0 }
 0x7d5   : > { %v16379_v53 = vpop.f32.mrb[217].mxu1  ;;  %v8724_v5 = vpop.f32.mrb[195].mxu0 }
 0x7d6   : > { %v16380_v43 = vadd.f32 %v16379_v53, %v16378_v39  ;;  %v8715_v51 = vadd.f32 %v8714_v30, %v8630_v54  ;;  %20001 = vmatpush3.bf16.msra.mxu1 %v24619_v36 }
 0x7d7   : > { %20003 = vmatprep.subr.bf16.mxu1 %v24633_v57 }
 0x7d8   : > { %v8635_v21 = vadd.f32 %v16380_v43, %v24545_v22  ;;  %v16381_v59 = vpop.f32.mrb[218].mxu1  ;;  %v8733_v6 = vmax.f32 %v8715_v51, 0.0 }
 0x7d9   : > { %v16382_v48 = vpop.f32.mrb[219].mxu1 }
 0x7da   : > { %v8720_v16 = vadd.f32 %v17298_v49, %v8635_v21  ;;  %v16383_v15 = vadd.f32 %v16382_v48, %v16381_v59  ;;  %20005 = vmatpush3.bf16.msra.mxu1 %v24633_v57 }
 0x7db   : > { %20007 = vmatprep.subr.bf16.mxu1 %v24645_v42 }
 0x7dc   : > { %v16384_v2 = vpop.f32.mrb[220].mxu1  ;;  %v8640_v35 = vadd.f32 %v16383_v15, %v24682_v34  ;;  %v8561_v34 = vmax.f32 %v8551_v41, 0.0 }
 0x7dd   : > { %v16385_v19 = vpop.f32.mrb[221].mxu1 }
 0x7de   : > { %v16386_v14 = vadd.f32 %v16385_v19, %v16384_v2  ;;  %v8725_v61 = vadd.f32 %v8724_v5, %v8640_v35  ;;  %20009 = vmatpush3.bf16.msra.mxu1 %v24645_v42 }
 0x7df   : > { %20011 = vmatprep.subr.bf16.mxu1 %v24656_v28 }
 0x7e0   : > { %v8645_v22 = vadd.f32 %v16386_v14, %v24686_v9  ;;  %v8562_v9 = vmax.f32 %v8556_v58, 0.0 }
 0x7e2   : > { %v8730_v47 = vadd.f32 %v17301_v27, %v8645_v22  ;;  %20013 = vmatpush3.bf16.msra.mxu1 %v24656_v28 }
 0x7e3   : > { %20015 = vmatprep.subr.bf16.mxu1 %v24666_v26 }
 0x7e6   : > { %20017 = vmatpush3.bf16.msra.mxu1 %v24666_v26 }
 0x7e7   : > { %17774 = vmatprep.subr.mxu1 %v24673_v17 }
 0x7ea   : > { %17775 = vmatpush3.msra.mxu1 %v24673_v17 }
 0x7eb   : > { %17777 = vmatmul.mubr.msk.f32.vlgmr.msra.gmra.mrb[246].mxu1 %vm8776_vm15, %v8560_v63  ;;  %20051 = vmatprep.subr.bf16.mxu1 %v24588_v7 }
 0x7ec   : > { %17779 = vmatprep.mubr.msk.f32.mxu1 %vm8776_vm15, %v8561_v34  ;;  %20053 = vmatpush3.bf16.msra.mxu1 %v24588_v7  ;;  %v8734_v7 = vmax.f32 %v8720_v16, 0.0 }
 0x7ed   : > { %20055 = vmatprep.subr.bf16.mxu1 %v24603_v29 }
 0x7ef   : > { %17780 = vmatmul.mubr.msk.f32.gmra.mrb[248].mxu1 %vm8776_vm15, %v8562_v9 }
 0x7f0   : > { %20057 = vmatpush3.bf16.msra.mxu1 %v24603_v29  ;;  %17850 = vmatprep.mubr.msk.f32.mxu1 %vm8776_vm15, %v8733_v6  ;;  %v24950_v29 = vld [vmem:[%s27158_s12] ss:$0 sm:$0xff] }
 0x7f1   : > { %20059 = vmatprep.subr.bf16.mxu1 %v24619_v36 }
 0x7f4   : > { %20061 = vmatpush3.bf16.msra.mxu1 %v24619_v36  ;;  %v8735_v36 = vmax.f32 %v8725_v61, 0.0 }
 0x7f5   : > { %20063 = vmatprep.subr.bf16.mxu1 %v24633_v57 }
 0x7f8   : > { %20065 = vmatpush3.bf16.msra.mxu1 %v24633_v57 }
 0x7f9   : > { %20067 = vmatprep.subr.bf16.mxu1 %v24645_v42 }
 0x7fc   : > { %20069 = vmatpush3.bf16.msra.mxu1 %v24645_v42 }
 0x7fd   : > { %20071 = vmatprep.subr.bf16.mxu1 %v24656_v28 }
 0x800   : > { %20073 = vmatpush3.bf16.msra.mxu1 %v24656_v28 }
 0x801   : > { %20075 = vmatprep.subr.bf16.mxu1 %v24666_v26 }
 0x804   : > { %20077 = vmatpush3.bf16.msra.mxu1 %v24666_v26  ;;  %v8736_v26 = vmax.f32 %v8730_v47, 0.0 }
 0x805   : > { %17848 = vmatprep.subr.mxu1 %v24673_v17 }
 0x808   : > { %17849 = vmatpush3.msra.mxu1 %v24673_v17 }
 0x809   : > { %17851 = vmatmul.mubr.msk.f32.vlgmr.msra.gmra.mrb[250].mxu1 %vm8776_vm15, %v8734_v7  ;;  %v17334_v57 = vpop.f32.mrb[222].mxu1 }
 0x80a   : > { %17853 = vmatprep.mubr.msk.f32.mxu1 %vm8776_vm15, %v8735_v36  ;;  %v8861_v42 = vadd.f32 %v17334_v57, %v24950_v29  ;;  %v8855_v28 = vpop.f32.mrb[223].mxu1 }
 0x80b   : > { %v8856_v0 = vadd.f32 %v24950_v29, %v8855_v28 }
 0x80c   : > { %v8875_v18 = vmax.f32 %v8861_v42, 0.0 }
 0x80d   : > { %v8874_v1 = vmax.f32 %v8856_v0, 0.0  ;;  %17854 = vmatmul.mubr.msk.f32.gmra.mrb[252].mxu1 %vm8776_vm15, %v8736_v26 }
 0x80f   : > { %17370 = vmatprep.mubr.f32.mxu0 %v8874_v1 }
 0x810   : > { %17371 = vmatmul.mubr.f32.vlgmr.msra.gmra.mrb[196].mxu0 %v8875_v18 }
 0x811   : > { %19721 = vmatpush3.bf16.msra.mxu0 %v24740_v62  ;;  %v17337_v17 = vpop.f32.mrb[224].mxu1 }
 0x812   : > { %v8871_v23 = vadd.f32 %v17337_v17, %v24950_v29  ;;  %v8865_v55 = vpop.f32.mrb[225].mxu1  ;;  %19723 = vmatprep.subr.bf16.mxu0 %v24755_v3 }
 0x813   : > { %v8866_v40 = vadd.f32 %v24950_v29, %v8865_v55 }
 0x814   : > { %v8877_v33 = vmax.f32 %v8871_v23, 0.0 }
 0x815   : > { %v8876_v37 = vmax.f32 %v8866_v40, 0.0  ;;  %19725 = vmatpush3.bf16.msra.mxu0 %v24755_v3 }
 0x816   : > { %19727 = vmatprep.subr.bf16.mxu0 %v24768_v38 }
 0x817   : > { %17373 = vmatprep.mubr.f32.mxu0 %v8876_v37 }
 0x818   : > { %17374 = vmatmul.mubr.f32.gmra.mrb[198].mxu0 %v8877_v33 }
 0x819   : > { %19729 = vmatpush3.bf16.msra.mxu0 %v24768_v38 }
 0x81a   : > { %19731 = vmatprep.subr.bf16.mxu0 %v24784_v12 }
 0x81d   : > { %19733 = vmatpush3.bf16.msra.mxu0 %v24784_v12 }
 0x81e   : > { %19735 = vmatprep.subr.bf16.mxu0 %v24799_v44 }
 0x821   : > { %19737 = vmatpush3.bf16.msra.mxu0 %v24799_v44 }
 0x822   : > { %19739 = vmatprep.subr.bf16.mxu0 %v24817_v60 }
 0x825   : > { %19741 = vmatpush3.bf16.msra.mxu0 %v24817_v60 }
 0x826   : > { %19743 = vmatprep.subr.bf16.mxu0 %v24830_v4 }
 0x827   : > { %v17408_v45 = vpop.f32.mrb[226].mxu1 }
 0x828   : > { %v9100_v8 = vpop.f32.mrb[227].mxu1  ;;  %v9106_v32 = vadd.f32 %v17408_v45, %v24950_v29 }
 0x829   : > { %v9101_v10 = vadd.f32 %v24950_v29, %v9100_v8  ;;  %19745 = vmatpush3.bf16.msra.mxu0 %v24830_v4 }
 0x82a   : > { %19747 = vmatprep.subr.bf16.mxu0 %v24842_v25  ;;  %v9120_v24 = vmax.f32 %v9106_v32, 0.0 }
 0x82b   : > { %v9119_v13 = vmax.f32 %v9101_v10, 0.0 }
 0x82d   : > { %19749 = vmatpush3.bf16.msra.mxu0 %v24842_v25  ;;  %17444 = vmatprep.mubr.f32.mxu0 %v9119_v13 }
 0x82e   : > { %v17411_v20 = vpop.f32.mrb[228].mxu1  ;;  %19779 = vmatprep.subr.bf16.mxu0 %v24740_v62 }
 0x82f   : > { %v9116_v41 = vadd.f32 %v17411_v20, %v24950_v29  ;;  %v9110_v46 = vpop.f32.mrb[229].mxu1 }
 0x830   : > { %v9111_v52 = vadd.f32 %v24950_v29, %v9110_v46  ;;  %17445 = vmatmul.mubr.f32.vlgmr.msra.gmra.mrb[200].mxu0 %v9120_v24 }
 0x831   : > { %19781 = vmatpush3.bf16.msra.mxu0 %v24740_v62  ;;  %v9122_v50 = vmax.f32 %v9116_v41, 0.0 }
 0x832   : > { %v9121_v31 = vmax.f32 %v9111_v52, 0.0  ;;  %19783 = vmatprep.subr.bf16.mxu0 %v24755_v3 }
 0x834   : > { %17447 = vmatprep.mubr.f32.mxu0 %v9121_v31 }
 0x835   : > { %17448 = vmatmul.mubr.f32.gmra.mrb[202].mxu0 %v9122_v50 }
 0x836   : > { %19785 = vmatpush3.bf16.msra.mxu0 %v24755_v3 }
 0x837   : > { %19787 = vmatprep.subr.bf16.mxu0 %v24768_v38 }
 0x83a   : > { %19789 = vmatpush3.bf16.msra.mxu0 %v24768_v38 }
 0x83b   : > { %19791 = vmatprep.subr.bf16.mxu0 %v24784_v12 }
 0x83e   : > { %19793 = vmatpush3.bf16.msra.mxu0 %v24784_v12 }
 0x83f   : > { %19795 = vmatprep.subr.bf16.mxu0 %v24799_v44 }
 0x842   : > { %19797 = vmatpush3.bf16.msra.mxu0 %v24799_v44 }
 0x843   : > { %19799 = vmatprep.subr.bf16.mxu0 %v24817_v60 }
 0x846   : > { %19801 = vmatpush3.bf16.msra.mxu0 %v24817_v60  ;;  %v17482_v49 = vpop.f32.mrb[230].mxu1 }
 0x847   : > { %v9338_v56 = vpop.f32.mrb[231].mxu1  ;;  %19803 = vmatprep.subr.bf16.mxu0 %v24830_v4  ;;  %v9344_v11 = vadd.f32 %v17482_v49, %v24950_v29 }
 0x848   : > { %v9339_v30 = vadd.f32 %v24950_v29, %v9338_v56 }
 0x849   : > { %v9358_v54 = vmax.f32 %v9344_v11, 0.0 }
 0x84a   : > { %v9357_v58 = vmax.f32 %v9339_v30, 0.0  ;;  %19805 = vmatpush3.bf16.msra.mxu0 %v24830_v4 }
 0x84b   : > { %19807 = vmatprep.subr.bf16.mxu0 %v24842_v25 }
 0x84c   : > { %17518 = vmatprep.mubr.f32.mxu0 %v9357_v58 }
 0x84e   : > { %19809 = vmatpush3.bf16.msra.mxu0 %v24842_v25  ;;  %v17485_v39 = vpop.f32.mrb[232].mxu1 }
 0x84f   : > { %v9354_v27 = vadd.f32 %v17485_v39, %v24950_v29  ;;  %v9348_v53 = vpop.f32.mrb[233].mxu1  ;;  %19839 = vmatprep.subr.bf16.mxu0 %v24740_v62 }
 0x850   : > { %v9349_v5 = vadd.f32 %v24950_v29, %v9348_v53 }
 0x851   : > { %17519 = vmatmul.mubr.f32.vlgmr.msra.gmra.mrb[204].mxu0 %v9358_v54  ;;  %v9360_v51 = vmax.f32 %v9354_v27, 0.0 }
 0x852   : > { %v9359_v43 = vmax.f32 %v9349_v5, 0.0  ;;  %19841 = vmatpush3.bf16.msra.mxu0 %v24740_v62 }
 0x853   : > { %19843 = vmatprep.subr.bf16.mxu0 %v24755_v3 }
 0x854   : > { %17521 = vmatprep.mubr.f32.mxu0 %v9359_v43 }
 0x855   : > { %17522 = vmatmul.mubr.f32.gmra.mrb[206].mxu0 %v9360_v51 }
 0x856   : > { %19845 = vmatpush3.bf16.msra.mxu0 %v24755_v3 }
 0x857   : > { %19847 = vmatprep.subr.bf16.mxu0 %v24768_v38 }
 0x85a   : > { %19849 = vmatpush3.bf16.msra.mxu0 %v24768_v38 }
 0x85b   : > { %19851 = vmatprep.subr.bf16.mxu0 %v24784_v12 }
 0x85e   : > { %19853 = vmatpush3.bf16.msra.mxu0 %v24784_v12 }
 0x85f   : > { %19855 = vmatprep.subr.bf16.mxu0 %v24799_v44 }
 0x862   : > { %19857 = vmatpush3.bf16.msra.mxu0 %v24799_v44 }
 0x863   : > { %19859 = vmatprep.subr.bf16.mxu0 %v24817_v60 }
 0x864   : > { %v17556_v21 = vpop.f32.mrb[234].mxu1 }
 0x865   : > { %v9576_v59 = vpop.f32.mrb[235].mxu1  ;;  %v9582_v35 = vadd.f32 %v17556_v21, %v24950_v29 }
 0x866   : > { %v9577_v48 = vadd.f32 %v24950_v29, %v9576_v59  ;;  %19861 = vmatpush3.bf16.msra.mxu0 %v24817_v60 }
 0x867   : > { %19863 = vmatprep.subr.bf16.mxu0 %v24830_v4  ;;  %v9596_v14 = vmax.f32 %v9582_v35, 0.0 }
 0x868   : > { %v9595_v16 = vmax.f32 %v9577_v48, 0.0  ;;  %v17559_v15 = vpop.f32.mrb[236].mxu1 }
 0x869   : > { %v9586_v2 = vpop.f32.mrb[237].mxu1  ;;  %v9592_v61 = vadd.f32 %v17559_v15, %v24950_v29 }
 0x86a   : > { %19865 = vmatpush3.bf16.msra.mxu0 %v24830_v4  ;;  %17592 = vmatprep.mubr.f32.mxu0 %v9595_v16  ;;  %v9587_v19 = vadd.f32 %v24950_v29, %v9586_v2 }
 0x86b   : > { %19867 = vmatprep.subr.bf16.mxu0 %v24842_v25  ;;  %v9598_v47 = vmax.f32 %v9592_v61, 0.0 }
 0x86c   : > { %v9597_v22 = vmax.f32 %v9587_v19, 0.0 }
 0x86e   : > { %19869 = vmatpush3.bf16.msra.mxu0 %v24842_v25 }
 0x86f   : > { %19899 = vmatprep.subr.bf16.mxu0 %v24740_v62 }
 0x871   : > { %17593 = vmatmul.mubr.f32.vlgmr.msra.gmra.mrb[208].mxu0 %v9596_v14 }
 0x872   : > { %17595 = vmatprep.mubr.f32.mxu0 %v9597_v22  ;;  %19901 = vmatpush3.bf16.msra.mxu0 %v24740_v62 }
 0x873   : > { %19903 = vmatprep.subr.bf16.mxu0 %v24755_v3 }
 0x875   : > { %17596 = vmatmul.mubr.f32.gmra.mrb[210].mxu0 %v9598_v47 }
 0x876   : > { %19905 = vmatpush3.bf16.msra.mxu0 %v24755_v3 }
 0x877   : > { %19907 = vmatprep.subr.bf16.mxu0 %v24768_v38 }
 0x87a   : > { %19909 = vmatpush3.bf16.msra.mxu0 %v24768_v38 }
 0x87b   : > { %19911 = vmatprep.subr.bf16.mxu0 %v24784_v12 }
 0x87e   : > { %19913 = vmatpush3.bf16.msra.mxu0 %v24784_v12 }
 0x87f   : > { %19915 = vmatprep.subr.bf16.mxu0 %v24799_v44 }
 0x882   : > { %v17630_v63 = vpop.f32.mrb[238].mxu1  ;;  %19917 = vmatpush3.bf16.msra.mxu0 %v24799_v44 }
 0x883   : > { %v9814_v34 = vpop.f32.mrb[239].mxu1  ;;  %19919 = vmatprep.subr.bf16.mxu0 %v24817_v60  ;;  %v9820_v57 = vadd.f32 %v17630_v63, %v24950_v29 }
 0x884   : > { %v9815_v9 = vadd.f32 %v24950_v29, %v9814_v34 }
 0x885   : > { %v9834_v28 = vmax.f32 %v9820_v57, 0.0 }
 0x886   : > { %v9833_v6 = vmax.f32 %v9815_v9, 0.0  ;;  %v17633_v7 = vpop.f32.mrb[240].mxu1  ;;  %19921 = vmatpush3.bf16.msra.mxu0 %v24817_v60 }
 0x887   : > { %v9824_v36 = vpop.f32.mrb[241].mxu1  ;;  %19923 = vmatprep.subr.bf16.mxu0 %v24830_v4  ;;  %v9830_v26 = vadd.f32 %v17633_v7, %v24950_v29 }
 0x888   : > { %17666 = vmatprep.mubr.f32.mxu0 %v9833_v6  ;;  %v9825_v42 = vadd.f32 %v24950_v29, %v9824_v36 }
 0x889   : > { %v9836_v1 = vmax.f32 %v9830_v26, 0.0 }
 0x88a   : > { %19925 = vmatpush3.bf16.msra.mxu0 %v24830_v4  ;;  %v9835_v0 = vmax.f32 %v9825_v42, 0.0 }
 0x88b   : > { %19927 = vmatprep.subr.bf16.mxu0 %v24842_v25 }
 0x88e   : > { %19929 = vmatpush3.bf16.msra.mxu0 %v24842_v25 }
 0x88f   : > { %19959 = vmatprep.subr.bf16.mxu0 %v24740_v62 }
 0x891   : > { %17667 = vmatmul.mubr.f32.vlgmr.msra.gmra.mrb[212].mxu0 %v9834_v28 }
 0x892   : > { %17669 = vmatprep.mubr.f32.mxu0 %v9835_v0  ;;  %19961 = vmatpush3.bf16.msra.mxu0 %v24740_v62 }
 0x893   : > { %19963 = vmatprep.subr.bf16.mxu0 %v24755_v3 }
 0x895   : > { %17670 = vmatmul.mubr.f32.gmra.mrb[214].mxu0 %v9836_v1 }
 0x896   : > { %19965 = vmatpush3.bf16.msra.mxu0 %v24755_v3 }
 0x897   : > { %19967 = vmatprep.subr.bf16.mxu0 %v24768_v38 }
 0x89a   : > { %19969 = vmatpush3.bf16.msra.mxu0 %v24768_v38 }
 0x89b   : > { %19971 = vmatprep.subr.bf16.mxu0 %v24784_v12 }
 0x89e   : > { %19973 = vmatpush3.bf16.msra.mxu0 %v24784_v12 }
 0x89f   : > { %19975 = vmatprep.subr.bf16.mxu0 %v24799_v44 }
 0x8a0   : > { %v17704_v18 = vpop.f32.mrb[242].mxu1 }
 0x8a1   : > { %v10052_v17 = vpop.f32.mrb[243].mxu1  ;;  %v10058_v33 = vadd.f32 %v17704_v18, %v24950_v29 }
 0x8a2   : > { %v10053_v23 = vadd.f32 %v24950_v29, %v10052_v17  ;;  %19977 = vmatpush3.bf16.msra.mxu0 %v24799_v44 }
 0x8a3   : > { %19979 = vmatprep.subr.bf16.mxu0 %v24817_v60  ;;  %v10072_v8 = vmax.f32 %v10058_v33, 0.0 }
 0x8a4   : > { %v10071_v55 = vmax.f32 %v10053_v23, 0.0  ;;  %v17707_v40 = vpop.f32.mrb[244].mxu1 }
 0x8a5   : > { %v10062_v37 = vpop.f32.mrb[245].mxu1  ;;  %v10068_v10 = vadd.f32 %v17707_v40, %v24950_v29 }
 0x8a6   : > { %19981 = vmatpush3.bf16.msra.mxu0 %v24817_v60  ;;  %17740 = vmatprep.mubr.f32.mxu0 %v10071_v55  ;;  %v10063_v45 = vadd.f32 %v24950_v29, %v10062_v37 }
 0x8a7   : > { %19983 = vmatprep.subr.bf16.mxu0 %v24830_v4  ;;  %v10074_v13 = vmax.f32 %v10068_v10, 0.0 }
 0x8a8   : > { %v10073_v32 = vmax.f32 %v10063_v45, 0.0 }
 0x8aa   : > { %19985 = vmatpush3.bf16.msra.mxu0 %v24830_v4 }
 0x8ab   : > { %19987 = vmatprep.subr.bf16.mxu0 %v24842_v25 }
 0x8ae   : > { %19989 = vmatpush3.bf16.msra.mxu0 %v24842_v25 }
 0x8af   : > { %20019 = vmatprep.subr.bf16.mxu0 %v24740_v62 }
 0x8b1   : > { %17741 = vmatmul.mubr.f32.vlgmr.msra.gmra.mrb[216].mxu0 %v10072_v8 }
 0x8b2   : > { %17743 = vmatprep.mubr.f32.mxu0 %v10073_v32  ;;  %20021 = vmatpush3.bf16.msra.mxu0 %v24740_v62 }
 0x8b3   : > { %20023 = vmatprep.subr.bf16.mxu0 %v24755_v3 }
 0x8b5   : > { %17744 = vmatmul.mubr.f32.gmra.mrb[218].mxu0 %v10074_v13 }
 0x8b6   : > { %20025 = vmatpush3.bf16.msra.mxu0 %v24755_v3 }
 0x8b7   : > { %20027 = vmatprep.subr.bf16.mxu0 %v24768_v38 }
 0x8ba   : > { %20029 = vmatpush3.bf16.msra.mxu0 %v24768_v38 }
 0x8bb   : > { %20031 = vmatprep.subr.bf16.mxu0 %v24784_v12 }
 0x8be   : > { %v17778_v24 = vpop.f32.mrb[246].mxu1  ;;  %20033 = vmatpush3.bf16.msra.mxu0 %v24784_v12 }
 0x8bf   : > { %v10290_v20 = vpop.f32.mrb[247].mxu1  ;;  %20035 = vmatprep.subr.bf16.mxu0 %v24799_v44  ;;  %v10296_v50 = vadd.f32 %v17778_v24, %v24950_v29 }
 0x8c0   : > { %v10291_v41 = vadd.f32 %v24950_v29, %v10290_v20 }
 0x8c1   : > { %v10310_v56 = vmax.f32 %v10296_v50, 0.0 }
 0x8c2   : > { %v10309_v46 = vmax.f32 %v10291_v41, 0.0  ;;  %v17781_v52 = vpop.f32.mrb[248].mxu1  ;;  %20037 = vmatpush3.bf16.msra.mxu0 %v24799_v44 }
 0x8c3   : > { %v10300_v31 = vpop.f32.mrb[249].mxu1  ;;  %20039 = vmatprep.subr.bf16.mxu0 %v24817_v60  ;;  %v10306_v30 = vadd.f32 %v17781_v52, %v24950_v29 }
 0x8c4   : > { %17814 = vmatprep.mubr.f32.mxu0 %v10309_v46  ;;  %v10301_v49 = vadd.f32 %v24950_v29, %v10300_v31 }
 0x8c5   : > { %v10312_v11 = vmax.f32 %v10306_v30, 0.0 }
 0x8c6   : > { %20041 = vmatpush3.bf16.msra.mxu0 %v24817_v60  ;;  %v10311_v58 = vmax.f32 %v10301_v49, 0.0 }
 0x8c7   : > { %20043 = vmatprep.subr.bf16.mxu0 %v24830_v4 }
 0x8ca   : > { %20045 = vmatpush3.bf16.msra.mxu0 %v24830_v4 }
 0x8cb   : > { %20047 = vmatprep.subr.bf16.mxu0 %v24842_v25 }
 0x8ce   : > { %20049 = vmatpush3.bf16.msra.mxu0 %v24842_v25 }
 0x8cf   : > { %20079 = vmatprep.subr.bf16.mxu0 %v24740_v62 }
 0x8d1   : > { %17815 = vmatmul.mubr.f32.vlgmr.msra.gmra.mrb[220].mxu0 %v10310_v56 }
 0x8d2   : > { %17817 = vmatprep.mubr.f32.mxu0 %v10311_v58  ;;  %20081 = vmatpush3.bf16.msra.mxu0 %v24740_v62 }
 0x8d3   : > { %20083 = vmatprep.subr.bf16.mxu0 %v24755_v3 }
 0x8d5   : > { %17818 = vmatmul.mubr.f32.gmra.mrb[222].mxu0 %v10312_v11 }
 0x8d6   : > { %20085 = vmatpush3.bf16.msra.mxu0 %v24755_v3  ;;  %v25092_v3 = vld [vmem:[%s27160_s14] ss:$0 sm:$0xff] }
 0x8d7   : > { %20087 = vmatprep.subr.bf16.mxu0 %v24768_v38 }
 0x8da   : > { %20089 = vmatpush3.bf16.msra.mxu0 %v24768_v38 }
 0x8db   : > { %20091 = vmatprep.subr.bf16.mxu0 %v24784_v12 }
 0x8dc   : > { %v17852_v39 = vpop.f32.mrb[250].mxu1 }
 0x8dd   : > { %v10528_v54 = vpop.f32.mrb[251].mxu1  ;;  %v10534_v16 = vadd.f32 %v17852_v39, %v24950_v29 }
 0x8de   : > { %v10529_v27 = vadd.f32 %v24950_v29, %v10528_v54  ;;  %20093 = vmatpush3.bf16.msra.mxu0 %v24784_v12 }
 0x8df   : > { %20095 = vmatprep.subr.bf16.mxu0 %v24799_v44 }
 0x8e0   : > { %v10547_v62 = vmax.f32 %v10529_v27, 0.0  ;;  %v17855_v53 = vpop.f32.mrb[252].mxu1 }
 0x8e1   : > { %v10538_v5 = vpop.f32.mrb[253].mxu1  ;;  %v10544_v61 = vadd.f32 %v17855_v53, %v24950_v29 }
 0x8e2   : > { %20097 = vmatpush3.bf16.msra.mxu0 %v24799_v44  ;;  %17888 = vmatprep.mubr.f32.mxu0 %v10547_v62 }
 0x8e3   : > { %v17372_v38 = vpop.f32.mrb[196].mxu0  ;;  %20099 = vmatprep.subr.bf16.mxu0 %v24817_v60  ;;  %v10550_v9 = vmax.f32 %v10544_v61, 0.0 }
 0x8e4   : > { %v25097_v43 = vadd.f32 %v17372_v38, %v25092_v3  ;;  %v8950_v12 = vpop.f32.mrb[197].mxu0 }
 0x8e5   : > { %v25100_v51 = vadd.f32 %v25092_v3, %v8950_v12 }
 0x8e6   : > { %v8970_v21 = vmax.f32 %v25097_v43, 0.0  ;;  %20101 = vmatpush3.bf16.msra.mxu0 %v24817_v60  ;;  %v10539_v60 = vadd.f32 %v24950_v29, %v10538_v5 }
 0x8e7   : > { %v8969_v59 = vmax.f32 %v25100_v51, 0.0  ;;  %20103 = vmatprep.subr.bf16.mxu0 %v24830_v4 }
 0x8e8   : > { %v8977_v44 = vsel %vm8973_vm0, %v8970_v21, -inf  ;;  %v10549_v47 = vmax.f32 %v10539_v60, 0.0 }
 0x8e9   : > { %8978 = vmax.xlane.f32.xlu1 %v8977_v44  ;;  %v8974_v48 = vsel %vm8973_vm0, %v8969_v59, -inf }
 0x8ea   : > { %20105 = vmatpush3.bf16.msra.mxu0 %v24830_v4  ;;  %8975 = vmax.xlane.f32.xlu0 %v8974_v48  ;;  %v10548_v4 = vmax.f32 %v10534_v16, 0.0 }
 0x8eb   : > { %v17375_v15 = vpop.f32.mrb[198].mxu0  ;;  %20107 = vmatprep.subr.bf16.mxu0 %v24842_v25 }
 0x8ec   : > { %v25117_v2 = vadd.f32 %v17375_v15, %v25092_v3  ;;  %v8960_v35 = vpop.f32.mrb[199].mxu0 }
 0x8ed   : > { %v25120_v19 = vadd.f32 %v25092_v3, %v8960_v35 }
 0x8ee   : > { %v8972_v14 = vmax.f32 %v25117_v2, 0.0  ;;  %20109 = vmatpush3.bf16.msra.mxu0 %v24842_v25 }
 0x8ef   : > { %v8971_v22 = vmax.f32 %v25120_v19, 0.0 }
 0x8f0   : > { %v8983_v63 = vsel %vm8973_vm0, %v8972_v14, -inf }
 0x8f1   : > { %17889 = vmatmul.mubr.f32.vlgmr.msra.gmra.mrb[224].mxu0 %v10548_v4  ;;  %8984 = vmax.xlane.f32.xlu1 %v8983_v63  ;;  %v8980_v34 = vsel %vm8973_vm0, %v8971_v22, -inf }
 0x8f2   : > { %17891 = vmatprep.mubr.f32.mxu0 %v10549_v47  ;;  %8981 = vmax.xlane.f32.xlu0 %v8980_v34 }
 0x8f5   : > { %17892 = vmatmul.mubr.f32.gmra.mrb[226].mxu0 %v10550_v9 }
 0x903   : > { %v17446_v25 = vpop.f32.mrb[200].mxu0 }
 0x904   : > { %v25133_v29 = vadd.f32 %v17446_v25, %v25092_v3  ;;  %v9189_v6 = vpop.f32.mrb[201].mxu0 }
 0x905   : > { %v25136_v7 = vadd.f32 %v25092_v3, %v9189_v6 }
 0x906   : > { %v9209_v36 = vmax.f32 %v25133_v29, 0.0 }
 0x907   : > { %v9208_v57 = vmax.f32 %v25136_v7, 0.0 }
 0x908   : > { %v17449_v42 = vpop.f32.mrb[202].mxu0  ;;  %v9215_v28 = vsel %vm8973_vm0, %v9209_v36, -inf }
 0x909   : > { %v25144_v26 = vadd.f32 %v17449_v42, %v25092_v3  ;;  %v9199_v0 = vpop.f32.mrb[203].mxu0  ;;  %9216 = vmax.xlane.f32.xlu0 %v9215_v28  ;;  %v9212_v1 = vsel %vm8973_vm0, %v9208_v57, -inf }
 0x90a   : > { %v25150_v18 = vadd.f32 %v25092_v3, %v9199_v0  ;;  %9213 = vmax.xlane.f32.xlu1 %v9212_v1 }
 0x90b   : > { %v9211_v17 = vmax.f32 %v25144_v26, 0.0 }
 0x90c   : > { %v9210_v23 = vmax.f32 %v25150_v18, 0.0 }
 0x90d   : > { %v9221_v55 = vsel %vm8973_vm0, %v9211_v17, -inf }
 0x90e   : > { %9222 = vmax.xlane.f32.xlu1 %v9221_v55  ;;  %v9218_v40 = vsel %vm8973_vm0, %v9210_v23, -inf }
 0x90f   : > { %9219 = vmax.xlane.f32.xlu0 %v9218_v40 }
 0x924   : > { %v17520_v37 = vpop.f32.mrb[204].mxu0 }
 0x925   : > { %v25161_v33 = vadd.f32 %v17520_v37, %v25092_v3  ;;  %v9427_v45 = vpop.f32.mrb[205].mxu0 }
 0x926   : > { %v25164_v8 = vadd.f32 %v25092_v3, %v9427_v45 }
 0x927   : > { %v9447_v10 = vmax.f32 %v25161_v33, 0.0 }
 0x928   : > { %v9446_v32 = vmax.f32 %v25164_v8, 0.0  ;;  %v17523_v13 = vpop.f32.mrb[206].mxu0 }
 0x929   : > { %v25169_v24 = vadd.f32 %v17523_v13, %v25092_v3  ;;  %v9437_v20 = vpop.f32.mrb[207].mxu0  ;;  %v9453_v41 = vsel %vm8973_vm0, %v9447_v10, -inf }
 0x92a   : > { %v25175_v46 = vadd.f32 %v25092_v3, %v9437_v20  ;;  %9454 = vmax.xlane.f32.xlu1 %v9453_v41  ;;  %v9450_v52 = vsel %vm8973_vm0, %v9446_v32, -inf }
 0x92b   : > { %v9449_v31 = vmax.f32 %v25169_v24, 0.0  ;;  %9451 = vmax.xlane.f32.xlu0 %v9450_v52 }
 0x92c   : > { %v9448_v50 = vmax.f32 %v25175_v46, 0.0 }
 0x92d   : > { %v9459_v49 = vsel %vm8973_vm0, %v9449_v31, -inf }
 0x92e   : > { %9460 = vmax.xlane.f32.xlu1 %v9459_v49  ;;  %v9456_v56 = vsel %vm8973_vm0, %v9448_v50, -inf }
 0x92f   : > { %9457 = vmax.xlane.f32.xlu0 %v9456_v56 }
 0x944   : > { %v17594_v30 = vpop.f32.mrb[208].mxu0 }
 0x945   : > { %v25189_v58 = vadd.f32 %v17594_v30, %v25092_v3  ;;  %v9665_v11 = vpop.f32.mrb[209].mxu0 }
 0x946   : > { %v25192_v39 = vadd.f32 %v25092_v3, %v9665_v11 }
 0x947   : > { %v9685_v54 = vmax.f32 %v25189_v58, 0.0 }
 0x948   : > { %v9684_v27 = vmax.f32 %v25192_v39, 0.0  ;;  %v17597_v62 = vpop.f32.mrb[210].mxu0 }
 0x949   : > { %v25197_v53 = vadd.f32 %v17597_v62, %v25092_v3  ;;  %v9675_v5 = vpop.f32.mrb[211].mxu0  ;;  %v9691_v38 = vsel %vm8973_vm0, %v9685_v54, -inf }
 0x94a   : > { %v25203_v12 = vadd.f32 %v25092_v3, %v9675_v5  ;;  %9692 = vmax.xlane.f32.xlu1 %v9691_v38  ;;  %v9688_v44 = vsel %vm8973_vm0, %v9684_v27, -inf }
 0x94b   : > { %v9687_v48 = vmax.f32 %v25197_v53, 0.0  ;;  %9689 = vmax.xlane.f32.xlu0 %v9688_v44 }
 0x94c   : > { %v9686_v16 = vmax.f32 %v25203_v12, 0.0 }
 0x94d   : > { %v9697_v15 = vsel %vm8973_vm0, %v9687_v48, -inf }
 0x94e   : > { %9698 = vmax.xlane.f32.xlu1 %v9697_v15  ;;  %v9694_v60 = vsel %vm8973_vm0, %v9686_v16, -inf }
 0x94f   : > { %9695 = vmax.xlane.f32.xlu0 %v9694_v60 }
 0x964   : > { %v17668_v35 = vpop.f32.mrb[212].mxu0 }
 0x965   : > { %v25217_v4 = vadd.f32 %v17668_v35, %v25092_v3  ;;  %v9903_v61 = vpop.f32.mrb[213].mxu0 }
 0x966   : > { %v25220_v47 = vadd.f32 %v25092_v3, %v9903_v61 }
 0x967   : > { %v9923_v63 = vmax.f32 %v25217_v4, 0.0 }
 0x968   : > { %v9922_v34 = vmax.f32 %v25220_v47, 0.0  ;;  %v17671_v9 = vpop.f32.mrb[214].mxu0 }
 0x969   : > { %v25225_v25 = vadd.f32 %v17671_v9, %v25092_v3  ;;  %v9913_v6 = vpop.f32.mrb[215].mxu0  ;;  %v9929_v42 = vsel %vm8973_vm0, %v9923_v63, -inf }
 0x96a   : > { %v25231_v28 = vadd.f32 %v25092_v3, %v9913_v6  ;;  %9930 = vmax.xlane.f32.xlu1 %v9929_v42  ;;  %v9926_v0 = vsel %vm8973_vm0, %v9922_v34, -inf }
 0x96b   : > { %v9925_v1 = vmax.f32 %v25225_v25, 0.0  ;;  %9927 = vmax.xlane.f32.xlu0 %v9926_v0 }
 0x96c   : > { %v9924_v55 = vmax.f32 %v25231_v28, 0.0 }
 0x96d   : > { %v9935_v40 = vsel %vm8973_vm0, %v9925_v1, -inf }
 0x96e   : > { %9936 = vmax.xlane.f32.xlu1 %v9935_v40  ;;  %v9932_v37 = vsel %vm8973_vm0, %v9924_v55, -inf }
 0x96f   : > { %9933 = vmax.xlane.f32.xlu0 %v9932_v37 }
 0x984   : > { %v17742_v45 = vpop.f32.mrb[216].mxu0 }
 0x985   : > { %v25245_v13 = vadd.f32 %v17742_v45, %v25092_v3  ;;  %v10141_v20 = vpop.f32.mrb[217].mxu0 }
 0x986   : > { %v25248_v41 = vadd.f32 %v25092_v3, %v10141_v20 }
 0x987   : > { %v27169_v52 = vmax.f32 %v25245_v13, 0.0 }
 0x988   : > { %v27168_v49 = vmax.f32 %v25248_v41, 0.0  ;;  %v17745_v56 = vpop.f32.mrb[218].mxu0 }
 0x989   : > { %v25253_v30 = vadd.f32 %v17745_v56, %v25092_v3  ;;  %v10151_v11 = vpop.f32.mrb[219].mxu0  ;;  %v10167_v62 = vsel %vm8973_vm0, %v27169_v52, -inf }
 0x98a   : > { %v25259_v5 = vadd.f32 %v25092_v3, %v10151_v11  ;;  %10168 = vmax.xlane.f32.xlu1 %v10167_v62  ;;  %v10164_v38 = vsel %vm8973_vm0, %v27168_v49, -inf }
 0x98b   : > { %v27165_v44 = vmax.f32 %v25253_v30, 0.0  ;;  %10165 = vmax.xlane.f32.xlu0 %v10164_v38 }
 0x98c   : > { %v27164_v15 = vmax.f32 %v25259_v5, 0.0 }
 0x98d   : > { %v10173_v60 = vsel %vm8973_vm0, %v27165_v44, -inf }
 0x98e   : > { %10174 = vmax.xlane.f32.xlu1 %v10173_v60  ;;  %v10170_v35 = vsel %vm8973_vm0, %v27164_v15, -inf }
 0x98f   : > { %10171 = vmax.xlane.f32.xlu0 %v10170_v35  ;;  %v8979_v35 = vpop.xlane.xlu1 %8978 }
 0x9a4   : > { %v17816_v61 = vpop.f32.mrb[220].mxu0 }
 0x9a5   : > { %v25273_v9 = vadd.f32 %v17816_v61, %v25092_v3  ;;  %v10379_v6 = vpop.f32.mrb[221].mxu0 }
 0x9a6   : > { %v25276_v42 = vadd.f32 %v25092_v3, %v10379_v6 }
 0x9a7   : > { %v27163_v0 = vmax.f32 %v25273_v9, 0.0 }
 0x9a8   : > { %v27162_v40 = vmax.f32 %v25276_v42, 0.0  ;;  %v17819_v37 = vpop.f32.mrb[222].mxu0 }
 0x9a9   : > { %v25281_v45 = vadd.f32 %v17819_v37, %v25092_v3  ;;  %v10389_v20 = vpop.f32.mrb[223].mxu0  ;;  %v10405_v56 = vsel %vm8973_vm0, %v27163_v0, -inf  ;;  %v8976_v37 = vpop.xlane.xlu0 %8975 }
 0x9aa   : > { %v25287_v11 = vadd.f32 %v25092_v3, %v10389_v20  ;;  %10406 = vmax.xlane.f32.xlu1 %v10405_v56  ;;  %v10402_v62 = vsel %vm8973_vm0, %v27162_v40, -inf  ;;  %v8985_v20 = vpop.xlane.xlu1 %8984 }
 0x9ab   : > { %v27166_v38 = vmax.f32 %v25281_v45, 0.0  ;;  %10403 = vmax.xlane.f32.xlu0 %v10402_v62  ;;  %v25379_v51 = vsub.f32 %v8972_v14, %v8985_v20 }
 0x9ac   : > { %v27167_v60 = vmax.f32 %v25287_v11, 0.0 }
 0x9ad   : > { %v10411_v61 = vsel %vm8973_vm0, %v27166_v38, -inf  ;;  %v8982_v56 = vpop.xlane.xlu0 %8981  ;;  %v8996_v2 = vmul.f32 1.442695, %v25379_v51 }
 0x9ae   : > { %10412 = vmax.xlane.f32.xlu1 %v10411_v61  ;;  %v10408_v6 = vsel %vm8973_vm0, %v27167_v60, -inf  ;;  %v9214_v40 = vpop.xlane.xlu1 %9213 }
 0x9af   : > { %10409 = vmax.xlane.f32.xlu0 %v10408_v6  ;;  %v25306_v38 = vsub.f32 %v9208_v57, %v9214_v40 }
 0x9b1   : > { %v9217_v0 = vpop.xlane.xlu0 %9216  ;;  %v9228_v29 = vmul.f32 1.442695, %v25306_v38 }
 0x9b2   : > { %v9223_v15 = vpop.xlane.xlu1 %9222  ;;  %v25302_v62 = vsub.f32 %v9209_v36, %v9217_v0 }
 0x9b3   : > { %v25310_v61 = vsub.f32 %v9211_v17, %v9223_v15 }
 0x9b4   : > { %v9230_v60 = vmul.f32 1.442695, %v25302_v62 }
 0x9b5   : > { %v9220_v44 = vpop.xlane.xlu0 %9219  ;;  %v9234_v36 = vmul.f32 1.442695, %v25310_v61 }
 0x9b6   : > { %v25315_v49 = vsub.f32 %v9210_v23, %v9220_v44  ;;  %20863 = vpow2.f32 %v9230_v60 }
 0x9b7   : > { %v9455_v6 = vpop.xlane.xlu1 %9454  ;;  %20865 = vpow2.f32 %v9228_v29 }
 0x9b8   : > { %v9232_v7 = vmul.f32 1.442695, %v25315_v49  ;;  %v25322_v57 = vsub.f32 %v9447_v10, %v9455_v6  ;;  %20867 = vpow2.f32 %v9234_v36 }
 0x9b9   : > { %v9452_v52 = vpop.xlane.xlu0 %9451 }
 0x9ba   : > { %v25326_v17 = vsub.f32 %v9446_v32, %v9452_v52  ;;  %20869 = vpow2.f32 %v9232_v7  ;;  %v9468_v10 = vmul.f32 1.442695, %v25322_v57 }
 0x9bb   : > { %v9461_v18 = vpop.xlane.xlu1 %9460 }
 0x9bc   : > { %v25338_v8 = vsub.f32 %v9449_v31, %v9461_v18  ;;  %v9466_v40 = vmul.f32 1.442695, %v25326_v17  ;;  %20871 = vpow2.f32 %v9468_v10  ;;  %v25384_v10 = vsub.f32 %v8971_v22, %v8982_v56 }
 0x9bd   : > { %v9458_v15 = vpop.xlane.xlu0 %9457 }
 0x9be   : > { %v25344_v60 = vsub.f32 %v9448_v50, %v9458_v15  ;;  %v25361_v50 = vsub.f32 %v8970_v21, %v8979_v35  ;;  %v9472_v7 = vmul.f32 1.442695, %v25338_v8  ;;  %20873 = vpow2.f32 %v9466_v40 }
 0x9bf   : > { %v8994_v14 = vmul.f32 1.442695, %v25384_v10 }
 0x9c0   : > { %v9470_v18 = vmul.f32 1.442695, %v25344_v60  ;;  %v20864_v15 = vpop.eup %20863  ;;  %v8992_v35 = vmul.f32 1.442695, %v25361_v50  ;;  %20875 = vpow2.f32 %v9472_v7 }
 0x9c1   : > { %v20866_v21 = vpop.eup %20865 }
 0x9c2   : > { %20877 = vpow2.f32 %v9470_v18 }
 0x9c3   : > { %20879 = vpow2.f32 %v8992_v35 }
 0x9c4   : > { %v17890_v26 = vpop.f32.mrb[224].mxu0 }
 0x9c5   : > { %v25329_v23 = vadd.f32 %v17890_v26, %v25092_v3  ;;  %v10617_v44 = vpop.f32.mrb[225].mxu0 }
 0x9c6   : > { %v25332_v0 = vadd.f32 %v25092_v3, %v10617_v44 }
 0x9c7   : > { %v10637_v33 = vmax.f32 %v25329_v23, 0.0 }
 0x9c8   : > { %v10636_v32 = vmax.f32 %v25332_v0, 0.0  ;;  %v17893_v52 = vpop.f32.mrb[226].mxu0 }
 0x9c9   : > { %v25347_v6 = vadd.f32 %v17893_v52, %v25092_v3  ;;  %v10627_v29 = vpop.f32.mrb[227].mxu0  ;;  %v10643_v36 = vsel %vm8973_vm0, %v10637_v33, -inf  ;;  %v9239_v52 = vsel %vm8973_vm0, %v20864_v15, 0.0 }
 0x9ca   : > { %v25353_v24 = vadd.f32 %v25092_v3, %v10627_v29  ;;  %10644 = vmax.xlane.f32.xlu1 %v10643_v36  ;;  %v10640_v31 = vsel %vm8973_vm0, %v10636_v32, -inf  ;;  %v25367_v3 = vsub.f32 %v8969_v59, %v8976_v37  ;;  %v20868_v59 = vpop.eup %20867  ;;  %v9236_v29 = vsel %vm8973_vm0, %v20866_v21, 0.0 }
 0x9cb   : > { %v10639_v46 = vmax.f32 %v25347_v6, 0.0  ;;  %10641 = vmax.xlane.f32.xlu0 %v10640_v31  ;;  %v20870_v40 = vpop.eup %20869  ;;  %v9245_v20 = vsel %vm8973_vm0, %v20868_v59, 0.0 }
 0x9cc   : > { %v10638_v26 = vmax.f32 %v25353_v24, 0.0  ;;  %v8990_v37 = vmul.f32 1.442695, %v25367_v3  ;;  %v20872_v36 = vpop.eup %20871  ;;  %v9242_v19 = vsel %vm8973_vm0, %v20870_v40, 0.0 }
 0x9cd   : > { %v10649_v44 = vsel %vm8973_vm0, %v10639_v46, -inf  ;;  %v20874_v22 = vpop.eup %20873 }
 0x9ce   : > { %10650 = vmax.xlane.f32.xlu1 %v10649_v44  ;;  %v10646_v43 = vsel %vm8973_vm0, %v10638_v26, -inf  ;;  %20881 = vpow2.f32 %v8990_v37  ;;  %v9477_v44 = vsel %vm8973_vm0, %v20872_v36, 0.0  ;;  %v20876_v15 = vpop.eup %20875  ;;  %v9474_v21 = vsel %vm8973_vm0, %v20874_v22, 0.0 }
 0x9cf   : > { %10647 = vmax.xlane.f32.xlu0 %v10646_v43  ;;  %20883 = vpow2.f32 %v8996_v2  ;;  %v20878_v35 = vpop.eup %20877  ;;  %v9483_v37 = vsel %vm8973_vm0, %v20876_v15, 0.0 }
 0x9d0   : > { %20885 = vpow2.f32 %v8994_v14 }
 0x9d2   : > { %9240 = vadd.xlane.f32.xlu1 %v9239_v52  ;;  %v20880_v52 = vpop.eup %20879 }
 0x9d3   : > { %9237 = vadd.xlane.f32.xlu0 %v9236_v29  ;;  %v9480_v29 = vsel %vm8973_vm0, %v20878_v35, 0.0  ;;  %v9001_v53 = vsel %vm8973_vm0, %v20880_v52, 0.0 }
 0x9d6   : > { %9246 = vadd.xlane.f32.xlu1 %v9245_v20 }
 0x9d7   : > { %v9693_v56 = vpop.xlane.xlu1 %9692  ;;  %9243 = vadd.xlane.f32.xlu0 %v9242_v19 }
 0x9d8   : > { %v25394_v31 = vsub.f32 %v9685_v54, %v9693_v56  ;;  %v9690_v7 = vpop.xlane.xlu0 %9689  ;;  %v20882_v2 = vpop.eup %20881 }
 0x9d9   : > { %v25398_v18 = vsub.f32 %v9684_v27, %v9690_v7  ;;  %v8998_v12 = vsel %vm8973_vm0, %v20882_v2, 0.0 }
 0x9da   : > { %v9706_v43 = vmul.f32 1.442695, %v25394_v31  ;;  %9478 = vadd.xlane.f32.xlu1 %v9477_v44 }
 0x9db   : > { %27209 = vst [vmem:[#allocation2_spill] sm:$0xff] %v25398_v18  ;;  %v9704_v59 = vmul.f32 1.442695, %v25398_v18  ;;  %v9699_v58 = vpop.xlane.xlu1 %9698  ;;  %9475 = vadd.xlane.f32.xlu0 %v9474_v21 }
 0x9dc   : > { %20887 = vpow2.f32 %v9706_v43  ;;  %v25406_v54 = vsub.f32 %v9687_v48, %v9699_v58  ;;  %v9696_v39 = vpop.xlane.xlu0 %9695  ;;  %v20884_v48 = vpop.eup %20883 }
 0x9dd   : > { %20889 = vpow2.f32 %v9704_v59  ;;  %v25410_v27 = vsub.f32 %v9686_v16, %v9696_v39  ;;  %v20886_v16 = vpop.eup %20885  ;;  %v9007_v20 = vsel %vm8973_vm0, %v20884_v48, 0.0 }
 0x9de   : > { %27210 = vst [vmem:[#allocation3_spill] sm:$0xff] %v25406_v54  ;;  %v9710_v40 = vmul.f32 1.442695, %v25406_v54  ;;  %9484 = vadd.xlane.f32.xlu1 %v9483_v37  ;;  %v9004_v19 = vsel %vm8973_vm0, %v20886_v16, 0.0  ;;  %v27216_v16 = vmax.f32 %v25245_v13, 0.0  ;;  %v27222_v13 = vmax.f32 %v25259_v5, 0.0 }
 0x9df   : > { %27211 = vst [vmem:[#allocation4_spill] sm:$0xff] %v25410_v27  ;;  %v9708_v14 = vmul.f32 1.442695, %v25410_v27  ;;  %9481 = vadd.xlane.f32.xlu0 %v9480_v29 }
 0x9e0   : > { %20891 = vpow2.f32 %v9710_v40 }
 0x9e1   : > { %20893 = vpow2.f32 %v9708_v14 }
 0x9e2   : > { %9002 = vadd.xlane.f32.xlu1 %v9001_v53 }
 0x9e3   : > { %8999 = vadd.xlane.f32.xlu0 %v8998_v12 }
 0x9e6   : > { %v20888_v36 = vpop.eup %20887  ;;  %9008 = vadd.xlane.f32.xlu1 %v9007_v20 }
 0x9e7   : > { %v20890_v22 = vpop.eup %20889  ;;  %9005 = vadd.xlane.f32.xlu0 %v9004_v19  ;;  %v9715_v56 = vsel %vm8973_vm0, %v20888_v36, 0.0  ;;  %v27218_v19 = vmax.f32 %v25248_v41, 0.0 }
 0x9e8   : > { %v9712_v44 = vsel %vm8973_vm0, %v20890_v22, 0.0 }
 0x9ea   : > { %v20892_v7 = vpop.eup %20891  ;;  %9716 = vadd.xlane.f32.xlu1 %v9715_v56 }
 0x9eb   : > { %v20894_v15 = vpop.eup %20893  ;;  %9713 = vadd.xlane.f32.xlu0 %v9712_v44  ;;  %v9721_v43 = vsel %vm8973_vm0, %v20892_v7, 0.0 }
 0x9ec   : > { %v9718_v21 = vsel %vm8973_vm0, %v20894_v15, 0.0  ;;  %v27220_v15 = vmax.f32 %v25253_v30, 0.0 }
 0x9ee   : > { %9722 = vadd.xlane.f32.xlu1 %v9721_v43 }
 0x9ef   : > { %9719 = vadd.xlane.f32.xlu0 %v9718_v21 }
 0x9f7   : > { %v9931_v35 = vpop.xlane.xlu1 %9930 }
 0x9f8   : > { %v25426_v59 = vsub.f32 %v9923_v63, %v9931_v35  ;;  %v9928_v58 = vpop.xlane.xlu0 %9927 }
 0x9f9   : > { %v25430_v39 = vsub.f32 %v9922_v34, %v9928_v58 }
 0x9fa   : > { %27212 = vst [vmem:[#allocation5_spill] sm:$0xff] %v25426_v59  ;;  %v9944_v37 = vmul.f32 1.442695, %v25426_v59 }
 0x9fb   : > { %27213 = vst [vmem:[#allocation6_spill] sm:$0xff] %v25430_v39  ;;  %v9942_v52 = vmul.f32 1.442695, %v25430_v39  ;;  %v9937_v40 = vpop.xlane.xlu1 %9936 }
 0x9fc   : > { %20895 = vpow2.f32 %v9944_v37  ;;  %v25436_v29 = vsub.f32 %v9925_v1, %v9937_v40  ;;  %v9934_v2 = vpop.xlane.xlu0 %9933 }
 0x9fd   : > { %20897 = vpow2.f32 %v9942_v52  ;;  %v25440_v4 = vsub.f32 %v9924_v55, %v9934_v2 }
 0x9fe   : > { %27214 = vst [vmem:[#allocation7_spill] sm:$0xff] %v25436_v29  ;;  %v9948_v47 = vmul.f32 1.442695, %v25436_v29 }
 0x9ff   : > { %27215 = vst [vmem:[#allocation8_spill] sm:$0xff] %v25440_v4  ;;  %v9946_v63 = vmul.f32 1.442695, %v25440_v4 }
 0xa00   : > { %20899 = vpow2.f32 %v9948_v47 }
 0xa01   : > { %20901 = vpow2.f32 %v9946_v63 }
 0xa06   : > { %v20896_v34 = vpop.eup %20895 }
 0xa07   : > { %v20898_v14 = vpop.eup %20897  ;;  %v9953_v53 = vsel %vm8973_vm0, %v20896_v34, 0.0 }
 0xa08   : > { %9954 = vadd.xlane.f32.xlu1 %v9953_v53  ;;  %v9950_v25 = vsel %vm8973_vm0, %v20898_v14, 0.0  ;;  %v27224_v14 = vmax.f32 %v25273_v9, 0.0  ;;  %v27230_v9 = vmax.f32 %v25287_v11, 0.0 }
 0xa09   : > { %9951 = vadd.xlane.f32.xlu0 %v9950_v25 }
 0xa0a   : > { %v20900_v1 = vpop.eup %20899 }
 0xa0b   : > { %v20902_v48 = vpop.eup %20901  ;;  %v9959_v28 = vsel %vm8973_vm0, %v20900_v1, 0.0  ;;  %v27226_v1 = vmax.f32 %v25276_v42, 0.0 }
 0xa0c   : > { %9960 = vadd.xlane.f32.xlu1 %v9959_v28  ;;  %v9956_v55 = vsel %vm8973_vm0, %v20902_v48, 0.0 }
 0xa0d   : > { %9957 = vadd.xlane.f32.xlu0 %v9956_v55 }
 0xa17   : > { %v10169_v12 = vpop.xlane.xlu1 %10168 }
 0xa18   : > { %v25450_v20 = vsub.f32 %v27216_v16, %v10169_v12  ;;  %v10166_v36 = vpop.xlane.xlu0 %10165  ;;  %v27228_v16 = vmax.f32 %v25281_v45, 0.0 }
 0xa19   : > { %v25454_v22 = vsub.f32 %v27218_v19, %v10166_v36 }
 0xa1a   : > { %27217 = vst [vmem:[#allocation9_spill] sm:$0xff] %v25450_v20  ;;  %v10182_v56 = vmul.f32 1.442695, %v25450_v20 }
 0xa1b   : > { %27219 = vst [vmem:[#allocation10_spill] sm:$0xff] %v25454_v22  ;;  %v10180_v7 = vmul.f32 1.442695, %v25454_v22  ;;  %v10175_v44 = vpop.xlane.xlu1 %10174 }
 0xa1c   : > { %20903 = vpow2.f32 %v10182_v56  ;;  %v25460_v43 = vsub.f32 %v27220_v15, %v10175_v44  ;;  %v10172_v21 = vpop.xlane.xlu0 %10171 }
 0xa1d   : > { %20905 = vpow2.f32 %v10180_v7  ;;  %v25464_v35 = vsub.f32 %v27222_v13, %v10172_v21 }
 0xa1e   : > { %27221 = vst [vmem:[#allocation11_spill] sm:$0xff] %v25460_v43  ;;  %v10186_v41 = vmul.f32 1.442695, %v25460_v43 }
 0xa1f   : > { %27223 = vst [vmem:[#allocation12_spill] sm:$0xff] %v25464_v35  ;;  %v10184_v58 = vmul.f32 1.442695, %v25464_v35 }
 0xa20   : > { %20907 = vpow2.f32 %v10186_v41 }
 0xa21   : > { %20909 = vpow2.f32 %v10184_v58 }
 0xa26   : > { %v20904_v37 = vpop.eup %20903 }
 0xa27   : > { %v20906_v52 = vpop.eup %20905  ;;  %v10191_v40 = vsel %vm8973_vm0, %v20904_v37, 0.0 }
 0xa28   : > { %10192 = vadd.xlane.f32.xlu1 %v10191_v40  ;;  %v10188_v30 = vsel %vm8973_vm0, %v20906_v52, 0.0 }
 0xa29   : > { %10189 = vadd.xlane.f32.xlu0 %v10188_v30 }
 0xa2a   : > { %v20908_v2 = vpop.eup %20907 }
 0xa2b   : > { %v20910_v47 = vpop.eup %20909  ;;  %v10197_v5 = vsel %vm8973_vm0, %v20908_v2, 0.0 }
 0xa2c   : > { %10198 = vadd.xlane.f32.xlu1 %v10197_v5  ;;  %v10194_v63 = vsel %vm8973_vm0, %v20910_v47, 0.0 }
 0xa2d   : > { %10195 = vadd.xlane.f32.xlu0 %v10194_v63 }
 0xa37   : > { %v10407_v34 = vpop.xlane.xlu1 %10406 }
 0xa38   : > { %v25474_v53 = vsub.f32 %v27224_v14, %v10407_v34  ;;  %v10404_v25 = vpop.xlane.xlu0 %10403 }
 0xa39   : > { %v25478_v48 = vsub.f32 %v27226_v1, %v10404_v25 }
 0xa3a   : > { %27225 = vst [vmem:[#allocation13_spill] sm:$0xff] %v25474_v53  ;;  %v10420_v28 = vmul.f32 1.442695, %v25474_v53 }
 0xa3b   : > { %27227 = vst [vmem:[#allocation14_spill] sm:$0xff] %v25478_v48  ;;  %v10418_v55 = vmul.f32 1.442695, %v25478_v48  ;;  %v10413_v12 = vpop.xlane.xlu1 %10412 }
 0xa3c   : > { %20911 = vpow2.f32 %v10420_v28  ;;  %v25484_v36 = vsub.f32 %v27228_v16, %v10413_v12  ;;  %v10410_v19 = vpop.xlane.xlu0 %10409  ;;  %v21038_v28 = vmov 1966171168   ;;  %v10696_v12 = vlaneseq }
 0xa3d   : > { %20913 = vpow2.f32 %v10418_v55  ;;  %v25488_v56 = vsub.f32 %v27230_v9, %v10410_v19  ;;  %v10694_v55 = vunpack.c.l.s4 %v21038_v28 }
 0xa3e   : > { %27229 = vst [vmem:[#allocation15_spill] sm:$0xff] %v25484_v36  ;;  %v10424_v42 = vmul.f32 1.442695, %v25484_v36 }
 0xa3f   : > { %27231 = vst [vmem:[#allocation16_spill] sm:$0xff] %v25488_v56  ;;  %v10422_v7 = vmul.f32 1.442695, %v25488_v56 }
 0xa40   : > { %20915 = vpow2.f32 %v10424_v42 }
 0xa41   : > { %20917 = vpow2.f32 %v10422_v7 }
 0xa46   : > { %v20912_v44 = vpop.eup %20911 }
 0xa47   : > { %v20914_v15 = vpop.eup %20913  ;;  %v10429_v21 = vsel %vm8973_vm0, %v20912_v44, 0.0 }
 0xa48   : > { %10430 = vadd.xlane.f32.xlu1 %v10429_v21  ;;  %v10426_v45 = vsel %vm8973_vm0, %v20914_v15, 0.0  ;;  %v10695_v15 = vunpack.c.0.s8 %v10694_v55  ;;  %v10697_v21 = vshrl.u32 %v10696_v12, 7 }
 0xa49   : > { %10427 = vadd.xlane.f32.xlu0 %v10426_v45 }
 0xa4a   : > { %v20916_v13 = vpop.eup %20915 }
 0xa4b   : > { %v20918_v41 = vpop.eup %20917  ;;  %v10435_v11 = vsel %vm8973_vm0, %v20916_v13, 0.0 }
 0xa4c   : > { %10436 = vadd.xlane.f32.xlu1 %v10435_v11  ;;  %v10432_v58 = vsel %vm8973_vm0, %v20918_v41, 0.0  ;;  %v25520_v41 = vsub.s32 %v10695_v15, %v10697_v21 }
 0xa4d   : > { %10433 = vadd.xlane.f32.xlu0 %v10432_v58 }
 0xa57   : > { %v10645_v37 = vpop.xlane.xlu1 %10644 }
 0xa58   : > { %v25498_v52 = vsub.f32 %v10637_v33, %v10645_v37  ;;  %v10642_v40 = vpop.xlane.xlu0 %10641 }
 0xa59   : > { %v25502_v30 = vsub.f32 %v10636_v32, %v10642_v40 }
 0xa5a   : > { %27232 = vst [vmem:[#allocation17_spill] sm:$0xff] %v25498_v52  ;;  %v10658_v2 = vmul.f32 1.442695, %v25498_v52 }
 0xa5b   : > { %27233 = vst [vmem:[#allocation18_spill] sm:$0xff] %v25502_v30  ;;  %v10656_v47 = vmul.f32 1.442695, %v25502_v30  ;;  %v10651_v5 = vpop.xlane.xlu1 %10650 }
 0xa5c   : > { %20919 = vpow2.f32 %v10658_v2  ;;  %v25508_v63 = vsub.f32 %v10639_v46, %v10651_v5  ;;  %v10648_v34 = vpop.xlane.xlu0 %10647 }
 0xa5d   : > { %20921 = vpow2.f32 %v10656_v47  ;;  %v25512_v23 = vsub.f32 %v10638_v26, %v10648_v34 }
 0xa5e   : > { %27234 = vst [vmem:[#allocation19_spill] sm:$0xff] %v25508_v63  ;;  %v10662_v0 = vmul.f32 1.442695, %v25508_v63 }
 0xa5f   : > { %27235 = vst [vmem:[#allocation20_spill] sm:$0xff] %v25512_v23  ;;  %v10660_v33 = vmul.f32 1.442695, %v25512_v23  ;;  %v9241_v32 = vpop.xlane.xlu1 %9240 }
 0xa60   : > { %20923 = vpow2.f32 %v10662_v0  ;;  %v9238_v14 = vpop.xlane.xlu0 %9237 }
 0xa61   : > { %20925 = vpow2.f32 %v10660_v33 }
 0xa62   : > { %20927 = vlog2.f32 %v9241_v32 }
 0xa63   : > { %20929 = vlog2.f32 %v9238_v14  ;;  %v9247_v46 = vpop.xlane.xlu1 %9246 }
 0xa64   : > { %20931 = vlog2.f32 %v9247_v46  ;;  %v9244_v7 = vpop.xlane.xlu0 %9243 }
 0xa65   : > { %20933 = vlog2.f32 %v9244_v7 }
 0xa66   : > { %v20920_v25 = vpop.eup %20919 }
 0xa67   : > { %v20922_v6 = vpop.eup %20921  ;;  %v10667_v1 = vsel %vm8973_vm0, %v20920_v25, 0.0  ;;  %v9479_v58 = vpop.xlane.xlu1 %9478 }
 0xa68   : > { %10668 = vadd.xlane.f32.xlu1 %v10667_v1  ;;  %v10664_v24 = vsel %vm8973_vm0, %v20922_v6, 0.0  ;;  %v9476_v40 = vpop.xlane.xlu0 %9475  ;;  %20935 = vlog2.f32 %v9479_v58 }
 0xa69   : > { %10665 = vadd.xlane.f32.xlu0 %v10664_v24  ;;  %20937 = vlog2.f32 %v9476_v40 }
 0xa6a   : > { %v20924_v26 = vpop.eup %20923 }
 0xa6b   : > { %v20926_v16 = vpop.eup %20925  ;;  %v10673_v19 = vsel %vm8973_vm0, %v20924_v26, 0.0  ;;  %v9485_v0 = vpop.xlane.xlu1 %9484 }
 0xa6c   : > { %v20928_v9 = vpop.eup %20927  ;;  %10674 = vadd.xlane.f32.xlu1 %v10673_v19  ;;  %v10670_v42 = vsel %vm8973_vm0, %v20926_v16, 0.0  ;;  %v9482_v6 = vpop.xlane.xlu0 %9481  ;;  %20939 = vlog2.f32 %v9485_v0  ;;  %v25538_v19 = vsub.s32 0, %v10697_v21 }
 0xa6d   : > { %10671 = vadd.xlane.f32.xlu0 %v10670_v42  ;;  %v20930_v44 = vpop.eup %20929  ;;  %v9251_v45 = vmul.f32 0.6931472, %v20928_v9  ;;  %20941 = vlog2.f32 %v9482_v6 }
 0xa6e   : > { %v9249_v13 = vmul.f32 0.6931472, %v20930_v44  ;;  %v20932_v37 = vpop.eup %20931 }
 0xa6f   : > { %v9257_v11 = vsub.f32 %v25302_v62, %v9251_v45  ;;  %v9255_v34 = vmul.f32 0.6931472, %v20932_v37  ;;  %v20934_v32 = vpop.eup %20933  ;;  %v9003_v55 = vpop.xlane.xlu1 %9002 }
 0xa70   : > { %v9256_v2 = vsub.f32 %v25306_v38, %v9249_v13  ;;  %v9253_v24 = vmul.f32 0.6931472, %v20934_v32  ;;  %v9000_v42 = vpop.xlane.xlu0 %8999  ;;  %20943 = vlog2.f32 %v9003_v55 }
 0xa71   : > { %v10973_v47 = vcombine.high %v9257_v11, %v9257_v11  ;;  %v10980_v5 = vrot.slane %v9257_v11, %v25520_v41  ;;  %v9259_v46 = vsub.f32 %v25310_v61, %v9255_v34  ;;  %20945 = vlog2.f32 %v9000_v42 }
 0xa72   : > { %v10924_v33 = vcombine.high %v9256_v2, %v9256_v2  ;;  %v10931_v62 = vrot.slane %v9256_v2, %v25520_v41  ;;  %v20936_v61 = vpop.eup %20935  ;;  %v9258_v15 = vsub.f32 %v25315_v49, %v9253_v24 }
 0xa73   : > { %v10987_v14 = vrot.slane %v10973_v47, %v25520_v41  ;;  %v10988_v25 = vcombine.high %v10980_v5, %v10980_v5  ;;  %v25529_v1 = vrot.slane %v10980_v5, %v25520_v41  ;;  %v11071_v16 = vcombine.high %v9259_v46, %v9259_v46  ;;  %v20938_v34 = vpop.eup %20937 }
 0xa74   : > { %v10938_v38 = vrot.slane %v10924_v33, %v25520_v41  ;;  %v10939_v9 = vcombine.high %v10931_v62, %v10931_v62  ;;  %v25549_v11 = vrot.slane %v10931_v62, %v25520_v41  ;;  %v11078_v21 = vrot.slane %v9259_v46, %v25520_v41 }
 0xa75   : > { %v10989_v26 = vcombine.high %v10987_v14, %v10987_v14  ;;  %v25533_v28 = vrot.slane %v10988_v25, %v25520_v41  ;;  %v25536_v12 = vrot.slane %v10987_v14, %v25520_v41  ;;  %v11018_v7 = vcombine.high %v25529_v1, %v25529_v1 }
 0xa76   : > { %v10940_v44 = vcombine.high %v10938_v38, %v10938_v38  ;;  %v11085_v37 = vrot.slane %v11071_v16, %v25520_v41  ;;  %v9489_v40 = vmul.f32 0.6931472, %v20936_v61  ;;  %v25560_v47 = vrot.slane %v10938_v38, %v25520_v41 }
 0xa77   : > { %v25544_v45 = vrot.slane %v10989_v26, %v25520_v41  ;;  %v11020_v13 = vcombine.high %v25533_v28, %v25533_v28  ;;  %v11019_v58 = vcombine.high %v25536_v12, %v25536_v12  ;;  %v25563_v5 = vrot.slane %v10939_v9, %v25520_v41 }
 0xa78   : > { %27236 = vst [vmem:[#allocation21_spill] sm:$0xff] %v25560_v47  ;;  %v25566_v0 = vrot.slane %v11018_v7, %v25538_v19  ;;  %v25571_v32 = vrot.slane %v10940_v44, %v25520_v41  ;;  %v11022_v14 = vcombine.high %v9258_v15, %v9258_v15  ;;  %v10969_v46 = vcombine.high %v25549_v11, %v25549_v11  ;;  %v20940_v7 = vpop.eup %20939 }
 0xa79   : > { %v11021_v25 = vcombine.high %v25544_v45, %v25544_v45  ;;  %v25576_v6 = vrot.slane %v11020_v13, %v25538_v19  ;;  %v11086_v62 = vcombine.high %v11078_v21, %v11078_v21  ;;  %v25583_v24 = vrot.slane %v11019_v58, %v25538_v19 }
 0xa7a   : > { %27237 = vst [vmem:[#allocation22_spill] sm:$0xff] %v25571_v32  ;;  %v11087_v26 = vcombine.high %v11085_v37, %v11085_v37  ;;  %v9495_v55 = vsub.f32 %v25322_v57, %v9489_v40  ;;  %v10970_v16 = vcombine.high %v25560_v47, %v25560_v47  ;;  %v10971_v61 = vcombine.high %v25563_v5, %v25563_v5  ;;  %v20942_v40 = vpop.eup %20941 }
 0xa7b   : > { %v11029_v9 = vrot.slane %v9258_v15, %v25520_v41  ;;  %v9487_v42 = vmul.f32 0.6931472, %v20938_v34  ;;  %v10972_v44 = vcombine.high %v25571_v32, %v25571_v32  ;;  %v25596_v58 = vrot.slane %v11078_v21, %v25520_v41  ;;  %v25610_v33 = vpop.eup %20943 }
 0xa7c   : > { %v11036_v57 = vrot.slane %v11022_v14, %v25520_v41  ;;  %v25600_v38 = vrot.slane %v11021_v25, %v25538_v19  ;;  %v25605_v34 = vrot.slane %v11085_v37, %v25520_v41  ;;  %v25608_v2 = vrot.slane %v11086_v62, %v25520_v41  ;;  %v25626_v23 = vpop.eup %20945 }
 0xa7d   : > { %v25613_v21 = vrot.slane %v10969_v46, %v25538_v19  ;;  %v25618_v25 = vrot.slane %v11087_v26, %v25520_v41  ;;  %v11173_v13 = vcombine.high %v9495_v55, %v9495_v55  ;;  %v25621_v15 = vrot.slane %v10971_v61, %v25538_v19 }
 0xa7e   : > { %v11037_v62 = vcombine.high %v11029_v9, %v11029_v9  ;;  %v9494_v49 = vsub.f32 %v25326_v17, %v9487_v42  ;;  %v25629_v46 = vrot.slane %v10970_v16, %v25538_v19  ;;  %v11116_v14 = vcombine.high %v25596_v58, %v25596_v58 }
 0xa7f   : > { %27238 = vst [vmem:[#allocation23_spill] sm:$0xff] %v25613_v21  ;;  %27239 = vst [vmem:[#allocation24_spill] sm:$0xff] %v25621_v15  ;;  %v11038_v26 = vcombine.high %v11036_v57, %v11036_v57  ;;  %v11180_v63 = vrot.slane %v9495_v55, %v25520_v41  ;;  %v25635_v61 = vrot.slane %v10972_v44, %v25538_v19  ;;  %v9493_v56 = vmul.f32 0.6931472, %v20940_v7 }
 0xa80   : > { %27240 = vst [vmem:[#allocation25_spill] sm:$0xff] %v25629_v46  ;;  %v11117_v37 = vcombine.high %v25605_v34, %v25605_v34  ;;  %v11118_v17 = vcombine.high %v25608_v2, %v25608_v2  ;;  %v25642_v42 = vrot.slane %v11029_v9, %v25520_v41  ;;  %v11119_v16 = vcombine.high %v25618_v25, %v25618_v25 }
 0xa81   : > { %27241 = vst [vmem:[#allocation26_spill] sm:$0xff] %v25635_v61  ;;  %v25647_v30 = vrot.slane %v11036_v57, %v25520_v41  ;;  %v11187_v55 = vrot.slane %v11173_v13, %v25520_v41  ;;  %v25655_v36 = vrot.slane %v11037_v62, %v25520_v41  ;;  %v11124_v9 = vcombine.high %v9494_v49, %v9494_v49 }
 0xa82   : > { %27242 = vst [vmem:[#allocation27_spill] sm:$0xff] %v25642_v42  ;;  %v25658_v48 = vrot.slane %v11116_v14, %v25538_v19  ;;  %v25663_v53 = vrot.slane %v11038_v26, %v25520_v41  ;;  %v11188_v7 = vcombine.high %v11180_v63, %v11180_v63  ;;  %v25666_v13 = vrot.slane %v11118_v17, %v25538_v19 }
 0xa83   : > { %27243 = vst [vmem:[#allocation28_spill] sm:$0xff] %v25647_v30  ;;  %27244 = vst [vmem:[#allocation29_spill] sm:$0xff] %v25655_v36  ;;  %v25671_v62 = vrot.slane %v11117_v37, %v25538_v19  ;;  %v11067_v14 = vcombine.high %v25642_v42, %v25642_v42  ;;  %v25676_v44 = vrot.slane %v11119_v16, %v25538_v19  ;;  %v9491_v35 = vmul.f32 0.6931472, %v20942_v40  ;;  %v9009_v16 = vpop.xlane.xlu1 %9008 }
 0xa84   : > { %27245 = vst [vmem:[#allocation30_spill] sm:$0xff] %v25663_v53  ;;  %v11068_v26 = vcombine.high %v25647_v30, %v25647_v30  ;;  %v11189_v57 = vcombine.high %v11187_v55, %v11187_v55  ;;  %v11069_v17 = vcombine.high %v25655_v36, %v25655_v36  ;;  %v11131_v43 = vrot.slane %v9494_v49, %v25520_v41 }
 0xa85   : > { %v11138_v52 = vrot.slane %v11124_v9, %v25520_v41  ;;  %v9497_v37 = vsub.f32 %v25338_v8, %v9493_v56  ;;  %v11070_v22 = vcombine.high %v25663_v53, %v25663_v53  ;;  %v25690_v20 = vrot.slane %v11180_v63, %v25520_v41 }
 0xa86   : > { %v25693_v40 = vrot.slane %v11188_v7, %v25520_v41  ;;  %v25698_v49 = vrot.slane %v11067_v14, %v25538_v19  ;;  %v25705_v9 = vrot.slane %v11068_v26, %v25538_v19  ;;  %v25708_v63 = vrot.slane %v11187_v55, %v25520_v41 }
 0xa87   : > { %v25711_v7 = vrot.slane %v11189_v57, %v25520_v41  ;;  %v9496_v4 = vsub.f32 %v25344_v60, %v9491_v35  ;;  %v25715_v14 = vrot.slane %v11069_v17, %v25538_v19  ;;  %v11139_v29 = vcombine.high %v11131_v43, %v11131_v43 }
 0xa88   : > { %27246 = vst [vmem:[#allocation31_spill] sm:$0xff] %v25698_v49  ;;  %27247 = vst [vmem:[#allocation32_spill] sm:$0xff] %v25705_v9  ;;  %v11140_v8 = vcombine.high %v11138_v52, %v11138_v52  ;;  %v11271_v39 = vcombine.high %v9497_v37, %v9497_v37  ;;  %v25718_v56 = vrot.slane %v11070_v22, %v25538_v19  ;;  %v9013_v17 = vmul.f32 0.6931472, %v25610_v33 }
 0xa89   : > { %27248 = vst [vmem:[#allocation33_spill] sm:$0xff] %v25715_v14  ;;  %v11218_v26 = vcombine.high %v25690_v20, %v25690_v20  ;;  %v11220_v55 = vcombine.high %v25693_v40, %v25693_v40  ;;  %v11278_v57 = vrot.slane %v9497_v37, %v25520_v41  ;;  %v25728_v35 = vrot.slane %v11131_v43, %v25520_v41 }
 0xa8a   : > { %27249 = vst [vmem:[#allocation34_spill] sm:$0xff] %v25718_v56  ;;  %20947 = vlog2.f32 %v9009_v16  ;;  %v11219_v22 = vcombine.high %v25708_v63, %v25708_v63  ;;  %v11221_v59 = vcombine.high %v25711_v7, %v25711_v7  ;;  %v25736_v27 = vrot.slane %v11138_v52, %v25520_v41 }
 0xa8b   : > { %27250 = vst [vmem:[#allocation35_spill] sm:$0xff] %v25728_v35  ;;  %v11222_v54 = vcombine.high %v9496_v4, %v9496_v4  ;;  %v25741_v60 = vrot.slane %v11139_v29, %v25520_v41  ;;  %v25744_v43 = vrot.slane %v11140_v8, %v25520_v41  ;;  %v11285_v33 = vrot.slane %v11271_v39, %v25520_v41 }
 0xa8c   : > { %27251 = vst [vmem:[#allocation36_spill] sm:$0xff] %v25736_v27  ;;  %v25748_v16 = vrot.slane %v11218_v26, %v25538_v19  ;;  %v25751_v56 = vrot.slane %v11220_v55, %v25538_v19  ;;  %v11286_v14 = vcombine.high %v11278_v57, %v11278_v57  ;;  %v11169_v29 = vcombine.high %v25728_v35, %v25728_v35 }
 0xa8d   : > { %27252 = vst [vmem:[#allocation37_spill] sm:$0xff] %v25741_v60  ;;  %27253 = vst [vmem:[#allocation38_spill] sm:$0xff] %v25744_v43  ;;  %v11229_v8 = vrot.slane %v9496_v4, %v25520_v41  ;;  %v9019_v39 = vsub.f32 %v25361_v50, %v9013_v17  ;;  %v25762_v26 = vrot.slane %v11219_v22, %v25538_v19  ;;  %v9006_v17 = vpop.xlane.xlu0 %9005  ;;  %v9011_v36 = vmul.f32 0.6931472, %v25626_v23 }
 0xa8e   : > { %v25765_v55 = vrot.slane %v11221_v59, %v25538_v19  ;;  %v11170_v52 = vcombine.high %v25736_v27, %v25736_v27  ;;  %v11236_v9 = vrot.slane %v11222_v54, %v25520_v41  ;;  %v11171_v37 = vcombine.high %v25741_v60, %v25741_v60 }
 0xa8f   : > { %v11172_v53 = vcombine.high %v25744_v43, %v25744_v43  ;;  %v11287_v4 = vcombine.high %v11285_v33, %v11285_v33  ;;  %v25779_v22 = vrot.slane %v11278_v57, %v25520_v41  ;;  %v25782_v49 = vrot.slane %v11285_v33, %v25520_v41 }
 0xa90   : > { %v25785_v54 = vrot.slane %v11286_v14, %v25520_v41  ;;  %v25790_v30 = vrot.slane %v11169_v29, %v25538_v19  ;;  %v11237_v50 = vcombine.high %v11229_v8, %v11229_v8  ;;  %v10741_v42 = vcombine.high %v9019_v39, %v9019_v39 }
 0xa91   : > { %v25795_v57 = vrot.slane %v11170_v52, %v25538_v19  ;;  %v11238_v27 = vcombine.high %v11236_v9, %v11236_v9  ;;  %20949 = vlog2.f32 %v9006_v17  ;;  %v25798_v14 = vrot.slane %v11171_v37, %v25538_v19 }
 0xa92   : > { %27254 = vst [vmem:[#allocation39_spill] sm:$0xff] %v25790_v30  ;;  %v25801_v61 = vrot.slane %v11172_v53, %v25538_v19  ;;  %v25804_v29 = vrot.slane %v11287_v4, %v25520_v41  ;;  %v11316_v59 = vcombine.high %v25779_v22, %v25779_v22  ;;  %v11317_v52 = vcombine.high %v25782_v49, %v25782_v49 }
 0xa93   : > { %27255 = vst [vmem:[#allocation40_spill] sm:$0xff] %v25795_v57  ;;  %27256 = vst [vmem:[#allocation41_spill] sm:$0xff] %v25798_v14  ;;  %v11318_v17 = vcombine.high %v25785_v54, %v25785_v54  ;;  %v25814_v37 = vrot.slane %v11229_v8, %v25520_v41  ;;  %v25819_v4 = vrot.slane %v11237_v50, %v25520_v41 }
 0xa94   : > { %v20948_v33 = vpop.eup %20947  ;;  %27257 = vst [vmem:[#allocation42_spill] sm:$0xff] %v25801_v61  ;;  %v10748_v23 = vrot.slane %v9019_v39, %v25520_v41  ;;  %v10755_v61 = vrot.slane %v10741_v42, %v25520_v41  ;;  %v25826_v43 = vrot.slane %v11236_v9, %v25520_v41  ;;  %v25829_v14 = vrot.slane %v11238_v27, %v25520_v41 }
 0xa95   : > { %27258 = vst [vmem:[#allocation43_spill] sm:$0xff] %v25814_v37  ;;  %27259 = vst [vmem:[#allocation44_spill] sm:$0xff] %v25819_v4  ;;  %v9017_v8 = vmul.f32 0.6931472, %v20948_v33  ;;  %v11319_v53 = vcombine.high %v25804_v29, %v25804_v29  ;;  %v12583_v50 = vrot.slane %v25785_v54, %v25538_v19  ;;  %v9018_v42 = vsub.f32 %v25367_v3, %v9011_v36 }
 0xa96   : > { %27260 = vst [vmem:[#allocation45_spill] sm:$0xff] %v25826_v43  ;;  %27261 = vst [vmem:[#allocation46_spill] sm:$0xff] %v25829_v14  ;;  %v25839_v57 = vrot.slane %v11316_v59, %v25538_v19  ;;  %v25842_v9 = vrot.slane %v11318_v17, %v25538_v19  ;;  %v25845_v27 = vrot.slane %v11317_v52, %v25538_v19 }
 0xa97   : > { %v11267_v33 = vcombine.high %v25814_v37, %v25814_v37  ;;  %v11269_v54 = vcombine.high %v25819_v4, %v25819_v4  ;;  %v10756_v30 = vcombine.high %v10748_v23, %v10748_v23  ;;  %v10757_v18 = vcombine.high %v10755_v61, %v10755_v61  ;;  %v9717_v4 = vpop.xlane.xlu1 %9716 }
 0xa98   : > { %v9021_v39 = vsub.f32 %v25379_v51, %v9017_v8  ;;  %v11268_v3 = vcombine.high %v25826_v43, %v25826_v43  ;;  %v11270_v36 = vcombine.high %v25829_v14, %v25829_v14  ;;  %v25857_v59 = vrot.slane %v10748_v23, %v25520_v41 }
 0xa99   : > { %v25860_v52 = vrot.slane %v10755_v61, %v25520_v41  ;;  %v25863_v17 = vrot.slane %v11319_v53, %v25538_v19  ;;  %v10692_v8 = vcombine.high %v9018_v42, %v9018_v42  ;;  %v25870_v46 = vrot.slane %v11267_v33, %v25538_v19 }
 0xa9a   : > { %v10839_v15 = vcombine.high %v9021_v39, %v9021_v39  ;;  %v10846_v61 = vrot.slane %v9021_v39, %v25520_v41  ;;  %v25876_v53 = vrot.slane %v11269_v54, %v25538_v19  ;;  %v10778_v37 = vrot.slane %v10756_v30, %v25520_v41 }
 0xa9b   : > { %v20950_v35 = vpop.eup %20949  ;;  %27262 = vst [vmem:[#allocation47_spill] sm:$0xff] %v25870_v46  ;;  %v25882_v51 = vrot.slane %v10757_v18, %v25520_v41  ;;  %v25885_v33 = vrot.slane %v11268_v3, %v25538_v19  ;;  %v25888_v23 = vrot.slane %v11270_v36, %v25538_v19  ;;  %v10786_v39 = vcombine.high %v25857_v59, %v25857_v59 }
 0xa9c   : > { %27263 = vst [vmem:[#allocation48_spill] sm:$0xff] %v25876_v53  ;;  %v10787_v54 = vcombine.high %v25860_v52, %v25860_v52  ;;  %v9714_v53 = vpop.xlane.xlu0 %9713  ;;  %v27266_v30 = vrot.slane %v25529_v1, %v25538_v19  ;;  %v10699_v60 = vrot.slane %v9018_v42, %v25520_v41  ;;  %v10706_v3 = vrot.slane %v10692_v8, %v25520_v41 }
 0xa9d   : > { %27264 = vst [vmem:[#allocation49_spill] sm:$0xff] %v25885_v33  ;;  %27265 = vst [vmem:[#allocation50_spill] sm:$0xff] %v25888_v23  ;;  %v9015_v33 = vmul.f32 0.6931472, %v20950_v35  ;;  %v10853_v36 = vrot.slane %v10839_v15, %v25520_v41  ;;  %v10854_v23 = vcombine.high %v10846_v61, %v10846_v61  ;;  %v10862_v14 = vrot.slane %v10846_v61, %v25520_v41 }
 0xa9e   : > { %v13448_v18 = vsel %vm696_vm9, %v25857_v59, %v27266_v30  ;;  %20951 = vlog2.f32 %v9717_v4  ;;  %v10788_v46 = vcombine.high %v10778_v37, %v10778_v37  ;;  %v10789_v43 = vcombine.high %v25882_v51, %v25882_v51 }
 0xa9f   : > { %v27267_v1 = vrot.slane %v25536_v12, %v25538_v19  ;;  %20953 = vlog2.f32 %v9714_v53  ;;  %v10855_v42 = vcombine.high %v10853_v36, %v10853_v36  ;;  %v10869_v35 = vrot.slane %v10853_v36, %v25520_v41 }
 0xaa0   : > { %v10876_v15 = vrot.slane %v10854_v23, %v25520_v41  ;;  %v10884_v8 = vcombine.high %v10862_v14, %v10862_v14  ;;  %v10707_v30 = vcombine.high %v10699_v60, %v10699_v60  ;;  %v10708_v61 = vcombine.high %v10706_v3, %v10706_v3 }
 0xaa1   : > { %v13452_v59 = vsel %vm696_vm9, %v25860_v52, %v27267_v1  ;;  %v27268_v4 = vrot.slane %v25596_v58, %v25538_v19  ;;  %v9020_v47 = vsub.f32 %v25384_v10, %v9015_v33  ;;  %v10883_v12 = vrot.slane %v10855_v42, %v25520_v41 }
 0xaa2   : > { %v10885_v21 = vcombine.high %v10869_v35, %v10869_v35  ;;  %v10886_v52 = vcombine.high %v10876_v15, %v10876_v15  ;;  %v27269_v53 = vrot.slane %v25608_v2, %v25538_v19  ;;  %v13466_v23 = vsel %vm696_vm9, %v10884_v8, %v25658_v48  ;;  %v9723_v8 = vpop.xlane.xlu1 %9722 }
 0xaa3   : > { %v13464_v32 = vsel %vm696_vm9, %v10862_v14, %v27268_v4  ;;  %v27270_v1 = vrot.slane %v25605_v34, %v25538_v19  ;;  %v27271_v10 = vrot.slane %v25779_v22, %v25538_v19  ;;  %v10887_v2 = vcombine.high %v10883_v12, %v10883_v12 }
 0xaa4   : > { %v13465_v36 = vsel %vm696_vm9, %v10876_v15, %v27269_v53  ;;  %v13467_v42 = vsel %vm696_vm9, %v10886_v52, %v25666_v13  ;;  %v27272_v48 = vrot.slane %v25618_v25, %v25538_v19  ;;  %v25947_v22 = vsel %vm790_vm4, %v13466_v23, %v25839_v57 }
 0xaa5   : > { %v13468_v58 = vsel %vm696_vm9, %v10869_v35, %v27270_v1  ;;  %v25932_v14 = vsel %vm790_vm4, %v13464_v32, %v27271_v10  ;;  %v25935_v33 = vsel %vm790_vm4, %v13465_v36, %v12583_v50  ;;  %v13470_v35 = vsel %vm696_vm9, %v10885_v21, %v25671_v62 }
 0xaa6   : > { %v13469_v34 = vsel %vm696_vm9, %v10883_v12, %v27272_v48  ;;  %v25951_v32 = vsel %vm790_vm4, %v13467_v42, %v25842_v9  ;;  %v27273_v50 = vrot.slane %v25782_v49, %v25538_v19  ;;  %v27274_v25 = vrot.slane %v25804_v29, %v25538_v19  ;;  %v27283_v42 = vld [vmem:[#allocation23_spill] sm:$0xff]  ;;  %v27284_v48 = vld [vmem:[#allocation21_spill] sm:$0xff] }
 0xaa7   : > { %v27275_v21 = vrot.slane %v25533_v28, %v25538_v19  ;;  %v13471_v57 = vsel %vm696_vm9, %v10887_v2, %v25676_v44  ;;  %v25973_v49 = vsel %vm790_vm4, %v13470_v35, %v25845_v27  ;;  %v10790_v9 = vcombine.high %v9020_v47, %v9020_v47  ;;  %v27286_v35 = vld [vmem:[#allocation22_spill] sm:$0xff] }
 0xaa8   : > { %v25957_v13 = vsel %vm790_vm4, %v13468_v58, %v27273_v50  ;;  %v25963_v15 = vsel %vm790_vm4, %v13469_v34, %v27274_v25  ;;  %v13450_v29 = vsel %vm696_vm9, %v10786_v39, %v25566_v0  ;;  %v27276_v4 = vrot.slane %v25544_v45, %v25538_v19  ;;  %v20952_v12 = vpop.eup %20951 }
 0xaa9   : > { %v13449_v62 = vsel %vm696_vm9, %v10778_v37, %v27275_v21  ;;  %v10715_v37 = vrot.slane %v10699_v60, %v25520_v41  ;;  %v25985_v44 = vsel %vm790_vm4, %v13471_v57, %v25863_v17  ;;  %v13451_v27 = vsel %vm696_vm9, %v10788_v46, %v25576_v6  ;;  %v20954_v39 = vpop.eup %20953  ;;  %v27288_v21 = vld [vmem:[#allocation24_spill] sm:$0xff]  ;;  %v27289_v57 = vld [vmem:[#allocation25_spill] sm:$0xff] }
 0xaaa   : > { %v13453_v28 = vsel %vm696_vm9, %v25882_v51, %v27276_v4  ;;  %v13454_v52 = vsel %vm696_vm9, %v10787_v54, %v25583_v24  ;;  %v10722_v0 = vrot.slane %v10706_v3, %v25520_v41  ;;  %v10729_v45 = vrot.slane %v10707_v30, %v25520_v41 }
 0xaab   : > { %v27277_v51 = vrot.slane %v25690_v20, %v25538_v19  ;;  %v27278_v17 = vrot.slane %v25693_v40, %v25538_v19  ;;  %v10736_v6 = vrot.slane %v10708_v61, %v25520_v41  ;;  %20955 = vlog2.f32 %v9723_v8 }
 0xaac   : > { %v13455_v24 = vsel %vm696_vm9, %v10789_v43, %v25600_v38  ;;  %v26010_v46 = vsel %vm790_vm4, %v13450_v29, %v25748_v16  ;;  %v10797_v20 = vrot.slane %v9020_v47, %v25520_v41  ;;  %v10804_v54 = vrot.slane %v10790_v9, %v25520_v41  ;;  %v27290_v29 = vld [vmem:[#allocation35_spill] sm:$0xff] }
 0xaad   : > { %v25997_v60 = vsel %vm790_vm4, %v13448_v18, %v27277_v51  ;;  %v26003_v53 = vsel %vm790_vm4, %v13449_v62, %v27278_v17  ;;  %v26016_v40 = vsel %vm790_vm4, %v13451_v27, %v25751_v56  ;;  %v27279_v18 = vrot.slane %v25708_v63, %v25538_v19  ;;  %v27295_v51 = vld [vmem:[#allocation26_spill] sm:$0xff] }
 0xaae   : > { %v27280_v38 = vrot.slane %v25711_v7, %v25538_v19  ;;  %v10737_v16 = vcombine.high %v10715_v37, %v10715_v37  ;;  %v26032_v47 = vsel %vm790_vm4, %v13454_v52, %v25762_v26  ;;  %v10738_v30 = vcombine.high %v10722_v0, %v10722_v0 }
 0xaaf   : > { %v26022_v3 = vsel %vm790_vm4, %v13452_v59, %v27279_v18  ;;  %v10739_v56 = vcombine.high %v10729_v45, %v10729_v45  ;;  %v9727_v61 = vmul.f32 0.6931472, %v20952_v12  ;;  %v26036_v63 = vsel %vm790_vm4, %v13455_v24, %v25765_v55 }
 0xab0   : > { %v26028_v43 = vsel %vm790_vm4, %v13453_v28, %v27280_v38  ;;  %v10740_v59 = vcombine.high %v10736_v6, %v10736_v6  ;;  %v27281_v36 = vrot.slane %v25549_v11, %v25538_v19  ;;  %v9725_v23 = vmul.f32 0.6931472, %v20954_v39  ;;  %v9720_v39 = vpop.xlane.xlu0 %9719 }
 0xab1   : > { %v27282_v1 = vrot.slane %v25563_v5, %v25538_v19  ;;  %v10805_v58 = vcombine.high %v10797_v20, %v10797_v20  ;;  %v10806_v10 = vcombine.high %v10804_v54, %v10804_v54  ;;  %v9733_v2 = vsub.f32 %v25394_v31, %v9727_v61 }
 0xab2   : > { %v13440_v7 = vsel %vm696_vm9, %v10715_v37, %v27281_v36  ;;  %v13442_v55 = vsel %vm696_vm9, %v10737_v16, %v27283_v42  ;;  %v27285_v34 = vrot.slane %v27284_v48, %v25538_v19  ;;  %v27287_v50 = vrot.slane %v27286_v35, %v25538_v19  ;;  %v27292_v37 = vld [vmem:[#allocation37_spill] sm:$0xff]  ;;  %v27304_v42 = vld [vmem:[#allocation40_spill] sm:$0xff]  ;;  %v27305_v48 = vld [vmem:[#allocation42_spill] sm:$0xff] }
 0xab3   : > { %v13441_v26 = vsel %vm696_vm9, %v10729_v45, %v27282_v1  ;;  %v10813_v5 = vrot.slane %v10797_v20, %v25520_v41  ;;  %v13443_v62 = vsel %vm696_vm9, %v10739_v56, %v27288_v21  ;;  %v13446_v31 = vsel %vm696_vm9, %v10738_v30, %v27289_v57  ;;  %v27297_v16 = vld [vmem:[#allocation41_spill] sm:$0xff]  ;;  %v27302_v1 = vld [vmem:[#allocation27_spill] sm:$0xff]  ;;  %v27306_v21 = vld [vmem:[#allocation28_spill] sm:$0xff] }
 0xab4   : > { %v13444_v11 = vsel %vm696_vm9, %v10722_v0, %v27285_v34  ;;  %v13445_v25 = vsel %vm696_vm9, %v10736_v6, %v27287_v50  ;;  %v11373_v9 = vcombine.high %v9733_v2, %v9733_v2  ;;  %v11380_v8 = vrot.slane %v9733_v2, %v25520_v41  ;;  %v27294_v0 = vld [vmem:[#allocation2_spill] sm:$0xff]  ;;  %v27296_v6 = vld [vmem:[#allocation39_spill] sm:$0xff] }
 0xab5   : > { %v27291_v4 = vrot.slane %v27290_v29, %v25538_v19  ;;  %v27293_v12 = vrot.slane %v27292_v37, %v25538_v19  ;;  %v10820_v52 = vrot.slane %v10804_v54, %v25520_v41  ;;  %v9732_v45 = vsub.f32 %v27294_v0, %v9725_v23  ;;  %v20956_v38 = vpop.eup %20955  ;;  %v27298_v54 = vld [vmem:[#allocation36_spill] sm:$0xff]  ;;  %v27308_v29 = vld [vmem:[#allocation29_spill] sm:$0xff]  ;;  %v27310_v37 = vld [vmem:[#allocation31_spill] sm:$0xff] }
 0xab6   : > { %v13447_v17 = vsel %vm696_vm9, %v10740_v59, %v27295_v51  ;;  %v26081_v24 = vsel %vm790_vm4, %v13442_v55, %v27296_v6  ;;  %v10827_v20 = vrot.slane %v10805_v58, %v25520_v41  ;;  %v10834_v18 = vrot.slane %v10806_v10, %v25520_v41  ;;  %v27300_v59 = vld [vmem:[#allocation38_spill] sm:$0xff]  ;;  %v27311_v0 = vld [vmem:[#allocation43_spill] sm:$0xff] }
 0xab7   : > { %v26067_v28 = vsel %vm790_vm4, %v13440_v7, %v27291_v4  ;;  %v26073_v27 = vsel %vm790_vm4, %v13441_v26, %v27293_v12  ;;  %v26087_v30 = vsel %vm790_vm4, %v13443_v62, %v27297_v16  ;;  %v27299_v56 = vrot.slane %v27298_v54, %v25538_v19  ;;  %v27313_v6 = vld [vmem:[#allocation30_spill] sm:$0xff] }
 0xab8   : > { %v27301_v36 = vrot.slane %v27300_v59, %v25538_v19  ;;  %v10835_v23 = vcombine.high %v10813_v5, %v10813_v5  ;;  %v27303_v26 = vrot.slane %v27302_v1, %v25538_v19  ;;  %v11387_v10 = vrot.slane %v11373_v9, %v25520_v41  ;;  %v9955_v9 = vpop.xlane.xlu1 %9954  ;;  %v27316_v1 = vld [vmem:[#allocation33_spill] sm:$0xff] }
 0xab9   : > { %v26093_v61 = vsel %vm790_vm4, %v13444_v11, %v27299_v56  ;;  %v11388_v2 = vcombine.high %v11380_v8, %v11380_v8  ;;  %20957 = vlog2.f32 %v9720_v39  ;;  %v26108_v55 = vsel %vm790_vm4, %v13446_v31, %v27304_v42  ;;  %v27315_v56 = vld [vmem:[#allocation32_spill] sm:$0xff] }
 0xaba   : > { %v26099_v7 = vsel %vm790_vm4, %v13445_v25, %v27301_v36  ;;  %v13456_v58 = vsel %vm696_vm9, %v10813_v5, %v27303_v26  ;;  %v26112_v34 = vsel %vm790_vm4, %v13447_v17, %v27305_v48  ;;  %v10836_v11 = vcombine.high %v10820_v52, %v10820_v52  ;;  %v27317_v26 = vld [vmem:[#allocation34_spill] sm:$0xff] }
 0xabb   : > { %v11324_v35 = vcombine.high %v9732_v45, %v9732_v45  ;;  %v10837_v50 = vcombine.high %v10827_v20, %v10827_v20  ;;  %v10838_v25 = vcombine.high %v10834_v18, %v10834_v18  ;;  %v27307_v62 = vrot.slane %v27306_v21, %v25538_v19  ;;  %v27323_v21 = vld [vmem:[#allocation47_spill] sm:$0xff] }
 0xabc   : > { %v9731_v57 = vmul.f32 0.6931472, %v20956_v38  ;;  %v27309_v4 = vrot.slane %v27308_v29, %v25538_v19  ;;  %v13458_v12 = vsel %vm696_vm9, %v10835_v23, %v27310_v37  ;;  %v27312_v39 = vrot.slane %v27311_v0, %v25538_v19  ;;  %v9952_v29 = vpop.xlane.xlu0 %9951 }
 0xabd   : > { %v13460_v5 = vsel %vm696_vm9, %v10820_v52, %v27307_v62  ;;  %v11396_v17 = vrot.slane %v11380_v8, %v25520_v41  ;;  %v27314_v52 = vrot.slane %v27313_v6, %v25538_v19  ;;  %v11389_v16 = vcombine.high %v11387_v10, %v11387_v10  ;;  %v27324_v62 = vld [vmem:[#allocation46_spill] sm:$0xff] }
 0xabe   : > { %v13457_v31 = vsel %vm696_vm9, %v10827_v20, %v27309_v4  ;;  %v26128_v51 = vsel %vm790_vm4, %v13456_v58, %v27312_v39  ;;  %v11410_v54 = vrot.slane %v11388_v2, %v25520_v41  ;;  %v11331_v20 = vrot.slane %v9732_v45, %v25520_v41  ;;  %v27320_v45 = vld [vmem:[#allocation3_spill] sm:$0xff]  ;;  %v27326_v4 = vld [vmem:[#allocation49_spill] sm:$0xff]  ;;  %v27327_v39 = vld [vmem:[#allocation48_spill] sm:$0xff] }
 0xabf   : > { %v13461_v38 = vsel %vm696_vm9, %v10834_v18, %v27314_v52  ;;  %v13462_v59 = vsel %vm696_vm9, %v10836_v11, %v27315_v56  ;;  %v11403_v36 = vrot.slane %v11387_v10, %v25520_v41  ;;  %v11338_v23 = vrot.slane %v11324_v35, %v25520_v41  ;;  %v27318_v18 = vld [vmem:[#allocation45_spill] sm:$0xff]  ;;  %v27321_v11 = vld [vmem:[#allocation44_spill] sm:$0xff]  ;;  %v27328_v6 = vld [vmem:[#allocation50_spill] sm:$0xff] }
 0xac0   : > { %20959 = vlog2.f32 %v9955_v9  ;;  %v13459_v8 = vsel %vm696_vm9, %v10837_v50, %v27316_v1  ;;  %v13463_v58 = vsel %vm696_vm9, %v10838_v25, %v27317_v26  ;;  %v27319_v42 = vrot.slane %v27318_v18, %v25538_v19 }
 0xac1   : > { %v9735_v48 = vsub.f32 %v27320_v45, %v9731_v57  ;;  %v27322_v10 = vrot.slane %v27321_v11, %v25538_v19  ;;  %v26160_v50 = vsel %vm790_vm4, %v13458_v12, %v27323_v21  ;;  %v27325_v25 = vrot.slane %v27324_v62, %v25538_v19  ;;  %v9961_v11 = vpop.xlane.xlu1 %9960 }
 0xac2   : > { %v26149_v2 = vsel %vm790_vm4, %v13460_v5, %v27319_v42  ;;  %v11418_v5 = vcombine.high %v11396_v17, %v11396_v17  ;;  %v26170_v57 = vsel %vm790_vm4, %v13462_v59, %v27326_v4  ;;  %v11417_v37 = vrot.slane %v11389_v16, %v25520_v41 }
 0xac3   : > { %v26156_v35 = vsel %vm790_vm4, %v13457_v31, %v27322_v10  ;;  %v26166_v9 = vsel %vm790_vm4, %v13461_v38, %v27325_v25  ;;  %v11420_v31 = vcombine.high %v11410_v54, %v11410_v54  ;;  %v11339_v0 = vcombine.high %v11331_v20, %v11331_v20  ;;  %v20958_v1 = vpop.eup %20957 }
 0xac4   : > { %v26175_v12 = vsel %vm790_vm4, %v13459_v8, %v27327_v39  ;;  %v26179_v52 = vsel %vm790_vm4, %v13463_v58, %v27328_v6  ;;  %v11419_v38 = vcombine.high %v11403_v36, %v11403_v36  ;;  %v11340_v56 = vcombine.high %v11338_v23, %v11338_v23  ;;  %v27329_v6 = vld [vmem:[#allocation4_spill] sm:$0xff] }
 0xac5   : > { %v11347_v26 = vrot.slane %v11331_v20, %v25520_v41  ;;  %v11471_v18 = vcombine.high %v9735_v48, %v9735_v48  ;;  %v11478_v59 = vrot.slane %v9735_v48, %v25520_v41  ;;  %20961 = vlog2.f32 %v9952_v29 }
 0xac6   : > { %v12675_v16 = vrot.slane %v11396_v17, %v25538_v19  ;;  %v12679_v42 = vrot.slane %v11410_v54, %v25538_v19  ;;  %v12683_v8 = vrot.slane %v11418_v5, %v25538_v19  ;;  %v12691_v45 = vrot.slane %v11403_v36, %v25538_v19 }
 0xac7   : > { %v11421_v58 = vcombine.high %v11417_v37, %v11417_v37  ;;  %v12687_v10 = vrot.slane %v11420_v31, %v25538_v19  ;;  %v11354_v21 = vrot.slane %v11338_v23, %v25520_v41  ;;  %v11361_v20 = vrot.slane %v11339_v0, %v25520_v41 }
 0xac8   : > { %v12695_v62 = vrot.slane %v11417_v37, %v25538_v19  ;;  %v12699_v48 = vrot.slane %v11419_v38, %v25538_v19  ;;  %v11368_v17 = vrot.slane %v11340_v56, %v25520_v41  ;;  %v9729_v25 = vmul.f32 0.6931472, %v20958_v1 }
 0xac9   : > { %v11369_v54 = vcombine.high %v11347_v26, %v11347_v26  ;;  %v11485_v5 = vrot.slane %v11471_v18, %v25520_v41  ;;  %v11486_v29 = vcombine.high %v11478_v59, %v11478_v59  ;;  %20963 = vlog2.f32 %v9961_v11 }
 0xaca   : > { %v20960_v36 = vpop.eup %20959  ;;  %v26196_v4 = vsel %vm653_vm3, %v25997_v60, %v12675_v16  ;;  %v26200_v23 = vsel %vm653_vm3, %v26003_v53, %v12679_v42  ;;  %v26204_v37 = vsel %vm653_vm3, %v26010_v46, %v12683_v8  ;;  %v26208_v31 = vsel %vm653_vm3, %v26022_v3, %v12691_v45 }
 0xacb   : > { %v12703_v0 = vrot.slane %v11421_v58, %v25538_v19  ;;  %v26213_v39 = vsel %vm653_vm3, %v26016_v40, %v12687_v10  ;;  %v11371_v60 = vcombine.high %v11361_v20, %v11361_v20  ;;  %v9734_v38 = vsub.f32 %v27329_v6, %v9729_v25 }
 0xacc   : > { %v26218_v53 = vsel %vm653_vm3, %v26028_v43, %v12695_v62  ;;  %v26222_v46 = vsel %vm653_vm3, %v26032_v47, %v12699_v48  ;;  %v11370_v56 = vcombine.high %v11354_v21, %v11354_v21  ;;  %v11372_v3 = vcombine.high %v11368_v17, %v11368_v17 }
 0xacd   : > { %v12643_v1 = vrot.slane %v11347_v26, %v25538_v19  ;;  %v12647_v18 = vrot.slane %v11361_v20, %v25538_v19  ;;  %v12651_v40 = vrot.slane %v11369_v54, %v25538_v19  ;;  %v9965_v16 = vmul.f32 0.6931472, %v20960_v36 }
 0xace   : > { %v12659_v42 = vrot.slane %v11354_v21, %v25538_v19  ;;  %v11487_v8 = vcombine.high %v11485_v5, %v11485_v5  ;;  %v11494_v45 = vrot.slane %v11478_v59, %v25520_v41  ;;  %v11508_v43 = vrot.slane %v11486_v29, %v25520_v41 }
 0xacf   : > { %v20962_v11 = vpop.eup %20961  ;;  %v12655_v47 = vrot.slane %v11371_v60, %v25538_v19  ;;  %v12663_v58 = vrot.slane %v11368_v17, %v25538_v19  ;;  %v11422_v10 = vcombine.high %v9734_v38, %v9734_v38  ;;  %v11429_v26 = vrot.slane %v9734_v38, %v25520_v41 }
 0xad0   : > { %v26235_v20 = vsel %vm653_vm3, %v26036_v63, %v12703_v0  ;;  %v12667_v62 = vrot.slane %v11370_v56, %v25538_v19  ;;  %v12671_v21 = vrot.slane %v11372_v3, %v25538_v19  ;;  %v11501_v59 = vrot.slane %v11485_v5, %v25520_v41  ;;  %v27330_v63 = vld [vmem:[#allocation5_spill] sm:$0xff] }
 0xad1   : > { %v26242_v48 = vsel %vm653_vm3, %v26067_v28, %v12643_v1  ;;  %v26246_v17 = vsel %vm653_vm3, %v26073_v27, %v12647_v18  ;;  %v26250_v25 = vsel %vm653_vm3, %v26081_v24, %v12651_v40  ;;  %v9971_v54 = vsub.f32 %v27330_v63, %v9965_v16  ;;  %v9958_v40 = vpop.xlane.xlu0 %9957 }
 0xad2   : > { %v26255_v29 = vsel %vm653_vm3, %v26093_v61, %v12659_v42  ;;  %v11515_v5 = vrot.slane %v11487_v8, %v25520_v41  ;;  %v11516_v36 = vcombine.high %v11494_v45, %v11494_v45  ;;  %v11518_v0 = vcombine.high %v11508_v43, %v11508_v43 }
 0xad3   : > { %v20964_v28 = vpop.eup %20963  ;;  %v26260_v60 = vsel %vm653_vm3, %v26087_v30, %v12655_v47  ;;  %v26264_v27 = vsel %vm653_vm3, %v26099_v7, %v12663_v58  ;;  %v11436_v24 = vrot.slane %v11422_v10, %v25520_v41  ;;  %v11437_v6 = vcombine.high %v11429_v26, %v11429_v26 }
 0xad4   : > { %v26269_v61 = vsel %vm653_vm3, %v26108_v55, %v12667_v62  ;;  %v26273_v38 = vsel %vm653_vm3, %v26112_v34, %v12671_v21  ;;  %v11517_v56 = vcombine.high %v11501_v59, %v11501_v59  ;;  %v12739_v3 = vrot.slane %v11494_v45, %v25538_v19 }
 0xad5   : > { %v12743_v30 = vrot.slane %v11508_v43, %v25538_v19  ;;  %v12755_v1 = vrot.slane %v11501_v59, %v25538_v19  ;;  %v11573_v7 = vcombine.high %v9971_v54, %v9971_v54  ;;  %v9963_v18 = vmul.f32 0.6931472, %v20962_v11  ;;  %v27331_v59 = vld [vmem:[#allocation6_spill] sm:$0xff] }
 0xad6   : > { %v11519_v16 = vcombine.high %v11515_v5, %v11515_v5  ;;  %v12747_v42 = vrot.slane %v11516_v36, %v25538_v19  ;;  %v12751_v55 = vrot.slane %v11518_v0, %v25538_v19  ;;  %v11445_v8 = vrot.slane %v11429_v26, %v25520_v41 }
 0xad7   : > { %v12759_v34 = vrot.slane %v11515_v5, %v25538_v19  ;;  %v11438_v47 = vcombine.high %v11436_v24, %v11436_v24  ;;  %v11452_v58 = vrot.slane %v11436_v24, %v25520_v41  ;;  %v11459_v45 = vrot.slane %v11437_v6, %v25520_v41  ;;  %v10193_v5 = vpop.xlane.xlu1 %10192 }
 0xad8   : > { %v12763_v43 = vrot.slane %v11517_v56, %v25538_v19  ;;  %v26287_v11 = vsel %vm653_vm3, %v25932_v14, %v12739_v3  ;;  %v11580_v10 = vrot.slane %v9971_v54, %v25520_v41  ;;  %20965 = vlog2.f32 %v9958_v40 }
 0xad9   : > { %v26292_v62 = vsel %vm653_vm3, %v25935_v33, %v12743_v30  ;;  %v26296_v26 = vsel %vm653_vm3, %v25957_v13, %v12755_v1  ;;  %v11587_v21 = vrot.slane %v11573_v7, %v25520_v41  ;;  %v9970_v63 = vsub.f32 %v27331_v59, %v9963_v18 }
 0xada   : > { %v12767_v36 = vrot.slane %v11519_v16, %v25538_v19  ;;  %v26303_v14 = vsel %vm653_vm3, %v25947_v22, %v12747_v42  ;;  %v26307_v54 = vsel %vm653_vm3, %v25951_v32, %v12751_v55  ;;  %v11467_v33 = vcombine.high %v11445_v8, %v11445_v8 }
 0xadb   : > { %v26311_v13 = vsel %vm653_vm3, %v25963_v15, %v12759_v34  ;;  %v11466_v0 = vrot.slane %v11438_v47, %v25520_v41  ;;  %v11468_v24 = vcombine.high %v11452_v58, %v11452_v58  ;;  %v11469_v6 = vcombine.high %v11459_v45, %v11459_v45 }
 0xadc   : > { %v26316_v56 = vsel %vm653_vm3, %v25973_v49, %v12763_v43  ;;  %v11588_v3 = vcombine.high %v11580_v10, %v11580_v10  ;;  %v9969_v22 = vmul.f32 0.6931472, %v20964_v28  ;;  %20967 = vlog2.f32 %v10193_v5 }
 0xadd   : > { %v12707_v30 = vrot.slane %v11445_v8, %v25538_v19  ;;  %v11589_v32 = vcombine.high %v11587_v21, %v11587_v21  ;;  %v11596_v1 = vrot.slane %v11580_v10, %v25520_v41  ;;  %v11524_v7 = vcombine.high %v9970_v63, %v9970_v63 }
 0xade   : > { %v12711_v15 = vrot.slane %v11459_v45, %v25538_v19  ;;  %v12715_v18 = vrot.slane %v11467_v33, %v25538_v19  ;;  %v12723_v40 = vrot.slane %v11452_v58, %v25538_v19  ;;  %v11603_v16 = vrot.slane %v11587_v21, %v25520_v41  ;;  %v27332_v45 = vld [vmem:[#allocation7_spill] sm:$0xff] }
 0xadf   : > { %v11470_v42 = vcombine.high %v11466_v0, %v11466_v0  ;;  %v12719_v49 = vrot.slane %v11469_v6, %v25538_v19  ;;  %v12727_v28 = vrot.slane %v11466_v0, %v25538_v19  ;;  %v12731_v55 = vrot.slane %v11468_v24, %v25538_v19 }
 0xae0   : > { %v26329_v8 = vsel %vm653_vm3, %v25985_v44, %v12767_v36  ;;  %v11610_v34 = vrot.slane %v11588_v3, %v25520_v41  ;;  %v11531_v47 = vrot.slane %v9970_v63, %v25520_v41  ;;  %v9973_v43 = vsub.f32 %v27332_v45, %v9969_v22 }
 0xae1   : > { %v26336_v58 = vsel %vm653_vm3, %v26128_v51, %v12707_v30  ;;  %v11617_v10 = vrot.slane %v11589_v32, %v25520_v41  ;;  %v11618_v21 = vcombine.high %v11596_v1, %v11596_v1  ;;  %v11538_v59 = vrot.slane %v11524_v7, %v25520_v41 }
 0xae2   : > { %v20966_v5 = vpop.eup %20965  ;;  %v26342_v44 = vsel %vm653_vm3, %v26156_v35, %v12711_v15  ;;  %v26346_v36 = vsel %vm653_vm3, %v26160_v50, %v12715_v18  ;;  %v26350_v63 = vsel %vm653_vm3, %v26149_v2, %v12723_v40  ;;  %v11619_v51 = vcombine.high %v11603_v16, %v11603_v16 }
 0xae3   : > { %v12735_v33 = vrot.slane %v11470_v42, %v25538_v19  ;;  %v26355_v0 = vsel %vm653_vm3, %v26175_v12, %v12719_v49  ;;  %v26359_v24 = vsel %vm653_vm3, %v26166_v9, %v12727_v28  ;;  %v26363_v35 = vsel %vm653_vm3, %v26170_v57, %v12731_v55 }
 0xae4   : > { %v11620_v50 = vcombine.high %v11610_v34, %v11610_v34  ;;  %v12835_v6 = vrot.slane %v11596_v1, %v25538_v19  ;;  %v12851_v2 = vrot.slane %v11603_v16, %v25538_v19  ;;  %v11539_v3 = vcombine.high %v11531_v47, %v11531_v47 }
 0xae5   : > { %v11621_v22 = vcombine.high %v11617_v10, %v11617_v10  ;;  %v12839_v30 = vrot.slane %v11610_v34, %v25538_v19  ;;  %v12843_v12 = vrot.slane %v11618_v21, %v25538_v19  ;;  %v11540_v32 = vcombine.high %v11538_v59, %v11538_v59  ;;  %v27333_v34 = vld [vmem:[#allocation8_spill] sm:$0xff] }
 0xae6   : > { %v20968_v7 = vpop.eup %20967  ;;  %v12855_v9 = vrot.slane %v11617_v10, %v25538_v19  ;;  %v12859_v15 = vrot.slane %v11619_v51, %v25538_v19  ;;  %v11671_v18 = vcombine.high %v9973_v43, %v9973_v43  ;;  %v9967_v57 = vmul.f32 0.6931472, %v20966_v5  ;;  %v10190_v10 = vpop.xlane.xlu0 %10189 }
 0xae7   : > { %v26373_v40 = vsel %vm653_vm3, %v26179_v52, %v12735_v33  ;;  %v11547_v1 = vrot.slane %v11531_v47, %v25520_v41  ;;  %v11554_v16 = vrot.slane %v11538_v59, %v25520_v41  ;;  %v11678_v42 = vrot.slane %v9973_v43, %v25520_v41 }
 0xae8   : > { %v12847_v49 = vrot.slane %v11620_v50, %v25538_v19  ;;  %v26381_v28 = vsel %vm655_vm5, %v26196_v4, %v12835_v6  ;;  %v11561_v55 = vrot.slane %v11539_v3, %v25520_v41  ;;  %v9972_v45 = vsub.f32 %v27333_v34, %v9967_v57 }
 0xae9   : > { %v12863_v52 = vrot.slane %v11621_v22, %v25538_v19  ;;  %v26388_v47 = vsel %vm655_vm5, %v26200_v23, %v12839_v30  ;;  %v26392_v43 = vsel %vm655_vm5, %v26208_v31, %v12851_v2  ;;  %v11568_v21 = vrot.slane %v11540_v32, %v25520_v41 }
 0xaea   : > { %v26397_v4 = vsel %vm655_vm5, %v26204_v37, %v12843_v12  ;;  %v26401_v59 = vsel %vm655_vm5, %v26218_v53, %v12855_v9  ;;  %v26405_v5 = vsel %vm655_vm5, %v26222_v46, %v12859_v15  ;;  %v11685_v23 = vrot.slane %v11671_v18, %v25520_v41  ;;  %v10199_v9 = vpop.xlane.xlu1 %10198 }
 0xaeb   : > { %v11569_v51 = vcombine.high %v11547_v1, %v11547_v1  ;;  %v11570_v33 = vcombine.high %v11554_v16, %v11554_v16  ;;  %v11686_v31 = vcombine.high %v11678_v42, %v11678_v42  ;;  %20969 = vlog2.f32 %v10190_v10 }
 0xaec   : > { %v26410_v50 = vsel %vm655_vm5, %v26213_v39, %v12847_v49  ;;  %v11571_v37 = vcombine.high %v11561_v55, %v11561_v55  ;;  %v11622_v6 = vcombine.high %v9972_v45, %v9972_v45  ;;  %v10203_v2 = vmul.f32 0.6931472, %v20968_v7  ;;  %v27334_v49 = vld [vmem:[#allocation9_spill] sm:$0xff] }
 0xaed   : > { %v26414_v53 = vsel %vm655_vm5, %v26235_v20, %v12863_v52  ;;  %v11572_v3 = vcombine.high %v11568_v21, %v11568_v21  ;;  %v12803_v46 = vrot.slane %v11547_v1, %v25538_v19  ;;  %v12819_v22 = vrot.slane %v11554_v16, %v25538_v19 }
 0xaee   : > { %v12807_v30 = vrot.slane %v11561_v55, %v25538_v19  ;;  %v11687_v12 = vcombine.high %v11685_v23, %v11685_v23  ;;  %v11694_v32 = vrot.slane %v11678_v42, %v25520_v41  ;;  %v11629_v39 = vrot.slane %v9972_v45, %v25520_v41 }
 0xaef   : > { %v12811_v15 = vrot.slane %v11569_v51, %v25538_v19  ;;  %v12823_v7 = vrot.slane %v11568_v21, %v25538_v19  ;;  %v12827_v20 = vrot.slane %v11570_v33, %v25538_v19  ;;  %v11708_v18 = vrot.slane %v11686_v31, %v25520_v41 }
 0xaf0   : > { %v12815_v57 = vrot.slane %v11571_v37, %v25538_v19  ;;  %v11701_v1 = vrot.slane %v11685_v23, %v25520_v41  ;;  %v11636_v16 = vrot.slane %v11622_v6, %v25520_v41  ;;  %v10209_v55 = vsub.f32 %v27334_v49, %v10203_v2 }
 0xaf1   : > { %v12831_v42 = vrot.slane %v11572_v3, %v25538_v19  ;;  %v26432_v34 = vsel %vm655_vm5, %v26242_v48, %v12803_v46  ;;  %v26436_v45 = vsel %vm655_vm5, %v26255_v29, %v12819_v22  ;;  %20971 = vlog2.f32 %v10199_v9 }
 0xaf2   : > { %v26440_v10 = vsel %vm655_vm5, %v26246_v17, %v12807_v30  ;;  %v11715_v52 = vrot.slane %v11687_v12, %v25520_v41  ;;  %v11716_v21 = vcombine.high %v11694_v32, %v11694_v32  ;;  %v11637_v23 = vcombine.high %v11629_v39, %v11629_v39  ;;  %v10196_v12 = vpop.xlane.xlu0 %10195 }
 0xaf3   : > { %v26445_v51 = vsel %vm655_vm5, %v26250_v25, %v12811_v15  ;;  %v26449_v48 = vsel %vm655_vm5, %v26264_v27, %v12823_v7  ;;  %v26453_v29 = vsel %vm655_vm5, %v26269_v61, %v12827_v20  ;;  %v11718_v33 = vcombine.high %v11708_v18, %v11708_v18 }
 0xaf4   : > { %v26457_v17 = vsel %vm655_vm5, %v26260_v60, %v12815_v57  ;;  %v11717_v31 = vcombine.high %v11701_v1, %v11701_v1  ;;  %v11638_v37 = vcombine.high %v11636_v16, %v11636_v16  ;;  %v11773_v6 = vcombine.high %v10209_v55, %v10209_v55 }
 0xaf5   : > { %v20970_v2 = vpop.eup %20969  ;;  %v26461_v25 = vsel %vm655_vm5, %v26273_v38, %v12831_v42  ;;  %v12899_v27 = vrot.slane %v11694_v32, %v25538_v19  ;;  %v12903_v3 = vrot.slane %v11708_v18, %v25538_v19  ;;  %v11645_v61 = vrot.slane %v11629_v39, %v25520_v41 }
 0xaf6   : > { %v11719_v46 = vcombine.high %v11715_v52, %v11715_v52  ;;  %v12907_v22 = vrot.slane %v11716_v21, %v25538_v19  ;;  %v12915_v60 = vrot.slane %v11701_v1, %v25538_v19  ;;  %v11659_v30 = vrot.slane %v11637_v23, %v25520_v41 }
 0xaf7   : > { %v12911_v9 = vrot.slane %v11718_v33, %v25538_v19  ;;  %v12919_v15 = vrot.slane %v11715_v52, %v25538_v19  ;;  %v11652_v38 = vrot.slane %v11636_v16, %v25520_v41  ;;  %v11780_v32 = vrot.slane %v10209_v55, %v25520_v41  ;;  %v27335_v33 = vld [vmem:[#allocation10_spill] sm:$0xff] }
 0xaf8   : > { %v12923_v7 = vrot.slane %v11717_v31, %v25538_v19  ;;  %v11666_v39 = vrot.slane %v11638_v37, %v25520_v41  ;;  %v11787_v20 = vrot.slane %v11773_v6, %v25520_v41  ;;  %v10201_v18 = vmul.f32 0.6931472, %v20970_v2 }
 0xaf9   : > { %v26478_v57 = vsel %vm655_vm5, %v26287_v11, %v12899_v27  ;;  %v26482_v1 = vsel %vm655_vm5, %v26292_v62, %v12903_v3  ;;  %v11667_v49 = vcombine.high %v11645_v61, %v11645_v61  ;;  %20973 = vlog2.f32 %v10196_v12 }
 0xafa   : > { %v12927_v16 = vrot.slane %v11719_v46, %v25538_v19  ;;  %v26487_v55 = vsel %vm655_vm5, %v26303_v14, %v12907_v22  ;;  %v26491_v42 = vsel %vm655_vm5, %v26296_v26, %v12915_v60  ;;  %v11669_v52 = vcombine.high %v11659_v30, %v11659_v30  ;;  %v10431_v46 = vpop.xlane.xlu1 %10430 }
 0xafb   : > { %v20972_v21 = vpop.eup %20971  ;;  %v26495_v11 = vsel %vm655_vm5, %v26307_v54, %v12911_v9  ;;  %v11668_v62 = vcombine.high %v11652_v38, %v11652_v38  ;;  %v11788_v23 = vcombine.high %v11780_v32, %v11780_v32  ;;  %v10208_v31 = vsub.f32 %v27335_v33, %v10201_v18 }
 0xafc   : > { %v26500_v37 = vsel %vm655_vm5, %v26311_v13, %v12919_v15  ;;  %v26504_v14 = vsel %vm655_vm5, %v26316_v56, %v12923_v7  ;;  %v11670_v26 = vcombine.high %v11666_v39, %v11666_v39  ;;  %v11789_v6 = vcombine.high %v11787_v20, %v11787_v20 }
 0xafd   : > { %v12867_v2 = vrot.slane %v11645_v61, %v25538_v19  ;;  %v12871_v27 = vrot.slane %v11659_v30, %v25538_v19  ;;  %v12875_v54 = vrot.slane %v11667_v49, %v25538_v19  ;;  %v12883_v3 = vrot.slane %v11652_v38, %v25538_v19  ;;  %v27336_v49 = vld [vmem:[#allocation11_spill] sm:$0xff] }
 0xafe   : > { %v12879_v22 = vrot.slane %v11669_v52, %v25538_v19  ;;  %v12887_v13 = vrot.slane %v11666_v39, %v25538_v19  ;;  %v11796_v60 = vrot.slane %v11780_v32, %v25520_v41  ;;  %v10207_v12 = vmul.f32 0.6931472, %v20972_v21 }
 0xaff   : > { %v12891_v56 = vrot.slane %v11668_v62, %v25538_v19  ;;  %v11810_v9 = vrot.slane %v11788_v23, %v25520_v41  ;;  %v11724_v15 = vcombine.high %v10208_v31, %v10208_v31  ;;  %v11731_v61 = vrot.slane %v10208_v31, %v25520_v41 }
 0xb00   : > { %v12895_v30 = vrot.slane %v11670_v26, %v25538_v19  ;;  %v11803_v7 = vrot.slane %v11787_v20, %v25520_v41  ;;  %v11817_v38 = vrot.slane %v11789_v6, %v25520_v41  ;;  %20975 = vlog2.f32 %v10431_v46 }
 0xb01   : > { %v26521_v39 = vsel %vm655_vm5, %v26329_v8, %v12927_v16  ;;  %v26525_v32 = vsel %vm655_vm5, %v26336_v58, %v12867_v2  ;;  %v26529_v18 = vsel %vm655_vm5, %v26342_v44, %v12871_v27  ;;  %v10211_v52 = vsub.f32 %v27336_v49, %v10207_v12  ;;  %v10428_v27 = vpop.xlane.xlu0 %10427 }
 0xb02   : > { %v26534_v20 = vsel %vm655_vm5, %v26346_v36, %v12875_v54  ;;  %v26538_v21 = vsel %vm655_vm5, %v26355_v0, %v12879_v22  ;;  %v26542_v8 = vsel %vm655_vm5, %v26350_v63, %v12883_v3  ;;  %v11818_v58 = vcombine.high %v11796_v60, %v11796_v60 }
 0xb03   : > { %v20974_v16 = vpop.eup %20973  ;;  %v26546_v44 = vsel %vm655_vm5, %v26359_v24, %v12887_v13  ;;  %v11820_v62 = vcombine.high %v11810_v9, %v11810_v9  ;;  %v11738_v23 = vrot.slane %v11724_v15, %v25520_v41  ;;  %v11739_v33 = vcombine.high %v11731_v61, %v11731_v61 }
 0xb04   : > { %v26551_v36 = vsel %vm655_vm5, %v26363_v35, %v12891_v56  ;;  %v26555_v0 = vsel %vm655_vm5, %v26373_v40, %v12895_v30  ;;  %v11819_v63 = vcombine.high %v11803_v7, %v11803_v7  ;;  %v11821_v31 = vcombine.high %v11817_v38, %v11817_v38 }
 0xb05   : > { %v12995_v26 = vrot.slane %v11796_v60, %v25538_v19  ;;  %v12999_v6 = vrot.slane %v11810_v9, %v25538_v19  ;;  %v11747_v24 = vrot.slane %v11731_v61, %v25520_v41  ;;  %v11871_v2 = vcombine.high %v10211_v52, %v10211_v52 }
 0xb06   : > { %v13003_v54 = vrot.slane %v11818_v58, %v25538_v19  ;;  %v13011_v3 = vrot.slane %v11803_v7, %v25538_v19  ;;  %v11878_v35 = vrot.slane %v10211_v52, %v25520_v41  ;;  %v10205_v46 = vmul.f32 0.6931472, %v20974_v16  ;;  %v27337_v16 = vld [vmem:[#allocation12_spill] sm:$0xff] }
 0xb07   : > { %v13007_v40 = vrot.slane %v11820_v62, %v25538_v19  ;;  %v13015_v22 = vrot.slane %v11817_v38, %v25538_v19  ;;  %v11740_v13 = vcombine.high %v11738_v23, %v11738_v23  ;;  %v11761_v60 = vrot.slane %v11739_v33, %v25520_v41 }
 0xb08   : > { %v13019_v12 = vrot.slane %v11819_v63, %v25538_v19  ;;  %v13023_v56 = vrot.slane %v11821_v31, %v25538_v19  ;;  %v11754_v9 = vrot.slane %v11738_v23, %v25520_v41  ;;  %20977 = vlog2.f32 %v10428_v27 }
 0xb09   : > { %v26571_v15 = vsel %vm657_vm6, %v26381_v28, %v12995_v26  ;;  %v26575_v61 = vsel %vm657_vm6, %v26388_v47, %v12999_v6  ;;  %v11769_v30 = vcombine.high %v11747_v24, %v11747_v24  ;;  %v11885_v7 = vrot.slane %v11871_v2, %v25520_v41  ;;  %v10437_v2 = vpop.xlane.xlu1 %10436 }
 0xb0a   : > { %v20976_v38 = vpop.eup %20975  ;;  %v26580_v49 = vsel %vm657_vm6, %v26397_v4, %v13003_v54  ;;  %v26584_v52 = vsel %vm657_vm6, %v26392_v43, %v13011_v3  ;;  %v11886_v58 = vcombine.high %v11878_v35, %v11878_v35  ;;  %v10210_v28 = vsub.f32 %v27337_v16, %v10205_v46 }
 0xb0b   : > { %v26589_v62 = vsel %vm657_vm6, %v26410_v50, %v13007_v40  ;;  %v26593_v47 = vsel %vm657_vm6, %v26401_v59, %v13015_v22  ;;  %v11768_v23 = vrot.slane %v11740_v13, %v25520_v41  ;;  %v11771_v33 = vcombine.high %v11761_v60, %v11761_v60 }
 0xb0c   : > { %v26598_v4 = vsel %vm657_vm6, %v26405_v5, %v13019_v12  ;;  %v26602_v43 = vsel %vm657_vm6, %v26414_v53, %v13023_v56  ;;  %v11770_v63 = vcombine.high %v11754_v9, %v11754_v9  ;;  %v12963_v31 = vrot.slane %v11747_v24, %v25538_v19 }
 0xb0d   : > { %v12967_v50 = vrot.slane %v11761_v60, %v25538_v19  ;;  %v12971_v26 = vrot.slane %v11769_v30, %v25538_v19  ;;  %v11887_v59 = vcombine.high %v11885_v7, %v11885_v7  ;;  %v10441_v6 = vmul.f32 0.6931472, %v20976_v38 }
 0xb0e   : > { %v12979_v27 = vrot.slane %v11754_v9, %v25538_v19  ;;  %v11894_v54 = vrot.slane %v11878_v35, %v25520_v41  ;;  %v11908_v5 = vrot.slane %v11886_v58, %v25520_v41  ;;  %v11822_v3 = vcombine.high %v10210_v28, %v10210_v28  ;;  %v27338_v9 = vld [vmem:[#allocation13_spill] sm:$0xff] }
 0xb0f   : > { %v11772_v46 = vcombine.high %v11768_v23, %v11768_v23  ;;  %v12975_v53 = vrot.slane %v11771_v33, %v25538_v19  ;;  %v12983_v40 = vrot.slane %v11768_v23, %v25538_v19  ;;  %v11901_v24 = vrot.slane %v11885_v7, %v25520_v41 }
 0xb10   : > { %v12987_v22 = vrot.slane %v11770_v63, %v25538_v19  ;;  %v26616_v13 = vsel %vm657_vm6, %v26432_v34, %v12963_v31  ;;  %v11829_v60 = vrot.slane %v10210_v28, %v25520_v41  ;;  %20979 = vlog2.f32 %v10437_v2 }
 0xb11   : > { %v26621_v35 = vsel %vm657_vm6, %v26440_v10, %v12967_v50  ;;  %v26625_v12 = vsel %vm657_vm6, %v26445_v51, %v12971_v26  ;;  %v11915_v56 = vrot.slane %v11887_v59, %v25520_v41  ;;  %v10447_v30 = vsub.f32 %v27338_v9, %v10441_v6  ;;  %v27339_v9 = vld [vmem:[#allocation14_spill] sm:$0xff] }
 0xb12   : > { %v20978_v7 = vpop.eup %20977  ;;  %v26631_v34 = vsel %vm657_vm6, %v26436_v45, %v12979_v27  ;;  %v11916_v38 = vcombine.high %v11894_v54, %v11894_v54  ;;  %v11918_v58 = vcombine.high %v11908_v5, %v11908_v5  ;;  %v11836_v16 = vrot.slane %v11822_v3, %v25520_v41 }
 0xb13   : > { %v12991_v10 = vrot.slane %v11772_v46, %v25538_v19  ;;  %v26637_v28 = vsel %vm657_vm6, %v26457_v17, %v12975_v53  ;;  %v26641_v51 = vsel %vm657_vm6, %v26449_v48, %v12983_v40  ;;  %v11917_v23 = vcombine.high %v11901_v24, %v11901_v24 }
 0xb14   : > { %v26645_v33 = vsel %vm657_vm6, %v26453_v29, %v12987_v22  ;;  %v13059_v45 = vrot.slane %v11894_v54, %v25538_v19  ;;  %v11837_v63 = vcombine.high %v11829_v60, %v11829_v60  ;;  %v11973_v31 = vcombine.high %v10447_v30, %v10447_v30  ;;  %v10669_v22 = vpop.xlane.xlu1 %10668 }
 0xb15   : > { %v11919_v50 = vcombine.high %v11915_v56, %v11915_v56  ;;  %v13063_v26 = vrot.slane %v11908_v5, %v25538_v19  ;;  %v13075_v59 = vrot.slane %v11901_v24, %v25538_v19  ;;  %v10439_v17 = vmul.f32 0.6931472, %v20978_v7 }
 0xb16   : > { %v13067_v6 = vrot.slane %v11916_v38, %v25538_v19  ;;  %v13071_v48 = vrot.slane %v11918_v58, %v25538_v19  ;;  %v13079_v2 = vrot.slane %v11915_v56, %v25538_v19  ;;  %v11838_v27 = vcombine.high %v11836_v16, %v11836_v16 }
 0xb17   : > { %v26655_v29 = vsel %vm657_vm6, %v26461_v25, %v12991_v10  ;;  %v13083_v54 = vrot.slane %v11917_v23, %v25538_v19  ;;  %v11845_v3 = vrot.slane %v11829_v60, %v25520_v41  ;;  %v11852_v5 = vrot.slane %v11836_v16, %v25520_v41  ;;  %v10434_v23 = vpop.xlane.xlu0 %10433 }
 0xb18   : > { %v26662_v46 = vsel %vm657_vm6, %v26478_v57, %v13059_v45  ;;  %v11859_v53 = vrot.slane %v11837_v63, %v25520_v41  ;;  %v11980_v40 = vrot.slane %v10447_v30, %v25520_v41  ;;  %v11987_v24 = vrot.slane %v11973_v31, %v25520_v41 }
 0xb19   : > { %v13087_v25 = vrot.slane %v11919_v50, %v25538_v19  ;;  %v26670_v56 = vsel %vm657_vm6, %v26482_v1, %v13063_v26  ;;  %v26674_v60 = vsel %vm657_vm6, %v26491_v42, %v13075_v59  ;;  %v10446_v57 = vsub.f32 %v27339_v9, %v10439_v17 }
 0xb1a   : > { %v20980_v7 = vpop.eup %20979  ;;  %v26679_v38 = vsel %vm657_vm6, %v26487_v55, %v13067_v6  ;;  %v26683_v30 = vsel %vm657_vm6, %v26495_v11, %v13071_v48  ;;  %v26687_v58 = vsel %vm657_vm6, %v26500_v37, %v13079_v2  ;;  %v11866_v1 = vrot.slane %v11838_v27, %v25520_v41 }
 0xb1b   : > { %v26692_v42 = vsel %vm657_vm6, %v26504_v14, %v13083_v54  ;;  %v11867_v16 = vcombine.high %v11845_v3, %v11845_v3  ;;  %v11868_v10 = vcombine.high %v11852_v5, %v11852_v5  ;;  %20981 = vlog2.f32 %v10669_v22 }
 0xb1c   : > { %v11869_v55 = vcombine.high %v11859_v53, %v11859_v53  ;;  %v13027_v45 = vrot.slane %v11845_v3, %v25538_v19  ;;  %v11988_v63 = vcombine.high %v11980_v40, %v11980_v40  ;;  %v11989_v11 = vcombine.high %v11987_v24, %v11987_v24 }
 0xb1d   : > { %v13031_v31 = vrot.slane %v11859_v53, %v25538_v19  ;;  %v13043_v37 = vrot.slane %v11852_v5, %v25538_v19  ;;  %v11996_v50 = vrot.slane %v11980_v40, %v25520_v41  ;;  %v11924_v26 = vcombine.high %v10446_v57, %v10446_v57 }
 0xb1e   : > { %v11870_v59 = vcombine.high %v11866_v1, %v11866_v1  ;;  %v12003_v14 = vrot.slane %v11987_v24, %v25520_v41  ;;  %v10445_v17 = vmul.f32 0.6931472, %v20980_v7  ;;  %20983 = vlog2.f32 %v10434_v23  ;;  %v27340_v7 = vld [vmem:[#allocation15_spill] sm:$0xff] }
 0xb1f   : > { %v26701_v6 = vsel %vm657_vm6, %v26521_v39, %v13087_v25  ;;  %v13035_v48 = vrot.slane %v11867_v16, %v25538_v19  ;;  %v13047_v2 = vrot.slane %v11866_v1, %v25538_v19  ;;  %v11931_v27 = vrot.slane %v10446_v57, %v25520_v41 }
 0xb20   : > { %v13039_v54 = vrot.slane %v11869_v55, %v25538_v19  ;;  %v13051_v3 = vrot.slane %v11868_v10, %v25538_v19  ;;  %v12010_v5 = vrot.slane %v11988_v63, %v25520_v41  ;;  %v12017_v53 = vrot.slane %v11989_v11, %v25520_v41 }
 0xb21   : > { %v26712_v40 = vsel %vm657_vm6, %v26525_v32, %v13027_v45  ;;  %v26716_v39 = vsel %vm657_vm6, %v26529_v18, %v13031_v31  ;;  %v12018_v24 = vcombine.high %v11996_v50, %v11996_v50  ;;  %v11938_v22 = vrot.slane %v11924_v26, %v25520_v41 }
 0xb22   : > { %v13055_v25 = vrot.slane %v11870_v59, %v25538_v19  ;;  %v26722_v9 = vsel %vm657_vm6, %v26542_v8, %v13043_v37  ;;  %v12019_v57 = vcombine.high %v12003_v14, %v12003_v14  ;;  %v10449_v1 = vsub.f32 %v27340_v7, %v10445_v17 }
 0xb23   : > { %v26727_v32 = vsel %vm657_vm6, %v26534_v20, %v13035_v48  ;;  %v26731_v18 = vsel %vm657_vm6, %v26546_v44, %v13047_v2  ;;  %v13155_v16 = vrot.slane %v11996_v50, %v25538_v19  ;;  %v11939_v10 = vcombine.high %v11931_v27, %v11931_v27 }
 0xb24   : > { %v26736_v23 = vsel %vm657_vm6, %v26551_v36, %v13051_v3  ;;  %v12020_v8 = vcombine.high %v12010_v5, %v12010_v5  ;;  %v12021_v55 = vcombine.high %v12017_v53, %v12017_v53  ;;  %v13171_v45 = vrot.slane %v12003_v14, %v25538_v19 }
 0xb25   : > { %v20982_v63 = vpop.eup %20981  ;;  %v26741_v20 = vsel %vm657_vm6, %v26538_v21, %v13039_v54  ;;  %v13159_v11 = vrot.slane %v12010_v5, %v25538_v19  ;;  %v13163_v44 = vrot.slane %v12018_v24, %v25538_v19  ;;  %v11940_v31 = vcombine.high %v11938_v22, %v11938_v22  ;;  %v10666_v24 = vpop.xlane.xlu0 %10665 }
 0xb26   : > { %v13175_v37 = vrot.slane %v12017_v53, %v25538_v19  ;;  %v13179_v50 = vrot.slane %v12019_v57, %v25538_v19  ;;  %v11947_v36 = vrot.slane %v11931_v27, %v25520_v41  ;;  %v12071_v26 = vcombine.high %v10449_v1, %v10449_v1 }
 0xb27   : > { %v26750_v59 = vsel %vm657_vm6, %v26555_v0, %v13055_v25  ;;  %v26754_v21 = vsel %vm659_vm7, %v26571_v15, %v13155_v16  ;;  %v11954_v14 = vrot.slane %v11938_v22, %v25520_v41  ;;  %v11961_v17 = vrot.slane %v11939_v10, %v25520_v41 }
 0xb28   : > { %v20984_v48 = vpop.eup %20983  ;;  %v13167_v2 = vrot.slane %v12020_v8, %v25538_v19  ;;  %v13183_v54 = vrot.slane %v12021_v55, %v25538_v19  ;;  %v26762_v27 = vsel %vm659_vm7, %v26584_v52, %v13171_v45  ;;  %v10679_v3 = vmul.f32 0.6931472, %v20982_v63  ;;  %v27341_v8 = vld [vmem:[#allocation17_spill] sm:$0xff] }
 0xb29   : > { %v26766_v0 = vsel %vm659_vm7, %v26575_v61, %v13159_v11  ;;  %v26770_v15 = vsel %vm659_vm7, %v26580_v49, %v13163_v44  ;;  %v11968_v5 = vrot.slane %v11940_v31, %v25520_v41  ;;  %v12078_v53 = vrot.slane %v10449_v1, %v25520_v41 }
 0xb2a   : > { %v26776_v22 = vsel %vm659_vm7, %v26593_v47, %v13175_v37  ;;  %v26780_v52 = vsel %vm659_vm7, %v26598_v4, %v13179_v50  ;;  %v11969_v25 = vcombine.high %v11947_v36, %v11947_v36  ;;  %v12085_v61 = vrot.slane %v12071_v26, %v25520_v41  ;;  %v27342_v26 = vld [vmem:[#allocation16_spill] sm:$0xff] }
 0xb2b   : > { %v11970_v57 = vcombine.high %v11954_v14, %v11954_v14  ;;  %v11971_v7 = vcombine.high %v11961_v17, %v11961_v17  ;;  %v13123_v49 = vrot.slane %v11947_v36, %v25538_v19  ;;  %v10443_v16 = vmul.f32 0.6931472, %v20984_v48 }
 0xb2c   : > { %v13127_v10 = vrot.slane %v11961_v17, %v25538_v19  ;;  %v13139_v1 = vrot.slane %v11954_v14, %v25538_v19  ;;  %v10685_v55 = vsub.f32 %v27341_v8, %v10679_v3  ;;  %20985 = vlog2.f32 %v10666_v24 }
 0xb2d   : > { %v26789_v47 = vsel %vm659_vm7, %v26589_v62, %v13167_v2  ;;  %v11972_v4 = vcombine.high %v11968_v5, %v11968_v5  ;;  %v12086_v45 = vcombine.high %v12078_v53, %v12078_v53  ;;  %v12094_v63 = vrot.slane %v12078_v53, %v25520_v41 }
 0xb2e   : > { %v26794_v11 = vsel %vm659_vm7, %v26602_v43, %v13183_v54  ;;  %v13131_v44 = vrot.slane %v11969_v25, %v25538_v19  ;;  %v13143_v31 = vrot.slane %v11968_v5, %v25538_v19  ;;  %v12087_v37 = vcombine.high %v12085_v61, %v12085_v61 }
 0xb2f   : > { %v13135_v50 = vrot.slane %v11971_v7, %v25538_v19  ;;  %v26801_v36 = vsel %vm659_vm7, %v26616_v13, %v13123_v49  ;;  %v12101_v62 = vrot.slane %v12085_v61, %v25520_v41  ;;  %v10448_v14 = vsub.f32 %v27342_v26, %v10443_v16 }
 0xb30   : > { %v13147_v17 = vrot.slane %v11970_v57, %v25538_v19  ;;  %v26808_v43 = vsel %vm659_vm7, %v26621_v35, %v13127_v10  ;;  %v26812_v48 = vsel %vm659_vm7, %v26631_v34, %v13139_v1  ;;  %v12173_v2 = vcombine.high %v10685_v55, %v10685_v55 }
 0xb31   : > { %v13151_v54 = vrot.slane %v11972_v4, %v25538_v19  ;;  %v26816_v13 = vrot.slane %v12086_v45, %v25520_v41  ;;  %v12116_v3 = vcombine.high %v12094_v63, %v12094_v63  ;;  %v12180_v5 = vrot.slane %v10685_v55, %v25520_v41 }
 0xb32   : > { %v26821_v53 = vsel %vm659_vm7, %v26625_v12, %v13131_v44  ;;  %v26824_v35 = vrot.slane %v12087_v37, %v25520_v41  ;;  %v13219_v34 = vrot.slane %v12094_v63, %v25538_v19  ;;  %v12187_v24 = vrot.slane %v12173_v2, %v25520_v41 }
 0xb33   : > { %v26830_v25 = vsel %vm659_vm7, %v26641_v51, %v13143_v31  ;;  %v12117_v61 = vcombine.high %v12101_v62, %v12101_v62  ;;  %v13235_v57 = vrot.slane %v12101_v62, %v25538_v19  ;;  %v12022_v7 = vcombine.high %v10448_v14, %v10448_v14 }
 0xb34   : > { %v26835_v12 = vsel %vm659_vm7, %v26637_v28, %v13135_v50  ;;  %v26839_v49 = vsel %vm659_vm7, %v26645_v33, %v13147_v17  ;;  %v26842_v16 = vrot.slane %v10448_v14, %v25520_v41  ;;  %v12188_v10 = vcombine.high %v12180_v5, %v12180_v5 }
 0xb35   : > { %v26846_v51 = vsel %vm659_vm7, %v26655_v29, %v13151_v54  ;;  %v12118_v1 = vcombine.high %v26816_v13, %v26816_v13  ;;  %v13223_v8 = vrot.slane %v26816_v13, %v25538_v19  ;;  %v13227_v28 = vrot.slane %v12116_v3, %v25538_v19 }
 0xb36   : > { %v20986_v55 = vpop.eup %20985  ;;  %v12119_v33 = vcombine.high %v26824_v35, %v26824_v35  ;;  %v13239_v4 = vrot.slane %v26824_v35, %v25538_v19  ;;  %v26860_v29 = vsel %vm659_vm7, %v26662_v46, %v13219_v34  ;;  %v12189_v45 = vcombine.high %v12187_v24, %v12187_v24 }
 0xb37   : > { %v26863_v63 = vrot.slane %v12117_v61, %v25538_v19  ;;  %v26867_v44 = vsel %vm659_vm7, %v26674_v60, %v13235_v57  ;;  %v12036_v31 = vrot.slane %v12022_v7, %v25520_v41  ;;  %v12196_v37 = vrot.slane %v12180_v5, %v25520_v41  ;;  %v10675_v57 = vpop.xlane.xlu1 %10674 }
 0xb38   : > { %v12037_v50 = vcombine.high %v26842_v16, %v26842_v16  ;;  %v12203_v62 = vrot.slane %v12187_v24, %v25520_v41  ;;  %v12210_v46 = vrot.slane %v12188_v10, %v25520_v41  ;;  %v12217_v26 = vrot.slane %v12189_v45, %v25520_v41  ;;  %v10672_v45 = vpop.xlane.xlu0 %10671 }
 0xb39   : > { %v26883_v60 = vrot.slane %v26842_v16, %v25520_v41  ;;  %v12218_v14 = vcombine.high %v12196_v37, %v12196_v37  ;;  %v13315_v17 = vrot.slane %v12196_v37, %v25538_v19  ;;  %v10677_v2 = vmul.f32 0.6931472, %v20986_v55 }
 0xb3a   : > { %v12219_v54 = vcombine.high %v12203_v62, %v12203_v62  ;;  %v12220_v13 = vcombine.high %v12210_v46, %v12210_v46  ;;  %v12221_v3 = vcombine.high %v12217_v26, %v12217_v26  ;;  %v13319_v5 = vrot.slane %v12210_v46, %v25538_v19  ;;  %v27343_v46 = vld [vmem:[#allocation18_spill] sm:$0xff] }
 0xb3b   : > { %v13323_v35 = vrot.slane %v12218_v14, %v25538_v19  ;;  %v13331_v34 = vrot.slane %v12203_v62, %v25538_v19  ;;  %v13335_v24 = vrot.slane %v12217_v26, %v25538_v19  ;;  %v13640_v61 = vsel %vm661_vm8, %v26754_v21, %v13315_v17 }
 0xb3c   : > { %v13327_v7 = vrot.slane %v12220_v13, %v25538_v19  ;;  %v13339_v16 = vrot.slane %v12219_v54, %v25538_v19  ;;  %v13343_v10 = vrot.slane %v12221_v3, %v25538_v19  ;;  %v13641_v55 = vsel %vm661_vm8, %v26766_v0, %v13319_v5  ;;  %13672 = vst.msk [vmem:[%s26879_s25 + $0x40] sm:$0xff] %vm8973_vm0, %v13640_v61 }
 0xb3d   : > { %v13642_v21 = vsel %vm661_vm8, %v26770_v15, %v13323_v35  ;;  %v13644_v37 = vsel %vm661_vm8, %v26762_v27, %v13331_v34  ;;  %v13645_v62 = vsel %vm661_vm8, %v26776_v22, %v13335_v24  ;;  %13673 = vst.msk [vmem:[%s26879_s25 + $0x48] sm:$0xff] %vm8973_vm0, %v13641_v55  ;;  %v10684_v26 = vsub.f32 %v27343_v46, %v10677_v2 }
 0xb3e   : > { %v13643_v0 = vsel %vm661_vm8, %v26789_v47, %v13327_v7  ;;  %v13646_v14 = vsel %vm661_vm8, %v26780_v52, %v13339_v16  ;;  %v13647_v17 = vsel %vm661_vm8, %v26794_v11, %v13343_v10  ;;  %13674 = vst.msk [vmem:[%s26879_s25 + $0x50] sm:$0xff] %vm8973_vm0, %v13642_v21  ;;  %13676 = vst.msk [vmem:[%s26879_s25 + $0x60] sm:$0xff] %vm8973_vm0, %v13644_v37  ;;  %20987 = vlog2.f32 %v10675_v57 }
 0xb3f   : > { %13677 = vst.msk [vmem:[%s26879_s25 + $0x68] sm:$0xff] %vm8973_vm0, %v13645_v62  ;;  %v26921_v27 = vrot.slane %v12118_v1, %v25538_v19  ;;  %13675 = vst.msk [vmem:[%s26879_s25 + $0x58] sm:$0xff] %vm8973_vm0, %v13643_v0  ;;  %v12124_v15 = vcombine.high %v10684_v26, %v10684_v26  ;;  %v12131_v22 = vrot.slane %v10684_v26, %v25520_v41  ;;  %20989 = vlog2.f32 %v10672_v45 }
 0xb40   : > { %13678 = vst.msk [vmem:[%s26879_s25 + $0x70] sm:$0xff] %vm8973_vm0, %v13646_v14  ;;  %13679 = vst.msk [vmem:[%s26879_s25 + $0x78] sm:$0xff] %vm8973_vm0, %v13647_v17  ;;  %v26932_v52 = vsel %vm659_vm7, %v26670_v56, %v13223_v8  ;;  %v26936_v47 = vsel %vm659_vm7, %v26679_v38, %v13227_v28  ;;  %v12038_v11 = vcombine.high %v12036_v31, %v12036_v31 }
 0xb41   : > { %v26939_v1 = vrot.slane %v12036_v31, %v25520_v41  ;;  %v13247_v2 = vrot.slane %v12119_v33, %v25538_v19  ;;  %v12138_v54 = vrot.slane %v12124_v15, %v25520_v41  ;;  %v12139_v13 = vcombine.high %v12131_v22, %v12131_v22 }
 0xb42   : > { %v12147_v3 = vrot.slane %v12131_v22, %v25520_v41  ;;  %v26946_v5 = vsel %vm659_vm7, %v26687_v58, %v13239_v4  ;;  %v26949_v56 = vrot.slane %v12037_v50, %v25520_v41  ;;  %v12067_v38 = vcombine.high %v26883_v60, %v26883_v60 }
 0xb43   : > { %v13187_v8 = vrot.slane %v26883_v60, %v25538_v19  ;;  %v12140_v28 = vcombine.high %v12138_v54, %v12138_v54  ;;  %v12154_v33 = vrot.slane %v12138_v54, %v25520_v41  ;;  %v12161_v31 = vrot.slane %v12139_v13, %v25520_v41 }
 0xb44   : > { %v12169_v35 = vcombine.high %v12147_v3, %v12147_v3  ;;  %v12066_v34 = vrot.slane %v12038_v11, %v25520_v41  ;;  %v12068_v58 = vcombine.high %v26939_v1, %v26939_v1  ;;  %v13203_v4 = vrot.slane %v26939_v1, %v25538_v19 }
 0xb45   : > { %v13283_v50 = vrot.slane %v12147_v3, %v25538_v19  ;;  %v12168_v24 = vrot.slane %v12140_v28, %v25520_v41  ;;  %v12170_v60 = vcombine.high %v12154_v33, %v12154_v33  ;;  %v12171_v61 = vcombine.high %v12161_v31, %v12161_v31  ;;  %v27344_v3 = vld [vmem:[#allocation19_spill] sm:$0xff] }
 0xb46   : > { %v13287_v57 = vrot.slane %v12161_v31, %v25538_v19  ;;  %v12069_v7 = vcombine.high %v26949_v56, %v26949_v56  ;;  %v13291_v16 = vrot.slane %v12169_v35, %v25538_v19  ;;  %v13299_v10 = vrot.slane %v12154_v33, %v25538_v19 }
 0xb47   : > { %v13632_v55 = vsel %vm661_vm8, %v26801_v36, %v13283_v50  ;;  %v12172_v45 = vcombine.high %v12168_v24, %v12168_v24  ;;  %v13295_v21 = vrot.slane %v12171_v61, %v25538_v19  ;;  %v13303_v37 = vrot.slane %v12168_v24, %v25538_v19 }
 0xb48   : > { %v13307_v62 = vrot.slane %v12170_v60, %v25538_v19  ;;  %13664 = vst.msk [vmem:[%s26879_s25] sm:$0xff] %vm8973_vm0, %v13632_v55  ;;  %v20988_v46 = vpop.eup %20987  ;;  %v12070_v26 = vcombine.high %v12066_v34, %v12066_v34  ;;  %v13633_v36 = vsel %vm661_vm8, %v26808_v43, %v13287_v57  ;;  %v13634_v0 = vsel %vm661_vm8, %v26821_v53, %v13291_v16 }
 0xb49   : > { %v13636_v14 = vsel %vm661_vm8, %v26812_v48, %v13299_v10  ;;  %v20990_v17 = vpop.eup %20989  ;;  %v13311_v15 = vrot.slane %v12172_v45, %v25538_v19  ;;  %v13635_v22 = vsel %vm661_vm8, %v26835_v12, %v13295_v21  ;;  %v13637_v11 = vsel %vm661_vm8, %v26830_v25, %v13303_v37  ;;  %13665 = vst.msk [vmem:[%s26879_s25 + $0x8] sm:$0xff] %vm8973_vm0, %v13633_v36 }
 0xb4a   : > { %v13638_v1 = vsel %vm661_vm8, %v26839_v49, %v13307_v62  ;;  %13666 = vst.msk [vmem:[%s26879_s25 + $0x10] sm:$0xff] %vm8973_vm0, %v13634_v0  ;;  %13668 = vst.msk [vmem:[%s26879_s25 + $0x20] sm:$0xff] %vm8973_vm0, %v13636_v14  ;;  %v26998_v43 = vsel %vm659_vm7, %v26692_v42, %v26863_v63  ;;  %v13191_v48 = vrot.slane %v26949_v56, %v25538_v19  ;;  %v10683_v53 = vmul.f32 0.6931472, %v20988_v46 }
 0xb4b   : > { %13667 = vst.msk [vmem:[%s26879_s25 + $0x18] sm:$0xff] %vm8973_vm0, %v13635_v22  ;;  %13669 = vst.msk [vmem:[%s26879_s25 + $0x28] sm:$0xff] %vm8973_vm0, %v13637_v11  ;;  %v10681_v25 = vmul.f32 0.6931472, %v20990_v17  ;;  %v13195_v12 = vrot.slane %v12067_v38, %v25538_v19  ;;  %v13207_v49 = vrot.slane %v12066_v34, %v25538_v19  ;;  %v13211_v54 = vrot.slane %v12068_v58, %v25538_v19  ;;  %v27345_v38 = vld [vmem:[#allocation20_spill] sm:$0xff] }
 0xb4c   : > { %13670 = vst.msk [vmem:[%s26879_s25 + $0x30] sm:$0xff] %vm8973_vm0, %v13638_v1  ;;  %v13639_v42 = vsel %vm661_vm8, %v26846_v51, %v13311_v15  ;;  %v13627_v63 = vsel %vm659_vm7, %v26683_v30, %v26921_v27  ;;  %v27018_v13 = vsel %vm659_vm7, %v26701_v6, %v13247_v2  ;;  %v10687_v56 = vsub.f32 %v27344_v3, %v10683_v53 }
 0xb4d   : > { %13671 = vst.msk [vmem:[%s26879_s25 + $0x38] sm:$0xff] %vm8973_vm0, %v13639_v42  ;;  %v10686_v28 = vsub.f32 %v27345_v38, %v10681_v25  ;;  %v13199_v33 = vrot.slane %v12069_v7, %v25538_v19  ;;  %v13215_v31 = vrot.slane %v12070_v26, %v25538_v19  ;;  %v27028_v51 = vsel %vm659_vm7, %v26712_v40, %v13187_v8 }
 0xb4e   : > { %v27032_v30 = vsel %vm659_vm7, %v26722_v9, %v13203_v4  ;;  %v12271_v6 = vcombine.high %v10687_v56, %v10687_v56  ;;  %v12278_v27 = vrot.slane %v10687_v56, %v25520_v41  ;;  %v13617_v34 = vsel %vm659_vm7, %v26716_v39, %v13191_v48 }
 0xb4f   : > { %v12222_v2 = vcombine.high %v10686_v28, %v10686_v28  ;;  %v12229_v35 = vrot.slane %v10686_v28, %v25520_v41  ;;  %v13618_v58 = vsel %vm659_vm7, %v26727_v32, %v13195_v12  ;;  %v27042_v40 = vsel %vm659_vm7, %v26731_v18, %v13207_v49 }
 0xb50   : > { %v27046_v9 = vsel %vm659_vm7, %v26736_v23, %v13211_v54  ;;  %v12285_v8 = vrot.slane %v12271_v6, %v25520_v41  ;;  %v12286_v4 = vcombine.high %v12278_v27, %v12278_v27  ;;  %v12294_v50 = vrot.slane %v12278_v27, %v25520_v41 }
 0xb51   : > { %v12236_v24 = vrot.slane %v12222_v2, %v25520_v41  ;;  %v13619_v39 = vsel %vm659_vm7, %v26741_v20, %v13199_v33  ;;  %v13623_v32 = vsel %vm659_vm7, %v26750_v59, %v13215_v31  ;;  %v12237_v60 = vcombine.high %v12229_v35, %v12229_v35 }
 0xb52   : > { %v12245_v18 = vrot.slane %v12229_v35, %v25520_v41  ;;  %v12287_v61 = vcombine.high %v12285_v8, %v12285_v8  ;;  %v12301_v23 = vrot.slane %v12285_v8, %v25520_v41  ;;  %v12308_v57 = vrot.slane %v12286_v4, %v25520_v41 }
 0xb53   : > { %v12316_v7 = vcombine.high %v12294_v50, %v12294_v50  ;;  %v13379_v16 = vrot.slane %v12294_v50, %v25538_v19  ;;  %v12238_v10 = vcombine.high %v12236_v24, %v12236_v24  ;;  %v12252_v55 = vrot.slane %v12236_v24, %v25520_v41 }
 0xb54   : > { %v12259_v20 = vrot.slane %v12237_v60, %v25520_v41  ;;  %v12315_v45 = vrot.slane %v12287_v61, %v25520_v41  ;;  %v12317_v59 = vcombine.high %v12301_v23, %v12301_v23  ;;  %v12318_v21 = vcombine.high %v12308_v57, %v12308_v57 }
 0xb55   : > { %v13383_v37 = vrot.slane %v12308_v57, %v25538_v19  ;;  %v13387_v62 = vrot.slane %v12316_v7, %v25538_v19  ;;  %v13395_v46 = vrot.slane %v12301_v23, %v25538_v19  ;;  %v13656_v26 = vsel %vm661_vm8, %v26860_v29, %v13379_v16 }
 0xb56   : > { %v12266_v36 = vrot.slane %v12238_v10, %v25520_v41  ;;  %v12319_v0 = vcombine.high %v12315_v45, %v12315_v45  ;;  %v13391_v14 = vrot.slane %v12318_v21, %v25538_v19  ;;  %v13399_v17 = vrot.slane %v12315_v45, %v25538_v19  ;;  %13688 = vst.msk [vmem:[%s26879_s25 + $0xc0] sm:$0xff] %vm8973_vm0, %v13656_v26 }
 0xb57   : > { %v13403_v15 = vrot.slane %v12317_v59, %v25538_v19  ;;  %v13657_v22 = vsel %vm661_vm8, %v26932_v52, %v13383_v37  ;;  %v13658_v29 = vsel %vm661_vm8, %v26936_v47, %v13387_v62  ;;  %v13660_v41 = vsel %vm661_vm8, %v26867_v44, %v13395_v46 }
 0xb58   : > { %v12267_v11 = vcombine.high %v12245_v18, %v12245_v18  ;;  %v13407_v1 = vrot.slane %v12319_v0, %v25538_v19  ;;  %v13659_v48 = vsel %vm661_vm8, %v13627_v63, %v13391_v14  ;;  %v13661_v53 = vsel %vm661_vm8, %v26946_v5, %v13399_v17  ;;  %13689 = vst.msk [vmem:[%s26879_s25 + $0xc8] sm:$0xff] %vm8973_vm0, %v13657_v22 }
 0xb59   : > { %v13662_v25 = vsel %vm661_vm8, %v26998_v43, %v13403_v15  ;;  %13690 = vst.msk [vmem:[%s26879_s25 + $0xd0] sm:$0xff] %vm8973_vm0, %v13658_v29  ;;  %13692 = vst.msk [vmem:[%s26879_s25 + $0xe0] sm:$0xff] %vm8973_vm0, %v13660_v41  ;;  %v12268_v44 = vcombine.high %v12252_v55, %v12252_v55  ;;  %v12269_v52 = vcombine.high %v12259_v20, %v12259_v20 }
 0xb5a   : > { %13691 = vst.msk [vmem:[%s26879_s25 + $0xd8] sm:$0xff] %vm8973_vm0, %v13659_v48  ;;  %13693 = vst.msk [vmem:[%s26879_s25 + $0xe8] sm:$0xff] %vm8973_vm0, %v13661_v53  ;;  %v12270_v47 = vcombine.high %v12266_v36, %v12266_v36  ;;  %v13347_v5 = vrot.slane %v12245_v18, %v25538_v19  ;;  %v13663_v43 = vsel %vm661_vm8, %v27018_v13, %v13407_v1 }
 0xb5b   : > { %13694 = vst.msk [vmem:[%s26879_s25 + $0xf0] sm:$0xff] %vm8973_vm0, %v13662_v25  ;;  %v13351_v12 = vrot.slane %v12259_v20, %v25538_v19  ;;  %v13355_v49 = vrot.slane %v12267_v11, %v25538_v19  ;;  %v13363_v54 = vrot.slane %v12252_v55, %v25538_v19  ;;  %13695 = vst.msk [vmem:[%s26879_s25 + $0xf8] sm:$0xff] %vm8973_vm0, %v13663_v43 }
 0xb5c   : > { %v13359_v42 = vrot.slane %v12269_v52, %v25538_v19  ;;  %v13367_v63 = vrot.slane %v12266_v36, %v25538_v19  ;;  %v13371_v13 = vrot.slane %v12268_v44, %v25538_v19  ;;  %v13375_v3 = vrot.slane %v12270_v47, %v25538_v19 }
 0xb5d   : > { %v13648_v56 = vsel %vm661_vm8, %v27028_v51, %v13347_v5  ;;  %v13649_v38 = vsel %vm661_vm8, %v13617_v34, %v13351_v12  ;;  %v13650_v28 = vsel %vm661_vm8, %v13618_v58, %v13355_v49  ;;  %v13652_v33 = vsel %vm661_vm8, %v27032_v30, %v13363_v54 }
 0xb5e   : > { %v13651_v31 = vsel %vm661_vm8, %v13619_v39, %v13359_v42  ;;  %v13653_v6 = vsel %vm661_vm8, %v27042_v40, %v13367_v63  ;;  %v13654_v27 = vsel %vm661_vm8, %v27046_v9, %v13371_v13  ;;  %v13655_v19 = vsel %vm661_vm8, %v13623_v32, %v13375_v3  ;;  %13680 = vst.msk [vmem:[%s26879_s25 + $0x80] sm:$0xff] %vm8973_vm0, %v13648_v56 }
 0xb5f   : > { %13681 = vst.msk [vmem:[%s26879_s25 + $0x88] sm:$0xff] %vm8973_vm0, %v13649_v38  ;;  %13682 = vst.msk [vmem:[%s26879_s25 + $0x90] sm:$0xff] %vm8973_vm0, %v13650_v28 }
 0xb60   : > { %13684 = vst.msk [vmem:[%s26879_s25 + $0xa0] sm:$0xff] %vm8973_vm0, %v13652_v33  ;;  %13683 = vst.msk [vmem:[%s26879_s25 + $0x98] sm:$0xff] %vm8973_vm0, %v13651_v31 }
 0xb61   : > { %13685 = vst.msk [vmem:[%s26879_s25 + $0xa8] sm:$0xff] %vm8973_vm0, %v13653_v6  ;;  %13686 = vst.msk [vmem:[%s26879_s25 + $0xb0] sm:$0xff] %vm8973_vm0, %v13654_v27 }
 0xb62   : > { %13687 = vst.msk [vmem:[%s26879_s25 + $0xb8] sm:$0xff] %vm8973_vm0, %v13655_v19 }
 0xb63 PF: > { %s25_s20 = sadd.s32 1, %s21032_s20   ;;  %s27346_s18 = smov %s21028_s19 }
 0xb64   : > { %p22_p5 = scmp.ge.s32.totalorder %s25_s20, 4   ;;  %s27347_s19 = smov %s27349_s21 }
 0xb66   :  { %24 = sbr.rel (!%p22_p5) target bundleno = 2 (0x2), region = 111 }

</bundles_post_ra>
